<compile_context>
chip_gen: v6e
topology: v6e:2x2x1
jax: 0.10.0
libtpu: 0.0.40
codegen_flags: <defaults>
</compile_context>

<pallas_src>
import functools

import jax
import jax.numpy as jnp
import numpy as np
from jax.experimental import pallas as pl
from jax.experimental.pallas import tpu as pltpu


# ----------------------------------------------------------------------------
# In-kernel helpers
# ----------------------------------------------------------------------------
def _zero_halo(pad_ref):
    """Zero only the 1-pixel halo of a padded (B, Hp, Wp, C) VMEM buffer."""
    b, hp, wp, c = pad_ref.shape
    zrow = jnp.zeros((b, 1, wp, c), pad_ref.dtype)
    zcol = jnp.zeros((b, hp, 1, c), pad_ref.dtype)
    pad_ref[:, pl.ds(0, 1), :, :] = zrow
    pad_ref[:, pl.ds(hp - 1, 1), :, :] = zrow
    pad_ref[:, :, pl.ds(0, 1), :] = zcol
    pad_ref[:, :, pl.ds(wp - 1, 1), :] = zcol


def _conv3x3(pad_ref, w_ref, acc_ref, store_fn, *, hout, wout, cin, cout,
             stride, chunk, nb):
    """3x3 conv (pad already applied) as 9 shifted bf16 matmuls, f32 VMEM acc.

    pad_ref : (nb, hin+2, win+2, cin) bf16, zero halo, interior = activation
    w_ref   : (9, cin, cout)          bf16 per-tap weight matrices
    acc_ref : (nb*chunk*wout, cout)   f32 scratch accumulator
    store_fn(row0, acc_value)         consumes one finished f32 row-chunk

    No im2col patch buffer: every tap load is lane-dense (full minor dim cin)
    and stride decimation is done with strided `pl.ds` reads, not value-level
    gathers.
    """
    n_chunks = hout // chunk
    for c in range(n_chunks):
        row0 = c * chunk                       # first output row of the chunk
        for t in range(9):
            dy, dx = divmod(t, 3)
            if stride == 1:
                tap = pad_ref[:, pl.ds(row0 + dy, chunk), pl.ds(dx, wout), :]
            else:
                tap = pad_ref[:, pl.ds(row0 * stride + dy, chunk, stride),
                              pl.ds(dx, wout, stride), :]
            lhs = tap.reshape(nb * chunk * wout, cin)
            prod = jnp.dot(lhs, w_ref[t], preferred_element_type=jnp.float32)
            if t == 0:
                acc_ref[...] = prod            # overwrite: no zero pass needed
            else:
                acc_ref[...] += prod
        store_fn(row0, acc_ref[...])


def _preact_block_kernel(x_ref, s1_ref, b1_ref, w1_ref, s2_ref, b2_ref, w2_ref,
                         o_ref, xpad1_ref, xpad2_ref, acc1_ref, acc2_ref,
                         *, stride, chunk0, chunk1, chunk2):
    """Fused BN1+ReLU -> conv1 -> BN2+ReLU -> conv2 for a batch block (NHWC).

    x_ref     : (B, H, W, Cin)        f32 input images
    s1/b1_ref : (1, 1, 1, Cin)        f32 folded BN1 scale / bias
    w1_ref    : (9, Cin, C1)          bf16 conv1 per-tap weights
    s2/b2_ref : (1, C1)               f32 folded BN2 scale / bias
    w2_ref    : (9, C1, C2)           bf16 conv2 per-tap weights
    o_ref     : (B, H2, W2, C2)       f32 output
    xpad1_ref : (B, H+2,  W+2,  Cin)  bf16 padded stage-1 activation (scratch)
    xpad2_ref : (B, H1+2, W1+2, C1)   bf16 padded stage-2 activation (scratch)
    acc1_ref  : (B*chunk1*W1, C1)     f32 conv1 row-chunk accumulator
    acc2_ref  : (B*chunk2*W2, C2)     f32 conv2 row-chunk accumulator
    """
    nb, H, W, Cin = x_ref.shape
    _, H2, W2, C2 = o_ref.shape
    H1 = xpad2_ref.shape[1] - 2
    W1 = xpad2_ref.shape[2] - 2
    C1 = xpad2_ref.shape[3]

    # Zero only the 1-pixel halos (4 thin border stores each).  Done every
    # grid step so it is safe when the grid is sharded across TensorCores;
    # the interiors are fully rewritten each step.
    _zero_halo(xpad1_ref)
    _zero_halo(xpad2_ref)

    # ---- Stage 0: BN1 (folded, inference) + ReLU, chunked over rows --------
    s1 = s1_ref[...]
    b1 = b1_ref[...]
    for c in range(H // chunk0):
        r0 = c * chunk0
        x = x_ref[:, pl.ds(r0, chunk0), :, :]                      # f32
        y1 = jnp.maximum(x * s1 + b1, 0.0)
        xpad1_ref[:, pl.ds(1 + r0, chunk0), pl.ds(1, W), :] = (
            y1.astype(xpad1_ref.dtype))

    # ---- Stage 1: conv1 (3x3, pad=1, stride) -> BN2 + ReLU -> xpad2 --------
    # dropout1 is identity at inference time.
    s2 = s2_ref[...]
    b2 = b2_ref[...]

    def store1(row0, z1):                       # z1: (nb*chunk1*W1, C1) f32
        y2 = jnp.maximum(z1 * s2 + b2, 0.0)
        xpad2_ref[:, pl.ds(1 + row0, chunk1), pl.ds(1, W1), :] = (
            y2.astype(xpad2_ref.dtype).reshape(nb, chunk1, W1, C1))

    _conv3x3(xpad1_ref, w1_ref, acc1_ref, store1,
             hout=H1, wout=W1, cin=Cin, cout=C1,
             stride=stride, chunk=chunk1, nb=nb)

    # ---- Stage 2: conv2 (3x3, pad=1, stride=1) -> output --------------------
    # dropout2 is identity at inference time.
    def store2(row0, z2):                       # z2: (nb*chunk2*W2, C2) f32
        o_ref[:, pl.ds(row0, chunk2), :, :] = (
            z2.reshape(nb, chunk2, W2, C2).astype(o_ref.dtype))

    _conv3x3(xpad2_ref, w2_ref, acc2_ref, store2,
             hout=H2, wout=W2, cin=C1, cout=C2,
             stride=1, chunk=chunk2, nb=nb)


# ----------------------------------------------------------------------------
# Wrapper-side parameter preparation / sizing heuristics
# ----------------------------------------------------------------------------
def _fold_bn(gamma, beta, mean, var, eps):
    inv_std = jax.lax.rsqrt(var.astype(jnp.float32) + eps)
    scale = gamma.astype(jnp.float32) * inv_std
    bias = beta.astype(jnp.float32) - mean.astype(jnp.float32) * scale
    return scale, bias


def _taps_conv_w(w_oihw):
    """OIHW -> (9, Cin, Cout) bf16: one (Cin, Cout) MXU operand per 3x3 tap."""
    w = jnp.transpose(w_oihw.astype(jnp.float32), (2, 3, 1, 0))   # (3,3,Ci,Co)
    kh, kw, ci, co = w.shape
    return w.reshape(kh * kw, ci, co).astype(jnp.bfloat16)


def _largest_divisor_leq(n, cap):
    cap = max(1, min(n, cap))
    for d in range(cap, 0, -1):
        if n % d == 0:
            return d
    return 1


def _vmem_limit_bytes():
    """Generation-aware VMEM budget (v5e/v6e: 128 MiB, v7x: 64 MiB per TC)."""
    cap = 64 * 1024 * 1024
    try:
        info = pltpu.get_tpu_info()
        cap = int(getattr(info, "vmem_capacity_bytes", cap))
    except Exception:
        pass
    # Leave headroom for compiler-internal scratch; never below 32 MiB.
    return int(max(32 * 1024 * 1024, min(cap * 3 // 4, 96 * 1024 * 1024)))


def preact_block_nhwc(x_nhwc, params, *, stride=1, eps=1e-5):
    """Fused PreActBlock forward (inference), NHWC in / NHWC out (f32)."""
    N, H, W, Cin = x_nhwc.shape
    C1 = params["conv1_w"].shape[0]
    C2 = params["conv2_w"].shape[0]
    H1 = (H - 1) // stride + 1          # conv1 out: (H + 2 - 3)//stride + 1
    W1 = (W - 1) // stride + 1
    H2, W2 = H1, W1                     # conv2: stride 1, pad 1, k 3

    s1, b1 = _fold_bn(params["bn1_gamma"], params["bn1_beta"],
                      params["bn1_mean"], params["bn1_var"], eps)
    s2, b2 = _fold_bn(params["bn2_gamma"], params["bn2_beta"],
                      params["bn2_mean"], params["bn2_var"], eps)
    w1 = _taps_conv_w(params["conv1_w"])
    w2 = _taps_conv_w(params["conv2_w"])

    vmem_limit = _vmem_limit_bytes()

    # ---- batch block: amortize per-step overhead for tiny images, but keep
    #      >= 2 parallel grid steps when the batch allows (v7x 2nd TC). -------
    ROW_TARGET = 1024                   # target matmul M rows per grid step
    ROW_CHUNK = 512                     # max live f32 intermediate rows
    bb_cap = max(1, ROW_TARGET // max(1, H1 * W1))
    if N >= 2:
        bb_cap = min(bb_cap, max(1, N // 2))
    b_blk = _largest_divisor_leq(N, bb_cap)

    def _chunks(bb):
        c0 = _largest_divisor_leq(H, max(1, ROW_CHUNK // max(1, bb * W)))
        c1 = _largest_divisor_leq(H1, max(1, ROW_CHUNK // max(1, bb * W1)))
        c2 = _largest_divisor_leq(H2, max(1, ROW_CHUNK // max(1, bb * W2)))
        return c0, c1, c2

    def _footprint(bb):
        c0, c1, c2 = _chunks(bb)
        io = 2 * (bb * H * W * Cin * 4 + bb * H2 * W2 * C2 * 4)   # dbl-buffered
        wts = 9 * (Cin * C1 + C1 * C2) * 2
        scratch = (bb * (H + 2) * (W + 2) * Cin * 2
                   + bb * (H1 + 2) * (W1 + 2) * C1 * 2
                   + bb * c1 * W1 * C1 * 4 + bb * c2 * W2 * C2 * 4)
        return io + wts + scratch

    while b_blk > 1 and _footprint(b_blk) > int(0.6 * vmem_limit):
        b_blk = _largest_divisor_leq(N, b_blk - 1)
    chunk0, chunk1, chunk2 = _chunks(b_blk)

    kernel = functools.partial(_preact_block_kernel, stride=stride,
                               chunk0=chunk0, chunk1=chunk1, chunk2=chunk2)

    flops = 2 * N * 9 * (H1 * W1 * Cin * C1 + H2 * W2 * C1 * C2)
    bytes_accessed = (N * H * W * Cin * 4 + N * H2 * W2 * C2 * 4
                      + 9 * (Cin * C1 + C1 * C2) * 2
                      + 4 * (Cin + C1) * 4)
    cost = pl.CostEstimate(flops=flops, transcendentals=0,
                           bytes_accessed=bytes_accessed)

    # TODO(synk): emit/accept bf16 activations when neighboring layers consume
    #             bf16 (halves HBM traffic); kept f32 here for interface parity.
    return pl.pallas_call(
        kernel,
        out_shape=jax.ShapeDtypeStruct((N, H2, W2, C2), jnp.float32),
        grid=(N // b_blk,),
        in_specs=[
            pl.BlockSpec((b_blk, H, W, Cin), lambda n: (n, 0, 0, 0)),
            pl.BlockSpec((1, 1, 1, Cin), lambda n: (0, 0, 0, 0)),
            pl.BlockSpec((1, 1, 1, Cin), lambda n: (0, 0, 0, 0)),
            pl.BlockSpec((9, Cin, C1), lambda n: (0, 0, 0)),
            pl.BlockSpec((1, C1), lambda n: (0, 0)),
            pl.BlockSpec((1, C1), lambda n: (0, 0)),
            pl.BlockSpec((9, C1, C2), lambda n: (0, 0, 0)),
        ],
        out_specs=pl.BlockSpec((b_blk, H2, W2, C2), lambda n: (n, 0, 0, 0)),
        scratch_shapes=[
            pltpu.VMEM((b_blk, H + 2, W + 2, Cin), jnp.bfloat16),
            pltpu.VMEM((b_blk, H1 + 2, W1 + 2, C1), jnp.bfloat16),
            pltpu.VMEM((b_blk * chunk1 * W1, C1), jnp.float32),
            pltpu.VMEM((b_blk * chunk2 * W2, C2), jnp.float32),
        ],
        compiler_params=pltpu.CompilerParams(
            dimension_semantics=("parallel",),
            vmem_limit_bytes=vmem_limit,
        ),
        cost_estimate=cost,
    )(x_nhwc.astype(jnp.float32),
      s1.reshape(1, 1, 1, Cin), b1.reshape(1, 1, 1, Cin), w1,
      s2.reshape(1, C1), b2.reshape(1, C1), w2)


def preact_block(x_nchw, params, *, stride=1, eps=1e-5):
    """PreActBlock forward (inference). NCHW in/out like the PyTorch module.

    For a full network keep activations NHWC end-to-end and transpose only at
    the model boundary; these transposes exist here only for interface parity.
    """
    x = jnp.transpose(x_nchw, (0, 2, 3, 1))                 # NCHW -> NHWC
    out = preact_block_nhwc(x, params, stride=stride, eps=eps)
    return jnp.transpose(out, (0, 3, 1, 2))                 # NHWC -> NCHW


# ----------------------------------------------------------------------------
# Pure-JAX reference + test harness
# ----------------------------------------------------------------------------
def _reference_preact_block(x_nchw, p, *, stride=1, eps=1e-5):
    """Pure-JAX reference (lax.conv) for correctness checking."""
    def bn(x, gamma, beta, mean, var):
        g = gamma.reshape(1, -1, 1, 1)
        b = beta.reshape(1, -1, 1, 1)
        m = mean.reshape(1, -1, 1, 1)
        v = var.reshape(1, -1, 1, 1)
        return (x - m) / jnp.sqrt(v + eps) * g + b

    out = jnp.maximum(bn(x_nchw, p["bn1_gamma"], p["bn1_beta"],
                         p["bn1_mean"], p["bn1_var"]), 0.0)
    out = jax.lax.conv_general_dilated(
        out, p["conv1_w"], (stride, stride), ((1, 1), (1, 1)),
        dimension_numbers=("NCHW", "OIHW", "NCHW"))
    out = jnp.maximum(bn(out, p["bn2_gamma"], p["bn2_beta"],
                         p["bn2_mean"], p["bn2_var"]), 0.0)
    out = jax.lax.conv_general_dilated(
        out, p["conv2_w"], (1, 1), ((1, 1), (1, 1)),
        dimension_numbers=("NCHW", "OIHW", "NCHW"))
    return out


def _make_params(key, in_channels, out_channels):
    ks = jax.random.split(key, 10)
    f32 = jnp.float32
    return {
        "bn1_gamma": jax.random.uniform(ks[0], (in_channels,), f32, 0.5, 1.5),
        "bn1_beta": 0.1 * jax.random.normal(ks[1], (in_channels,), f32),
        "bn1_mean": 0.1 * jax.random.normal(ks[2], (in_channels,), f32),
        "bn1_var": jax.random.uniform(ks[3], (in_channels,), f32, 0.5, 1.5),
        "conv1_w": 0.1 * jax.random.normal(ks[4], (out_channels, in_channels, 3, 3), f32),
        "bn2_gamma": jax.random.uniform(ks[5], (out_channels,), f32, 0.5, 1.5),
        "bn2_beta": 0.1 * jax.random.normal(ks[6], (out_channels,), f32),
        "bn2_mean": 0.1 * jax.random.normal(ks[7], (out_channels,), f32),
        "bn2_var": jax.random.uniform(ks[8], (out_channels,), f32, 0.5, 1.5),
        "conv2_w": 0.1 * jax.random.normal(ks[9], (out_channels, out_channels, 3, 3), f32),
    }


if __name__ == "__main__":
    key = jax.random.PRNGKey(0)
    k_x, k_p = jax.random.split(key)

    # Small shapes consistent with the module: NCHW input.
    N, C_IN, C_OUT, H, W = 2, 4, 8, 16, 16
    STRIDE = 1

    x = jax.random.normal(k_x, (N, C_IN, H, W), jnp.float32)
    params = _make_params(k_p, C_IN, C_OUT)

    out = jax.block_until_ready(preact_block(x, params, stride=STRIDE))
    ref = jax.block_until_ready(_reference_preact_block(x, params, stride=STRIDE))

    assert out.shape == ref.shape, (out.shape, ref.shape)
    # bf16 MXU operands (f32 accumulation) -> slightly looser tolerance.
    assert np.allclose(np.asarray(out), np.asarray(ref), atol=3e-2, rtol=3e-2), \
        "Pallas output does not match JAX reference"

    print("KERNEL_OK")
</pallas_src>

<mosaic_0001>
module attributes {stable_mosaic.version = 11 : i64} {
  func.func @_preact_block_kernel(%arg0: i32, %arg1: memref<1x16x16x4xf32, #tpu.memory_space<vmem>>, %arg2: memref<1x1x1x4xf32, #tpu.memory_space<vmem>>, %arg3: memref<1x1x1x4xf32, #tpu.memory_space<vmem>>, %arg4: memref<9x4x8xbf16, #tpu.memory_space<vmem>>, %arg5: memref<1x8xf32, #tpu.memory_space<vmem>>, %arg6: memref<1x8xf32, #tpu.memory_space<vmem>>, %arg7: memref<9x8x8xbf16, #tpu.memory_space<vmem>>, %arg8: memref<1x16x16x8xf32, #tpu.memory_space<vmem>>, %arg9: memref<1x18x18x4xbf16, #tpu.memory_space<vmem>>, %arg10: memref<1x18x18x8xbf16, #tpu.memory_space<vmem>>, %arg11: memref<256x8xf32, #tpu.memory_space<vmem>>, %arg12: memref<256x8xf32, #tpu.memory_space<vmem>>) attributes {dimension_semantics = [#tpu.dimension_semantics<parallel>], iteration_bounds = array<i64: 2>, scalar_prefetch = 0 : i64, scratch_operands = 4 : i64, tpu.core_type = #tpu.core_type<tc>, window_params = [{transform_indices = @transform_0, window_bounds = array<i64: 1, 16, 16, 4>}, {pipeline_mode = #tpu.pipeline_mode<synchronous>, transform_indices = @transform_1, window_bounds = array<i64: 1, 1, 1, 4>}, {pipeline_mode = #tpu.pipeline_mode<synchronous>, transform_indices = @transform_2, window_bounds = array<i64: 1, 1, 1, 4>}, {pipeline_mode = #tpu.pipeline_mode<synchronous>, transform_indices = @transform_3, window_bounds = array<i64: 9, 4, 8>}, {pipeline_mode = #tpu.pipeline_mode<synchronous>, transform_indices = @transform_4, window_bounds = array<i64: 1, 8>}, {pipeline_mode = #tpu.pipeline_mode<synchronous>, transform_indices = @transform_5, window_bounds = array<i64: 1, 8>}, {pipeline_mode = #tpu.pipeline_mode<synchronous>, transform_indices = @transform_6, window_bounds = array<i64: 9, 8, 8>}, {transform_indices = @transform_7, window_bounds = array<i64: 1, 16, 16, 8>}]} {
    %cst = arith.constant 0.000000e+00 : bf16
    %0 = vector.broadcast %cst : bf16 to vector<1x1x18x4xbf16>
    %cst_0 = arith.constant 0.000000e+00 : bf16
    %1 = vector.broadcast %cst_0 : bf16 to vector<1x18x1x4xbf16>
    %c0 = arith.constant 0 : index
    %c0_1 = arith.constant 0 : index
    %c0_2 = arith.constant 0 : index
    %c0_3 = arith.constant 0 : index
    %2 = vector.load %arg9[%c0, %c0_1, %c0_2, %c0_3] : memref<1x18x18x4xbf16, #tpu.memory_space<vmem>>, vector<1x1x18x4xbf16>
    tpu.vector_store %arg9[%c0, %c0_1, %c0_2, %c0_3], %0 {strides = array<i32>} : memref<1x18x18x4xbf16, #tpu.memory_space<vmem>>, vector<1x1x18x4xbf16>,
    %c0_4 = arith.constant 0 : index
    %c17 = arith.constant 17 : index
    %c0_5 = arith.constant 0 : index
    %c0_6 = arith.constant 0 : index
    %3 = vector.load %arg9[%c0_4, %c17, %c0_5, %c0_6] : memref<1x18x18x4xbf16, #tpu.memory_space<vmem>>, vector<1x1x18x4xbf16>
    tpu.vector_store %arg9[%c0_4, %c17, %c0_5, %c0_6], %0 {strides = array<i32>} : memref<1x18x18x4xbf16, #tpu.memory_space<vmem>>, vector<1x1x18x4xbf16>,
    %c0_7 = arith.constant 0 : index
    %c0_8 = arith.constant 0 : index
    %c0_9 = arith.constant 0 : index
    %c0_10 = arith.constant 0 : index
    %4 = vector.load %arg9[%c0_7, %c0_8, %c0_9, %c0_10] : memref<1x18x18x4xbf16, #tpu.memory_space<vmem>>, vector<1x18x1x4xbf16>
    tpu.vector_store %arg9[%c0_7, %c0_8, %c0_9, %c0_10], %1 {strides = array<i32>} : memref<1x18x18x4xbf16, #tpu.memory_space<vmem>>, vector<1x18x1x4xbf16>,
    %c0_11 = arith.constant 0 : index
    %c0_12 = arith.constant 0 : index
    %c17_13 = arith.constant 17 : index
    %c0_14 = arith.constant 0 : index
    %5 = vector.load %arg9[%c0_11, %c0_12, %c17_13, %c0_14] : memref<1x18x18x4xbf16, #tpu.memory_space<vmem>>, vector<1x18x1x4xbf16>
    tpu.vector_store %arg9[%c0_11, %c0_12, %c17_13, %c0_14], %1 {strides = array<i32>} : memref<1x18x18x4xbf16, #tpu.memory_space<vmem>>, vector<1x18x1x4xbf16>,
    %cst_15 = arith.constant 0.000000e+00 : bf16
    %6 = vector.broadcast %cst_15 : bf16 to vector<1x1x18x8xbf16>
    %cst_16 = arith.constant 0.000000e+00 : bf16
    %7 = vector.broadcast %cst_16 : bf16 to vector<1x18x1x8xbf16>
    %c0_17 = arith.constant 0 : index
    %c0_18 = arith.constant 0 : index
    %c0_19 = arith.constant 0 : index
    %c0_20 = arith.constant 0 : index
    %8 = vector.load %arg10[%c0_17, %c0_18, %c0_19, %c0_20] : memref<1x18x18x8xbf16, #tpu.memory_space<vmem>>, vector<1x1x18x8xbf16>
    tpu.vector_store %arg10[%c0_17, %c0_18, %c0_19, %c0_20], %6 {strides = array<i32>} : memref<1x18x18x8xbf16, #tpu.memory_space<vmem>>, vector<1x1x18x8xbf16>,
    %c0_21 = arith.constant 0 : index
    %c17_22 = arith.constant 17 : index
    %c0_23 = arith.constant 0 : index
    %c0_24 = arith.constant 0 : index
    %9 = vector.load %arg10[%c0_21, %c17_22, %c0_23, %c0_24] : memref<1x18x18x8xbf16, #tpu.memory_space<vmem>>, vector<1x1x18x8xbf16>
    tpu.vector_store %arg10[%c0_21, %c17_22, %c0_23, %c0_24], %6 {strides = array<i32>} : memref<1x18x18x8xbf16, #tpu.memory_space<vmem>>, vector<1x1x18x8xbf16>,
    %c0_25 = arith.constant 0 : index
    %c0_26 = arith.constant 0 : index
    %c0_27 = arith.constant 0 : index
    %c0_28 = arith.constant 0 : index
    %10 = vector.load %arg10[%c0_25, %c0_26, %c0_27, %c0_28] : memref<1x18x18x8xbf16, #tpu.memory_space<vmem>>, vector<1x18x1x8xbf16>
    tpu.vector_store %arg10[%c0_25, %c0_26, %c0_27, %c0_28], %7 {strides = array<i32>} : memref<1x18x18x8xbf16, #tpu.memory_space<vmem>>, vector<1x18x1x8xbf16>,
    %c0_29 = arith.constant 0 : index
    %c0_30 = arith.constant 0 : index
    %c17_31 = arith.constant 17 : index
    %c0_32 = arith.constant 0 : index
    %11 = vector.load %arg10[%c0_29, %c0_30, %c17_31, %c0_32] : memref<1x18x18x8xbf16, #tpu.memory_space<vmem>>, vector<1x18x1x8xbf16>
    tpu.vector_store %arg10[%c0_29, %c0_30, %c17_31, %c0_32], %7 {strides = array<i32>} : memref<1x18x18x8xbf16, #tpu.memory_space<vmem>>, vector<1x18x1x8xbf16>,
    %c0_33 = arith.constant 0 : index
    %c0_34 = arith.constant 0 : index
    %c0_35 = arith.constant 0 : index
    %c0_36 = arith.constant 0 : index
    %12 = vector.load %arg2[%c0_33, %c0_34, %c0_35, %c0_36] : memref<1x1x1x4xf32, #tpu.memory_space<vmem>>, vector<1x1x1x4xf32>
    %c0_37 = arith.constant 0 : index
    %c0_38 = arith.constant 0 : index
    %c0_39 = arith.constant 0 : index
    %c0_40 = arith.constant 0 : index
    %13 = vector.load %arg3[%c0_37, %c0_38, %c0_39, %c0_40] : memref<1x1x1x4xf32, #tpu.memory_space<vmem>>, vector<1x1x1x4xf32>
    %c0_41 = arith.constant 0 : index
    %c0_42 = arith.constant 0 : index
    %c0_43 = arith.constant 0 : index
    %c0_44 = arith.constant 0 : index
    %14 = vector.load %arg1[%c0_41, %c0_42, %c0_43, %c0_44] : memref<1x16x16x4xf32, #tpu.memory_space<vmem>>, vector<1x16x16x4xf32>
    %15 = vector.broadcast %12 : vector<1x1x1x4xf32> to vector<1x16x16x4xf32>
    %16 = arith.mulf %14, %15 : vector<1x16x16x4xf32>
    %17 = vector.broadcast %13 : vector<1x1x1x4xf32> to vector<1x16x16x4xf32>
    %18 = arith.addf %16, %17 : vector<1x16x16x4xf32>
    %cst_45 = arith.constant 0.000000e+00 : f32
    %19 = vector.broadcast %cst_45 : f32 to vector<1x16x16x4xf32>
    %20 = arith.maximumf %18, %19 : vector<1x16x16x4xf32>
    %21 = arith.truncf %20 : vector<1x16x16x4xf32> to vector<1x16x16x4xbf16>
    %c0_46 = arith.constant 0 : index
    %c1 = arith.constant 1 : index
    %c1_47 = arith.constant 1 : index
    %c0_48 = arith.constant 0 : index
    %22 = vector.load %arg9[%c0_46, %c1, %c1_47, %c0_48] : memref<1x18x18x4xbf16, #tpu.memory_space<vmem>>, vector<1x16x16x4xbf16>
    tpu.vector_store %arg9[%c0_46, %c1, %c1_47, %c0_48], %21 {strides = array<i32>} : memref<1x18x18x4xbf16, #tpu.memory_space<vmem>>, vector<1x16x16x4xbf16>,
    %c0_49 = arith.constant 0 : index
    %c0_50 = arith.constant 0 : index
    %23 = vector.load %arg5[%c0_49, %c0_50] : memref<1x8xf32, #tpu.memory_space<vmem>>, vector<1x8xf32>
    %c0_51 = arith.constant 0 : index
    %c0_52 = arith.constant 0 : index
    %24 = vector.load %arg6[%c0_51, %c0_52] : memref<1x8xf32, #tpu.memory_space<vmem>>, vector<1x8xf32>
    %c0_53 = arith.constant 0 : index
    %c0_54 = arith.constant 0 : index
    %c0_55 = arith.constant 0 : index
    %c0_56 = arith.constant 0 : index
    %25 = vector.load %arg9[%c0_53, %c0_54, %c0_55, %c0_56] : memref<1x18x18x4xbf16, #tpu.memory_space<vmem>>, vector<1x16x16x4xbf16>
    %26 = vector.shape_cast %25 : vector<1x16x16x4xbf16> to vector<256x4xbf16>
    %c0_57 = arith.constant 0 : index
    %c0_58 = arith.constant 0 : index
    %c0_59 = arith.constant 0 : index
    %27 = vector.load %arg4[%c0_57, %c0_58, %c0_59] : memref<9x4x8xbf16, #tpu.memory_space<vmem>>, vector<1x4x8xbf16>
    %28 = vector.shape_cast %27 : vector<1x4x8xbf16> to vector<4x8xbf16>
    %cst_60 = arith.constant dense<0.000000e+00> : vector<256x8xf32>
    %29 = tpu.matmul %26, %28, %cst_60 {dimension_numbers = #tpu.dot_dimension_numbers<[1], [0], [0], [1], [0, 0, 1, 1], [], []>} : vector<256x4xbf16>, vector<4x8xbf16>, vector<256x8xf32> -> vector<256x8xf32>
    %c0_61 = arith.constant 0 : index
    %c0_62 = arith.constant 0 : index
    %30 = vector.load %arg11[%c0_61, %c0_62] : memref<256x8xf32, #tpu.memory_space<vmem>>, vector<256x8xf32>
    tpu.vector_store %arg11[%c0_61, %c0_62], %29 {strides = array<i32>} : memref<256x8xf32, #tpu.memory_space<vmem>>, vector<256x8xf32>,
    %c0_63 = arith.constant 0 : index
    %c0_64 = arith.constant 0 : index
    %c1_65 = arith.constant 1 : index
    %c0_66 = arith.constant 0 : index
    %31 = vector.load %arg9[%c0_63, %c0_64, %c1_65, %c0_66] : memref<1x18x18x4xbf16, #tpu.memory_space<vmem>>, vector<1x16x16x4xbf16>
    %32 = vector.shape_cast %31 : vector<1x16x16x4xbf16> to vector<256x4xbf16>
    %c1_67 = arith.constant 1 : index
    %c0_68 = arith.constant 0 : index
    %c0_69 = arith.constant 0 : index
    %33 = vector.load %arg4[%c1_67, %c0_68, %c0_69] : memref<9x4x8xbf16, #tpu.memory_space<vmem>>, vector<1x4x8xbf16>
    %34 = vector.shape_cast %33 : vector<1x4x8xbf16> to vector<4x8xbf16>
    %cst_70 = arith.constant dense<0.000000e+00> : vector<256x8xf32>
    %35 = tpu.matmul %32, %34, %cst_70 {dimension_numbers = #tpu.dot_dimension_numbers<[1], [0], [0], [1], [0, 0, 1, 1], [], []>} : vector<256x4xbf16>, vector<4x8xbf16>, vector<256x8xf32> -> vector<256x8xf32>
    %c0_71 = arith.constant 0 : index
    %c0_72 = arith.constant 0 : index
    %36 = vector.load %arg11[%c0_71, %c0_72] : memref<256x8xf32, #tpu.memory_space<vmem>>, vector<256x8xf32>
    %37 = arith.addf %36, %35 : vector<256x8xf32>
    %c0_73 = arith.constant 0 : index
    %c0_74 = arith.constant 0 : index
    %38 = vector.load %arg11[%c0_73, %c0_74] : memref<256x8xf32, #tpu.memory_space<vmem>>, vector<256x8xf32>
    tpu.vector_store %arg11[%c0_73, %c0_74], %37 {strides = array<i32>} : memref<256x8xf32, #tpu.memory_space<vmem>>, vector<256x8xf32>,
    %c0_75 = arith.constant 0 : index
    %c0_76 = arith.constant 0 : index
    %c2 = arith.constant 2 : index
    %c0_77 = arith.constant 0 : index
    %39 = vector.load %arg9[%c0_75, %c0_76, %c2, %c0_77] : memref<1x18x18x4xbf16, #tpu.memory_space<vmem>>, vector<1x16x16x4xbf16>
    %40 = vector.shape_cast %39 : vector<1x16x16x4xbf16> to vector<256x4xbf16>
    %c2_78 = arith.constant 2 : index
    %c0_79 = arith.constant 0 : index
    %c0_80 = arith.constant 0 : index
    %41 = vector.load %arg4[%c2_78, %c0_79, %c0_80] : memref<9x4x8xbf16, #tpu.memory_space<vmem>>, vector<1x4x8xbf16>
    %42 = vector.shape_cast %41 : vector<1x4x8xbf16> to vector<4x8xbf16>
    %cst_81 = arith.constant dense<0.000000e+00> : vector<256x8xf32>
    %43 = tpu.matmul %40, %42, %cst_81 {dimension_numbers = #tpu.dot_dimension_numbers<[1], [0], [0], [1], [0, 0, 1, 1], [], []>} : vector<256x4xbf16>, vector<4x8xbf16>, vector<256x8xf32> -> vector<256x8xf32>
    %c0_82 = arith.constant 0 : index
    %c0_83 = arith.constant 0 : index
    %44 = vector.load %arg11[%c0_82, %c0_83] : memref<256x8xf32, #tpu.memory_space<vmem>>, vector<256x8xf32>
    %45 = arith.addf %44, %43 : vector<256x8xf32>
    %c0_84 = arith.constant 0 : index
    %c0_85 = arith.constant 0 : index
    %46 = vector.load %arg11[%c0_84, %c0_85] : memref<256x8xf32, #tpu.memory_space<vmem>>, vector<256x8xf32>
    tpu.vector_store %arg11[%c0_84, %c0_85], %45 {strides = array<i32>} : memref<256x8xf32, #tpu.memory_space<vmem>>, vector<256x8xf32>,
    %c0_86 = arith.constant 0 : index
    %c1_87 = arith.constant 1 : index
    %c0_88 = arith.constant 0 : index
    %c0_89 = arith.constant 0 : index
    %47 = vector.load %arg9[%c0_86, %c1_87, %c0_88, %c0_89] : memref<1x18x18x4xbf16, #tpu.memory_space<vmem>>, vector<1x16x16x4xbf16>
    %48 = vector.shape_cast %47 : vector<1x16x16x4xbf16> to vector<256x4xbf16>
    %c3 = arith.constant 3 : index
    %c0_90 = arith.constant 0 : index
    %c0_91 = arith.constant 0 : index
    %49 = vector.load %arg4[%c3, %c0_90, %c0_91] : memref<9x4x8xbf16, #tpu.memory_space<vmem>>, vector<1x4x8xbf16>
    %50 = vector.shape_cast %49 : vector<1x4x8xbf16> to vector<4x8xbf16>
    %cst_92 = arith.constant dense<0.000000e+00> : vector<256x8xf32>
    %51 = tpu.matmul %48, %50, %cst_92 {dimension_numbers = #tpu.dot_dimension_numbers<[1], [0], [0], [1], [0, 0, 1, 1], [], []>} : vector<256x4xbf16>, vector<4x8xbf16>, vector<256x8xf32> -> vector<256x8xf32>
    %c0_93 = arith.constant 0 : index
    %c0_94 = arith.constant 0 : index
    %52 = vector.load %arg11[%c0_93, %c0_94] : memref<256x8xf32, #tpu.memory_space<vmem>>, vector<256x8xf32>
    %53 = arith.addf %52, %51 : vector<256x8xf32>
    %c0_95 = arith.constant 0 : index
    %c0_96 = arith.constant 0 : index
    %54 = vector.load %arg11[%c0_95, %c0_96] : memref<256x8xf32, #tpu.memory_space<vmem>>, vector<256x8xf32>
    tpu.vector_store %arg11[%c0_95, %c0_96], %53 {strides = array<i32>} : memref<256x8xf32, #tpu.memory_space<vmem>>, vector<256x8xf32>,
    %c0_97 = arith.constant 0 : index
    %c1_98 = arith.constant 1 : index
    %c1_99 = arith.constant 1 : index
    %c0_100 = arith.constant 0 : index
    %55 = vector.load %arg9[%c0_97, %c1_98, %c1_99, %c0_100] : memref<1x18x18x4xbf16, #tpu.memory_space<vmem>>, vector<1x16x16x4xbf16>
    %56 = vector.shape_cast %55 : vector<1x16x16x4xbf16> to vector<256x4xbf16>
    %c4 = arith.constant 4 : index
    %c0_101 = arith.constant 0 : index
    %c0_102 = arith.constant 0 : index
    %57 = vector.load %arg4[%c4, %c0_101, %c0_102] : memref<9x4x8xbf16, #tpu.memory_space<vmem>>, vector<1x4x8xbf16>
    %58 = vector.shape_cast %57 : vector<1x4x8xbf16> to vector<4x8xbf16>
    %cst_103 = arith.constant dense<0.000000e+00> : vector<256x8xf32>
    %59 = tpu.matmul %56, %58, %cst_103 {dimension_numbers = #tpu.dot_dimension_numbers<[1], [0], [0], [1], [0, 0, 1, 1], [], []>} : vector<256x4xbf16>, vector<4x8xbf16>, vector<256x8xf32> -> vector<256x8xf32>
    %c0_104 = arith.constant 0 : index
    %c0_105 = arith.constant 0 : index
    %60 = vector.load %arg11[%c0_104, %c0_105] : memref<256x8xf32, #tpu.memory_space<vmem>>, vector<256x8xf32>
    %61 = arith.addf %60, %59 : vector<256x8xf32>
    %c0_106 = arith.constant 0 : index
    %c0_107 = arith.constant 0 : index
    %62 = vector.load %arg11[%c0_106, %c0_107] : memref<256x8xf32, #tpu.memory_space<vmem>>, vector<256x8xf32>
    tpu.vector_store %arg11[%c0_106, %c0_107], %61 {strides = array<i32>} : memref<256x8xf32, #tpu.memory_space<vmem>>, vector<256x8xf32>,
    %c0_108 = arith.constant 0 : index
    %c1_109 = arith.constant 1 : index
    %c2_110 = arith.constant 2 : index
    %c0_111 = arith.constant 0 : index
    %63 = vector.load %arg9[%c0_108, %c1_109, %c2_110, %c0_111] : memref<1x18x18x4xbf16, #tpu.memory_space<vmem>>, vector<1x16x16x4xbf16>
    %64 = vector.shape_cast %63 : vector<1x16x16x4xbf16> to vector<256x4xbf16>
    %c5 = arith.constant 5 : index
    %c0_112 = arith.constant 0 : index
    %c0_113 = arith.constant 0 : index
    %65 = vector.load %arg4[%c5, %c0_112, %c0_113] : memref<9x4x8xbf16, #tpu.memory_space<vmem>>, vector<1x4x8xbf16>
    %66 = vector.shape_cast %65 : vector<1x4x8xbf16> to vector<4x8xbf16>
    %cst_114 = arith.constant dense<0.000000e+00> : vector<256x8xf32>
    %67 = tpu.matmul %64, %66, %cst_114 {dimension_numbers = #tpu.dot_dimension_numbers<[1], [0], [0], [1], [0, 0, 1, 1], [], []>} : vector<256x4xbf16>, vector<4x8xbf16>, vector<256x8xf32> -> vector<256x8xf32>
    %c0_115 = arith.constant 0 : index
    %c0_116 = arith.constant 0 : index
    %68 = vector.load %arg11[%c0_115, %c0_116] : memref<256x8xf32, #tpu.memory_space<vmem>>, vector<256x8xf32>
    %69 = arith.addf %68, %67 : vector<256x8xf32>
    %c0_117 = arith.constant 0 : index
    %c0_118 = arith.constant 0 : index
    %70 = vector.load %arg11[%c0_117, %c0_118] : memref<256x8xf32, #tpu.memory_space<vmem>>, vector<256x8xf32>
    tpu.vector_store %arg11[%c0_117, %c0_118], %69 {strides = array<i32>} : memref<256x8xf32, #tpu.memory_space<vmem>>, vector<256x8xf32>,
    %c0_119 = arith.constant 0 : index
    %c2_120 = arith.constant 2 : index
    %c0_121 = arith.constant 0 : index
    %c0_122 = arith.constant 0 : index
    %71 = vector.load %arg9[%c0_119, %c2_120, %c0_121, %c0_122] : memref<1x18x18x4xbf16, #tpu.memory_space<vmem>>, vector<1x16x16x4xbf16>
    %72 = vector.shape_cast %71 : vector<1x16x16x4xbf16> to vector<256x4xbf16>
    %c6 = arith.constant 6 : index
    %c0_123 = arith.constant 0 : index
    %c0_124 = arith.constant 0 : index
    %73 = vector.load %arg4[%c6, %c0_123, %c0_124] : memref<9x4x8xbf16, #tpu.memory_space<vmem>>, vector<1x4x8xbf16>
    %74 = vector.shape_cast %73 : vector<1x4x8xbf16> to vector<4x8xbf16>
    %cst_125 = arith.constant dense<0.000000e+00> : vector<256x8xf32>
    %75 = tpu.matmul %72, %74, %cst_125 {dimension_numbers = #tpu.dot_dimension_numbers<[1], [0], [0], [1], [0, 0, 1, 1], [], []>} : vector<256x4xbf16>, vector<4x8xbf16>, vector<256x8xf32> -> vector<256x8xf32>
    %c0_126 = arith.constant 0 : index
    %c0_127 = arith.constant 0 : index
    %76 = vector.load %arg11[%c0_126, %c0_127] : memref<256x8xf32, #tpu.memory_space<vmem>>, vector<256x8xf32>
    %77 = arith.addf %76, %75 : vector<256x8xf32>
    %c0_128 = arith.constant 0 : index
    %c0_129 = arith.constant 0 : index
    %78 = vector.load %arg11[%c0_128, %c0_129] : memref<256x8xf32, #tpu.memory_space<vmem>>, vector<256x8xf32>
    tpu.vector_store %arg11[%c0_128, %c0_129], %77 {strides = array<i32>} : memref<256x8xf32, #tpu.memory_space<vmem>>, vector<256x8xf32>,
    %c0_130 = arith.constant 0 : index
    %c2_131 = arith.constant 2 : index
    %c1_132 = arith.constant 1 : index
    %c0_133 = arith.constant 0 : index
    %79 = vector.load %arg9[%c0_130, %c2_131, %c1_132, %c0_133] : memref<1x18x18x4xbf16, #tpu.memory_space<vmem>>, vector<1x16x16x4xbf16>
    %80 = vector.shape_cast %79 : vector<1x16x16x4xbf16> to vector<256x4xbf16>
    %c7 = arith.constant 7 : index
    %c0_134 = arith.constant 0 : index
    %c0_135 = arith.constant 0 : index
    %81 = vector.load %arg4[%c7, %c0_134, %c0_135] : memref<9x4x8xbf16, #tpu.memory_space<vmem>>, vector<1x4x8xbf16>
    %82 = vector.shape_cast %81 : vector<1x4x8xbf16> to vector<4x8xbf16>
    %cst_136 = arith.constant dense<0.000000e+00> : vector<256x8xf32>
    %83 = tpu.matmul %80, %82, %cst_136 {dimension_numbers = #tpu.dot_dimension_numbers<[1], [0], [0], [1], [0, 0, 1, 1], [], []>} : vector<256x4xbf16>, vector<4x8xbf16>, vector<256x8xf32> -> vector<256x8xf32>
    %c0_137 = arith.constant 0 : index
    %c0_138 = arith.constant 0 : index
    %84 = vector.load %arg11[%c0_137, %c0_138] : memref<256x8xf32, #tpu.memory_space<vmem>>, vector<256x8xf32>
    %85 = arith.addf %84, %83 : vector<256x8xf32>
    %c0_139 = arith.constant 0 : index
    %c0_140 = arith.constant 0 : index
    %86 = vector.load %arg11[%c0_139, %c0_140] : memref<256x8xf32, #tpu.memory_space<vmem>>, vector<256x8xf32>
    tpu.vector_store %arg11[%c0_139, %c0_140], %85 {strides = array<i32>} : memref<256x8xf32, #tpu.memory_space<vmem>>, vector<256x8xf32>,
    %c0_141 = arith.constant 0 : index
    %c2_142 = arith.constant 2 : index
    %c2_143 = arith.constant 2 : index
    %c0_144 = arith.constant 0 : index
    %87 = vector.load %arg9[%c0_141, %c2_142, %c2_143, %c0_144] : memref<1x18x18x4xbf16, #tpu.memory_space<vmem>>, vector<1x16x16x4xbf16>
    %88 = vector.shape_cast %87 : vector<1x16x16x4xbf16> to vector<256x4xbf16>
    %c8 = arith.constant 8 : index
    %c0_145 = arith.constant 0 : index
    %c0_146 = arith.constant 0 : index
    %89 = vector.load %arg4[%c8, %c0_145, %c0_146] : memref<9x4x8xbf16, #tpu.memory_space<vmem>>, vector<1x4x8xbf16>
    %90 = vector.shape_cast %89 : vector<1x4x8xbf16> to vector<4x8xbf16>
    %cst_147 = arith.constant dense<0.000000e+00> : vector<256x8xf32>
    %91 = tpu.matmul %88, %90, %cst_147 {dimension_numbers = #tpu.dot_dimension_numbers<[1], [0], [0], [1], [0, 0, 1, 1], [], []>} : vector<256x4xbf16>, vector<4x8xbf16>, vector<256x8xf32> -> vector<256x8xf32>
    %c0_148 = arith.constant 0 : index
    %c0_149 = arith.constant 0 : index
    %92 = vector.load %arg11[%c0_148, %c0_149] : memref<256x8xf32, #tpu.memory_space<vmem>>, vector<256x8xf32>
    %93 = arith.addf %92, %91 : vector<256x8xf32>
    %c0_150 = arith.constant 0 : index
    %c0_151 = arith.constant 0 : index
    %94 = vector.load %arg11[%c0_150, %c0_151] : memref<256x8xf32, #tpu.memory_space<vmem>>, vector<256x8xf32>
    tpu.vector_store %arg11[%c0_150, %c0_151], %93 {strides = array<i32>} : memref<256x8xf32, #tpu.memory_space<vmem>>, vector<256x8xf32>,
    %c0_152 = arith.constant 0 : index
    %c0_153 = arith.constant 0 : index
    %95 = vector.load %arg11[%c0_152, %c0_153] : memref<256x8xf32, #tpu.memory_space<vmem>>, vector<256x8xf32>
    %96 = vector.broadcast %23 : vector<1x8xf32> to vector<256x8xf32>
    %97 = arith.mulf %95, %96 : vector<256x8xf32>
    %98 = vector.broadcast %24 : vector<1x8xf32> to vector<256x8xf32>
    %99 = arith.addf %97, %98 : vector<256x8xf32>
    %cst_154 = arith.constant 0.000000e+00 : f32
    %100 = vector.broadcast %cst_154 : f32 to vector<256x8xf32>
    %101 = arith.maximumf %99, %100 : vector<256x8xf32>
    %102 = arith.truncf %101 : vector<256x8xf32> to vector<256x8xbf16>
    %103 = vector.shape_cast %102 : vector<256x8xbf16> to vector<1x16x16x8xbf16>
    %c0_155 = arith.constant 0 : index
    %c1_156 = arith.constant 1 : index
    %c1_157 = arith.constant 1 : index
    %c0_158 = arith.constant 0 : index
    %104 = vector.load %arg10[%c0_155, %c1_156, %c1_157, %c0_158] : memref<1x18x18x8xbf16, #tpu.memory_space<vmem>>, vector<1x16x16x8xbf16>
    tpu.vector_store %arg10[%c0_155, %c1_156, %c1_157, %c0_158], %103 {strides = array<i32>} : memref<1x18x18x8xbf16, #tpu.memory_space<vmem>>, vector<1x16x16x8xbf16>,
    %c0_159 = arith.constant 0 : index
    %c0_160 = arith.constant 0 : index
    %c0_161 = arith.constant 0 : index
    %c0_162 = arith.constant 0 : index
    %105 = vector.load %arg10[%c0_159, %c0_160, %c0_161, %c0_162] : memref<1x18x18x8xbf16, #tpu.memory_space<vmem>>, vector<1x16x16x8xbf16>
    %106 = vector.shape_cast %105 : vector<1x16x16x8xbf16> to vector<256x8xbf16>
    %c0_163 = arith.constant 0 : index
    %c0_164 = arith.constant 0 : index
    %c0_165 = arith.constant 0 : index
    %107 = vector.load %arg7[%c0_163, %c0_164, %c0_165] : memref<9x8x8xbf16, #tpu.memory_space<vmem>>, vector<1x8x8xbf16>
    %108 = vector.shape_cast %107 : vector<1x8x8xbf16> to vector<8x8xbf16>
    %cst_166 = arith.constant dense<0.000000e+00> : vector<256x8xf32>
    %109 = tpu.matmul %106, %108, %cst_166 {dimension_numbers = #tpu.dot_dimension_numbers<[1], [0], [0], [1], [0, 0, 1, 1], [], []>} : vector<256x8xbf16>, vector<8x8xbf16>, vector<256x8xf32> -> vector<256x8xf32>
    %c0_167 = arith.constant 0 : index
    %c0_168 = arith.constant 0 : index
    %110 = vector.load %arg12[%c0_167, %c0_168] : memref<256x8xf32, #tpu.memory_space<vmem>>, vector<256x8xf32>
    tpu.vector_store %arg12[%c0_167, %c0_168], %109 {strides = array<i32>} : memref<256x8xf32, #tpu.memory_space<vmem>>, vector<256x8xf32>,
    %c0_169 = arith.constant 0 : index
    %c0_170 = arith.constant 0 : index
    %c1_171 = arith.constant 1 : index
    %c0_172 = arith.constant 0 : index
    %111 = vector.load %arg10[%c0_169, %c0_170, %c1_171, %c0_172] : memref<1x18x18x8xbf16, #tpu.memory_space<vmem>>, vector<1x16x16x8xbf16>
    %112 = vector.shape_cast %111 : vector<1x16x16x8xbf16> to vector<256x8xbf16>
    %c1_173 = arith.constant 1 : index
    %c0_174 = arith.constant 0 : index
    %c0_175 = arith.constant 0 : index
    %113 = vector.load %arg7[%c1_173, %c0_174, %c0_175] : memref<9x8x8xbf16, #tpu.memory_space<vmem>>, vector<1x8x8xbf16>
    %114 = vector.shape_cast %113 : vector<1x8x8xbf16> to vector<8x8xbf16>
    %cst_176 = arith.constant dense<0.000000e+00> : vector<256x8xf32>
    %115 = tpu.matmul %112, %114, %cst_176 {dimension_numbers = #tpu.dot_dimension_numbers<[1], [0], [0], [1], [0, 0, 1, 1], [], []>} : vector<256x8xbf16>, vector<8x8xbf16>, vector<256x8xf32> -> vector<256x8xf32>
    %c0_177 = arith.constant 0 : index
    %c0_178 = arith.constant 0 : index
    %116 = vector.load %arg12[%c0_177, %c0_178] : memref<256x8xf32, #tpu.memory_space<vmem>>, vector<256x8xf32>
    %117 = arith.addf %116, %115 : vector<256x8xf32>
    %c0_179 = arith.constant 0 : index
    %c0_180 = arith.constant 0 : index
    %118 = vector.load %arg12[%c0_179, %c0_180] : memref<256x8xf32, #tpu.memory_space<vmem>>, vector<256x8xf32>
    tpu.vector_store %arg12[%c0_179, %c0_180], %117 {strides = array<i32>} : memref<256x8xf32, #tpu.memory_space<vmem>>, vector<256x8xf32>,
    %c0_181 = arith.constant 0 : index
    %c0_182 = arith.constant 0 : index
    %c2_183 = arith.constant 2 : index
    %c0_184 = arith.constant 0 : index
    %119 = vector.load %arg10[%c0_181, %c0_182, %c2_183, %c0_184] : memref<1x18x18x8xbf16, #tpu.memory_space<vmem>>, vector<1x16x16x8xbf16>
    %120 = vector.shape_cast %119 : vector<1x16x16x8xbf16> to vector<256x8xbf16>
    %c2_185 = arith.constant 2 : index
    %c0_186 = arith.constant 0 : index
    %c0_187 = arith.constant 0 : index
    %121 = vector.load %arg7[%c2_185, %c0_186, %c0_187] : memref<9x8x8xbf16, #tpu.memory_space<vmem>>, vector<1x8x8xbf16>
    %122 = vector.shape_cast %121 : vector<1x8x8xbf16> to vector<8x8xbf16>
    %cst_188 = arith.constant dense<0.000000e+00> : vector<256x8xf32>
    %123 = tpu.matmul %120, %122, %cst_188 {dimension_numbers = #tpu.dot_dimension_numbers<[1], [0], [0], [1], [0, 0, 1, 1], [], []>} : vector<256x8xbf16>, vector<8x8xbf16>, vector<256x8xf32> -> vector<256x8xf32>
    %c0_189 = arith.constant 0 : index
    %c0_190 = arith.constant 0 : index
    %124 = vector.load %arg12[%c0_189, %c0_190] : memref<256x8xf32, #tpu.memory_space<vmem>>, vector<256x8xf32>
    %125 = arith.addf %124, %123 : vector<256x8xf32>
    %c0_191 = arith.constant 0 : index
    %c0_192 = arith.constant 0 : index
    %126 = vector.load %arg12[%c0_191, %c0_192] : memref<256x8xf32, #tpu.memory_space<vmem>>, vector<256x8xf32>
    tpu.vector_store %arg12[%c0_191, %c0_192], %125 {strides = array<i32>} : memref<256x8xf32, #tpu.memory_space<vmem>>, vector<256x8xf32>,
    %c0_193 = arith.constant 0 : index
    %c1_194 = arith.constant 1 : index
    %c0_195 = arith.constant 0 : index
    %c0_196 = arith.constant 0 : index
    %127 = vector.load %arg10[%c0_193, %c1_194, %c0_195, %c0_196] : memref<1x18x18x8xbf16, #tpu.memory_space<vmem>>, vector<1x16x16x8xbf16>
    %128 = vector.shape_cast %127 : vector<1x16x16x8xbf16> to vector<256x8xbf16>
    %c3_197 = arith.constant 3 : index
    %c0_198 = arith.constant 0 : index
    %c0_199 = arith.constant 0 : index
    %129 = vector.load %arg7[%c3_197, %c0_198, %c0_199] : memref<9x8x8xbf16, #tpu.memory_space<vmem>>, vector<1x8x8xbf16>
    %130 = vector.shape_cast %129 : vector<1x8x8xbf16> to vector<8x8xbf16>
    %cst_200 = arith.constant dense<0.000000e+00> : vector<256x8xf32>
    %131 = tpu.matmul %128, %130, %cst_200 {dimension_numbers = #tpu.dot_dimension_numbers<[1], [0], [0], [1], [0, 0, 1, 1], [], []>} : vector<256x8xbf16>, vector<8x8xbf16>, vector<256x8xf32> -> vector<256x8xf32>
    %c0_201 = arith.constant 0 : index
    %c0_202 = arith.constant 0 : index
    %132 = vector.load %arg12[%c0_201, %c0_202] : memref<256x8xf32, #tpu.memory_space<vmem>>, vector<256x8xf32>
    %133 = arith.addf %132, %131 : vector<256x8xf32>
    %c0_203 = arith.constant 0 : index
    %c0_204 = arith.constant 0 : index
    %134 = vector.load %arg12[%c0_203, %c0_204] : memref<256x8xf32, #tpu.memory_space<vmem>>, vector<256x8xf32>
    tpu.vector_store %arg12[%c0_203, %c0_204], %133 {strides = array<i32>} : memref<256x8xf32, #tpu.memory_space<vmem>>, vector<256x8xf32>,
    %c0_205 = arith.constant 0 : index
    %c1_206 = arith.constant 1 : index
    %c1_207 = arith.constant 1 : index
    %c0_208 = arith.constant 0 : index
    %135 = vector.load %arg10[%c0_205, %c1_206, %c1_207, %c0_208] : memref<1x18x18x8xbf16, #tpu.memory_space<vmem>>, vector<1x16x16x8xbf16>
    %136 = vector.shape_cast %135 : vector<1x16x16x8xbf16> to vector<256x8xbf16>
    %c4_209 = arith.constant 4 : index
    %c0_210 = arith.constant 0 : index
    %c0_211 = arith.constant 0 : index
    %137 = vector.load %arg7[%c4_209, %c0_210, %c0_211] : memref<9x8x8xbf16, #tpu.memory_space<vmem>>, vector<1x8x8xbf16>
    %138 = vector.shape_cast %137 : vector<1x8x8xbf16> to vector<8x8xbf16>
    %cst_212 = arith.constant dense<0.000000e+00> : vector<256x8xf32>
    %139 = tpu.matmul %136, %138, %cst_212 {dimension_numbers = #tpu.dot_dimension_numbers<[1], [0], [0], [1], [0, 0, 1, 1], [], []>} : vector<256x8xbf16>, vector<8x8xbf16>, vector<256x8xf32> -> vector<256x8xf32>
    %c0_213 = arith.constant 0 : index
    %c0_214 = arith.constant 0 : index
    %140 = vector.load %arg12[%c0_213, %c0_214] : memref<256x8xf32, #tpu.memory_space<vmem>>, vector<256x8xf32>
    %141 = arith.addf %140, %139 : vector<256x8xf32>
    %c0_215 = arith.constant 0 : index
    %c0_216 = arith.constant 0 : index
    %142 = vector.load %arg12[%c0_215, %c0_216] : memref<256x8xf32, #tpu.memory_space<vmem>>, vector<256x8xf32>
    tpu.vector_store %arg12[%c0_215, %c0_216], %141 {strides = array<i32>} : memref<256x8xf32, #tpu.memory_space<vmem>>, vector<256x8xf32>,
    %c0_217 = arith.constant 0 : index
    %c1_218 = arith.constant 1 : index
    %c2_219 = arith.constant 2 : index
    %c0_220 = arith.constant 0 : index
    %143 = vector.load %arg10[%c0_217, %c1_218, %c2_219, %c0_220] : memref<1x18x18x8xbf16, #tpu.memory_space<vmem>>, vector<1x16x16x8xbf16>
    %144 = vector.shape_cast %143 : vector<1x16x16x8xbf16> to vector<256x8xbf16>
    %c5_221 = arith.constant 5 : index
    %c0_222 = arith.constant 0 : index
    %c0_223 = arith.constant 0 : index
    %145 = vector.load %arg7[%c5_221, %c0_222, %c0_223] : memref<9x8x8xbf16, #tpu.memory_space<vmem>>, vector<1x8x8xbf16>
    %146 = vector.shape_cast %145 : vector<1x8x8xbf16> to vector<8x8xbf16>
    %cst_224 = arith.constant dense<0.000000e+00> : vector<256x8xf32>
    %147 = tpu.matmul %144, %146, %cst_224 {dimension_numbers = #tpu.dot_dimension_numbers<[1], [0], [0], [1], [0, 0, 1, 1], [], []>} : vector<256x8xbf16>, vector<8x8xbf16>, vector<256x8xf32> -> vector<256x8xf32>
    %c0_225 = arith.constant 0 : index
    %c0_226 = arith.constant 0 : index
    %148 = vector.load %arg12[%c0_225, %c0_226] : memref<256x8xf32, #tpu.memory_space<vmem>>, vector<256x8xf32>
    %149 = arith.addf %148, %147 : vector<256x8xf32>
    %c0_227 = arith.constant 0 : index
    %c0_228 = arith.constant 0 : index
    %150 = vector.load %arg12[%c0_227, %c0_228] : memref<256x8xf32, #tpu.memory_space<vmem>>, vector<256x8xf32>
    tpu.vector_store %arg12[%c0_227, %c0_228], %149 {strides = array<i32>} : memref<256x8xf32, #tpu.memory_space<vmem>>, vector<256x8xf32>,
    %c0_229 = arith.constant 0 : index
    %c2_230 = arith.constant 2 : index
    %c0_231 = arith.constant 0 : index
    %c0_232 = arith.constant 0 : index
    %151 = vector.load %arg10[%c0_229, %c2_230, %c0_231, %c0_232] : memref<1x18x18x8xbf16, #tpu.memory_space<vmem>>, vector<1x16x16x8xbf16>
    %152 = vector.shape_cast %151 : vector<1x16x16x8xbf16> to vector<256x8xbf16>
    %c6_233 = arith.constant 6 : index
    %c0_234 = arith.constant 0 : index
    %c0_235 = arith.constant 0 : index
    %153 = vector.load %arg7[%c6_233, %c0_234, %c0_235] : memref<9x8x8xbf16, #tpu.memory_space<vmem>>, vector<1x8x8xbf16>
    %154 = vector.shape_cast %153 : vector<1x8x8xbf16> to vector<8x8xbf16>
    %cst_236 = arith.constant dense<0.000000e+00> : vector<256x8xf32>
    %155 = tpu.matmul %152, %154, %cst_236 {dimension_numbers = #tpu.dot_dimension_numbers<[1], [0], [0], [1], [0, 0, 1, 1], [], []>} : vector<256x8xbf16>, vector<8x8xbf16>, vector<256x8xf32> -> vector<256x8xf32>
    %c0_237 = arith.constant 0 : index
    %c0_238 = arith.constant 0 : index
    %156 = vector.load %arg12[%c0_237, %c0_238] : memref<256x8xf32, #tpu.memory_space<vmem>>, vector<256x8xf32>
    %157 = arith.addf %156, %155 : vector<256x8xf32>
    %c0_239 = arith.constant 0 : index
    %c0_240 = arith.constant 0 : index
    %158 = vector.load %arg12[%c0_239, %c0_240] : memref<256x8xf32, #tpu.memory_space<vmem>>, vector<256x8xf32>
    tpu.vector_store %arg12[%c0_239, %c0_240], %157 {strides = array<i32>} : memref<256x8xf32, #tpu.memory_space<vmem>>, vector<256x8xf32>,
    %c0_241 = arith.constant 0 : index
    %c2_242 = arith.constant 2 : index
    %c1_243 = arith.constant 1 : index
    %c0_244 = arith.constant 0 : index
    %159 = vector.load %arg10[%c0_241, %c2_242, %c1_243, %c0_244] : memref<1x18x18x8xbf16, #tpu.memory_space<vmem>>, vector<1x16x16x8xbf16>
    %160 = vector.shape_cast %159 : vector<1x16x16x8xbf16> to vector<256x8xbf16>
    %c7_245 = arith.constant 7 : index
    %c0_246 = arith.constant 0 : index
    %c0_247 = arith.constant 0 : index
    %161 = vector.load %arg7[%c7_245, %c0_246, %c0_247] : memref<9x8x8xbf16, #tpu.memory_space<vmem>>, vector<1x8x8xbf16>
    %162 = vector.shape_cast %161 : vector<1x8x8xbf16> to vector<8x8xbf16>
    %cst_248 = arith.constant dense<0.000000e+00> : vector<256x8xf32>
    %163 = tpu.matmul %160, %162, %cst_248 {dimension_numbers = #tpu.dot_dimension_numbers<[1], [0], [0], [1], [0, 0, 1, 1], [], []>} : vector<256x8xbf16>, vector<8x8xbf16>, vector<256x8xf32> -> vector<256x8xf32>
    %c0_249 = arith.constant 0 : index
    %c0_250 = arith.constant 0 : index
    %164 = vector.load %arg12[%c0_249, %c0_250] : memref<256x8xf32, #tpu.memory_space<vmem>>, vector<256x8xf32>
    %165 = arith.addf %164, %163 : vector<256x8xf32>
    %c0_251 = arith.constant 0 : index
    %c0_252 = arith.constant 0 : index
    %166 = vector.load %arg12[%c0_251, %c0_252] : memref<256x8xf32, #tpu.memory_space<vmem>>, vector<256x8xf32>
    tpu.vector_store %arg12[%c0_251, %c0_252], %165 {strides = array<i32>} : memref<256x8xf32, #tpu.memory_space<vmem>>, vector<256x8xf32>,
    %c0_253 = arith.constant 0 : index
    %c2_254 = arith.constant 2 : index
    %c2_255 = arith.constant 2 : index
    %c0_256 = arith.constant 0 : index
    %167 = vector.load %arg10[%c0_253, %c2_254, %c2_255, %c0_256] : memref<1x18x18x8xbf16, #tpu.memory_space<vmem>>, vector<1x16x16x8xbf16>
    %168 = vector.shape_cast %167 : vector<1x16x16x8xbf16> to vector<256x8xbf16>
    %c8_257 = arith.constant 8 : index
    %c0_258 = arith.constant 0 : index
    %c0_259 = arith.constant 0 : index
    %169 = vector.load %arg7[%c8_257, %c0_258, %c0_259] : memref<9x8x8xbf16, #tpu.memory_space<vmem>>, vector<1x8x8xbf16>
    %170 = vector.shape_cast %169 : vector<1x8x8xbf16> to vector<8x8xbf16>
    %cst_260 = arith.constant dense<0.000000e+00> : vector<256x8xf32>
    %171 = tpu.matmul %168, %170, %cst_260 {dimension_numbers = #tpu.dot_dimension_numbers<[1], [0], [0], [1], [0, 0, 1, 1], [], []>} : vector<256x8xbf16>, vector<8x8xbf16>, vector<256x8xf32> -> vector<256x8xf32>
    %c0_261 = arith.constant 0 : index
    %c0_262 = arith.constant 0 : index
    %172 = vector.load %arg12[%c0_261, %c0_262] : memref<256x8xf32, #tpu.memory_space<vmem>>, vector<256x8xf32>
    %173 = arith.addf %172, %171 : vector<256x8xf32>
    %c0_263 = arith.constant 0 : index
    %c0_264 = arith.constant 0 : index
    %174 = vector.load %arg12[%c0_263, %c0_264] : memref<256x8xf32, #tpu.memory_space<vmem>>, vector<256x8xf32>
    tpu.vector_store %arg12[%c0_263, %c0_264], %173 {strides = array<i32>} : memref<256x8xf32, #tpu.memory_space<vmem>>, vector<256x8xf32>,
    %c0_265 = arith.constant 0 : index
    %c0_266 = arith.constant 0 : index
    %175 = vector.load %arg12[%c0_265, %c0_266] : memref<256x8xf32, #tpu.memory_space<vmem>>, vector<256x8xf32>
    %176 = vector.shape_cast %175 : vector<256x8xf32> to vector<1x16x16x8xf32>
    %c0_267 = arith.constant 0 : index
    %c0_268 = arith.constant 0 : index
    %c0_269 = arith.constant 0 : index
    %c0_270 = arith.constant 0 : index
    %177 = vector.load %arg8[%c0_267, %c0_268, %c0_269, %c0_270] : memref<1x16x16x8xf32, #tpu.memory_space<vmem>>, vector<1x16x16x8xf32>
    tpu.vector_store %arg8[%c0_267, %c0_268, %c0_269, %c0_270], %176 {strides = array<i32>} : memref<1x16x16x8xf32, #tpu.memory_space<vmem>>, vector<1x16x16x8xf32>,
    return
  }
  func.func @transform_0(%arg0: i32) -> (i32, i32, i32, i32) {
    %c0_i32 = arith.constant 0 : i32
    %c0_i32_0 = arith.constant 0 : i32
    %c0_i32_1 = arith.constant 0 : i32
    %c0_i32_2 = arith.constant 0 : i32
    return %arg0, %c0_i32, %c0_i32_0, %c0_i32_1 : i32, i32, i32, i32
  }
  func.func @transform_1(%arg0: i32) -> (i32, i32, i32, i32) {
    %c0_i32 = arith.constant 0 : i32
    %c0_i32_0 = arith.constant 0 : i32
    %c0_i32_1 = arith.constant 0 : i32
    %c0_i32_2 = arith.constant 0 : i32
    %c0_i32_3 = arith.constant 0 : i32
    return %c0_i32, %c0_i32_0, %c0_i32_1, %c0_i32_2 : i32, i32, i32, i32
  }
  func.func @transform_2(%arg0: i32) -> (i32, i32, i32, i32) {
    %c0_i32 = arith.constant 0 : i32
    %c0_i32_0 = arith.constant 0 : i32
    %c0_i32_1 = arith.constant 0 : i32
    %c0_i32_2 = arith.constant 0 : i32
    %c0_i32_3 = arith.constant 0 : i32
    return %c0_i32, %c0_i32_0, %c0_i32_1, %c0_i32_2 : i32, i32, i32, i32
  }
  func.func @transform_3(%arg0: i32) -> (i32, i32, i32) {
    %c0_i32 = arith.constant 0 : i32
    %c0_i32_0 = arith.constant 0 : i32
    %c0_i32_1 = arith.constant 0 : i32
    %c0_i32_2 = arith.constant 0 : i32
    return %c0_i32, %c0_i32_0, %c0_i32_1 : i32, i32, i32
  }
  func.func @transform_4(%arg0: i32) -> (i32, i32) {
    %c0_i32 = arith.constant 0 : i32
    %c0_i32_0 = arith.constant 0 : i32
    %c0_i32_1 = arith.constant 0 : i32
    return %c0_i32, %c0_i32_0 : i32, i32
  }
  func.func @transform_5(%arg0: i32) -> (i32, i32) {
    %c0_i32 = arith.constant 0 : i32
    %c0_i32_0 = arith.constant 0 : i32
    %c0_i32_1 = arith.constant 0 : i32
    return %c0_i32, %c0_i32_0 : i32, i32
  }
  func.func @transform_6(%arg0: i32) -> (i32, i32, i32) {
    %c0_i32 = arith.constant 0 : i32
    %c0_i32_0 = arith.constant 0 : i32
    %c0_i32_1 = arith.constant 0 : i32
    %c0_i32_2 = arith.constant 0 : i32
    return %c0_i32, %c0_i32_0, %c0_i32_1 : i32, i32, i32
  }
  func.func @transform_7(%arg0: i32) -> (i32, i32, i32, i32) {
    %c0_i32 = arith.constant 0 : i32
    %c0_i32_0 = arith.constant 0 : i32
    %c0_i32_1 = arith.constant 0 : i32
    %c0_i32_2 = arith.constant 0 : i32
    return %arg0, %c0_i32, %c0_i32_0, %c0_i32_1 : i32, i32, i32, i32
  }
}

</mosaic_0001>

<bundles_post_ra>
// kernel: tpu_custom_call.1
= control target key start
LH: loop header
LB: loop body
LE: loop exit
PB: predicated region body
PF: predicated region fallthrough
CT: control target
= control target key end

     0   :  { %s14470_s24 = smov 0   ;;  %s18286_s0 = inlined_call_operand.vmem [shape: f32[2,16,16,4], index: 0, kind: input, shape index: {}]   ;;  %s18287_s1 = inlined_call_operand.vmem [shape: f32[1,1,1,4], index: 1, kind: input, shape index: {}]   ;;  %s18288_s2 = inlined_call_operand.vmem [shape: f32[1,1,1,4], index: 2, kind: input, shape index: {}]   ;;  %s18289_s3 = inlined_call_operand.vmem [shape: bf16[9,4,8], index: 3, kind: input, shape index: {}]   ;;  %s18290_s4 = inlined_call_operand.vmem [shape: f32[1,8], index: 4, kind: input, shape index: {}]   ;;  %s18291_s5 = inlined_call_operand.vmem [shape: f32[1,8], index: 5, kind: input, shape index: {}]   ;;  %s18292_s6 = inlined_call_operand.vmem [shape: bf16[9,8,8], index: 6, kind: input, shape index: {}]   ;;  %s18293_s7 = inlined_call_operand.vmem [shape: f32[2,16,16,8], index: 7, kind: output, shape index: {}]  }
   0x1 LB: > { %s12539_s25 = sadd.s32 4294967295, %s14427_s24   ;;  %p12543_p0 = scmp.ge.s32.totalorder %s14427_s24, 1  ;;  %s14427_s24 = sphi %s14470_s24, %s17_s24  }
   0x2   : > { %p237_p1 = scmp.lt.s32.totalorder %s14427_s24, 3 }
   0x4   : > { %p238_p2 = pnand %p12543_p0, %p237_p1 }
   0x6   : > { %241 = sbr.rel (%p238_p2) target bundleno = 1234 (0x4d2), region = 48 }
   0xb   : > { %v1231_v0 = vld [vmem:[%s18289_s3] sm:$0x3]  ;;  %vm1361_vm0 = vcmask 1041408   ;;  %vm280_vm1 = vcmask 27648   ;;  %vm283_vm2 = vcmask 24576   ;;  %v18294_v2 = vmov 0  }
   0xc   : > { %14290 = vmatprep.subr.msk.bf16.mxu0 %vm1361_vm0, %v1231_v0  ;;  %v1363_v1 = vsel %vm1361_vm0, %v1231_v0, 0  ;;  %281 = vst.msk [vmem:[#allocation2] sm:$0xf] %vm280_vm1, %v18294_v2  ;;  %282 = vst.msk [vmem:[#allocation2 + $0x4] sm:$0xf] %vm280_vm1, %v18294_v2  ;;  %p269_p3 = scmp.lt.s32.totalorder %s12539_s25, 1 }
   0xd   : > { %vm290_vm3 = vsmask.f32 256  ;;  %284 = vst.msk [vmem:[#allocation2 + $0x8] sm:$0x1] %vm283_vm2, %v18294_v2  ;;  %288 = vst.msk [vmem:[#allocation2 + $0xd4] sm:$0x1] %vm283_vm2, %v18294_v2  ;;  %13679 = vmatpush3.bf16.msra.mxu0 %v1363_v1 }
   0xe   : > { %286 = vst.msk [vmem:[#allocation2 + $0xcc] sm:$0xf] %vm280_vm1, %v18294_v2  ;;  %287 = vst.msk [vmem:[#allocation2 + $0xd0] sm:$0xf] %vm280_vm1, %v18294_v2  ;;  %v12663_v3 = vld [vmem:[%s18289_s3 + $0x4] sm:$0x3] }
   0xf   : > { %vm14500_vm4 = vmand %vm283_vm2, %vm290_vm3  ;;  %v295_v5 = vld [vmem:[#allocation2 + $0xc] sm:$0x1]  ;;  %vm346_vm5 = vsmask.f32 7938  ;;  %vm405_vm6 = vcmask 57344   ;;  %14292 = vmatprep.subr.msk.bf16.mxu0 %vm1361_vm0, %v12663_v3  ;;  %s18353_s25 = smov (!%p269_p3, %s12539_s25), 1 }
  0x10   : > { %v296_v6 = vsel %vm14500_vm4, 0, %v295_v5  ;;  %406 = vst.msk [vmem:[#allocation3 + $0x8] sm:$0x1] %vm405_vm6, %v18294_v2  ;;  %410 = vst.msk [vmem:[#allocation3 + $0xd4] sm:$0x1] %vm405_vm6, %v18294_v2  ;;  %s13306_s9 = sshll.u32 %s18353_s25, 8 }
  0x11   : > { %297 = vst [vmem:[#allocation2 + $0xc] sm:$0x1] %v296_v6  ;;  %vm14519_vm7 = vmand %vm405_vm6, %vm290_vm3  ;;  %v12614_v8 = vld [vmem:[%s18289_s3 + $0x2] sm:$0x3]  ;;  %v298_v11 = vld [vmem:[#allocation2 + $0x18] sm:$0x1]  ;;  %s14549_s14 = scalar_lea.vmem %s18286_s0, %s13306_s9  ;;  %s18184_s8 = scalar_lea.vmem %s18293_s7, %s13306_s9 }
  0x12   : > { %vm14528_vm8 = vmand %vm283_vm2, %vm346_vm5  ;;  %14291 = vmatprep.subr.msk.bf16.mxu1 %vm1361_vm0, %v12614_v8  ;;  %v2093_v10 = vsel %vm1361_vm0, %v12614_v8, 0  ;;  %v301_v12 = vld [vmem:[#allocation2 + $0x24] sm:$0x1]  ;;  %v14538_v13 = vld [vmem:[%s18287_s1] ss:$0 sm:$0xff]  ;;  %v299_v14 = vsel %vm14500_vm4, 0, %v298_v11 }
  0x13   : > { %13713 = vmatpush3.bf16.msra.mxu1 %v2093_v10  ;;  %v302_v15 = vsel %vm14500_vm4, 0, %v301_v12  ;;  %v14554_v16 = vld [vmem:[%s18288_s2] ss:$0 sm:$0xff]  ;;  %300 = vst [vmem:[#allocation2 + $0x18] sm:$0x1] %v299_v14  ;;  %vm1312_vm9 = vcmask 31744   ;;  %vm14596_vm13 = vmand %vm280_vm1, %vm346_vm5 }
  0x14   : > { %303 = vst [vmem:[#allocation2 + $0x24] sm:$0x1] %v302_v15  ;;  %v351_v17 = vld [vmem:[#allocation2 + $0x14] sm:$0x1]  ;;  %v304_v18 = vld [vmem:[#allocation2 + $0x30] sm:$0x1] }
  0x15   : > { %v292_v19 = vld [vmem:[#allocation2] sm:$0x1]  ;;  %v352_v21 = vsel %vm14528_vm8, 0, %v351_v17  ;;  %v525_v23 = vld [vmem:[%s14549_s14 + $0x8] sm:$0xff]  ;;  %v14564_v25 = vsel %vm1361_vm0, %v12663_v3, 0  ;;  %v526_v26 = vld [vmem:[%s14549_s14 + $0x10] sm:$0xff] }
  0x16   : > { %v524_v20 = vld [vmem:[%s14549_s14] sm:$0xff]  ;;  %v293_v22 = vsel %vm14500_vm4, 0, %v292_v19  ;;  %v527_v27 = vld [vmem:[%s14549_s14 + $0x18] sm:$0xff]  ;;  %353 = vst [vmem:[#allocation2 + $0x14] sm:$0x1] %v352_v21  ;;  %v305_v28 = vsel %vm14500_vm4, 0, %v304_v18  ;;  %v563_v29 = vmul.f32 %v14538_v13, %v525_v23  ;;  %v564_v30 = vmul.f32 %v14538_v13, %v526_v26 }
  0x17   : > { %v562_v24 = vmul.f32 %v14538_v13, %v524_v20  ;;  %294 = vst [vmem:[#allocation2] sm:$0x1] %v293_v22  ;;  %vm760_vm10 = vsmask.f32 4368  ;;  %v565_v31 = vmul.f32 %v14538_v13, %v527_v27  ;;  %v528_v32 = vld [vmem:[%s14549_s14 + $0x20] sm:$0xff]  ;;  %v529_v33 = vld [vmem:[%s14549_s14 + $0x28] sm:$0xff] }
  0x18   : > { %v348_v34 = vld [vmem:[#allocation2 + $0x8] sm:$0x1]  ;;  %306 = vst [vmem:[#allocation2 + $0x30] sm:$0x1] %v305_v28  ;;  %v566_v36 = vmul.f32 %v14538_v13, %v528_v32  ;;  %v567_v37 = vmul.f32 %v14538_v13, %v529_v33  ;;  %v1560_v39 = vld [vmem:[#allocation2 + $0x4] sm:$0xf]  ;;  %v601_v40 = vadd.f32 %v14554_v16, %v563_v29  ;;  %v602_v41 = vadd.f32 %v14554_v16, %v564_v30  ;;  %vm14602_vm14 = vmor %vm290_vm3, %vm760_vm10 }
  0x19   : > { %v600_v35 = vadd.f32 %v14554_v16, %v562_v24  ;;  %v349_v38 = vsel %vm14528_vm8, 0, %v348_v34  ;;  %v603_v42 = vadd.f32 %v14554_v16, %v565_v31  ;;  %v1620_v43 = vshll.u32 %v1560_v39, 16  ;;  %v530_v48 = vld [vmem:[%s14549_s14 + $0x30] sm:$0xff]  ;;  %v1085_v18 = vld [vmem:[#allocation2 + $0xc] sm:$0xf] }
  0x1a   : > { %350 = vst [vmem:[#allocation2 + $0x8] sm:$0x1] %v349_v38  ;;  %v604_v45 = vadd.f32 %v14554_v16, %v566_v36  ;;  %v605_v46 = vadd.f32 %v14554_v16, %v567_v37  ;;  %v1624_v47 = vshrl.u32 %v1560_v39, 16  ;;  %v633_v49 = vmax.f32 %v601_v40, 0.0  ;;  %v1092_v27 = vld [vmem:[#allocation2 + $0x18] sm:$0xf] }
  0x1b   : > { %v632_v44 = vmax.f32 %v600_v35, 0.0  ;;  %v634_v50 = vmax.f32 %v602_v41, 0.0  ;;  %v635_v51 = vmax.f32 %v603_v42, 0.0  ;;  %v14586_v52 = vrot.slane %v1620_v43, 5  ;;  %v1099_v33 = vld [vmem:[#allocation2 + $0x24] sm:$0xf] }
  0x1c   : > { %v636_v54 = vmax.f32 %v604_v45, 0.0  ;;  %v637_v55 = vmax.f32 %v605_v46, 0.0  ;;  %v14588_v56 = vrot.slane %v1624_v47, 4  ;;  %v13309_v57 = vpack.c.bf16 %v633_v49, %v633_v49  ;;  %v531_v45 = vld [vmem:[%s14549_s14 + $0x38] sm:$0xff] }
  0x1d   : > { %v13308_v53 = vpack.c.bf16 %v632_v44, %v632_v44  ;;  %v13310_v58 = vpack.c.bf16 %v634_v50, %v634_v50  ;;  %v13311_v59 = vpack.c.bf16 %v635_v51, %v635_v51  ;;  %vm1607_vm11 = vsmask.f32 3328  ;;  %v1089_v44 = vld [vmem:[#allocation2 + $0x14] sm:$0x1] }
  0x1e   : > { %vm1608_vm12 = vsmask.f32 7440  ;;  %v14591_v60 = vmul.f32 %v14538_v13, %v530_v48  ;;  %v14317_v61 = vld [vmem:[#allocation2] sm:$0xff]   ;;  %v13312_v0 = vpack.c.bf16 %v636_v54, %v636_v54  ;;  %v13313_v1 = vpack.c.bf16 %v637_v55, %v637_v55  ;;  %v307_v55 = vld [vmem:[#allocation2 + $0x3c] sm:$0x1] }
  0x1f   : > { %v763_v62 = vshrl.u32 %v13308_v53, 16  ;;  %v766_v63 = vshll.u32 %v13308_v53, 16  ;;  %v771_v3 = vshrl.u32 %v13309_v57, 16  ;;  %v774_v5 = vshll.u32 %v13309_v57, 16  ;;  %13680 = vmatprep.mubr.msk.bf16.mxu0 %vm1312_vm9, %v14317_v61  ;;  %v1559_v34 = vld [vmem:[#allocation2] sm:$0xf]  ;;  %vm14632_vm15 = vmor %vm1607_vm11, %vm1608_vm12 }
  0x20   : > { %v780_v6 = vshrl.u32 %v13310_v58, 16  ;;  %v783_v8 = vshll.u32 %v13310_v58, 16  ;;  %v788_v11 = vshrl.u32 %v13311_v59, 16  ;;  %v791_v12 = vshll.u32 %v13311_v59, 16  ;;  %v532_v57 = vld [vmem:[%s14549_s14 + $0x40] sm:$0xff] }
  0x21   : > { %v765_v10 = vrot.slane %v763_v62, 7  ;;  %v797_v14 = vshrl.u32 %v13312_v0, 16  ;;  %v773_v15 = vrot.slane %v771_v3, 7  ;;  %v800_v20 = vshll.u32 %v13312_v0, 16  ;;  %v1561_v39 = vld [vmem:[#allocation2 + $0x8] sm:$0x1] }
  0x22   : > { %v782_v19 = vrot.slane %v780_v6, 7  ;;  %v805_v21 = vshrl.u32 %v13313_v1, 16  ;;  %v18311_v22 = vmov 0  ;;  %v14606_v26 = vrot.slane %v788_v11, 7  ;;  %v354_v6 = vld [vmem:[#allocation2 + $0x20] sm:$0x1] }
  0x23   : > { %v18312_v22 = vsel %vm14602_vm14, 4294967295, %v18311_v22  ;;  %v768_v23 = vor.u32 %v766_v63, %v765_v10  ;;  %v769_v24 = vrot.slane %v765_v10, 4  ;;  %v799_v28 = vrot.slane %v797_v14, 7 }
  0x24   : > { %18313 = vst [vmem:[#allocation6_spill] sm:$0xff] %v18312_v22  ;;  %v776_v29 = vor.u32 %v774_v5, %v773_v15  ;;  %v778_v30 = vrot.slane %v773_v15, 4  ;;  %v785_v31 = vor.u32 %v783_v8, %v782_v19  ;;  %v786_v32 = vrot.slane %v782_v19, 4  ;;  %v534_v8 = vld [vmem:[%s14549_s14 + $0x50] sm:$0xff]  ;;  %v535_v15 = vld [vmem:[%s14549_s14 + $0x58] sm:$0xff] }
  0x25   : > { %v1086_v35 = vsel %vm14596_vm13, %v768_v23, %v1085_v18  ;;  %v793_v36 = vor.u32 %v791_v12, %v14606_v26  ;;  %v795_v37 = vrot.slane %v14606_v26, 4  ;;  %v802_v38 = vor.u32 %v800_v20, %v799_v28 }
  0x26   : > { %v777_v40 = vsel %vm14602_vm14, %v769_v24, %v776_v29  ;;  %1087 = vst [vmem:[#allocation2 + $0xc] sm:$0xf] %v1086_v35  ;;  %v1093_v41 = vsel %vm14596_vm13, %v785_v31, %v1092_v27  ;;  %v803_v42 = vrot.slane %v799_v28, 4  ;;  %v14616_v43 = vrot.slane %v805_v21, 7  ;;  %v536_v21 = vld [vmem:[%s14549_s14 + $0x60] sm:$0xff] }
  0x27   : > { %1088 = vst.msk [vmem:[#allocation2 + $0x10] sm:$0xf] %vm280_vm1, %v777_v40  ;;  %v794_v46 = vsel %vm14602_vm14, %v786_v32, %v793_v36  ;;  %1094 = vst [vmem:[#allocation2 + $0x18] sm:$0xf] %v1093_v41  ;;  %v808_v47 = vshll.u32 %v13313_v1, 16  ;;  %v1100_v48 = vsel %vm14596_vm13, %v802_v38, %v1099_v33  ;;  %v1611_v49 = vshrl.u32 %v1559_v34, 16 }
  0x28   : > { %1095 = vst.msk [vmem:[#allocation2 + $0x1c] sm:$0xf] %vm280_vm1, %v794_v46  ;;  %v812_v50 = vrot.slane %v14616_v43, 4  ;;  %1101 = vst [vmem:[#allocation2 + $0x24] sm:$0xf] %v1100_v48  ;;  %v1614_v51 = vshll.u32 %v1559_v34, 16  ;;  %v1627_v53 = vor.u32 %v14588_v56, %v14586_v52  ;;  %v1090_v62 = vsel %vm14500_vm4, %v778_v30, %v1089_v44 }
  0x29   : > { %v1630_v54 = vshll.u32 %v1561_v39, 16  ;;  %v810_v58 = vor.u32 %v808_v47, %v14616_v43  ;;  %v1613_v61 = vrot.slane %v1611_v49, 4  ;;  %v569_v63 = vmul.f32 %v14538_v13, %v531_v45  ;;  %v533_v56 = vld [vmem:[%s14549_s14 + $0x48] sm:$0xff]  ;;  %1091 = vst [vmem:[#allocation2 + $0x14] sm:$0x1] %v1090_v62 }
  0x2a   : > { %v1616_v0 = vrot.slane %v1614_v51, 5  ;;  %v1628_v1 = vrot.slane %v1627_v53, 4  ;;  %v606_v5 = vadd.f32 %v14554_v16, %v14591_v60  ;;  %v308_v12 = vsel %vm14500_vm4, 0, %v307_v55 }
  0x2b   : > { %v1632_v3 = vrot.slane %v1630_v54, 5  ;;  %v811_v10 = vsel %vm14602_vm14, %v803_v42, %v810_v58  ;;  %v607_v11 = vadd.f32 %v14554_v16, %v569_v63  ;;  %v570_v14 = vmul.f32 %v14538_v13, %v532_v57  ;;  %309 = vst [vmem:[#allocation2 + $0x3c] sm:$0x1] %v308_v12  ;;  %v1106_v54 = vld [vmem:[#allocation2 + $0x30] sm:$0xf] }
  0x2c   : > { %1102 = vst.msk [vmem:[#allocation2 + $0x28] sm:$0xf] %vm280_vm1, %v811_v10  ;;  %v1617_v18 = vor.u32 %v1616_v0, %v1613_v61  ;;  %v638_v60 = vmax.f32 %v606_v5, 0.0  ;;  %v571_v20 = vmul.f32 %v14538_v13, %v533_v56  ;;  %v355_v28 = vsel %vm14528_vm8, 0, %v354_v6 }
  0x2d   : > { %v1633_v19 = vsel %vm14632_vm15, %v1628_v1, %v1632_v3  ;;  %v1562_v23 = vld [vmem:[#allocation2 + $0xc] sm:$0xf]  ;;  %v639_v24 = vmax.f32 %v607_v11, 0.0  ;;  %v608_v27 = vadd.f32 %v14554_v16, %v570_v14  ;;  %v572_v29 = vmul.f32 %v14538_v13, %v534_v8  ;;  %356 = vst [vmem:[#allocation2 + $0x20] sm:$0x1] %v355_v28 }
  0x2e   : > { %v14318_v30 = vld [vmem:[#allocation2 + $0xc] sm:$0xff]   ;;  %v1618_v31 = vrot.slane %v1617_v18, 4  ;;  %v13314_v32 = vpack.c.bf16 %v638_v60, %v638_v60  ;;  %v609_v33 = vadd.f32 %v14554_v16, %v571_v20  ;;  %v573_v34 = vmul.f32 %v14538_v13, %v535_v15  ;;  %v1565_v62 = vld [vmem:[#allocation2 + $0x18] sm:$0xf] }
  0x2f   : > { %v14319_v35 = vld [vmem:[#allocation2 + $0x18] sm:$0xff]   ;;  %v1635_v36 = vshrl.u32 %v1562_v23, 16  ;;  %v13315_v38 = vpack.c.bf16 %v639_v24, %v639_v24  ;;  %v14662_v39 = vadd.f32 %v14554_v16, %v572_v29  ;;  %v14665_v40 = vmul.f32 %v14538_v13, %v536_v21  ;;  %13681 = vmatmul.mubr.msk.bf16.vlgmr.msra.gmra.mxu0 %vm1312_vm9, %v14318_v30  ;;  %v1563_v42 = vld [vmem:[#allocation2 + $0x10] sm:$0xf] }
  0x30   : > { %v1623_v41 = vsel %vm14632_vm15, %v1618_v31, %v14586_v52  ;;  %v1638_v44 = vshll.u32 %v1562_v23, 16  ;;  %v814_v45 = vshrl.u32 %v13314_v32, 16  ;;  %v817_v46 = vshll.u32 %v13314_v32, 16  ;;  %13747 = vmatpush3.bf16.msra.mxu0 %v14564_v25  ;;  %13684 = vmatprep.mubr.msk.bf16.mxu0 %vm1312_vm9, %v14319_v35  ;;  %v1564_v48 = vld [vmem:[#allocation2 + $0x14] sm:$0x1] }
  0x31   : > { %v12615_v47 = vcombine.low %v1623_v41, %v1633_v19  ;;  %v1637_v49 = vrot.slane %v1635_v36, 4  ;;  %v1644_v51 = vshll.u32 %v1563_v42, 16  ;;  %v1648_v53 = vshrl.u32 %v1563_v42, 16  ;;  %v1566_v26 = vld [vmem:[#allocation2 + $0x1c] sm:$0xf] }
  0x32   : > { %v1640_v55 = vrot.slane %v1638_v44, 5  ;;  %v1654_v57 = vshll.u32 %v1564_v48, 16  ;;  %v816_v58 = vrot.slane %v814_v45, 7  ;;  %v822_v61 = vshrl.u32 %v13315_v38, 16  ;;  %v1568_v36 = vld [vmem:[#allocation2 + $0x24] sm:$0xf] }
  0x33   : > { %13714 = vmatprep.mubr.msk.bf16.mxu1 %vm1312_vm9, %v12615_v47  ;;  %v1646_v52 = vrot.slane %v1644_v51, 5  ;;  %v1650_v63 = vrot.slane %v1648_v53, 4  ;;  %v825_v56 = vshll.u32 %v13315_v38, 16  ;;  %v14675_v25 = vadd.f32 %v14554_v16, %v573_v34  ;;  %v14320_v0 = vld [vmem:[#allocation2 + $0x24] sm:$0xff]   ;;  %v1113_v53 = vld [vmem:[#allocation2 + $0x3c] sm:$0xf] }
  0x34   : > { %v1641_v1 = vor.u32 %v1640_v55, %v1637_v49  ;;  %v1656_v3 = vrot.slane %v1654_v57, 5  ;;  %v819_v5 = vor.u32 %v817_v46, %v816_v58  ;;  %v820_v6 = vrot.slane %v816_v58, 4  ;;  %v1096_v14 = vld [vmem:[#allocation2 + $0x20] sm:$0x1]  ;;  %v537_v49 = vld [vmem:[%s14549_s14 + $0x68] sm:$0xff] }
  0x35   : > { %v1651_v8 = vor.u32 %v1650_v63, %v1646_v52  ;;  %v14677_v10 = vrot.slane %v822_v61, 7  ;;  %v640_v11 = vmax.f32 %v608_v27, 0.0  ;;  %v641_v12 = vmax.f32 %v609_v33, 0.0  ;;  %v357_v27 = vld [vmem:[#allocation2 + $0x2c] sm:$0x1] }
  0x36   : > { %v1642_v15 = vrot.slane %v1641_v1, 4  ;;  %v1107_v18 = vsel %vm14596_vm13, %v819_v5, %v1106_v54  ;;  %v1097_v19 = vsel %vm14500_vm4, %v795_v37, %v1096_v14  ;;  %v1659_v60 = vshrl.u32 %v1565_v62, 16  ;;  %v12696_v37 = vld [vmem:[%s18289_s3 + $0x6] sm:$0x3]  ;;  %v1569_v63 = vld [vmem:[#allocation2 + $0x28] sm:$0xf] }
  0x37   : > { %v1652_v20 = vrot.slane %v1651_v8, 4  ;;  %v827_v21 = vor.u32 %v825_v56, %v14677_v10  ;;  %v829_v23 = vrot.slane %v14677_v10, 4  ;;  %1108 = vst [vmem:[#allocation2 + $0x30] sm:$0xf] %v1107_v18  ;;  %v13316_v24 = vpack.c.bf16 %v640_v11, %v640_v11  ;;  %1098 = vst [vmem:[#allocation2 + $0x20] sm:$0x1] %v1097_v19  ;;  %13685 = vmatmul.mubr.msk.bf16.gmra.mxu0 %vm1312_vm9, %v14320_v0 }
  0x38   : > { %v1647_v28 = vsel %vm14632_vm15, %v1642_v15, %v1646_v52  ;;  %v13317_v29 = vpack.c.bf16 %v641_v12, %v641_v12  ;;  %v1661_v30 = vrot.slane %v1659_v60, 4  ;;  %v1662_v31 = vshll.u32 %v1565_v62, 16  ;;  %14293 = vmatprep.subr.msk.bf16.mxu1 %vm1361_vm0, %v12696_v37  ;;  %v310_v14 = vld [vmem:[#allocation2 + $0x48] sm:$0x1] }
  0x39   : > { %v1657_v32 = vsel %vm14632_vm15, %v1652_v20, %v1656_v3  ;;  %v828_v33 = vsel %vm14602_vm14, %v820_v6, %v827_v21  ;;  %v831_v34 = vshrl.u32 %v13316_v24, 16  ;;  %v834_v35 = vshll.u32 %v13316_v24, 16  ;;  %v313_v20 = vld [vmem:[#allocation2 + $0x54] sm:$0x1]  ;;  %v12729_v21 = vld [vmem:[%s18289_s3 + $0x8] sm:$0x3] }
  0x3a   : > { %v12616_v38 = vcombine.low %v1647_v28, %v1657_v32  ;;  %1109 = vst.msk [vmem:[#allocation2 + $0x34] sm:$0xf] %vm280_vm1, %v828_v33  ;;  %v839_v41 = vshrl.u32 %v13317_v29, 16  ;;  %v842_v42 = vshll.u32 %v13317_v29, 16  ;;  %v1664_v44 = vrot.slane %v1662_v31, 5  ;;  %14294 = vmatprep.subr.msk.bf16.mxu0 %vm1361_vm0, %v12729_v21  ;;  %v541_v10 = vld [vmem:[%s14549_s14 + $0x88] sm:$0xff] }
  0x3b   : > { %v833_v45 = vrot.slane %v831_v34, 7  ;;  %v1668_v46 = vshll.u32 %v1566_v26, 16  ;;  %v1672_v47 = vshrl.u32 %v1566_v26, 16  ;;  %v358_v48 = vsel %vm14528_vm8, 0, %v357_v27  ;;  %v360_v33 = vld [vmem:[#allocation2 + $0x38] sm:$0x1] }
  0x3c   : > { %13715 = vmatmul.mubr.msk.bf16.vlgmr.msra.gmra.mxu1 %vm1312_vm9, %v12616_v38  ;;  %v14703_v51 = vrot.slane %v839_v41, 7  ;;  %v1665_v54 = vor.u32 %v1664_v44, %v1661_v30  ;;  %359 = vst [vmem:[#allocation2 + $0x2c] sm:$0x1] %v358_v48  ;;  %v1683_v55 = vshrl.u32 %v1568_v36, 16  ;;  %v1686_v57 = vshll.u32 %v1568_v36, 16 }
  0x3d   : > { %v836_v58 = vor.u32 %v834_v35, %v833_v45  ;;  %v837_v61 = vrot.slane %v833_v45, 4  ;;  %v1670_v62 = vrot.slane %v1668_v46, 5  ;;  %v1674_v52 = vrot.slane %v1672_v47, 4 }
  0x3e   : > { %v844_v56 = vor.u32 %v842_v42, %v14703_v51  ;;  %v846_v0 = vrot.slane %v14703_v51, 4  ;;  %v1567_v1 = vld [vmem:[#allocation2 + $0x20] sm:$0x1]  ;;  %v1666_v3 = vrot.slane %v1665_v54, 4  ;;  %v575_v5 = vmul.f32 %v14538_v13, %v537_v49  ;;  %v1571_v48 = vld [vmem:[#allocation2 + $0x30] sm:$0xf] }
  0x3f   : > { %v1114_v6 = vsel %vm14596_vm13, %v836_v58, %v1113_v53  ;;  %v1675_v8 = vor.u32 %v1674_v52, %v1670_v62  ;;  %v1678_v11 = vshll.u32 %v1567_v1, 16  ;;  %v1685_v12 = vrot.slane %v1683_v55, 4 }
  0x40   : > { %v845_v15 = vsel %vm14602_vm14, %v837_v61, %v844_v56  ;;  %1115 = vst [vmem:[#allocation2 + $0x3c] sm:$0xf] %v1114_v6  ;;  %v1671_v18 = vsel %vm14632_vm15, %v1666_v3, %v1670_v62  ;;  %v1688_v19 = vrot.slane %v1686_v57, 5  ;;  %v1692_v60 = vshll.u32 %v1569_v63, 16 }
  0x41   : > { %v14321_v24 = vld [vmem:[#allocation2 + $0x30] sm:$0xff]   ;;  %1116 = vst.msk [vmem:[#allocation2 + $0x40] sm:$0xf] %vm280_vm1, %v845_v15  ;;  %v1676_v27 = vrot.slane %v1675_v8, 4  ;;  %v1680_v28 = vrot.slane %v1678_v11, 5  ;;  %v1696_v29 = vshrl.u32 %v1569_v63, 16  ;;  %v612_v26 = vadd.f32 %v14554_v16, %v14665_v40 }
  0x42   : > { %v1689_v30 = vor.u32 %v1688_v19, %v1685_v12  ;;  %v14721_v31 = vrot.slane %v1692_v60, 5  ;;  %v311_v37 = vsel %vm14500_vm4, 0, %v310_v14  ;;  %v642_v32 = vmax.f32 %v14662_v39, 0.0  ;;  %13688 = vmatprep.mubr.msk.bf16.mxu0 %vm1312_vm9, %v14321_v24  ;;  %v1572_v54 = vld [vmem:[#allocation2 + $0x34] sm:$0xf] }
  0x43   : > { %v1681_v34 = vsel %vm14632_vm15, %v1676_v27, %v1680_v28  ;;  %v1103_v35 = vld [vmem:[#allocation2 + $0x2c] sm:$0x1]  ;;  %v1698_v36 = vrot.slane %v1696_v29, 4  ;;  %312 = vst [vmem:[#allocation2 + $0x48] sm:$0x1] %v311_v37  ;;  %v643_v40 = vmax.f32 %v14675_v25, 0.0  ;;  %v613_v47 = vadd.f32 %v14554_v16, %v575_v5 }
  0x44   : > { %v314_v38 = vsel %vm14500_vm4, 0, %v313_v20  ;;  %v12617_v41 = vcombine.low %v1671_v18, %v1681_v34  ;;  %v1104_v39 = vsel %vm14500_vm4, %v812_v50, %v1103_v35  ;;  %v14736_v42 = vrot.slane %v1689_v30, 4  ;;  %v363_v24 = vld [vmem:[#allocation2 + $0x44] sm:$0x1] }
  0x45   : > { %v13318_v44 = vpack.c.bf16 %v642_v32, %v642_v32  ;;  %315 = vst [vmem:[#allocation2 + $0x54] sm:$0x1] %v314_v38  ;;  %1105 = vst [vmem:[#allocation2 + $0x2c] sm:$0x1] %v1104_v39  ;;  %v1699_v45 = vor.u32 %v1698_v36, %v14721_v31  ;;  %v13319_v46 = vpack.c.bf16 %v643_v40, %v643_v40  ;;  %v644_v25 = vmax.f32 %v612_v26, 0.0 }
  0x46   : > { %13718 = vmatprep.mubr.msk.bf16.mxu1 %vm1312_vm9, %v12617_v41  ;;  %v1695_v43 = vsel %vm14632_vm15, %v14736_v42, %v14721_v31  ;;  %v361_v53 = vsel %vm14528_vm8, 0, %v360_v33  ;;  %v645_v61 = vmax.f32 %v613_v47, 0.0  ;;  %v1707_v56 = vshrl.u32 %v1571_v48, 16 }
  0x47   : > { %v848_v50 = vshrl.u32 %v13318_v44, 16  ;;  %v851_v49 = vshll.u32 %v13318_v44, 16  ;;  %v14747_v55 = vrot.slane %v1699_v45, 4  ;;  %v856_v57 = vshrl.u32 %v13319_v46, 16  ;;  %362 = vst [vmem:[#allocation2 + $0x38] sm:$0x1] %v361_v53 }
  0x48   : > { %v859_v58 = vshll.u32 %v13319_v46, 16  ;;  %v14322_v62 = vld [vmem:[#allocation2 + $0x3c] sm:$0xff]   ;;  %v13320_v63 = vpack.c.bf16 %v644_v25, %v644_v25  ;;  %v1710_v1 = vshll.u32 %v1571_v48, 16  ;;  %v13321_v5 = vpack.c.bf16 %v645_v61, %v645_v61 }
  0x49   : > { %v850_v52 = vrot.slane %v848_v50, 7  ;;  %v14749_v3 = vrot.slane %v856_v57, 7  ;;  %v1716_v6 = vshll.u32 %v1572_v54, 16  ;;  %v1720_v8 = vshrl.u32 %v1572_v54, 16  ;;  %13689 = vmatmul.mubr.msk.bf16.gmra.mxu0 %vm1312_vm9, %v14322_v62  ;;  %v1574_v44 = vld [vmem:[#allocation2 + $0x3c] sm:$0xf] }
  0x4a   : > { %v1120_v14 = vld [vmem:[#allocation2 + $0x48] sm:$0xf]  ;;  %v865_v15 = vshrl.u32 %v13320_v63, 16  ;;  %v868_v18 = vshll.u32 %v13320_v63, 16  ;;  %v873_v20 = vshrl.u32 %v13321_v5, 16  ;;  %v876_v21 = vshll.u32 %v13321_v5, 16 }
  0x4b   : > { %v853_v11 = vor.u32 %v851_v49, %v850_v52  ;;  %v854_v12 = vrot.slane %v850_v52, 4  ;;  %v861_v19 = vor.u32 %v859_v58, %v14749_v3  ;;  %v863_v60 = vrot.slane %v14749_v3, 4  ;;  %v316_v45 = vld [vmem:[#allocation2 + $0x60] sm:$0x1]  ;;  %v538_v49 = vld [vmem:[%s14549_s14 + $0x70] sm:$0xff]  ;;  %v539_v53 = vld [vmem:[%s14549_s14 + $0x78] sm:$0xff] }
  0x4c   : > { %v1570_v27 = vld [vmem:[#allocation2 + $0x2c] sm:$0x1]  ;;  %v867_v29 = vrot.slane %v865_v15, 7  ;;  %v1709_v26 = vrot.slane %v1707_v56, 4  ;;  %v1712_v30 = vrot.slane %v1710_v1, 5  ;;  %v14758_v33 = vrot.slane %v873_v20, 7 }
  0x4d   : > { %v1121_v28 = vsel %vm14596_vm13, %v853_v11, %v1120_v14  ;;  %v1702_v37 = vshll.u32 %v1570_v27, 16  ;;  %v862_v32 = vsel %vm14602_vm14, %v854_v12, %v861_v19  ;;  %v1127_v34 = vld [vmem:[#allocation2 + $0x54] sm:$0xf]  ;;  %v14760_v35 = vrot.slane %v1716_v6, 5  ;;  %v1575_v50 = vld [vmem:[#allocation2 + $0x40] sm:$0xf] }
  0x4e   : > { %1122 = vst [vmem:[#allocation2 + $0x48] sm:$0xf] %v1121_v28  ;;  %1123 = vst.msk [vmem:[#allocation2 + $0x4c] sm:$0xf] %vm280_vm1, %v862_v32  ;;  %v870_v36 = vor.u32 %v868_v18, %v867_v29  ;;  %v871_v40 = vrot.slane %v867_v29, 4  ;;  %v1713_v41 = vor.u32 %v1712_v30, %v1709_v26  ;;  %v1722_v39 = vrot.slane %v1720_v8, 4 }
  0x4f   : > { %v1110_v38 = vld [vmem:[#allocation2 + $0x38] sm:$0x1]  ;;  %v1704_v46 = vrot.slane %v1702_v37, 5  ;;  %v878_v47 = vor.u32 %v876_v21, %v14758_v33  ;;  %v880_v25 = vrot.slane %v14758_v33, 4  ;;  %v364_v61 = vsel %vm14528_vm8, 0, %v363_v24  ;;  %v540_v52 = vld [vmem:[%s14549_s14 + $0x80] sm:$0xff] }
  0x50   : > { %v1111_v48 = vsel %vm14500_vm4, %v829_v23, %v1110_v38  ;;  %v1128_v54 = vsel %vm14596_vm13, %v870_v36, %v1127_v34  ;;  %v14773_v57 = vrot.slane %v1713_v41, 4  ;;  %v1723_v58 = vor.u32 %v1722_v39, %v14760_v35  ;;  %v319_v62 = vld [vmem:[#allocation2 + $0x6c] sm:$0x1]  ;;  %365 = vst [vmem:[#allocation2 + $0x44] sm:$0x1] %v364_v61  ;;  %v542_v29 = vld [vmem:[%s14549_s14 + $0x90] sm:$0xff] }
  0x51   : > { %1112 = vst [vmem:[#allocation2 + $0x38] sm:$0x1] %v1111_v48  ;;  %v1705_v23 = vsel %vm14632_vm15, %v14747_v55, %v1704_v46  ;;  %v879_v63 = vsel %vm14602_vm14, %v871_v40, %v878_v47  ;;  %1129 = vst [vmem:[#allocation2 + $0x54] sm:$0xf] %v1128_v54  ;;  %v1731_v56 = vshrl.u32 %v1574_v44, 16  ;;  %v1734_v1 = vshll.u32 %v1574_v44, 16 }
  0x52   : > { %v12618_v5 = vcombine.low %v1695_v43, %v1705_v23  ;;  %1130 = vst.msk [vmem:[#allocation2 + $0x58] sm:$0xf] %vm280_vm1, %v879_v63  ;;  %v1724_v6 = vrot.slane %v1723_v58, 4  ;;  %v1740_v8 = vshll.u32 %v1575_v50, 16  ;;  %v1744_v55 = vshrl.u32 %v1575_v50, 16  ;;  %v543_v34 = vld [vmem:[%s14549_s14 + $0x98] sm:$0xff] }
  0x53   : > { %v1733_v11 = vrot.slane %v1731_v56, 4  ;;  %v1736_v12 = vrot.slane %v1734_v1, 5  ;;  %v317_v14 = vsel %vm14500_vm4, 0, %v316_v45  ;;  %v366_v15 = vld [vmem:[#allocation2 + $0x50] sm:$0x1]  ;;  %v576_v31 = vmul.f32 %v14538_v13, %v538_v49 }
  0x54   : > { %13719 = vmatmul.mubr.msk.bf16.gmra.mxu1 %vm1312_vm9, %v12618_v5  ;;  %v14794_v18 = vrot.slane %v1740_v8, 5  ;;  %318 = vst [vmem:[#allocation2 + $0x60] sm:$0x1] %v317_v14  ;;  %v577_v42 = vmul.f32 %v14538_v13, %v539_v53  ;;  %v320_v43 = vsel %vm14500_vm4, 0, %v319_v62  ;;  %v1746_v24 = vrot.slane %v1744_v55, 4 }
  0x55   : > { %v1577_v19 = vld [vmem:[#allocation2 + $0x48] sm:$0xf]  ;;  %v1737_v21 = vor.u32 %v1736_v12, %v1733_v11  ;;  %321 = vst [vmem:[#allocation2 + $0x6c] sm:$0x1] %v320_v43  ;;  %v578_v27 = vmul.f32 %v14538_v13, %v540_v52  ;;  %v579_v28 = vmul.f32 %v14538_v13, %v541_v10  ;;  %v614_v26 = vadd.f32 %v14554_v16, %v576_v31  ;;  %v14814_v44 = vld [vmem:[#allocation2 + $0x4c] sm:$0xf] }
  0x56   : > { %v14323_v20 = vld [vmem:[#allocation2 + $0x48] sm:$0xff]   ;;  %v615_v30 = vadd.f32 %v14554_v16, %v577_v42  ;;  %v367_v37 = vsel %vm14528_vm8, 0, %v366_v15  ;;  %v1755_v32 = vshrl.u32 %v1577_v19, 16  ;;  %v1747_v38 = vor.u32 %v1746_v24, %v14794_v18  ;;  %v369_v24 = vld [vmem:[#allocation2 + $0x5c] sm:$0x1] }
  0x57   : > { %13692 = vmatprep.mubr.msk.bf16.mxu0 %vm1312_vm9, %v14323_v20  ;;  %v14809_v40 = vrot.slane %v1737_v21, 4  ;;  %v616_v41 = vadd.f32 %v14554_v16, %v578_v27  ;;  %v617_v39 = vadd.f32 %v14554_v16, %v579_v28  ;;  %368 = vst [vmem:[#allocation2 + $0x50] sm:$0x1] %v367_v37  ;;  %v1719_v45 = vsel %vm14632_vm15, %v14773_v57, %v14760_v35  ;;  %v1117_v47 = vld [vmem:[#allocation2 + $0x44] sm:$0x1] }
  0x58   : > { %v1573_v36 = vld [vmem:[#allocation2 + $0x38] sm:$0x1]  ;;  %v646_v48 = vmax.f32 %v614_v26, 0.0  ;;  %v14821_v50 = vmul.f32 %v14538_v13, %v542_v29  ;;  %v1118_v53 = vsel %vm14500_vm4, %v846_v0, %v1117_v47  ;;  %v14827_v54 = vrot.slane %v1747_v38, 4 }
  0x59   : > { %v1726_v46 = vshll.u32 %v1573_v36, 16  ;;  %v14324_v49 = vld [vmem:[#allocation2 + $0x54] sm:$0xff]   ;;  %v647_v58 = vmax.f32 %v615_v30, 0.0  ;;  %v14830_v61 = vmul.f32 %v14538_v13, %v543_v34  ;;  %1119 = vst [vmem:[#allocation2 + $0x44] sm:$0x1] %v1118_v53  ;;  %v648_v57 = vmax.f32 %v616_v41, 0.0 }
  0x5a   : > { %v13322_v35 = vpack.c.bf16 %v646_v48, %v646_v48  ;;  %v649_v52 = vmax.f32 %v617_v39, 0.0  ;;  %13693 = vmatmul.mubr.msk.bf16.gmra.mxu0 %vm1312_vm9, %v14324_v49  ;;  %v1757_v23 = vrot.slane %v1755_v32, 4  ;;  %v1758_v63 = vshll.u32 %v1577_v19, 16  ;;  %v1581_v48 = vld [vmem:[#allocation2 + $0x58] sm:$0xf] }
  0x5b   : > { %v1728_v62 = vrot.slane %v1726_v46, 5  ;;  %v13323_v10 = vpack.c.bf16 %v647_v58, %v647_v58  ;;  %v1764_v51 = vshll.u32 %v14814_v44, 16  ;;  %v13324_v5 = vpack.c.bf16 %v648_v57, %v648_v57  ;;  %v1134_v12 = vld [vmem:[#allocation2 + $0x60] sm:$0xf]  ;;  %v322_v49 = vld [vmem:[#allocation2 + $0x78] sm:$0x1] }
  0x5c   : > { %v882_v56 = vshrl.u32 %v13322_v35, 16  ;;  %v885_v1 = vshll.u32 %v13322_v35, 16  ;;  %v13325_v55 = vpack.c.bf16 %v649_v52, %v649_v52  ;;  %v1760_v43 = vrot.slane %v1758_v63, 5  ;;  %v1141_v36 = vld [vmem:[#allocation2 + $0x6c] sm:$0xf] }
  0x5d   : > { %v1729_v0 = vsel %vm14632_vm15, %v1724_v6, %v1728_v62  ;;  %v890_v8 = vshrl.u32 %v13323_v10, 16  ;;  %v893_v11 = vshll.u32 %v13323_v10, 16  ;;  %v899_v15 = vshrl.u32 %v13324_v5, 16  ;;  %v325_v57 = vld [vmem:[#allocation2 + $0x84] sm:$0x1] }
  0x5e   : > { %v12619_v13 = vcombine.low %v1719_v45, %v1729_v0  ;;  %v884_v14 = vrot.slane %v882_v56, 7  ;;  %v902_v31 = vshll.u32 %v13324_v5, 16  ;;  %v1124_v42 = vld [vmem:[#allocation2 + $0x50] sm:$0x1]  ;;  %v907_v20 = vshrl.u32 %v13325_v55, 16 }
  0x5f   : > { %v14837_v19 = vrot.slane %v890_v8, 7  ;;  %v910_v21 = vshll.u32 %v13325_v55, 16  ;;  %v1125_v6 = vsel %vm14500_vm4, %v863_v60, %v1124_v42  ;;  %v901_v29 = vrot.slane %v899_v15, 7  ;;  %v1580_v45 = vld [vmem:[#allocation2 + $0x54] sm:$0xf] }
  0x60   : > { %13722 = vmatprep.mubr.msk.bf16.mxu1 %vm1312_vm9, %v12619_v13  ;;  %v887_v27 = vor.u32 %v885_v1, %v884_v14  ;;  %v888_v28 = vrot.slane %v884_v14, 4  ;;  %1126 = vst [vmem:[#allocation2 + $0x50] sm:$0x1] %v1125_v6  ;;  %v1761_v26 = vor.u32 %v1760_v43, %v1757_v23  ;;  %v1576_v30 = vld [vmem:[#allocation2 + $0x44] sm:$0x1]  ;;  %v1743_v37 = vsel %vm14632_vm15, %v14809_v40, %v14794_v18 }
  0x61   : > { %v895_v32 = vor.u32 %v893_v11, %v14837_v19  ;;  %v897_v34 = vrot.slane %v14837_v19, 4  ;;  %v14849_v3 = vrot.slane %v907_v20, 7  ;;  %v1750_v60 = vshll.u32 %v1576_v30, 16  ;;  %v372_v42 = vld [vmem:[#allocation2 + $0x68] sm:$0x1] }
  0x62   : > { %v1135_v38 = vsel %vm14596_vm13, %v887_v27, %v1134_v12  ;;  %v904_v41 = vor.u32 %v902_v31, %v901_v29  ;;  %v905_v39 = vrot.slane %v901_v29, 4  ;;  %v1762_v40 = vrot.slane %v1761_v26, 4  ;;  %v544_v12 = vld [vmem:[%s14549_s14 + $0xa0] sm:$0xff] }
  0x63   : > { %v896_v46 = vsel %vm14602_vm14, %v888_v28, %v895_v32  ;;  %1136 = vst [vmem:[#allocation2 + $0x60] sm:$0xf] %v1135_v38  ;;  %v912_v18 = vor.u32 %v910_v21, %v14849_v3  ;;  %v1766_v47 = vrot.slane %v1764_v51, 5  ;;  %v1752_v53 = vrot.slane %v1750_v60, 5  ;;  %v14887_v29 = vld [vmem:[%s18287_s1] ss:$0 sm:$0xff] }
  0x64   : > { %1137 = vst.msk [vmem:[#allocation2 + $0x64] sm:$0xf] %vm280_vm1, %v896_v46  ;;  %v1142_v58 = vsel %vm14596_vm13, %v904_v41, %v1141_v36  ;;  %v1768_v62 = vshrl.u32 %v14814_v44, 16  ;;  %v370_v35 = vsel %vm14528_vm8, 0, %v369_v24  ;;  %v1779_v23 = vshrl.u32 %v1580_v45, 16 }
  0x65   : > { %v913_v52 = vsel %vm14602_vm14, %v905_v39, %v912_v18  ;;  %1143 = vst [vmem:[#allocation2 + $0x6c] sm:$0xf] %v1142_v58  ;;  %v1767_v10 = vsel %vm14632_vm15, %v1762_v40, %v1766_v47  ;;  %371 = vst [vmem:[#allocation2 + $0x5c] sm:$0x1] %v370_v35  ;;  %v1782_v63 = vshll.u32 %v1580_v45, 16  ;;  %v1753_v51 = vsel %vm14632_vm15, %v14827_v54, %v1752_v53  ;;  %v545_v54 = vld [vmem:[%s14549_s14 + $0xa8] sm:$0xff] }
  0x66   : > { %1144 = vst.msk [vmem:[#allocation2 + $0x70] sm:$0xf] %vm280_vm1, %v913_v52  ;;  %v1770_v44 = vrot.slane %v1768_v62, 4  ;;  %v1788_v0 = vshll.u32 %v1581_v48, 16  ;;  %v1792_v56 = vshrl.u32 %v1581_v48, 16  ;;  %v12620_v1 = vcombine.low %v1743_v37, %v1753_v51 }
  0x67   : > { %v1579_v5 = vld [vmem:[#allocation2 + $0x50] sm:$0x1]  ;;  %v1781_v13 = vrot.slane %v1779_v23, 4  ;;  %v1784_v8 = vrot.slane %v1782_v63, 5  ;;  %v323_v11 = vsel %vm14500_vm4, 0, %v322_v49  ;;  %v618_v20 = vadd.f32 %v14554_v16, %v14821_v50 }
  0x68   : > { %v1771_v55 = vor.u32 %v1770_v44, %v1766_v47  ;;  %v1774_v14 = vshll.u32 %v1579_v5, 16  ;;  %v14873_v15 = vrot.slane %v1788_v0, 5  ;;  %v1794_v31 = vrot.slane %v1792_v56, 4  ;;  %324 = vst [vmem:[#allocation2 + $0x78] sm:$0x1] %v323_v11  ;;  %13723 = vmatmul.mubr.msk.bf16.gmra.mxu1 %vm1312_vm9, %v12620_v1 }
  0x69   : > { %v1785_v43 = vor.u32 %v1784_v8, %v1781_v13  ;;  %v619_v21 = vadd.f32 %v14554_v16, %v14830_v61  ;;  %v326_v6 = vsel %vm14500_vm4, 0, %v325_v57  ;;  %v582_v26 = vmul.f32 %v14887_v29, %v544_v12  ;;  %v14899_v41 = vld [vmem:[%s18288_s2] ss:$0 sm:$0xff] }
  0x6a   : > { %v1772_v24 = vrot.slane %v1771_v55, 4  ;;  %v1776_v27 = vrot.slane %v1774_v14, 5  ;;  %v1795_v28 = vor.u32 %v1794_v31, %v14873_v15  ;;  %327 = vst [vmem:[#allocation2 + $0x84] sm:$0x1] %v326_v6  ;;  %v1583_v30 = vld [vmem:[#allocation2 + $0x60] sm:$0xf]  ;;  %v583_v32 = vmul.f32 %v14887_v29, %v545_v54 }
  0x6b   : > { %v14325_v50 = vld [vmem:[#allocation2 + $0x60] sm:$0xff]   ;;  %v914_v37 = vrot.slane %v14849_v3, 4  ;;  %v650_v16 = vmax.f32 %v618_v20, 0.0  ;;  %v651_v61 = vmax.f32 %v619_v21, 0.0  ;;  %v14894_v38 = vrot.slane %v1785_v43, 4 }
  0x6c   : > { %v1777_v36 = vsel %vm14632_vm15, %v1772_v24, %v1776_v27  ;;  %v1131_v60 = vld [vmem:[#allocation2 + $0x5c] sm:$0x1]  ;;  %v620_v39 = vadd.f32 %v14899_v41, %v582_v26  ;;  %v373_v45 = vsel %vm14528_vm8, 0, %v372_v42  ;;  %13696 = vmatprep.mubr.msk.bf16.mxu0 %vm1312_vm9, %v14325_v50  ;;  %v14909_v47 = vrot.slane %v1795_v28, 4  ;;  %v1584_v49 = vld [vmem:[#allocation2 + $0x64] sm:$0xf] }
  0x6d   : > { %v14326_v46 = vld [vmem:[#allocation2 + $0x6c] sm:$0xff]   ;;  %v12621_v18 = vcombine.low %v1767_v10, %v1777_v36  ;;  %v1132_v40 = vsel %vm14500_vm4, %v880_v25, %v1131_v60  ;;  %v13326_v48 = vpack.c.bf16 %v650_v16, %v650_v16  ;;  %374 = vst [vmem:[#allocation2 + $0x68] sm:$0x1] %v373_v45  ;;  %v13327_v53 = vpack.c.bf16 %v651_v61, %v651_v61  ;;  %v375_v42 = vld [vmem:[#allocation2 + $0x74] sm:$0x1]  ;;  %v14340_v17 = vld [vmem:[#allocation2 + $0x60] sm:$0xff]  }
  0x6e   : > { %1133 = vst [vmem:[#allocation2 + $0x5c] sm:$0x1] %v1132_v40  ;;  %v621_v58 = vadd.f32 %v14899_v41, %v583_v32  ;;  %v652_v62 = vmax.f32 %v620_v39, 0.0  ;;  %v1803_v35 = vshrl.u32 %v1583_v30, 16  ;;  %13697 = vmatmul.mubr.msk.bf16.gmra.mxu0 %vm1312_vm9, %v14326_v46  ;;  %v1806_v52 = vshll.u32 %v1583_v30, 16 }
  0x6f   : > { %13726 = vmatprep.mubr.msk.bf16.mxu1 %vm1312_vm9, %v12621_v18  ;;  %v916_v57 = vshrl.u32 %v13326_v48, 16  ;;  %v919_v33 = vshll.u32 %v13326_v48, 16  ;;  %v1812_v10 = vshll.u32 %v1584_v49, 16  ;;  %v924_v25 = vshrl.u32 %v13327_v53, 16  ;;  %v1148_v13 = vld [vmem:[#allocation2 + $0x78] sm:$0xf] }
  0x70   : > { %v927_v23 = vshll.u32 %v13327_v53, 16  ;;  %v653_v63 = vmax.f32 %v621_v58, 0.0  ;;  %v13328_v51 = vpack.c.bf16 %v652_v62, %v652_v62  ;;  %v1791_v44 = vsel %vm14632_vm15, %v14894_v38, %v14873_v15  ;;  %v1586_v43 = vld [vmem:[#allocation2 + $0x6c] sm:$0xf]  ;;  %v1587_v27 = vld [vmem:[#allocation2 + $0x70] sm:$0xf] }
  0x71   : > { %v918_v0 = vrot.slane %v916_v57, 7  ;;  %v1805_v56 = vrot.slane %v1803_v35, 4  ;;  %v1808_v1 = vrot.slane %v1806_v52, 5  ;;  %v14918_v5 = vrot.slane %v924_v25, 7  ;;  %v1155_v50 = vld [vmem:[#allocation2 + $0x84] sm:$0xf] }
  0x72   : > { %v13329_v8 = vpack.c.bf16 %v653_v63, %v653_v63  ;;  %v933_v11 = vshrl.u32 %v13328_v51, 16  ;;  %v936_v12 = vshll.u32 %v13328_v51, 16  ;;  %v1816_v54 = vshrl.u32 %v1584_v49, 16  ;;  %v328_v46 = vld [vmem:[#allocation2 + $0x90] sm:$0x1]  ;;  %v547_v63 = vld [vmem:[%s14549_s14 + $0xb8] sm:$0xff] }
  0x73   : > { %v921_v55 = vor.u32 %v919_v33, %v918_v0  ;;  %v922_v14 = vrot.slane %v918_v0, 4  ;;  %v1809_v31 = vor.u32 %v1808_v1, %v1805_v56  ;;  %v929_v20 = vor.u32 %v927_v23, %v14918_v5  ;;  %v546_v57 = vld [vmem:[%s14549_s14 + $0xb0] sm:$0xff]  ;;  %v331_v33 = vld [vmem:[#allocation2 + $0x9c] sm:$0x1]  ;;  %v548_v51 = vld [vmem:[%s14549_s14 + $0xc0] sm:$0xff] }
  0x74   : > { %v935_v21 = vrot.slane %v933_v11, 7  ;;  %v941_v6 = vshrl.u32 %v13329_v8, 16  ;;  %v1138_v15 = vld [vmem:[#allocation2 + $0x68] sm:$0x1]  ;;  %v14921_v24 = vrot.slane %v1812_v10, 5  ;;  %v944_v30 = vshll.u32 %v13329_v8, 16 }
  0x75   : > { %v1582_v28 = vld [vmem:[#allocation2 + $0x5c] sm:$0x1]  ;;  %v1149_v26 = vsel %vm14596_vm13, %v921_v55, %v1148_v13  ;;  %v1139_v16 = vsel %vm14500_vm4, %v897_v34, %v1138_v15  ;;  %v14929_v61 = vrot.slane %v1809_v31, 4  ;;  %v930_v36 = vsel %vm14602_vm14, %v922_v14, %v929_v20  ;;  %v549_v0 = vld [vmem:[%s14549_s14 + $0xc8] sm:$0xff]  ;;  %v378_v14 = vld [vmem:[#allocation2 + $0x80] sm:$0x1] }
  0x76   : > { %v1798_v32 = vshll.u32 %v1582_v28, 16  ;;  %v931_v60 = vrot.slane %v14918_v5, 4  ;;  %1150 = vst [vmem:[#allocation2 + $0x78] sm:$0xf] %v1149_v26  ;;  %v938_v38 = vor.u32 %v936_v12, %v935_v21  ;;  %1140 = vst [vmem:[#allocation2 + $0x68] sm:$0x1] %v1139_v16  ;;  %v584_v55 = vmul.f32 %v14887_v29, %v546_v57 }
  0x77   : > { %1151 = vst.msk [vmem:[#allocation2 + $0x7c] sm:$0xf] %vm280_vm1, %v930_v36  ;;  %v939_v39 = vrot.slane %v935_v21, 4  ;;  %v14935_v45 = vrot.slane %v941_v6, 7  ;;  %v1818_v19 = vrot.slane %v1816_v54, 4  ;;  %v376_v34 = vsel %vm14528_vm8, 0, %v375_v42 }
  0x78   : > { %v1800_v18 = vrot.slane %v1798_v32, 5  ;;  %v1156_v40 = vsel %vm14596_vm13, %v938_v38, %v1155_v50  ;;  %377 = vst [vmem:[#allocation2 + $0x74] sm:$0x1] %v376_v34  ;;  %v1827_v48 = vshrl.u32 %v1586_v43, 16  ;;  %v1830_v49 = vshll.u32 %v1586_v43, 16 }
  0x79   : > { %v946_v53 = vor.u32 %v944_v30, %v14935_v45  ;;  %1157 = vst [vmem:[#allocation2 + $0x84] sm:$0xf] %v1156_v40  ;;  %v1815_v58 = vsel %vm14632_vm15, %v14929_v61, %v14921_v24  ;;  %v1819_v62 = vor.u32 %v1818_v19, %v14921_v24  ;;  %v1836_v35 = vshll.u32 %v1587_v27, 16 }
  0x7a   : > { %v1801_v52 = vsel %vm14632_vm15, %v14909_v47, %v1800_v18  ;;  %v1829_v10 = vrot.slane %v1827_v48, 4  ;;  %v1832_v25 = vrot.slane %v1830_v49, 5  ;;  %v1840_v23 = vshrl.u32 %v1587_v27, 16 }
  0x7b   : > { %v12622_v56 = vcombine.low %v1791_v44, %v1801_v52  ;;  %v947_v1 = vsel %vm14602_vm14, %v939_v39, %v946_v53  ;;  %v948_v13 = vrot.slane %v14935_v45, 4  ;;  %v14957_v8 = vrot.slane %v1836_v35, 5 }
  0x7c   : > { %1158 = vst.msk [vmem:[#allocation2 + $0x88] sm:$0xf] %vm280_vm1, %v947_v1  ;;  %v1833_v11 = vor.u32 %v1832_v25, %v1829_v10  ;;  %v1842_v12 = vrot.slane %v1840_v23, 4  ;;  %v329_v47 = vsel %vm14500_vm4, 0, %v328_v46  ;;  %v585_v31 = vmul.f32 %v14887_v29, %v547_v63 }
  0x7d   : > { %13727 = vmatmul.mubr.msk.bf16.gmra.mxu1 %vm1312_vm9, %v12622_v56  ;;  %v1585_v44 = vld [vmem:[#allocation2 + $0x68] sm:$0x1]  ;;  %330 = vst [vmem:[#allocation2 + $0x90] sm:$0x1] %v329_v47  ;;  %v332_v54 = vsel %vm14500_vm4, 0, %v331_v33  ;;  %v586_v42 = vmul.f32 %v14887_v29, %v548_v51  ;;  %v587_v43 = vmul.f32 %v14887_v29, %v549_v0  ;;  %v1820_v21 = vrot.slane %v1819_v62, 4 }
  0x7e   : > { %v14327_v20 = vld [vmem:[#allocation2 + $0x78] sm:$0xff]   ;;  %v1822_v6 = vshll.u32 %v1585_v44, 16  ;;  %v14969_v15 = vrot.slane %v1833_v11, 4  ;;  %v622_v24 = vadd.f32 %v14899_v41, %v584_v55  ;;  %333 = vst [vmem:[#allocation2 + $0x9c] sm:$0x1] %v332_v54  ;;  %v623_v28 = vadd.f32 %v14899_v41, %v585_v31 }
  0x7f   : > { %v1145_v27 = vld [vmem:[#allocation2 + $0x74] sm:$0x1]  ;;  %v624_v26 = vadd.f32 %v14899_v41, %v586_v42  ;;  %v625_v30 = vadd.f32 %v14899_v41, %v587_v43  ;;  %v379_v50 = vsel %vm14528_vm8, 0, %v378_v14  ;;  %v1589_v16 = vld [vmem:[#allocation2 + $0x78] sm:$0xf]  ;;  %13700 = vmatprep.mubr.msk.bf16.mxu0 %vm1312_vm9, %v14327_v20  ;;  %v1843_v38 = vor.u32 %v1842_v12, %v14957_v8 }
  0x80   : > { %v1824_v61 = vrot.slane %v1822_v6, 5  ;;  %v1146_v32 = vsel %vm14500_vm4, %v914_v37, %v1145_v27  ;;  %v1839_v36 = vsel %vm14632_vm15, %v14969_v15, %v14957_v8  ;;  %380 = vst [vmem:[#allocation2 + $0x80] sm:$0x1] %v379_v50  ;;  %v14987_v39 = vld [vmem:[#allocation2 + $0x7c] sm:$0xf]  ;;  %v654_v19 = vmax.f32 %v622_v24, 0.0 }
  0x81   : > { %1147 = vst [vmem:[#allocation2 + $0x74] sm:$0x1] %v1146_v32  ;;  %v655_v34 = vmax.f32 %v623_v28, 0.0  ;;  %v656_v46 = vmax.f32 %v624_v26, 0.0  ;;  %v657_v18 = vmax.f32 %v625_v30, 0.0  ;;  %v1851_v40 = vshrl.u32 %v1589_v16, 16 }
  0x82   : > { %v1825_v3 = vsel %vm14632_vm15, %v1820_v21, %v1824_v61  ;;  %v1854_v37 = vshll.u32 %v1589_v16, 16  ;;  %v1860_v48 = vshll.u32 %v14987_v39, 16  ;;  %v13330_v62 = vpack.c.bf16 %v654_v19, %v654_v19  ;;  %v381_v56 = vld [vmem:[#allocation2 + $0x8c] sm:$0x1]  ;;  %v1592_v32 = vld [vmem:[#allocation2 + $0x84] sm:$0xf] }
  0x83   : > { %v14328_v49 = vld [vmem:[#allocation2 + $0x84] sm:$0xff]   ;;  %v12623_v53 = vcombine.low %v1815_v58, %v1825_v3  ;;  %v13331_v35 = vpack.c.bf16 %v655_v34, %v655_v34  ;;  %v13332_v57 = vpack.c.bf16 %v656_v46, %v656_v46  ;;  %v1844_v33 = vrot.slane %v1843_v38, 4  ;;  %v550_v46 = vld [vmem:[%s14549_s14 + $0xd0] sm:$0xff] }
  0x84   : > { %v13333_v52 = vpack.c.bf16 %v657_v18, %v657_v18  ;;  %v1853_v10 = vrot.slane %v1851_v40, 4  ;;  %v1856_v25 = vrot.slane %v1854_v37, 5  ;;  %13701 = vmatmul.mubr.msk.bf16.gmra.mxu0 %vm1312_vm9, %v14328_v49  ;;  %v950_v23 = vshrl.u32 %v13330_v62, 16  ;;  %v1162_v1 = vld [vmem:[#allocation2 + $0x90] sm:$0xf] }
  0x85   : > { %13730 = vmatprep.mubr.msk.bf16.mxu1 %vm1312_vm9, %v12623_v53  ;;  %v953_v63 = vshll.u32 %v13330_v62, 16  ;;  %v958_v51 = vshrl.u32 %v13331_v35, 16  ;;  %v961_v0 = vshll.u32 %v13331_v35, 16  ;;  %v967_v11 = vshrl.u32 %v13332_v57, 16  ;;  %v1169_v30 = vld [vmem:[#allocation2 + $0x9c] sm:$0xf] }
  0x86   : > { %v970_v12 = vshll.u32 %v13332_v57, 16  ;;  %v975_v58 = vshrl.u32 %v13333_v52, 16  ;;  %v978_v47 = vshll.u32 %v13333_v52, 16  ;;  %v952_v55 = vrot.slane %v950_v23, 7  ;;  %v1593_v38 = vld [vmem:[#allocation2 + $0x88] sm:$0xf] }
  0x87   : > { %v14994_v14 = vrot.slane %v958_v51, 7  ;;  %v1152_v44 = vld [vmem:[#allocation2 + $0x80] sm:$0x1]  ;;  %v14996_v31 = vrot.slane %v1860_v48, 5  ;;  %v1864_v54 = vshrl.u32 %v14987_v39, 16  ;;  %v969_v43 = vrot.slane %v967_v11, 7 }
  0x88   : > { %v1588_v42 = vld [vmem:[#allocation2 + $0x74] sm:$0x1]  ;;  %v14999_v20 = vrot.slane %v975_v58, 7  ;;  %v1153_v21 = vsel %vm14500_vm4, %v931_v60, %v1152_v44  ;;  %v382_v6 = vsel %vm14528_vm8, 0, %v381_v56  ;;  %v955_v27 = vor.u32 %v953_v63, %v952_v55  ;;  %v334_v35 = vld [vmem:[#allocation2 + $0xa8] sm:$0x1] }
  0x89   : > { %v1846_v24 = vshll.u32 %v1588_v42, 16  ;;  %v956_v28 = vrot.slane %v952_v55, 4  ;;  %v963_v26 = vor.u32 %v961_v0, %v14994_v14  ;;  %1154 = vst [vmem:[#allocation2 + $0x80] sm:$0x1] %v1153_v21  ;;  %383 = vst [vmem:[#allocation2 + $0x8c] sm:$0x1] %v382_v6  ;;  %v972_v50 = vor.u32 %v970_v12, %v969_v43 }
  0x8a   : > { %v973_v16 = vrot.slane %v969_v43, 4  ;;  %v980_v61 = vor.u32 %v978_v47, %v14999_v20  ;;  %v1857_v5 = vor.u32 %v1856_v25, %v1853_v10  ;;  %v965_v19 = vrot.slane %v14994_v14, 4  ;;  %v551_v57 = vld [vmem:[%s14549_s14 + $0xd8] sm:$0xff]  ;;  %v337_v63 = vld [vmem:[#allocation2 + $0xb4] sm:$0x1]  ;;  %v553_v51 = vld [vmem:[%s14549_s14 + $0xe8] sm:$0xff] }
  0x8b   : > { %v1848_v60 = vrot.slane %v1846_v24, 5  ;;  %v964_v39 = vsel %vm14602_vm14, %v956_v28, %v963_v26  ;;  %v1163_v34 = vsel %vm14596_vm13, %v955_v27, %v1162_v1  ;;  %v982_v3 = vrot.slane %v14999_v20, 4  ;;  %v14415_v11 = vld [vmem:[%s18289_s3 + $0x6] sm:$0x3]  ;;  %v15042_v8 = vld [vmem:[%s18289_s3 + $0xa] sm:$0x3] }
  0x8c   : > { %1164 = vst [vmem:[#allocation2 + $0x90] sm:$0xf] %v1163_v34  ;;  %1165 = vst.msk [vmem:[#allocation2 + $0x94] sm:$0xf] %vm280_vm1, %v964_v39  ;;  %v981_v18 = vsel %vm14602_vm14, %v973_v16, %v980_v61  ;;  %v1170_v40 = vsel %vm14596_vm13, %v972_v50, %v1169_v30  ;;  %v1866_v37 = vrot.slane %v1864_v54, 4  ;;  %v1875_v49 = vshrl.u32 %v1592_v32, 16 }
  0x8d   : > { %v1849_v48 = vsel %vm14632_vm15, %v1844_v33, %v1848_v60  ;;  %1171 = vst [vmem:[#allocation2 + $0x9c] sm:$0xf] %v1170_v40  ;;  %1172 = vst.msk [vmem:[#allocation2 + $0xa0] sm:$0xf] %vm280_vm1, %v981_v18  ;;  %v1878_v53 = vshll.u32 %v1592_v32, 16  ;;  %v1884_v62 = vshll.u32 %v1593_v38, 16  ;;  %v588_v55 = vmul.f32 %v14887_v29, %v550_v46 }
  0x8e   : > { %v12624_v52 = vcombine.low %v1839_v36, %v1849_v48  ;;  %v1858_v10 = vrot.slane %v1857_v5, 4  ;;  %v1867_v25 = vor.u32 %v1866_v37, %v14996_v31  ;;  %v1888_v23 = vshrl.u32 %v1593_v38, 16  ;;  %v552_v33 = vld [vmem:[%s14549_s14 + $0xe0] sm:$0xff]  ;;  %v554_v6 = vld [vmem:[%s14549_s14 + $0xf0] sm:$0xff]  ;;  %v384_v26 = vld [vmem:[#allocation2 + $0x98] sm:$0x1] }
  0x8f   : > { %v1877_v0 = vrot.slane %v1875_v49, 4  ;;  %v1880_v56 = vrot.slane %v1878_v53, 5  ;;  %v15033_v1 = vrot.slane %v1884_v62, 5  ;;  %v3084_v12 = vsel %vm1361_vm0, %v14415_v11, 0  ;;  %v2353_v14 = vld [vmem:[#allocation2 + $0x4] sm:$0xf] }
  0x90   : > { %13731 = vmatmul.mubr.msk.bf16.gmra.mxu1 %vm1312_vm9, %v12624_v52  ;;  %v1591_v15 = vld [vmem:[#allocation2 + $0x80] sm:$0x1]  ;;  %v1868_v36 = vrot.slane %v1867_v25, 4  ;;  %v1159_v58 = vld [vmem:[#allocation2 + $0x8c] sm:$0x1]  ;;  %v1890_v47 = vrot.slane %v1888_v23, 4  ;;  %v589_v44 = vmul.f32 %v14887_v29, %v551_v57  ;;  %v626_v27 = vadd.f32 %v14899_v41, %v588_v55 }
  0x91   : > { %v1870_v54 = vshll.u32 %v1591_v15, 16  ;;  %v1160_v42 = vsel %vm14500_vm4, %v948_v13, %v1159_v58  ;;  %v1881_v43 = vor.u32 %v1880_v56, %v1877_v0  ;;  %13781 = vmatpush3.bf16.msra.mxu1 %v3084_v12  ;;  %v335_v21 = vsel %vm14500_vm4, 0, %v334_v35  ;;  %v555_v13 = vld [vmem:[%s14549_s14 + $0xf8] sm:$0xff] }
  0x92   : > { %1161 = vst [vmem:[#allocation2 + $0x8c] sm:$0x1] %v1160_v42  ;;  %v1891_v24 = vor.u32 %v1890_v47, %v15033_v1  ;;  %336 = vst [vmem:[#allocation2 + $0xa8] sm:$0x1] %v335_v21  ;;  %v627_v28 = vadd.f32 %v14899_v41, %v589_v44  ;;  %v338_v45 = vsel %vm14500_vm4, 0, %v337_v63  ;;  %14295 = vmatprep.subr.msk.bf16.mxu1 %vm1361_vm0, %v15042_v8  ;;  %v658_v34 = vmax.f32 %v626_v27, 0.0 }
  0x93   : > { %v14329_v30 = vld [vmem:[#allocation2 + $0x90] sm:$0xff]   ;;  %v1863_v50 = vsel %vm14632_vm15, %v1858_v10, %v14996_v31  ;;  %v1872_v16 = vrot.slane %v1870_v54, 5  ;;  %339 = vst [vmem:[#allocation2 + $0xb4] sm:$0x1] %v338_v45  ;;  %v590_v61 = vmul.f32 %v14887_v29, %v552_v33  ;;  %v591_v5 = vmul.f32 %v14887_v29, %v553_v51 }
  0x94   : > { %v14330_v32 = vld [vmem:[#allocation2 + $0x9c] sm:$0xff]   ;;  %v1882_v38 = vrot.slane %v1881_v43, 4  ;;  %v15068_v60 = vmul.f32 %v14887_v29, %v554_v6  ;;  %13704 = vmatprep.mubr.msk.bf16.mxu0 %vm1312_vm9, %v14329_v30  ;;  %v659_v46 = vmax.f32 %v627_v28, 0.0  ;;  %v1595_v18 = vld [vmem:[#allocation2 + $0x90] sm:$0xf]  ;;  %v15074_v31 = vmul.f32 %v14887_v29, %v555_v13 }
  0x95   : > { %v1873_v39 = vsel %vm14632_vm15, %v1868_v36, %v1872_v16  ;;  %13705 = vmatmul.mubr.msk.bf16.gmra.mxu0 %vm1312_vm9, %v14330_v32  ;;  %v1892_v37 = vrot.slane %v1891_v24, 4  ;;  %v628_v48 = vadd.f32 %v14899_v41, %v590_v61  ;;  %v629_v49 = vadd.f32 %v14899_v41, %v591_v5  ;;  %v15079_v53 = vld [vmem:[#allocation2 + $0x94] sm:$0xf]  ;;  %v387_v24 = vld [vmem:[#allocation2 + $0xa4] sm:$0x1] }
  0x96   : > { %v12625_v40 = vcombine.low %v1863_v50, %v1873_v39  ;;  %v13334_v62 = vpack.c.bf16 %v658_v34, %v658_v34  ;;  %v13335_v35 = vpack.c.bf16 %v659_v46, %v659_v46  ;;  %v385_v57 = vsel %vm14528_vm8, 0, %v384_v26 }
  0x97   : > { %v1899_v52 = vshrl.u32 %v1595_v18, 16  ;;  %v660_v29 = vmax.f32 %v628_v48, 0.0  ;;  %v661_v10 = vmax.f32 %v629_v49, 0.0  ;;  %386 = vst [vmem:[#allocation2 + $0x98] sm:$0x1] %v385_v57  ;;  %v1902_v25 = vshll.u32 %v1595_v18, 16 }
  0x98   : > { %13734 = vmatprep.mubr.msk.bf16.mxu1 %vm1312_vm9, %v12625_v40  ;;  %v1908_v23 = vshll.u32 %v15079_v53, 16  ;;  %v984_v33 = vshrl.u32 %v13334_v62, 16  ;;  %v987_v51 = vshll.u32 %v13334_v62, 16  ;;  %v992_v0 = vshrl.u32 %v13335_v35, 16  ;;  %v1599_v48 = vld [vmem:[#allocation2 + $0xa0] sm:$0xf] }
  0x99   : > { %v1594_v63 = vld [vmem:[#allocation2 + $0x8c] sm:$0x1]  ;;  %v995_v56 = vshll.u32 %v13335_v35, 16  ;;  %v1887_v11 = vsel %vm14632_vm15, %v1882_v38, %v15033_v1  ;;  %v13336_v15 = vpack.c.bf16 %v660_v29, %v660_v29  ;;  %v13337_v36 = vpack.c.bf16 %v661_v10, %v661_v10  ;;  %v1176_v42 = vld [vmem:[#allocation2 + $0xa8] sm:$0xf] }
  0x9a   : > { %v1894_v12 = vshll.u32 %v1594_v63, 16  ;;  %v986_v58 = vrot.slane %v984_v33, 7  ;;  %v15088_v47 = vrot.slane %v992_v0, 7  ;;  %v1901_v55 = vrot.slane %v1899_v52, 4  ;;  %v1598_v1 = vld [vmem:[#allocation2 + $0x9c] sm:$0xf] }
  0x9b   : > { %v1904_v44 = vrot.slane %v1902_v25, 5  ;;  %v1001_v43 = vshrl.u32 %v13336_v15, 16  ;;  %v1004_v21 = vshll.u32 %v13336_v15, 16  ;;  %v1009_v6 = vshrl.u32 %v13337_v36, 16  ;;  %v1183_v38 = vld [vmem:[#allocation2 + $0xb4] sm:$0xf] }
  0x9c   : > { %v1896_v54 = vrot.slane %v1894_v12, 5  ;;  %v989_v27 = vor.u32 %v987_v51, %v986_v58  ;;  %v990_v28 = vrot.slane %v986_v58, 4  ;;  %v997_v45 = vor.u32 %v995_v56, %v15088_v47  ;;  %v2352_v52 = vld [vmem:[#allocation2] sm:$0xe]  ;;  %v2354_v63 = vld [vmem:[#allocation2 + $0x8] sm:$0x1] }
  0x9d   : > { %v15091_v26 = vrot.slane %v1908_v23, 5  ;;  %v1003_v30 = vrot.slane %v1001_v43, 7  ;;  %v15095_v50 = vrot.slane %v1009_v6, 7  ;;  %v1012_v16 = vshll.u32 %v13337_v36, 16  ;;  %v390_v0 = vld [vmem:[#allocation2 + $0xb0] sm:$0x1] }
  0x9e   : > { %v1897_v13 = vsel %vm14632_vm15, %v1892_v37, %v1896_v54  ;;  %v998_v5 = vsel %vm14602_vm14, %v990_v28, %v997_v45  ;;  %v1177_v32 = vsel %vm14596_vm13, %v989_v27, %v1176_v42  ;;  %v1166_v39 = vld [vmem:[#allocation2 + $0x98] sm:$0x1]  ;;  %v1905_v34 = vor.u32 %v1904_v44, %v1901_v55  ;;  %v2355_v27 = vld [vmem:[#allocation2 + $0xc] sm:$0xe]  ;;  %v2356_v28 = vld [vmem:[#allocation2 + $0x10] sm:$0xf] }
  0x9f   : > { %v12626_v61 = vcombine.low %v1887_v11, %v1897_v13  ;;  %v999_v46 = vrot.slane %v15088_v47, 4  ;;  %1178 = vst [vmem:[#allocation2 + $0xa8] sm:$0xf] %v1177_v32  ;;  %1179 = vst.msk [vmem:[#allocation2 + $0xac] sm:$0xf] %vm280_vm1, %v998_v5  ;;  %v1006_v18 = vor.u32 %v1004_v21, %v1003_v30  ;;  %v1007_v40 = vrot.slane %v1003_v30, 4 }
  0xa0   : > { %v1014_v37 = vor.u32 %v1012_v16, %v15095_v50  ;;  %v1016_v49 = vrot.slane %v15095_v50, 4  ;;  %v1167_v62 = vsel %vm14500_vm4, %v965_v19, %v1166_v39  ;;  %v1912_v35 = vshrl.u32 %v15079_v53, 16  ;;  %v2357_v5 = vld [vmem:[#allocation2 + $0x14] sm:$0x1]  ;;  %v2362_v47 = vld [vmem:[#allocation2 + $0x28] sm:$0xf] }
  0xa1   : > { %13735 = vmatmul.mubr.msk.bf16.gmra.mxu1 %vm1312_vm9, %v12626_v61  ;;  %v388_v57 = vsel %vm14528_vm8, 0, %v387_v24  ;;  %v1184_v10 = vsel %vm14596_vm13, %v1006_v18, %v1183_v38  ;;  %1168 = vst [vmem:[#allocation2 + $0x98] sm:$0x1] %v1167_v62  ;;  %v1923_v25 = vshrl.u32 %v1598_v1, 16  ;;  %v1926_v23 = vshll.u32 %v1598_v1, 16 }
  0xa2   : > { %v1015_v29 = vsel %vm14602_vm14, %v1007_v40, %v1014_v37  ;;  %389 = vst [vmem:[#allocation2 + $0xa4] sm:$0x1] %v388_v57  ;;  %1185 = vst [vmem:[#allocation2 + $0xb4] sm:$0xf] %v1184_v10  ;;  %v15118_v19 = vrot.slane %v1905_v34, 4  ;;  %v1914_v53 = vrot.slane %v1912_v35, 4  ;;  %v15143_v18 = vadd.f32 %v14899_v41, %v15068_v60 }
  0xa3   : > { %1186 = vst.msk [vmem:[#allocation2 + $0xb8] sm:$0xf] %vm280_vm1, %v1015_v29  ;;  %v1932_v33 = vshll.u32 %v1599_v48, 16  ;;  %v1936_v51 = vshrl.u32 %v1599_v48, 16  ;;  %v1925_v56 = vrot.slane %v1923_v25, 4  ;;  %v1928_v11 = vrot.slane %v1926_v23, 5 }
  0xa4   : > { %vm2448_vm2 = vcmask 1042432   ;;  %vm2449_vm3 = vcmask 1046532   ;;  %v1915_v12 = vor.u32 %v1914_v53, %v15091_v26  ;;  %v18316_v58 = vmov 0  ;;  %v2371_v50 = vld [vmem:[#allocation2 + $0x4c] sm:$0xf] }
  0xa5   : > { %v15121_v15 = vrot.slane %v1932_v33, 5  ;;  %v1938_v36 = vrot.slane %v1936_v51, 4  ;;  %vm15123_vm10 = vmor %vm2448_vm2, %vm2449_vm3  ;;  %v12647_v55 = vrot.slane %v2352_v52, 9  ;;  %v1929_v44 = vor.u32 %v1928_v11, %v1925_v56  ;;  %v2358_v33 = vld [vmem:[#allocation2 + $0x18] sm:$0xe] }
  0xa6   : > { %v18317_v58 = vsel %vm15123_vm10, 4294967295, %v18316_v58  ;;  %v2453_v54 = vrot.slane %v2353_v14, 5  ;;  %v2456_v42 = vrot.slane %v2354_v63, 5  ;;  %v391_v43 = vsel %vm14528_vm8, 0, %v390_v0  ;;  %v14331_v21 = vld [vmem:[#allocation2 + $0xa8] sm:$0xff]  }
  0xa7   : > { %18318 = vst [vmem:[#allocation7_spill] sm:$0xff] %v18317_v58  ;;  %v1916_v6 = vrot.slane %v1915_v12, 4  ;;  %v1939_v24 = vor.u32 %v1938_v36, %v15121_v15  ;;  %392 = vst [vmem:[#allocation2 + $0xb0] sm:$0x1] %v391_v43  ;;  %v1911_v45 = vsel %vm14632_vm15, %v15118_v19, %v15091_v26  ;;  %v15134_v1 = vrot.slane %v1929_v44, 4  ;;  %13708 = vmatprep.mubr.msk.bf16.mxu0 %vm1312_vm9, %v14331_v21 }
  0xa8   : > { %v2454_v13 = vsel %vm15123_vm10, %v12647_v55, %v2453_v54  ;;  %v2455_v30 = vrot.slane %v2453_v54, 4  ;;  %v1601_v16 = vld [vmem:[#allocation2 + $0xa8] sm:$0xf]  ;;  %v1602_v61 = vld [vmem:[#allocation2 + $0xac] sm:$0xf]  ;;  %v15147_v26 = vadd.f32 %v14899_v41, %v15074_v31  ;;  %v12648_v29 = vrot.slane %v2355_v27, 9 }
  0xa9   : > { %v1597_v32 = vld [vmem:[#allocation2 + $0x98] sm:$0x1]  ;;  %v1173_v38 = vld [vmem:[#allocation2 + $0xa4] sm:$0x1]  ;;  %v15139_v39 = vrot.slane %v1939_v24, 4  ;;  %v1947_v34 = vshrl.u32 %v1601_v16, 16  ;;  %v1935_v62 = vsel %vm14632_vm15, %v15134_v1, %v15121_v15 }
  0xaa   : > { %v14332_v40 = vld [vmem:[#allocation2 + $0xb4] sm:$0xff]   ;;  %v1918_v37 = vshll.u32 %v1597_v32, 16  ;;  %v1174_v48 = vsel %vm14500_vm4, %v982_v3, %v1173_v38  ;;  %v2457_v60 = vsel %vm15123_vm10, %v2455_v30, %v2456_v42  ;;  %v1950_v41 = vshll.u32 %v1601_v16, 16  ;;  %v393_v3 = vld [vmem:[#allocation2 + $0xbc] sm:$0x1] }
  0xab   : > { %1175 = vst [vmem:[#allocation2 + $0xa4] sm:$0x1] %v1174_v48  ;;  %v12664_v35 = vcombine.low %v2454_v13, %v2457_v60  ;;  %v1949_v57 = vrot.slane %v1947_v34, 4  ;;  %v1956_v31 = vshll.u32 %v1602_v61, 16  ;;  %13709 = vmatmul.mubr.msk.bf16.gmra.mxu0 %vm1312_vm9, %v14332_v40  ;;  %v1960_v20 = vshrl.u32 %v1602_v61, 16 }
  0xac   : > { %v1920_v52 = vrot.slane %v1918_v37, 5  ;;  %v2460_v10 = vrot.slane %v2356_v28, 5  ;;  %v1952_v25 = vrot.slane %v1950_v41, 5  ;;  %v2463_v14 = vrot.slane %v2357_v5, 5  ;;  %v14416_v63 = vld [vmem:[%s18289_s3 + $0x8] sm:$0x3] }
  0xad   : > { %13748 = vmatprep.mubr.msk.bf16.mxu0 %vm1312_vm9, %v12664_v35  ;;  %v15161_v23 = vrot.slane %v1956_v31, 5  ;;  %v3874_v19 = vsel %vm1361_vm0, %v14416_v63, 0  ;;  %v1604_v53 = vld [vmem:[#allocation2 + $0xb4] sm:$0xf]  ;;  %v1962_v56 = vrot.slane %v1960_v20, 4  ;;  %v394_v42 = vsel %vm14528_vm8, 0, %v393_v3 }
  0xae   : > { %v1921_v51 = vsel %vm14632_vm15, %v1916_v6, %v1920_v52  ;;  %v1180_v0 = vld [vmem:[#allocation2 + $0xb0] sm:$0x1]  ;;  %v2461_v11 = vsel %vm15123_vm10, %v12648_v29, %v2460_v10  ;;  %v2462_v12 = vrot.slane %v2460_v10, 4  ;;  %v1605_v36 = vld [vmem:[#allocation2 + $0xb8] sm:$0xf]  ;;  %v1953_v54 = vor.u32 %v1952_v25, %v1949_v57 }
  0xaf   : > { %v12627_v55 = vcombine.low %v1911_v45, %v1921_v51  ;;  %v1181_v44 = vsel %vm14500_vm4, %v999_v46, %v1180_v0  ;;  %v2359_v43 = vld [vmem:[#allocation2 + $0x1c] sm:$0xf]  ;;  %v2360_v21 = vld [vmem:[#allocation2 + $0x20] sm:$0x1]  ;;  %v2361_v6 = vld [vmem:[#allocation2 + $0x24] sm:$0xe]  ;;  %v1963_v24 = vor.u32 %v1962_v56, %v15161_v23 }
  0xb0   : > { %1182 = vst [vmem:[#allocation2 + $0xb0] sm:$0x1] %v1181_v44  ;;  %v2464_v27 = vsel %vm15123_vm10, %v2462_v12, %v2463_v14  ;;  %395 = vst [vmem:[#allocation2 + $0xbc] sm:$0x1] %v394_v42  ;;  %v1971_v28 = vshrl.u32 %v1604_v53, 16  ;;  %v1974_v45 = vshll.u32 %v1604_v53, 16 }
  0xb1   : > { %v2363_v13 = vld [vmem:[#allocation2 + $0x2c] sm:$0x1]  ;;  %13738 = vmatprep.mubr.msk.bf16.mxu1 %vm1312_vm9, %v12627_v55  ;;  %v15181_v46 = vrot.slane %v1953_v54, 4  ;;  %v12665_v30 = vcombine.low %v2461_v11, %v2464_v27  ;;  %v1980_v16 = vshll.u32 %v1605_v36, 16  ;;  %v1984_v61 = vshrl.u32 %v1605_v36, 16 }
  0xb2   : > { %v2364_v5 = vld [vmem:[#allocation2 + $0x30] sm:$0xe]  ;;  %v1600_v32 = vld [vmem:[#allocation2 + $0xa4] sm:$0x1]  ;;  %v15183_v38 = vrot.slane %v1963_v24, 4  ;;  %v1973_v34 = vrot.slane %v1971_v28, 4 }
  0xb3   : > { %v1976_v40 = vrot.slane %v1974_v45, 5  ;;  %v12649_v37 = vrot.slane %v2358_v33, 9  ;;  %v1942_v48 = vshll.u32 %v1600_v32, 16  ;;  %v1959_v60 = vsel %vm14632_vm15, %v15181_v46, %v15161_v23  ;;  %v15194_v41 = vld [vmem:[%s18289_s3 + $0xc] sm:$0x3]  ;;  %13749 = vmatmul.mubr.msk.bf16.vlgmr.msra.gmra.mxu0 %vm1312_vm9, %v12665_v30 }
  0xb4   : > { %v15189_v35 = vrot.slane %v1980_v16, 5  ;;  %v1986_v57 = vrot.slane %v1984_v61, 4  ;;  %v2467_v52 = vrot.slane %v2359_v43, 5  ;;  %v2470_v20 = vrot.slane %v2360_v21, 5  ;;  %v2365_v10 = vld [vmem:[#allocation2 + $0x34] sm:$0xf]  ;;  %13815 = vmatpush3.bf16.msra.mxu0 %v3874_v19 }
  0xb5   : > { %v1977_v31 = vor.u32 %v1976_v40, %v1973_v34  ;;  %v12650_v29 = vrot.slane %v2361_v6, 9  ;;  %v2366_v3 = vld [vmem:[#allocation2 + $0x38] sm:$0x1]  ;;  %v1944_v25 = vrot.slane %v1942_v48, 5  ;;  %v2474_v14 = vrot.slane %v2362_v47, 5  ;;  %14296 = vmatprep.subr.msk.bf16.mxu0 %vm1361_vm0, %v15194_v41 }
  0xb6   : > { %v1987_v23 = vor.u32 %v1986_v57, %v15189_v35  ;;  %v2477_v63 = vrot.slane %v2363_v13, 5  ;;  %v2367_v53 = vld [vmem:[#allocation2 + $0x3c] sm:$0xe]  ;;  %v2468_v51 = vsel %vm15123_vm10, %v12649_v37, %v2467_v52  ;;  %v2469_v0 = vrot.slane %v2467_v52, 4  ;;  %v2368_v11 = vld [vmem:[#allocation2 + $0x40] sm:$0xf] }
  0xb7   : > { %v15198_v33 = vrot.slane %v1977_v31, 4  ;;  %v12651_v56 = vrot.slane %v2364_v5, 9  ;;  %v1945_v19 = vsel %vm14632_vm15, %v15139_v39, %v1944_v25  ;;  %v1603_v12 = vld [vmem:[#allocation2 + $0xb0] sm:$0x1]  ;;  %v1187_v36 = vld [vmem:[#allocation2 + $0xbc] sm:$0x1]  ;;  %v2475_v44 = vsel %vm15123_vm10, %v12650_v29, %v2474_v14 }
  0xb8   : > { %v15207_v55 = vrot.slane %v1987_v23, 4  ;;  %v2476_v54 = vrot.slane %v2474_v14, 4  ;;  %v12628_v42 = vcombine.low %v1935_v62, %v1945_v19  ;;  %v1966_v43 = vshll.u32 %v1603_v12, 16  ;;  %v2369_v6 = vld [vmem:[#allocation2 + $0x44] sm:$0x1] }
  0xb9   : > { %v1188_v39 = vsel %vm14500_vm4, %v1016_v49, %v1187_v36  ;;  %v1983_v21 = vsel %vm14632_vm15, %v15198_v33, %v15189_v35  ;;  %v2370_v24 = vld [vmem:[#allocation2 + $0x48] sm:$0xe]  ;;  %v2471_v27 = vsel %vm15123_vm10, %v2469_v0, %v2470_v20  ;;  %v2481_v1 = vrot.slane %v2365_v10, 5  ;;  %v2372_v28 = vld [vmem:[#allocation2 + $0x50] sm:$0x1] }
  0xba   : > { %1189 = vst [vmem:[#allocation2 + $0xbc] sm:$0x1] %v1188_v39  ;;  %v2478_v15 = vsel %vm15123_vm10, %v2476_v54, %v2477_v63  ;;  %v2484_v62 = vrot.slane %v2366_v3, 5  ;;  %13739 = vmatmul.mubr.msk.bf16.gmra.mxu1 %vm1312_vm9, %v12628_v42  ;;  %v1968_v49 = vrot.slane %v1966_v43, 5  ;;  %v12666_v45 = vcombine.low %v2468_v51, %v2471_v27  ;;  %v2373_v46 = vld [vmem:[#allocation2 + $0x54] sm:$0xe] }
  0xbb   : > { %v12667_v47 = vcombine.low %v2475_v44, %v2478_v15  ;;  %v12652_v13 = vrot.slane %v2367_v53, 9  ;;  %v2374_v30 = vld [vmem:[#allocation2 + $0x58] sm:$0xf]  ;;  %v2482_v16 = vsel %vm15123_vm10, %v12651_v56, %v2481_v1  ;;  %v2483_v61 = vrot.slane %v2481_v1, 4  ;;  %v2376_v34 = vld [vmem:[#allocation2 + $0x60] sm:$0xe] }
  0xbc   : > { %v2488_v5 = vrot.slane %v2368_v11, 5  ;;  %v2491_v32 = vrot.slane %v2369_v6, 5  ;;  %v1969_v40 = vsel %vm14632_vm15, %v15183_v38, %v1968_v49  ;;  %13752 = vmatprep.mubr.msk.bf16.mxu0 %vm1312_vm9, %v12666_v45  ;;  %v12653_v37 = vrot.slane %v2370_v24, 9  ;;  %v2375_v31 = vld [vmem:[#allocation2 + $0x5c] sm:$0x1] }
  0xbd   : > { %v2495_v48 = vrot.slane %v2371_v50, 5  ;;  %v2498_v57 = vrot.slane %v2372_v28, 5  ;;  %v12629_v52 = vcombine.low %v1959_v60, %v1969_v40  ;;  %13753 = vmatmul.mubr.msk.bf16.gmra.mxu0 %vm1312_vm9, %v12667_v47  ;;  %v2485_v20 = vsel %vm15123_vm10, %v2483_v61, %v2484_v62  ;;  %v2377_v3 = vld [vmem:[#allocation2 + $0x64] sm:$0xf]  ;;  %v2378_v25 = vld [vmem:[#allocation2 + $0x68] sm:$0x1] }
  0xbe   : > { %v2489_v29 = vsel %vm15123_vm10, %v12652_v13, %v2488_v5  ;;  %v2490_v10 = vrot.slane %v2488_v5, 4  ;;  %v12668_v23 = vcombine.low %v2482_v16, %v2485_v20  ;;  %v12654_v63 = vrot.slane %v2373_v46, 9  ;;  %v2379_v53 = vld [vmem:[#allocation2 + $0x6c] sm:$0xe]  ;;  %v2380_v51 = vld [vmem:[#allocation2 + $0x70] sm:$0xf] }
  0xbf   : > { %v2496_v38 = vsel %vm15123_vm10, %v12653_v37, %v2495_v48  ;;  %v2497_v14 = vrot.slane %v2495_v48, 4  ;;  %13742 = vmatprep.mubr.msk.bf16.mxu1 %vm1312_vm9, %v12629_v52  ;;  %v2502_v0 = vrot.slane %v2374_v30, 5  ;;  %v2505_v56 = vrot.slane %v2375_v31, 5  ;;  %v2382_v19 = vld [vmem:[#allocation2 + $0x78] sm:$0xe]  ;;  %v14333_v61 = vld [vmem:[#allocation2 + $0xc] sm:$0xff]  }
  0xc0   : > { %v2492_v60 = vsel %vm15123_vm10, %v2490_v10, %v2491_v32  ;;  %v12655_v11 = vrot.slane %v2376_v34, 9  ;;  %13756 = vmatprep.mubr.msk.bf16.mxu0 %vm1312_vm9, %v12668_v23  ;;  %v2509_v54 = vrot.slane %v2377_v3, 5  ;;  %v2512_v42 = vrot.slane %v2378_v25, 5  ;;  %v2381_v43 = vld [vmem:[#allocation2 + $0x74] sm:$0x1] }
  0xc1   : > { %v1606_v12 = vld [vmem:[#allocation2 + $0xbc] sm:$0x1]  ;;  %v12669_v36 = vcombine.low %v2489_v29, %v2492_v60  ;;  %v2499_v44 = vsel %vm15123_vm10, %v2497_v14, %v2498_v57  ;;  %v15250_v24 = vsel %vm15123_vm10, %v12654_v63, %v2502_v0  ;;  %v2504_v27 = vrot.slane %v2502_v0, 4  ;;  %v2385_v1 = vld [vmem:[#allocation2 + $0x84] sm:$0xe] }
  0xc2   : > { %v1990_v39 = vshll.u32 %v1606_v12, 16  ;;  %v12670_v6 = vcombine.low %v2496_v38, %v2499_v44  ;;  %v2383_v15 = vld [vmem:[#allocation2 + $0x7c] sm:$0xf]  ;;  %v15254_v62 = vsel %vm15123_vm10, %v12655_v11, %v2509_v54  ;;  %v2511_v50 = vrot.slane %v2509_v54, 4  ;;  %v2384_v45 = vld [vmem:[#allocation2 + $0x80] sm:$0x1] }
  0xc3   : > { %v12656_v28 = vrot.slane %v2379_v53, 9  ;;  %v2516_v49 = vrot.slane %v2380_v51, 5  ;;  %v15258_v13 = vsel %vm15123_vm10, %v2504_v27, %v2505_v56  ;;  %v2519_v46 = vrot.slane %v2381_v43, 5  ;;  %v2386_v16 = vld [vmem:[#allocation2 + $0x88] sm:$0xf] }
  0xc4   : > { %v1992_v47 = vrot.slane %v1990_v39, 5  ;;  %v12657_v30 = vrot.slane %v2382_v19, 9  ;;  %v12671_v5 = vcombine.low %v15250_v24, %v15258_v13  ;;  %v2513_v32 = vsel %vm15123_vm10, %v2511_v50, %v2512_v42  ;;  %v2387_v37 = vld [vmem:[#allocation2 + $0x8c] sm:$0x1]  ;;  %v2388_v48 = vld [vmem:[#allocation2 + $0x90] sm:$0xe] }
  0xc5   : > { %v15266_v34 = vsel %vm15123_vm10, %v12656_v28, %v2516_v49  ;;  %v2518_v40 = vrot.slane %v2516_v49, 4  ;;  %13757 = vmatmul.mubr.msk.bf16.gmra.mxu0 %vm1312_vm9, %v12669_v36  ;;  %v12672_v31 = vcombine.low %v15254_v62, %v2513_v32  ;;  %v2523_v52 = vrot.slane %v2383_v15, 5  ;;  %v2389_v29 = vld [vmem:[#allocation2 + $0x94] sm:$0xf]  ;;  %v2391_v10 = vld [vmem:[#allocation2 + $0x9c] sm:$0xe] }
  0xc6   : > { %v1993_v57 = vsel %vm14632_vm15, %v15207_v55, %v1992_v47  ;;  %v2526_v20 = vrot.slane %v2384_v45, 5  ;;  %13760 = vmatprep.mubr.msk.bf16.mxu0 %vm1312_vm9, %v12670_v6  ;;  %v12658_v55 = vrot.slane %v2385_v1, 9  ;;  %v2530_v23 = vrot.slane %v2386_v16, 5  ;;  %v2390_v38 = vld [vmem:[#allocation2 + $0x98] sm:$0x1]  ;;  %v14335_v32 = vld [vmem:[#allocation2 + $0x24] sm:$0xff]  }
  0xc7   : > { %v12630_v3 = vcombine.low %v1983_v21, %v1993_v57  ;;  %v15281_v25 = vsel %vm15123_vm10, %v2518_v40, %v2519_v46  ;;  %v2392_v14 = vld [vmem:[#allocation2 + $0xa0] sm:$0xf]  ;;  %v15287_v53 = vsel %vm15123_vm10, %v12657_v30, %v2523_v52  ;;  %v2525_v51 = vrot.slane %v2523_v52, 4  ;;  %v2394_v33 = vld [vmem:[#allocation2 + $0xa8] sm:$0xe]  ;;  %v14334_v47 = vld [vmem:[#allocation2 + $0x18] sm:$0xff]  }
  0xc8   : > { %v12673_v63 = vcombine.low %v15266_v34, %v15281_v25  ;;  %v2533_v35 = vrot.slane %v2387_v37, 5  ;;  %v15292_v21 = vsel %vm15123_vm10, %v12658_v55, %v2530_v23  ;;  %v2532_v60 = vrot.slane %v2530_v23, 4  ;;  %v2393_v11 = vld [vmem:[#allocation2 + $0xa4] sm:$0x1]  ;;  %v2395_v54 = vld [vmem:[#allocation2 + $0xac] sm:$0xf] }
  0xc9   : > { %13743 = vmatmul.mubr.msk.bf16.gmra.mxu1 %vm1312_vm9, %v12630_v3  ;;  %v12659_v0 = vrot.slane %v2388_v48, 9  ;;  %v2537_v56 = vrot.slane %v2389_v29, 5  ;;  %v15297_v19 = vsel %vm15123_vm10, %v2525_v51, %v2526_v20  ;;  %v2540_v12 = vrot.slane %v2390_v38, 5  ;;  %v2396_v24 = vld [vmem:[#allocation2 + $0xb0] sm:$0x1] }
  0xca   : > { %13782 = vmatprep.mubr.msk.bf16.mxu1 %vm1312_vm9, %v14333_v61  ;;  %v12660_v36 = vrot.slane %v2391_v10, 9  ;;  %v2544_v44 = vrot.slane %v2392_v14, 5  ;;  %v12674_v42 = vcombine.low %v15287_v53, %v15297_v19  ;;  %v15303_v43 = vsel %vm15123_vm10, %v2532_v60, %v2533_v35  ;;  %v2397_v27 = vld [vmem:[#allocation2 + $0xb4] sm:$0xe]  ;;  %v3343_v15 = vld [vmem:[#allocation2 + $0xc] sm:$0xf] }
  0xcb   : > { %v15307_v39 = vsel %vm15123_vm10, %v12659_v0, %v2537_v56  ;;  %v2539_v6 = vrot.slane %v2537_v56, 4  ;;  %v12675_v1 = vcombine.low %v15292_v21, %v15303_v43  ;;  %v2547_v28 = vrot.slane %v2393_v11, 5  ;;  %v2398_v49 = vld [vmem:[#allocation2 + $0xb8] sm:$0xf]  ;;  %v3344_v45 = vld [vmem:[#allocation2 + $0x10] sm:$0xf] }
  0xcc   : > { %v15313_v62 = vsel %vm15123_vm10, %v12660_v36, %v2544_v44  ;;  %v2546_v50 = vrot.slane %v2544_v44, 4  ;;  %v4440_v46 = vsel %vm1361_vm0, %v15042_v8, 0  ;;  %v12661_v30 = vrot.slane %v2394_v33, 9  ;;  %v2399_v61 = vld [vmem:[#allocation2 + $0xbc] sm:$0x1] }
  0xcd   : > { %v15317_v13 = vsel %vm15123_vm10, %v2539_v6, %v2540_v12  ;;  %v2551_v16 = vrot.slane %v2395_v54, 5  ;;  %13761 = vmatmul.mubr.msk.bf16.gmra.mxu0 %vm1312_vm9, %v12671_v5  ;;  %v2554_v48 = vrot.slane %v2396_v24, 5  ;;  %v12662_v57 = vrot.slane %v2397_v27, 9  ;;  %v3346_v29 = vld [vmem:[#allocation2 + $0x18] sm:$0xf] }
  0xce   : > { %v12676_v40 = vcombine.low %v15307_v39, %v15317_v13  ;;  %v15326_v37 = vsel %vm15123_vm10, %v2546_v50, %v2547_v28  ;;  %13764 = vmatprep.mubr.msk.bf16.mxu0 %vm1312_vm9, %v12672_v31  ;;  %v2558_v5 = vrot.slane %v2398_v49, 5  ;;  %v2561_v10 = vrot.slane %v2399_v61, 5  ;;  %v3345_v3 = vld [vmem:[#allocation2 + $0x14] sm:$0x1]  ;;  %v3347_v33 = vld [vmem:[#allocation2 + $0x1c] sm:$0xf] }
  0xcf   : > { %v12677_v8 = vcombine.low %v15313_v62, %v15326_v37  ;;  %v15333_v52 = vsel %vm15123_vm10, %v12661_v30, %v2551_v16  ;;  %v2553_v20 = vrot.slane %v2551_v16, 4  ;;  %v3392_v55 = vshrl.u32 %v3343_v15, 16  ;;  %v3348_v54 = vld [vmem:[#allocation2 + $0x20] sm:$0x1]  ;;  %v14336_v49 = vld [vmem:[#allocation2 + $0x30] sm:$0xff]  }
  0xd0   : > { %v3395_v23 = vshll.u32 %v3343_v15, 16  ;;  %v3401_v38 = vshll.u32 %v3344_v45, 16  ;;  %v15342_v14 = vsel %vm15123_vm10, %v12662_v57, %v2558_v5  ;;  %v2560_v51 = vrot.slane %v2558_v5, 4  ;;  %v340_v28 = vld [vmem:[#allocation2 + $0xc0] sm:$0x1] }
  0xd1   : > { %13783 = vmatmul.mubr.msk.bf16.vlgmr.msra.gmra.mxu1 %vm1312_vm9, %v14334_v47  ;;  %v15338_v31 = vsel %vm15123_vm10, %v2553_v20, %v2554_v48  ;;  %v3405_v35 = vshrl.u32 %v3344_v45, 16  ;;  %v3394_v0 = vrot.slane %v3392_v55, 4  ;;  %v3411_v44 = vshll.u32 %v3345_v3, 16  ;;  %v14337_v45 = vld [vmem:[#allocation2 + $0x3c] sm:$0xff]   ;;  %v3349_v20 = vld [vmem:[#allocation2 + $0x24] sm:$0xf] }
  0xd2   : > { %13786 = vmatprep.mubr.msk.bf16.mxu1 %vm1312_vm9, %v14335_v32  ;;  %13849 = vmatpush3.bf16.msra.mxu1 %v4440_v46  ;;  %v12678_v60 = vcombine.low %v15333_v52, %v15338_v31  ;;  %v3397_v56 = vrot.slane %v3395_v23, 5  ;;  %v3403_v11 = vrot.slane %v3401_v38, 5  ;;  %v15349_v12 = vsel %vm15123_vm10, %v2560_v51, %v2561_v10  ;;  %v3350_v53 = vld [vmem:[#allocation2 + $0x28] sm:$0xf]  ;;  %v4133_v43 = vld [vmem:[#allocation2 + $0xc] sm:$0xe] }
  0xd3   : > { %v3407_v36 = vrot.slane %v3405_v35, 4  ;;  %v3416_v6 = vshrl.u32 %v3346_v29, 16  ;;  %v12679_v24 = vcombine.low %v15342_v14, %v15349_v12  ;;  %v3419_v15 = vshll.u32 %v3346_v29, 16  ;;  %v4156_v39 = vld [vmem:[#allocation2 + $0x68] sm:$0x1] }
  0xd4   : > { %v3398_v27 = vor.u32 %v3397_v56, %v3394_v0  ;;  %v3425_v50 = vshll.u32 %v3347_v33, 16  ;;  %v3413_v46 = vrot.slane %v3411_v44, 5  ;;  %v3429_v16 = vshrl.u32 %v3347_v33, 16  ;;  %v5162_v4 = vld [vmem:[#allocation2 + $0xb8] sm:$0xf] }
  0xd5   : > { %v3408_v47 = vor.u32 %v3407_v36, %v3403_v11  ;;  %v3418_v30 = vrot.slane %v3416_v6, 4  ;;  %13765 = vmatmul.mubr.msk.bf16.gmra.mxu0 %vm1312_vm9, %v12673_v63  ;;  %v3421_v32 = vrot.slane %v3419_v15, 5  ;;  %v3435_v57 = vshll.u32 %v3348_v54, 16  ;;  %v14338_v15 = vld [vmem:[#allocation2 + $0x48] sm:$0xff]  }
  0xd6   : > { %v3399_v61 = vrot.slane %v3398_v27, 4  ;;  %v3427_v48 = vrot.slane %v3425_v50, 5  ;;  %13768 = vmatprep.mubr.msk.bf16.mxu0 %vm1312_vm9, %v12674_v42  ;;  %v3431_v29 = vrot.slane %v3429_v16, 4  ;;  %v15363_v10 = vsel %vm1361_vm0, %v15194_v41, 0  ;;  %v14339_v50 = vld [vmem:[#allocation2 + $0x54] sm:$0xff]  }
  0xd7   : > { %v3409_v5 = vrot.slane %v3408_v47, 4  ;;  %v341_v34 = vsel %vm14500_vm4, 0, %v340_v28  ;;  %v3422_v63 = vor.u32 %v3421_v32, %v3418_v30  ;;  %v3437_v3 = vrot.slane %v3435_v57, 5  ;;  %v3353_v32 = vld [vmem:[#allocation2 + $0x34] sm:$0xf] }
  0xd8   : > { %v3404_v25 = vsel %vm14632_vm15, %v3399_v61, %v3403_v11  ;;  %342 = vst [vmem:[#allocation2 + $0xc0] sm:$0x1] %v341_v34  ;;  %v662_v55 = vmax.f32 %v15143_v18, 0.0  ;;  %v3432_v42 = vor.u32 %v3431_v29, %v3427_v48  ;;  %v663_v41 = vmax.f32 %v15147_v26, 0.0  ;;  %v3351_v18 = vld [vmem:[#allocation2 + $0x2c] sm:$0x1] }
  0xd9   : > { %13787 = vmatmul.mubr.msk.bf16.gmra.mxu1 %vm1312_vm9, %v14336_v49  ;;  %v3414_v19 = vsel %vm14632_vm15, %v3409_v5, %v3413_v46  ;;  %v3440_v23 = vshrl.u32 %v3349_v20, 16  ;;  %v3423_v51 = vrot.slane %v3422_v63, 4  ;;  %v3443_v33 = vshll.u32 %v3349_v20, 16  ;;  %v3352_v26 = vld [vmem:[#allocation2 + $0x30] sm:$0xf] }
  0xda   : > { %13790 = vmatprep.mubr.msk.bf16.mxu1 %vm1312_vm9, %v14337_v45  ;;  %v15375_v38 = vcombine.low %v3404_v25, %v3414_v19  ;;  %v13338_v35 = vpack.c.bf16 %v662_v55, %v662_v55  ;;  %v3433_v0 = vrot.slane %v3432_v42, 4  ;;  %v13339_v56 = vpack.c.bf16 %v663_v41, %v663_v41 }
  0xdb   : > { %v3442_v11 = vrot.slane %v3440_v23, 4  ;;  %v3449_v36 = vshll.u32 %v3350_v53, 16  ;;  %v3428_v44 = vsel %vm14632_vm15, %v3423_v51, %v3427_v48  ;;  %v3445_v27 = vrot.slane %v3443_v33, 5  ;;  %v3354_v48 = vld [vmem:[#allocation2 + $0x38] sm:$0x1] }
  0xdc   : > { %v1018_v54 = vshrl.u32 %v13338_v35, 16  ;;  %v1021_v6 = vshll.u32 %v13338_v35, 16  ;;  %v3438_v28 = vsel %vm14632_vm15, %v3433_v0, %v3437_v3  ;;  %v1026_v49 = vshrl.u32 %v13339_v56, 16  ;;  %v4134_v3 = vld [vmem:[#allocation2 + $0x10] sm:$0xf] }
  0xdd   : > { %v1029_v45 = vshll.u32 %v13339_v56, 16  ;;  %v3451_v47 = vrot.slane %v3449_v36, 5  ;;  %13769 = vmatmul.mubr.msk.bf16.gmra.mxu0 %vm1312_vm9, %v12675_v1  ;;  %v15385_v46 = vcombine.low %v3428_v44, %v3438_v28  ;;  %v3446_v16 = vor.u32 %v3445_v27, %v3442_v11  ;;  %v4135_v51 = vld [vmem:[#allocation2 + $0x14] sm:$0x1]  ;;  %v4136_v35 = vld [vmem:[#allocation2 + $0x18] sm:$0xe] }
  0xde   : > { %v1020_v30 = vrot.slane %v1018_v54, 7  ;;  %v3453_v61 = vshrl.u32 %v3350_v53, 16  ;;  %13772 = vmatprep.mubr.msk.bf16.mxu0 %vm1312_vm9, %v12676_v40  ;;  %v15391_v57 = vrot.slane %v1026_v49, 7  ;;  %v3459_v5 = vshll.u32 %v3351_v18, 16  ;;  %v15399_v53 = vld [vmem:[%s18289_s3 + $0xe] sm:$0x3] }
  0xdf   : > { %v1190_v20 = vld [vmem:[#allocation2 + $0xc0] sm:$0xf]  ;;  %v3464_v29 = vshrl.u32 %v3352_v26, 16  ;;  %v3467_v21 = vshll.u32 %v3352_v26, 16  ;;  %v3447_v25 = vrot.slane %v3446_v16, 4  ;;  %14297 = vmatprep.subr.msk.bf16.mxu1 %vm1361_vm0, %v15399_v53  ;;  %v3473_v0 = vshll.u32 %v3353_v32, 16 }
  0xe0   : > { %v1023_v1 = vor.u32 %v1021_v6, %v1020_v30  ;;  %v1024_v34 = vrot.slane %v1020_v30, 4  ;;  %v3455_v63 = vrot.slane %v3453_v61, 4  ;;  %v1031_v55 = vor.u32 %v1029_v45, %v15391_v57  ;;  %v4137_v11 = vld [vmem:[#allocation2 + $0x1c] sm:$0xf]  ;;  %v4138_v27 = vld [vmem:[#allocation2 + $0x20] sm:$0x1] }
  0xe1   : > { %13791 = vmatmul.mubr.msk.bf16.gmra.mxu1 %vm1312_vm9, %v14338_v15  ;;  %v3461_v13 = vrot.slane %v3459_v5, 5  ;;  %v3466_v40 = vrot.slane %v3464_v29, 4  ;;  %v3452_v42 = vsel %vm14632_vm15, %v3447_v25, %v3451_v47  ;;  %v3469_v23 = vrot.slane %v3467_v21, 5  ;;  %v3355_v49 = vld [vmem:[#allocation2 + $0x3c] sm:$0xf]  ;;  %v14341_v45 = vld [vmem:[#allocation2 + $0x6c] sm:$0xff]  }
  0xe2   : > { %13794 = vmatprep.mubr.msk.bf16.mxu1 %vm1312_vm9, %v14339_v50  ;;  %v1191_v19 = vsel %vm14596_vm13, %v1023_v1, %v1190_v20  ;;  %v3456_v41 = vor.u32 %v3455_v63, %v3451_v47  ;;  %v1032_v33 = vsel %vm14602_vm14, %v1024_v34, %v1031_v55  ;;  %v3477_v56 = vshrl.u32 %v3353_v32, 16  ;;  %v3357_v20 = vld [vmem:[#allocation2 + $0x44] sm:$0x1]  ;;  %v3358_v1 = vld [vmem:[#allocation2 + $0x48] sm:$0xf] }
  0xe3   : > { %1192 = vst [vmem:[#allocation2 + $0xc0] sm:$0xf] %v1191_v19  ;;  %v3483_v18 = vshll.u32 %v3354_v48, 16  ;;  %1193 = vst.msk [vmem:[#allocation2 + $0xc4] sm:$0xf] %vm280_vm1, %v1032_v33  ;;  %v3470_v44 = vor.u32 %v3469_v23, %v3466_v40  ;;  %v12762_v54 = vrot.slane %v4133_v43, 9 }
  0xe4   : > { %v3457_v36 = vrot.slane %v3456_v41, 4  ;;  %v4231_v6 = vrot.slane %v4134_v3, 5  ;;  %v3475_v26 = vrot.slane %v3473_v0, 5  ;;  %v3479_v15 = vrot.slane %v3477_v56, 4  ;;  %v3359_v25 = vld [vmem:[#allocation2 + $0x4c] sm:$0xf] }
  0xe5   : > { %v3485_v50 = vrot.slane %v3483_v18, 5  ;;  %v4234_v28 = vrot.slane %v4135_v51, 5  ;;  %13773 = vmatmul.mubr.msk.bf16.gmra.mxu0 %vm1312_vm9, %v12677_v8  ;;  %v3471_v30 = vrot.slane %v3470_v44, 4  ;;  %v12763_v62 = vrot.slane %v4136_v35, 9  ;;  %v3356_v8 = vld [vmem:[#allocation2 + $0x40] sm:$0xf] }
  0xe6   : > { %v3462_v47 = vsel %vm14632_vm15, %v3457_v36, %v3461_v13  ;;  %v15419_v16 = vsel %vm15123_vm10, %v12762_v54, %v4231_v6  ;;  %v4233_v61 = vrot.slane %v4231_v6, 4  ;;  %13776 = vmatprep.mubr.msk.bf16.mxu0 %vm1312_vm9, %v12678_v60  ;;  %v3480_v48 = vor.u32 %v3479_v15, %v3475_v26  ;;  %v14342_v40 = vld [vmem:[#allocation2 + $0x78] sm:$0xff]   ;;  %v3360_v23 = vld [vmem:[#allocation2 + $0x50] sm:$0x1]  ;;  %v4139_v18 = vld [vmem:[#allocation2 + $0x24] sm:$0xe] }
  0xe7   : > { %v15425_v32 = vcombine.low %v3452_v42, %v3462_v47  ;;  %v4238_v37 = vrot.slane %v4137_v11, 5  ;;  %v3476_v5 = vsel %vm14632_vm15, %v3471_v30, %v3475_v26  ;;  %v4241_v21 = vrot.slane %v4138_v27, 5  ;;  %v4140_v11 = vld [vmem:[#allocation2 + $0x28] sm:$0xf]  ;;  %v4141_v6 = vld [vmem:[#allocation2 + $0x2c] sm:$0x1] }
  0xe8   : > { %v15431_v29 = vsel %vm15123_vm10, %v4233_v61, %v4234_v28  ;;  %v3488_v43 = vshrl.u32 %v3355_v49, 16  ;;  %v3481_v52 = vrot.slane %v3480_v48, 4  ;;  %v3491_v3 = vshll.u32 %v3355_v49, 16  ;;  %v4142_v27 = vld [vmem:[#allocation2 + $0x30] sm:$0xe]  ;;  %v14343_v26 = vld [vmem:[#allocation2 + $0x84] sm:$0xff]  }
  0xe9   : > { %13795 = vmatmul.mubr.msk.bf16.gmra.mxu1 %vm1312_vm9, %v14340_v17  ;;  %v12779_v31 = vcombine.low %v15419_v16, %v15431_v29  ;;  %v15438_v60 = vsel %vm15123_vm10, %v12763_v62, %v4238_v37  ;;  %v4240_v34 = vrot.slane %v4238_v37, 4  ;;  %v3497_v55 = vshll.u32 %v3356_v8, 16  ;;  %v4143_v48 = vld [vmem:[#allocation2 + $0x34] sm:$0xf]  ;;  %v3375_v29 = vld [vmem:[#allocation2 + $0x8c] sm:$0x1] }
  0xea   : > { %13798 = vmatprep.mubr.msk.bf16.mxu1 %vm1312_vm9, %v14341_v45  ;;  %v3490_v63 = vrot.slane %v3488_v43, 4  ;;  %v3501_v13 = vshrl.u32 %v3356_v8, 16  ;;  %v3486_v19 = vsel %vm14632_vm15, %v3481_v52, %v3485_v50  ;;  %v3507_v41 = vshll.u32 %v3357_v20, 16  ;;  %v3362_v43 = vld [vmem:[#allocation2 + $0x58] sm:$0xf] }
  0xeb   : > { %v15445_v42 = vsel %vm15123_vm10, %v4240_v34, %v4241_v21  ;;  %v3512_v51 = vshrl.u32 %v3358_v1, 16  ;;  %v15447_v35 = vcombine.low %v3476_v5, %v3486_v19  ;;  %v3493_v0 = vrot.slane %v3491_v3, 5  ;;  %v4144_v5 = vld [vmem:[#allocation2 + $0x38] sm:$0x1]  ;;  %v3363_v3 = vld [vmem:[#allocation2 + $0x5c] sm:$0x1] }
  0xec   : > { %v12780_v33 = vcombine.low %v15438_v60, %v15445_v42  ;;  %v3499_v56 = vrot.slane %v3497_v55, 5  ;;  %v3503_v17 = vrot.slane %v3501_v13, 4  ;;  %v3509_v36 = vrot.slane %v3507_v41, 5  ;;  %v3364_v41 = vld [vmem:[#allocation2 + $0x60] sm:$0xf] }
  0xed   : > { %v3514_v44 = vrot.slane %v3512_v51, 4  ;;  %v3515_v54 = vshll.u32 %v3358_v1, 16  ;;  %13777 = vmatmul.mubr.msk.bf16.gmra.mxu0 %vm1312_vm9, %v12679_v24  ;;  %v3494_v15 = vor.u32 %v3493_v0, %v3490_v63  ;;  %v3521_v50 = vshll.u32 %v3359_v25, 16 }
  0xee   : > { %v3525_v28 = vshrl.u32 %v3359_v25, 16  ;;  %v3531_v49 = vshll.u32 %v3360_v23, 16  ;;  %13816 = vmatprep.mubr.msk.bf16.mxu0 %vm1312_vm9, %v15375_v38  ;;  %v3504_v45 = vor.u32 %v3503_v17, %v3499_v56  ;;  %v12764_v30 = vrot.slane %v4139_v18, 9  ;;  %v3361_v38 = vld [vmem:[#allocation2 + $0x54] sm:$0xf] }
  0xef   : > { %v3517_v47 = vrot.slane %v3515_v54, 5  ;;  %v4245_v61 = vrot.slane %v4140_v11, 5  ;;  %v3495_v62 = vrot.slane %v3494_v15, 4  ;;  %v3523_v37 = vrot.slane %v3521_v50, 5  ;;  %v15462_v1 = vpop.f32.mrf.mxu0  ;;  %v14344_v11 = vld [vmem:[#allocation2 + $0x90] sm:$0xff]  }
  0xf0   : > { %v3527_v8 = vrot.slane %v3525_v28, 4  ;;  %v3533_v20 = vrot.slane %v3531_v49, 5  ;;  %v3505_v14 = vrot.slane %v3504_v45, 4  ;;  %v4248_v25 = vrot.slane %v4141_v6, 5  ;;  %v3365_v6 = vld [vmem:[#allocation2 + $0x64] sm:$0xf] }
  0xf1   : > { %13799 = vmatmul.mubr.msk.bf16.gmra.mxu1 %vm1312_vm9, %v14342_v40  ;;  %v3518_v12 = vor.u32 %v3517_v47, %v3514_v44  ;;  %v15460_v24 = vsel %vm15123_vm10, %v12764_v30, %v4245_v61  ;;  %v4247_v21 = vrot.slane %v4245_v61, 4  ;;  %v3500_v52 = vsel %vm14632_vm15, %v3495_v62, %v3499_v56  ;;  %v15475_v56 = vpop.f32.mrf.mxu0  ;;  %v3366_v45 = vld [vmem:[#allocation2 + $0x68] sm:$0x1]  ;;  %v4146_v62 = vld [vmem:[#allocation2 + $0x40] sm:$0xf] }
  0xf2   : > { %13802 = vmatprep.mubr.msk.bf16.mxu1 %vm1312_vm9, %v14343_v26  ;;  %v3528_v34 = vor.u32 %v3527_v8, %v3523_v37  ;;  %v12765_v63 = vrot.slane %v4142_v27, 9  ;;  %v3510_v55 = vsel %vm14632_vm15, %v3505_v14, %v3509_v36  ;;  %v4252_v40 = vrot.slane %v4143_v48, 5  ;;  %v15488_v27 = vld [vmem:[%s18289_s3 + $0x10] sm:$0x3]  ;;  %v14345_v26 = vld [vmem:[#allocation2 + $0x9c] sm:$0xff]  }
  0xf3   : > { %v3519_v13 = vrot.slane %v3518_v12, 4  ;;  %v4255_v19 = vrot.slane %v4144_v5, 5  ;;  %v15469_v23 = vcombine.low %v3500_v52, %v3510_v55  ;;  %v15473_v0 = vsel %vm15123_vm10, %v4247_v21, %v4248_v25  ;;  %v4145_v48 = vld [vmem:[#allocation2 + $0x3c] sm:$0xe]  ;;  %v4148_v14 = vld [vmem:[#allocation2 + $0x48] sm:$0xe] }
  0xf4   : > { %v3529_v51 = vrot.slane %v3528_v34, 4  ;;  %v3536_v18 = vshrl.u32 %v3361_v38, 16  ;;  %v12781_v36 = vcombine.low %v15460_v24, %v15473_v0  ;;  %v15483_v44 = vsel %vm15123_vm10, %v12765_v63, %v4252_v40  ;;  %v4150_v55 = vld [vmem:[#allocation2 + $0x50] sm:$0x1] }
  0xf5   : > { %v3524_v17 = vsel %vm14632_vm15, %v3519_v13, %v3523_v37  ;;  %v4254_v54 = vrot.slane %v4252_v40, 4  ;;  %13817 = vmatmul.mubr.msk.bf16.vlgmr.msra.gmra.mxu0 %vm1312_vm9, %v15385_v46  ;;  %v3539_v28 = vshll.u32 %v3361_v38, 16  ;;  %v3545_v49 = vshll.u32 %v3362_v43, 16 }
  0xf6   : > { %v3534_v15 = vsel %vm14632_vm15, %v3529_v51, %v3533_v20  ;;  %v3538_v50 = vrot.slane %v3536_v18, 4  ;;  %13883 = vmatpush3.bf16.msra.mxu0 %v15363_v10  ;;  %13820 = vmatprep.mubr.msk.bf16.mxu0 %vm1312_vm9, %v15425_v32  ;;  %v3549_v61 = vshrl.u32 %v3362_v43, 16  ;;  %v3555_v46 = vshll.u32 %v3363_v3, 16  ;;  %v4147_v10 = vld [vmem:[#allocation2 + $0x44] sm:$0x1]  ;;  %v15507_v32 = vpop.f32.mrf.mxu0 }
  0xf7   : > { %v15497_v47 = vcombine.low %v3524_v17, %v3534_v15  ;;  %v15501_v30 = vsel %vm15123_vm10, %v4254_v54, %v4255_v19  ;;  %v3541_v8 = vrot.slane %v3539_v28, 5  ;;  %v3547_v20 = vrot.slane %v3545_v49, 5  ;;  %14298 = vmatprep.subr.msk.bf16.mxu0 %vm1361_vm0, %v15488_v27  ;;  %v4149_v3 = vld [vmem:[#allocation2 + $0x4c] sm:$0xf] }
  0xf8   : > { %v3560_v5 = vshrl.u32 %v3364_v41, 16  ;;  %v3551_v12 = vrot.slane %v3549_v61, 4  ;;  %v3557_v21 = vrot.slane %v3555_v46, 5  ;;  %v3563_v38 = vshll.u32 %v3364_v41, 16  ;;  %v15511_v15 = vpop.f32.mrf.mxu0  ;;  %v14346_v41 = vld [vmem:[#allocation2 + $0xa8] sm:$0xff]  }
  0xf9   : > { %13803 = vmatmul.mubr.msk.bf16.gmra.mxu1 %vm1312_vm9, %v14344_v11  ;;  %v3569_v43 = vshll.u32 %v3365_v6, 16  ;;  %v3542_v52 = vor.u32 %v3541_v8, %v3538_v50  ;;  %v3573_v25 = vshrl.u32 %v3365_v6, 16  ;;  %v3579_v63 = vshll.u32 %v3366_v45, 16  ;;  %v3367_v61 = vld [vmem:[#allocation2 + $0x6c] sm:$0xf]  ;;  %v14347_v6 = vld [vmem:[#allocation2 + $0xb4] sm:$0xff]  }
  0xfa   : > { %13806 = vmatprep.mubr.msk.bf16.mxu1 %vm1312_vm9, %v14345_v26  ;;  %v3562_v34 = vrot.slane %v3560_v5, 4  ;;  %v3552_v13 = vor.u32 %v3551_v12, %v3547_v20  ;;  %v3565_v40 = vrot.slane %v3563_v38, 5  ;;  %v12766_v51 = vrot.slane %v4145_v48, 9  ;;  %v3368_v8 = vld [vmem:[#allocation2 + $0x70] sm:$0xf] }
  0xfb   : > { %v3571_v19 = vrot.slane %v3569_v43, 5  ;;  %v3543_v18 = vrot.slane %v3542_v52, 4  ;;  %v3575_v17 = vrot.slane %v3573_v25, 4  ;;  %v3581_v54 = vrot.slane %v3579_v63, 5  ;;  %v3371_v25 = vld [vmem:[#allocation2 + $0x7c] sm:$0xf]  ;;  %v15529_v63 = vpop.f32.mrf.mxu0 }
  0xfc   : > { %v4259_v11 = vrot.slane %v4146_v62, 5  ;;  %v3553_v28 = vrot.slane %v3552_v13, 4  ;;  %v3566_v49 = vor.u32 %v3565_v40, %v3562_v34  ;;  %v4262_v26 = vrot.slane %v4147_v10, 5  ;;  %v3370_v34 = vld [vmem:[#allocation2 + $0x78] sm:$0xf] }
  0xfd   : > { %v12767_v50 = vrot.slane %v4148_v14, 9  ;;  %13821 = vmatmul.mubr.msk.bf16.gmra.mxu0 %vm1312_vm9, %v15447_v35  ;;  %v3548_v45 = vsel %vm14632_vm15, %v3543_v18, %v3547_v20  ;;  %v3576_v46 = vor.u32 %v3575_v17, %v3571_v19  ;;  %v4266_v14 = vrot.slane %v4149_v3, 5  ;;  %v3369_v35 = vld [vmem:[#allocation2 + $0x74] sm:$0x1]  ;;  %v3372_v13 = vld [vmem:[#allocation2 + $0x80] sm:$0x1] }
  0xfe   : > { %v15519_v48 = vsel %vm15123_vm10, %v12766_v51, %v4259_v11  ;;  %v4261_v62 = vrot.slane %v4259_v11, 4  ;;  %13824 = vmatprep.mubr.msk.bf16.mxu0 %vm1312_vm9, %v15469_v23  ;;  %v3558_v5 = vsel %vm14632_vm15, %v3553_v28, %v3557_v21  ;;  %v3567_v10 = vrot.slane %v3566_v49, 4  ;;  %v4151_v11 = vld [vmem:[#allocation2 + $0x54] sm:$0xe]  ;;  %v3373_v21 = vld [vmem:[#allocation2 + $0x84] sm:$0xf] }
  0xff   : > { %v4269_v12 = vrot.slane %v4150_v55, 5  ;;  %v12736_v38 = vcombine.low %v3548_v45, %v3558_v5  ;;  %v3577_v43 = vrot.slane %v3576_v46, 4  ;;  %v3584_v52 = vshrl.u32 %v3367_v61, 16  ;;  %v14348_v5 = vld [vmem:[#allocation2 + $0xc0] sm:$0xff]  }
 0x100   : > { %v15527_v20 = vsel %vm15123_vm10, %v4261_v62, %v4262_v26  ;;  %v3572_v23 = vsel %vm14632_vm15, %v3567_v10, %v3571_v19  ;;  %v15538_v3 = vsel %vm15123_vm10, %v12767_v50, %v4266_v14  ;;  %v4268_v55 = vrot.slane %v4266_v14, 4  ;;  %v4152_v26 = vld [vmem:[#allocation2 + $0x58] sm:$0xf]  ;;  %v4154_v62 = vld [vmem:[#allocation2 + $0x60] sm:$0xe] }
 0x101   : > { %13807 = vmatmul.mubr.msk.bf16.gmra.mxu1 %vm1312_vm9, %v14346_v41  ;;  %v3582_v40 = vsel %vm14632_vm15, %v3577_v43, %v3581_v54  ;;  %v3586_v51 = vrot.slane %v3584_v52, 4  ;;  %v3587_v18 = vshll.u32 %v3367_v61, 16  ;;  %v3593_v17 = vshll.u32 %v3368_v8, 16  ;;  %v4153_v54 = vld [vmem:[#allocation2 + $0x5c] sm:$0x1]  ;;  %v15551_v61 = vpop.f32.mrf.mxu0 }
 0x102   : > { %13810 = vmatprep.mubr.msk.bf16.mxu1 %vm1312_vm9, %v14347_v6  ;;  %v15543_v41 = vcombine.low %v3572_v23, %v3582_v40  ;;  %v15547_v19 = vsel %vm15123_vm10, %v4268_v55, %v4269_v12  ;;  %v3597_v28 = vshrl.u32 %v3368_v8, 16  ;;  %v3603_v49 = vshll.u32 %v3369_v35, 16  ;;  %v4155_v55 = vld [vmem:[#allocation2 + $0x64] sm:$0xf] }
 0x103   : > { %v3589_v6 = vrot.slane %v3587_v18, 5  ;;  %v3595_v45 = vrot.slane %v3593_v17, 5  ;;  %v3608_v46 = vshrl.u32 %v3370_v34, 16  ;;  %v3611_v43 = vshll.u32 %v3370_v34, 16  ;;  %v15556_v37 = vpop.f32.mrf.mxu0 }
 0x104   : > { %v3599_v10 = vrot.slane %v3597_v28, 4  ;;  %v3605_v14 = vrot.slane %v3603_v49, 5  ;;  %v3617_v52 = vshll.u32 %v3371_v25, 16  ;;  %v3621_v35 = vshrl.u32 %v3371_v25, 16 }
 0x105   : > { %13825 = vmatmul.mubr.msk.bf16.gmra.mxu0 %vm1312_vm9, %v15497_v47  ;;  %v3590_v8 = vor.u32 %v3589_v6, %v3586_v51  ;;  %v3610_v12 = vrot.slane %v3608_v46, 4  ;;  %v3627_v23 = vshll.u32 %v3372_v13, 16  ;;  %v3613_v18 = vrot.slane %v3611_v43, 5  ;;  %v3374_v6 = vld [vmem:[#allocation2 + $0x88] sm:$0xf] }
 0x106   : > { %13828 = vmatprep.mubr.msk.bf16.mxu0 %vm1312_vm9, %v12736_v38  ;;  %v3600_v40 = vor.u32 %v3599_v10, %v3595_v45  ;;  %v3619_v17 = vrot.slane %v3617_v52, 5  ;;  %v12768_v2 = vrot.slane %v4151_v11, 9  ;;  %v3623_v28 = vrot.slane %v3621_v35, 4  ;;  %v3378_v35 = vld [vmem:[#allocation2 + $0x98] sm:$0x1] }
 0x107   : > { %v3591_v50 = vrot.slane %v3590_v8, 4  ;;  %v3629_v49 = vrot.slane %v3627_v23, 5  ;;  %v4273_v34 = vrot.slane %v4152_v26, 5  ;;  %v3614_v25 = vor.u32 %v3613_v18, %v3610_v12  ;;  %v3377_v12 = vld [vmem:[#allocation2 + $0x94] sm:$0xf] }
 0x108   : > { %v3601_v47 = vrot.slane %v3600_v40, 4  ;;  %v4276_v13 = vrot.slane %v4153_v54, 5  ;;  %v12769_v51 = vrot.slane %v4154_v62, 9  ;;  %v3624_v11 = vor.u32 %v3623_v28, %v3619_v17 }
 0x109   : > { %13811 = vmatmul.mubr.msk.bf16.gmra.mxu1 %vm1312_vm9, %v14348_v5  ;;  %v3596_v38 = vsel %vm14632_vm15, %v3591_v50, %v3595_v45  ;;  %v15567_v26 = vsel %vm15123_vm10, %v12768_v2, %v4273_v34  ;;  %v4275_v46 = vrot.slane %v4273_v34, 4  ;;  %v3615_v54 = vrot.slane %v3614_v25, 4  ;;  %v3376_v50 = vld [vmem:[#allocation2 + $0x90] sm:$0xf]  ;;  %v15575_v45 = vpop.f32.mrf.mxu0 }
 0x10a   : > { %13850 = vmatprep.mubr.msk.bf16.mxu1 %vm1312_vm9, %v12779_v31  ;;  %v3606_v5 = vsel %vm14632_vm15, %v3601_v47, %v3605_v14  ;;  %v4280_v62 = vrot.slane %v4155_v55, 5  ;;  %v4283_v10 = vrot.slane %v4156_v39, 5  ;;  %v3625_v52 = vrot.slane %v3624_v11, 4  ;;  %v4159_v11 = vld [vmem:[#allocation2 + $0x74] sm:$0x1] }
 0x10b   : > { %v12738_v43 = vcombine.low %v3596_v38, %v3606_v5  ;;  %v15573_v16 = vsel %vm15123_vm10, %v4275_v46, %v4276_v13  ;;  %v3632_v31 = vshrl.u32 %v3373_v21, 16  ;;  %v3620_v2 = vsel %vm14632_vm15, %v3615_v54, %v3619_v17  ;;  %v4157_v17 = vld [vmem:[#allocation2 + $0x6c] sm:$0xe]  ;;  %v4158_v13 = vld [vmem:[#allocation2 + $0x70] sm:$0xf]  ;;  %v15596_v46 = vpop.f32.mrf.mxu0 }
 0x10c   : > { %v15583_v39 = vsel %vm15123_vm10, %v12769_v51, %v4280_v62  ;;  %v4282_v8 = vrot.slane %v4280_v62, 4  ;;  %v3630_v23 = vsel %vm14632_vm15, %v3625_v52, %v3629_v49  ;;  %v3635_v40 = vshll.u32 %v3373_v21, 16  ;;  %v4160_v21 = vld [vmem:[#allocation2 + $0x78] sm:$0xe] }
 0x10d   : > { %13829 = vmatmul.mubr.msk.bf16.gmra.mxu0 %vm1312_vm9, %v15543_v41  ;;  %v3634_v55 = vrot.slane %v3632_v31, 4  ;;  %v3641_v18 = vshll.u32 %v3374_v6, 16  ;;  %v12739_v28 = vcombine.low %v3620_v2, %v3630_v23  ;;  %v3645_v47 = vshrl.u32 %v3374_v6, 16  ;;  %v15606_v31 = vpop.f32.mrf.mxu1 }
 0x10e   : > { %13832 = vmatprep.mubr.msk.bf16.mxu0 %vm1312_vm9, %v12738_v43  ;;  %v15592_v34 = vsel %vm15123_vm10, %v4282_v8, %v4283_v10  ;;  %v3651_v25 = vshll.u32 %v3375_v29, 16  ;;  %v3637_v51 = vrot.slane %v3635_v40, 5  ;;  %v3656_v49 = vshrl.u32 %v3376_v50, 16 }
 0x10f   : > { %v3643_v38 = vrot.slane %v3641_v18, 5  ;;  %v3647_v5 = vrot.slane %v3645_v47, 4  ;;  %v3659_v6 = vshll.u32 %v3376_v50, 16  ;;  %v3665_v62 = vshll.u32 %v3377_v12, 16  ;;  %v4162_v47 = vld [vmem:[#allocation2 + $0x80] sm:$0x1] }
 0x110   : > { %v3653_v54 = vrot.slane %v3651_v25, 5  ;;  %v3638_v10 = vor.u32 %v3637_v51, %v3634_v55  ;;  %v3658_v43 = vrot.slane %v3656_v49, 4  ;;  %v3669_v52 = vshrl.u32 %v3377_v12, 16  ;;  %v15608_v25 = vpop.f32.mrf.mxu0  ;;  %v3379_v12 = vld [vmem:[#allocation2 + $0x9c] sm:$0xf] }
 0x111   : > { %13851 = vmatmul.mubr.msk.bf16.vlgmr.msra.gmra.mxu1 %vm1312_vm9, %v12780_v33  ;;  %v3675_v29 = vshll.u32 %v3378_v35, 16  ;;  %v3648_v2 = vor.u32 %v3647_v5, %v3643_v38  ;;  %v3661_v8 = vrot.slane %v3659_v6, 5  ;;  %v3667_v60 = vrot.slane %v3665_v62, 5  ;;  %v4161_v33 = vld [vmem:[#allocation2 + $0x7c] sm:$0xf]  ;;  %v15617_v6 = vpop.f32.mrf.mxu1 }
 0x112   : > { %13854 = vmatprep.mubr.msk.bf16.mxu1 %vm1312_vm9, %v12781_v36  ;;  %v12770_v42 = vrot.slane %v4157_v17, 9  ;;  %v3639_v23 = vrot.slane %v3638_v10, 4  ;;  %v3671_v40 = vrot.slane %v3669_v52, 4  ;;  %v4287_v18 = vrot.slane %v4158_v13, 5  ;;  %v3380_v13 = vld [vmem:[#allocation2 + $0xa0] sm:$0xf] }
 0x113   : > { %v3677_v50 = vrot.slane %v3675_v29, 5  ;;  %v3649_v24 = vrot.slane %v3648_v2, 4  ;;  %v3662_v0 = vor.u32 %v3661_v8, %v3658_v43  ;;  %v4290_v36 = vrot.slane %v4159_v11, 5  ;;  %v3381_v5 = vld [vmem:[#allocation2 + $0xa4] sm:$0x1]  ;;  %v15625_v8 = vpop.f32.mrf.mxu0 }
 0x114   : > { %v12771_v55 = vrot.slane %v4160_v21, 9  ;;  %v3644_v35 = vsel %vm14632_vm15, %v3639_v23, %v3643_v38  ;;  %v3672_v51 = vor.u32 %v3671_v40, %v3667_v60  ;;  %v15615_v17 = vsel %vm15123_vm10, %v12770_v42, %v4287_v18  ;;  %v3383_v2 = vld [vmem:[#allocation2 + $0xac] sm:$0xf] }
 0x115   : > { %13833 = vmatmul.mubr.msk.bf16.gmra.mxu0 %vm1312_vm9, %v12739_v28  ;;  %v4289_v49 = vrot.slane %v4287_v18, 4  ;;  %v3654_v11 = vsel %vm14632_vm15, %v3649_v24, %v3653_v54  ;;  %v3663_v21 = vrot.slane %v3662_v0, 4  ;;  %v4294_v62 = vrot.slane %v4161_v33, 5  ;;  %v3382_v28 = vld [vmem:[#allocation2 + $0xa8] sm:$0xf]  ;;  %v15646_v0 = vpop.f32.mrf.mxu1 }
 0x116   : > { %v4297_v10 = vrot.slane %v4162_v47, 5  ;;  %v12740_v43 = vcombine.low %v3644_v35, %v3654_v11  ;;  %v3673_v52 = vrot.slane %v3672_v51, 4  ;;  %v3680_v29 = vshrl.u32 %v3379_v12, 16  ;;  %v3384_v24 = vld [vmem:[#allocation2 + $0xb0] sm:$0x1] }
 0x117   : > { %v15623_v38 = vsel %vm15123_vm10, %v4289_v49, %v4290_v36  ;;  %v18319_v42 = vcombine.low %v15483_v44, %v15501_v30  ;;  %v3668_v54 = vsel %vm14632_vm15, %v3663_v21, %v3667_v60  ;;  %v15637_v23 = vsel %vm15123_vm10, %v12771_v55, %v4294_v62  ;;  %v4164_v51 = vld [vmem:[#allocation2 + $0x88] sm:$0xf]  ;;  %v15657_v49 = vpop.f32.mrf.mxu1 }
 0x118   : > { %v4296_v40 = vrot.slane %v4294_v62, 4  ;;  %v18320_v18 = vcombine.low %v15519_v48, %v15527_v20  ;;  %13836 = vmatprep.mubr.msk.bf16.mxu0 %vm1312_vm9, %v12740_v43  ;;  %v3678_v44 = vsel %vm14632_vm15, %v3673_v52, %v3677_v50  ;;  %v3682_v30 = vrot.slane %v3680_v29, 4  ;;  %v4163_v20 = vld [vmem:[#allocation2 + $0x84] sm:$0xe]  ;;  %v15654_v62 = vpop.f32.mrf.mxu0 }
 0x119   : > { %13855 = vmatmul.mubr.msk.bf16.gmra.mxu1 %vm1312_vm9, %v18319_v42  ;;  %v3683_v60 = vshll.u32 %v3379_v12, 16  ;;  %v3689_v47 = vshll.u32 %v3380_v13, 16  ;;  %v12741_v36 = vcombine.low %v3668_v54, %v3678_v44  ;;  %v3693_v35 = vshrl.u32 %v3380_v13, 16  ;;  %v4165_v12 = vld [vmem:[#allocation2 + $0x8c] sm:$0x1] }
 0x11a   : > { %13858 = vmatprep.mubr.msk.bf16.mxu1 %vm1312_vm9, %v18320_v18  ;;  %v15650_v55 = vsel %vm15123_vm10, %v4296_v40, %v4297_v10  ;;  %v3699_v48 = vshll.u32 %v3381_v5, 16  ;;  %v3704_v21 = vshrl.u32 %v3382_v28, 16  ;;  %v3707_v29 = vshll.u32 %v3382_v28, 16  ;;  %v4166_v54 = vld [vmem:[#allocation2 + $0x90] sm:$0xe]  ;;  %v15659_v22 = vpop.f32.mrf.mxu0 }
 0x11b   : > { %v3685_v11 = vrot.slane %v3683_v60, 5  ;;  %v3691_v50 = vrot.slane %v3689_v47, 5  ;;  %v3695_v43 = vrot.slane %v3693_v35, 4  ;;  %v3713_v42 = vshll.u32 %v3383_v2, 16  ;;  %v4167_v18 = vld [vmem:[#allocation2 + $0x94] sm:$0xf] }
 0x11c   : > { %v3701_v52 = vrot.slane %v3699_v48, 5  ;;  %v3706_v5 = vrot.slane %v3704_v21, 4  ;;  %v3717_v10 = vshrl.u32 %v3383_v2, 16  ;;  %v3723_v40 = vshll.u32 %v3384_v24, 16  ;;  %v4168_v44 = vld [vmem:[#allocation2 + $0x98] sm:$0x1] }
 0x11d   : > { %13837 = vmatmul.mubr.msk.bf16.gmra.mxu0 %vm1312_vm9, %v12741_v36  ;;  %v3686_v13 = vor.u32 %v3685_v11, %v3682_v30  ;;  %v3696_v60 = vor.u32 %v3695_v43, %v3691_v50  ;;  %v3709_v47 = vrot.slane %v3707_v29, 5  ;;  %v3715_v33 = vrot.slane %v3713_v42, 5  ;;  %v15675_v29 = vpop.f32.mrf.mxu1 }
 0x11e   : > { %v12772_v41 = vrot.slane %v4163_v20, 9  ;;  %v3719_v35 = vrot.slane %v3717_v10, 4  ;;  %v3725_v48 = vrot.slane %v3723_v40, 5  ;;  %v4301_v28 = vrot.slane %v4164_v51, 5  ;;  %v15685_v10 = vpop.f32.mrf.mxu0 }
 0x11f   : > { %v3687_v14 = vrot.slane %v3686_v13, 4  ;;  %v18321_v30 = vcombine.low %v15538_v3, %v15547_v19  ;;  %v3697_v2 = vrot.slane %v3696_v60, 4  ;;  %v3710_v24 = vor.u32 %v3709_v47, %v3706_v5  ;;  %v3385_v19 = vld [vmem:[#allocation2 + $0xb4] sm:$0xf]  ;;  %v396_v60 = vld [vmem:[#allocation2 + $0xc8] sm:$0x1] }
 0x120   : > { %v4304_v36 = vrot.slane %v4165_v12, 5  ;;  %v12773_v11 = vrot.slane %v4166_v54, 9  ;;  %v18322_v21 = vcombine.low %v15567_v26, %v15573_v16  ;;  %v3720_v51 = vor.u32 %v3719_v35, %v3715_v33  ;;  %v3386_v16 = vld [vmem:[#allocation2 + $0xb8] sm:$0xf] }
 0x121   : > { %13859 = vmatmul.mubr.msk.bf16.gmra.mxu1 %vm1312_vm9, %v18321_v30  ;;  %v3692_v20 = vsel %vm14632_vm15, %v3687_v14, %v3691_v50  ;;  %v15673_v43 = vsel %vm15123_vm10, %v12772_v41, %v4301_v28  ;;  %v4303_v3 = vrot.slane %v4301_v28, 4  ;;  %v3702_v12 = vsel %vm14632_vm15, %v3697_v2, %v3701_v52  ;;  %v3387_v50 = vld [vmem:[#allocation2 + $0xbc] sm:$0x1]  ;;  %v3388_v30 = vld [vmem:[#allocation2 + $0xc0] sm:$0xf] }
 0x122   : > { %13862 = vmatprep.mubr.msk.bf16.mxu1 %vm1312_vm9, %v18322_v21  ;;  %v3711_v42 = vrot.slane %v3710_v24, 4  ;;  %v4308_v54 = vrot.slane %v4167_v18, 5  ;;  %v4311_v26 = vrot.slane %v4168_v44, 5  ;;  %v12742_v13 = vcombine.low %v3692_v20, %v3702_v12  ;;  %v3389_v21 = vld [vmem:[#allocation2 + $0xc4] sm:$0xf] }
 0x123   : > { %v3721_v5 = vrot.slane %v3720_v51, 4  ;;  %v15681_v14 = vsel %vm15123_vm10, %v4303_v3, %v4304_v36  ;;  %v5653_v41 = vsel %vm1361_vm0, %v15399_v53, 0  ;;  %v3728_v47 = vshrl.u32 %v3385_v19, 16  ;;  %v4169_v20 = vld [vmem:[#allocation2 + $0x9c] sm:$0xe] }
 0x124   : > { %v3716_v40 = vsel %vm14632_vm15, %v3711_v42, %v3715_v33  ;;  %v15693_v18 = vsel %vm15123_vm10, %v12773_v11, %v4308_v54  ;;  %v4310_v44 = vrot.slane %v4308_v54, 4  ;;  %13917 = vmatpush3.bf16.msra.mxu1 %v5653_v41  ;;  %13840 = vmatprep.mubr.msk.bf16.mxu0 %vm1312_vm9, %v12742_v13  ;;  %v3731_v35 = vshll.u32 %v3385_v19, 16  ;;  %v15698_v33 = vpop.f32.mrf.mxu1  ;;  %v4170_v19 = vld [vmem:[#allocation2 + $0xa0] sm:$0xf]  ;;  %v15706_v42 = vpop.f32.mrf.mxu0  ;;  %v4171_v41 = vld [vmem:[#allocation2 + $0xa4] sm:$0x1] }
 0x125   : > { %v3726_v53 = vsel %vm14632_vm15, %v3721_v5, %v3725_v48  ;;  %v3737_v28 = vshll.u32 %v3386_v16, 16  ;;  %v3741_v36 = vshrl.u32 %v3386_v16, 16  ;;  %v3747_v11 = vshll.u32 %v3387_v50, 16 }
 0x126   : > { %v12743_v2 = vcombine.low %v3716_v40, %v3726_v53  ;;  %v15702_v24 = vsel %vm15123_vm10, %v4310_v44, %v4311_v26  ;;  %v3730_v3 = vrot.slane %v3728_v47, 4  ;;  %v3733_v48 = vrot.slane %v3731_v35, 5  ;;  %v4172_v53 = vld [vmem:[#allocation2 + $0xa8] sm:$0xe]  ;;  %v15719_v47 = vpop.f32.mrf.mxu1 }
 0x127   : > { %v3739_v12 = vrot.slane %v3737_v28, 5  ;;  %v18323_v54 = vcombine.low %v15583_v39, %v15592_v34  ;;  %v3743_v26 = vrot.slane %v3741_v36, 4  ;;  %v3749_v16 = vrot.slane %v3747_v11, 5 }
 0x128   : > { %13841 = vmatmul.mubr.msk.bf16.gmra.mxu0 %vm1312_vm9, %v12743_v2  ;;  %v397_v13 = vsel %vm14528_vm8, 0, %v396_v60  ;;  %v3752_v5 = vshrl.u32 %v3388_v30, 16  ;;  %v18324_v50 = vcombine.low %v15615_v17, %v15623_v38  ;;  %v3734_v40 = vor.u32 %v3733_v48, %v3730_v3  ;;  %v4173_v60 = vld [vmem:[#allocation2 + $0xac] sm:$0xf]  ;;  %v4174_v38 = vld [vmem:[#allocation2 + $0xb0] sm:$0x1] }
 0x129   : > { %13863 = vmatmul.mubr.msk.bf16.gmra.mxu1 %vm1312_vm9, %v18323_v54  ;;  %398 = vst [vmem:[#allocation2 + $0xc8] sm:$0x1] %v397_v13  ;;  %v3755_v44 = vshll.u32 %v3388_v30, 16  ;;  %v3761_v39 = vshll.u32 %v3389_v21, 16  ;;  %v3765_v34 = vshrl.u32 %v3389_v21, 16  ;;  %v3744_v35 = vor.u32 %v3743_v26, %v3739_v12 }
 0x12a   : > { %13866 = vmatprep.mubr.msk.bf16.mxu1 %vm1312_vm9, %v18324_v50  ;;  %v3754_v28 = vrot.slane %v3752_v5, 4  ;;  %v12774_v2 = vrot.slane %v4169_v20, 9  ;;  %v4315_v36 = vrot.slane %v4170_v19, 5  ;;  %v3735_v11 = vrot.slane %v3734_v40, 4  ;;  %v1450_v50 = vpop.f32.mrf.mxu0  ;;  %v4175_v5 = vld [vmem:[#allocation2 + $0xb4] sm:$0xe] }
 0x12b   : > { %v3757_v54 = vrot.slane %v3755_v44, 5  ;;  %v15721_v51 = vrot.slane %v3761_v39, 5  ;;  %v3767_v17 = vrot.slane %v3765_v34, 4  ;;  %v3745_v3 = vrot.slane %v3744_v35, 4  ;;  %v4176_v40 = vld [vmem:[#allocation2 + $0xb8] sm:$0xf]  ;;  %v15730_v44 = vpop.f32.mrf.mxu1 }
 0x12c   : > { %v15725_v30 = vsel %vm15123_vm10, %v12774_v2, %v4315_v36  ;;  %v4317_v21 = vrot.slane %v4315_v36, 4  ;;  %v4318_v48 = vrot.slane %v4171_v41, 5  ;;  %v3740_v26 = vsel %vm14632_vm15, %v3735_v11, %v3739_v12  ;;  %v4177_v2 = vld [vmem:[#allocation2 + $0xbc] sm:$0x1]  ;;  %v4178_v36 = vld [vmem:[#allocation2 + $0xc0] sm:$0xe] }
 0x12d   : > { %v3758_v20 = vor.u32 %v3757_v54, %v3754_v28  ;;  %v3768_v19 = vor.u32 %v3767_v17, %v15721_v51  ;;  %v12775_v13 = vrot.slane %v4172_v53, 9  ;;  %v3750_v39 = vsel %vm14632_vm15, %v3745_v3, %v3749_v16  ;;  %v4179_v54 = vld [vmem:[#allocation2 + $0xc4] sm:$0xf]  ;;  %v5122_v17 = vld [vmem:[#allocation2 + $0x18] sm:$0xf] }
 0x12e   : > { %v15736_v34 = vsel %vm15123_vm10, %v4317_v21, %v4318_v48  ;;  %v4322_v35 = vrot.slane %v4173_v60, 5  ;;  %v4325_v41 = vrot.slane %v4174_v38, 5  ;;  %v12744_v12 = vcombine.low %v3740_v26, %v3750_v39  ;;  %v13698_v52 = vpop.f32.mrf.mxu0 }
 0x12f   : > { %v15738_v28 = vrot.slane %v3758_v20, 4  ;;  %v15740_v11 = vrot.slane %v3768_v19, 4  ;;  %v12791_v53 = vcombine.low %v15725_v30, %v15736_v34  ;;  %v18325_v16 = vcombine.low %v15637_v23, %v15650_v55 }
 0x130   : > { %v1194_v60 = vld [vmem:[#allocation2 + $0xc8] sm:$0x1]  ;;  %v15750_v38 = vsel %vm15123_vm10, %v12775_v13, %v4322_v35  ;;  %v4324_v3 = vrot.slane %v4322_v35, 4  ;;  %vm1526_vm1 = vcmask 64512   ;;  %v15754_v21 = vsel %vm1361_vm0, %v15488_v27, 0  ;;  %13844 = vmatprep.mubr.msk.bf16.mxu0 %vm1312_vm9, %v12744_v12 }
 0x131   : > { %13867 = vmatmul.mubr.msk.bf16.gmra.mxu1 %vm1312_vm9, %v18325_v16  ;;  %v18326_v48 = vcombine.low %v15673_v43, %v15681_v14  ;;  %v18327_v23 = vrot.slane %v15391_v57, 4  ;;  %v3764_v26 = vsel %vm14632_vm15, %v15738_v28, %v15721_v51  ;;  %1529 = vst.msk [vmem:[#allocation4 + $0x10] sm:$0xff] %vm1526_vm1, %v15462_v1  ;;  %v12776_v27 = vrot.slane %v4175_v5, 9  ;;  %1527 = vst.msk [vmem:[#allocation4] sm:$0xff] %vm1526_vm1, %v15475_v56  ;;  %v5123_v57 = vld [vmem:[#allocation2 + $0x1c] sm:$0xf]  ;;  %v15795_v1 = vpop.f32.mrf.mxu1  ;;  %v1463_v56 = vpop.f32.mrf.mxu0 }
 0x132   : > { %v4329_v20 = vrot.slane %v4176_v40, 5  ;;  %1530 = vst.msk [vmem:[#allocation4 + $0x18] sm:$0xff] %vm1526_vm1, %v15507_v32  ;;  %1528 = vst.msk [vmem:[#allocation4 + $0x8] sm:$0xff] %vm1526_vm1, %v15511_v15  ;;  %v4332_v32 = vrot.slane %v4177_v2, 5  ;;  %v4336_v15 = vrot.slane %v4179_v54, 5  ;;  %v5184_v13 = vshrl.u32 %v5123_v57, 16 }
 0x133   : > { %13870 = vmatprep.mubr.msk.bf16.mxu1 %vm1312_vm9, %v18326_v48  ;;  %v1195_v55 = vsel %vm14500_vm4, %v18327_v23, %v1194_v60  ;;  %1533 = vst.msk [vmem:[#allocation4 + $0x30] sm:$0xff] %vm1526_vm1, %v15529_v63  ;;  %1531 = vst.msk [vmem:[#allocation4 + $0x20] sm:$0xff] %vm1526_vm1, %v15551_v61  ;;  %v5124_v63 = vld [vmem:[#allocation2 + $0x20] sm:$0x1]  ;;  %v5127_v40 = vld [vmem:[#allocation2 + $0x2c] sm:$0x1]  ;;  %v15823_v39 = vpop.f32.mrf.mxu1 }
 0x134   : > { %1534 = vst.msk [vmem:[#allocation4 + $0x38] sm:$0xff] %vm1526_vm1, %v15556_v37  ;;  %1532 = vst.msk [vmem:[#allocation4 + $0x28] sm:$0xff] %vm1526_vm1, %v15575_v45  ;;  %v15805_v37 = vsel %vm15123_vm10, %v4324_v3, %v4325_v41  ;;  %v15812_v45 = vsel %vm15123_vm10, %v12776_v27, %v4329_v20  ;;  %v4338_v14 = vrot.slane %v4336_v15, 4  ;;  %v5190_v5 = vshll.u32 %v5124_v63, 16 }
 0x135   : > { %1537 = vst.msk [vmem:[#allocation4 + $0x50] sm:$0xff] %vm1526_vm1, %v15596_v46  ;;  %1535 = vst.msk [vmem:[#allocation4 + $0x40] sm:$0xff] %vm1526_vm1, %v15608_v25  ;;  %v12792_v61 = vcombine.low %v15750_v38, %v15805_v37  ;;  %v4331_v46 = vrot.slane %v4329_v20, 4  ;;  %v5171_v25 = vshrl.u32 %v5122_v17, 16  ;;  %v5186_v54 = vrot.slane %v5184_v13, 4 }
 0x136   : > { %1538 = vst.msk [vmem:[#allocation4 + $0x58] sm:$0xff] %vm1526_vm1, %v15625_v8  ;;  %1536 = vst.msk [vmem:[#allocation4 + $0x48] sm:$0xff] %vm1526_vm1, %v15654_v62  ;;  %v5125_v8 = vld [vmem:[#allocation2 + $0x24] sm:$0xf]  ;;  %v13699_v62 = vpop.f32.mrf.mxu0  ;;  %v18328_v3 = vcombine.low %v15693_v18, %v15702_v24  ;;  %v5214_v20 = vshll.u32 %v5127_v40, 16  ;;  %v15837_v18 = vpop.f32.mrf.mxu1  ;;  %v14349_v40 = vld [vmem:[#allocation2 + $0x18] sm:$0xff]  }
 0x137   : > { %1541 = vst.msk [vmem:[#allocation4 + $0x70] sm:$0xff] %vm1526_vm1, %v15659_v22  ;;  %1539 = vst.msk [vmem:[#allocation4 + $0x60] sm:$0xff] %vm1526_vm1, %v15685_v10  ;;  %v12777_v22 = vrot.slane %v4178_v36, 9  ;;  %v5174_v10 = vshll.u32 %v5122_v17, 16  ;;  %v5173_v19 = vrot.slane %v5171_v25, 4  ;;  %v5195_v12 = vshrl.u32 %v5125_v8, 16 }
 0x138   : > { %1542 = vst.msk [vmem:[#allocation4 + $0x78] sm:$0xff] %vm1526_vm1, %v15706_v42  ;;  %1540 = vst.msk [vmem:[#allocation4 + $0x68] sm:$0xff] %vm1526_vm1, %v1450_v50  ;;  %v5126_v42 = vld [vmem:[#allocation2 + $0x28] sm:$0xf]  ;;  %v15821_v50 = vsel %vm15123_vm10, %v4331_v46, %v4332_v32  ;;  %v1466_v35 = vpop.f32.mrf.mxu0  ;;  %v5192_v17 = vrot.slane %v5190_v5, 5  ;;  %v5198_v16 = vshll.u32 %v5125_v8, 16 }
 0x139   : > { %1545 = vst.msk [vmem:[#allocation4 + $0x90] sm:$0xff] %vm1526_vm1, %v13698_v52  ;;  %1196 = vst [vmem:[#allocation2 + $0xc8] sm:$0x1] %v1195_v55  ;;  %v15816_v43 = vsel %vm15123_vm10, %v12777_v22, %v4336_v15  ;;  %v5180_v52 = vshll.u32 %v5123_v57, 16  ;;  %v12793_v41 = vcombine.low %v15812_v45, %v15821_v50  ;;  %v5176_v2 = vrot.slane %v5174_v10, 5  ;;  %13871 = vmatmul.mubr.msk.bf16.gmra.mxu1 %vm1312_vm9, %v18328_v3  ;;  %v2258_v48 = vld [vmem:[#allocation4 + $0x10] sm:$0xff] }
 0x13a   : > { %1543 = vst.msk [vmem:[#allocation4 + $0x80] sm:$0xff] %vm1526_vm1, %v1463_v56  ;;  %1546 = vst.msk [vmem:[#allocation4 + $0x98] sm:$0xff] %vm1526_vm1, %v13699_v62  ;;  %v5204_v60 = vshll.u32 %v5126_v42, 16  ;;  %v5197_v55 = vrot.slane %v5195_v12, 4  ;;  %v5208_v27 = vshrl.u32 %v5126_v42, 16  ;;  %13874 = vmatprep.mubr.msk.bf16.mxu1 %vm1312_vm9, %v12791_v53  ;;  %v2290_v32 = vadd.f32 %v15606_v31, %v2258_v48  ;;  %v2256_v62 = vld [vmem:[#allocation4] sm:$0xff] }
 0x13b   : > { %v5182_v36 = vrot.slane %v5180_v52, 5  ;;  %1544 = vst.msk [vmem:[#allocation4 + $0x88] sm:$0xff] %vm1526_vm1, %v1466_v35  ;;  %v5177_v23 = vor.u32 %v5176_v2, %v5173_v19  ;;  %v5200_v15 = vrot.slane %v5198_v16, 5  ;;  %v5216_v30 = vrot.slane %v5214_v20, 5  ;;  %v2259_v13 = vld [vmem:[#allocation4 + $0x18] sm:$0xff]  ;;  %v15853_v16 = vpop.f32.mrf.mxu1 }
 0x13c   : > { %v5206_v63 = vrot.slane %v5204_v60, 5  ;;  %v5210_v8 = vrot.slane %v5208_v27, 4  ;;  %2322 = vst.msk [vmem:[#allocation4 + $0x10] sm:$0xff] %vm1526_vm1, %v2290_v32  ;;  %v2288_v34 = vadd.f32 %v2256_v62, %v15617_v6  ;;  %v5128_v5 = vld [vmem:[#allocation2 + $0x30] sm:$0xf]  ;;  %v2291_v6 = vadd.f32 %v15646_v0, %v2259_v13 }
 0x13d   : > { %v5187_v22 = vor.u32 %v5186_v54, %v5182_v36  ;;  %v5178_v25 = vrot.slane %v5177_v23, 4  ;;  %v5201_v52 = vor.u32 %v5200_v15, %v5197_v55  ;;  %v5129_v54 = vld [vmem:[#allocation2 + $0x34] sm:$0xf]  ;;  %v2262_v23 = vld [vmem:[#allocation4 + $0x30] sm:$0xff]  ;;  %v5131_v55 = vld [vmem:[#allocation2 + $0x3c] sm:$0xf]  ;;  %v15885_v32 = vpop.f32.mrf.mxu1 }
 0x13e   : > { %v5211_v19 = vor.u32 %v5210_v8, %v5206_v63  ;;  %2320 = vst.msk [vmem:[#allocation4] sm:$0xff] %vm1526_vm1, %v2288_v34  ;;  %2323 = vst.msk [vmem:[#allocation4 + $0x18] sm:$0xff] %vm1526_vm1, %v2291_v6  ;;  %v5219_v20 = vshrl.u32 %v5128_v5, 16  ;;  %v5222_v51 = vshll.u32 %v5128_v5, 16  ;;  %v5228_v28 = vshll.u32 %v5129_v54, 16  ;;  %v14351_v6 = vld [vmem:[#allocation2 + $0x30] sm:$0xff]  }
 0x13f   : > { %v5188_v10 = vrot.slane %v5187_v22, 4  ;;  %v5183_v42 = vsel %vm14632_vm15, %v5178_v25, %v5182_v36  ;;  %v5202_v12 = vrot.slane %v5201_v52, 4  ;;  %v2260_v52 = vld [vmem:[#allocation4 + $0x20] sm:$0xff]  ;;  %v5134_v34 = vld [vmem:[#allocation2 + $0x48] sm:$0xf]  ;;  %vm7310_vm0 = vcmask 1043456  }
 0x140   : > { %v3390_v57 = vld [vmem:[#allocation2 + $0xc8] sm:$0x1]  ;;  %v5212_v3 = vrot.slane %v5211_v19, 4  ;;  %v5221_v38 = vrot.slane %v5219_v20, 4  ;;  %v5224_v22 = vrot.slane %v5222_v51, 5  ;;  %v5230_v15 = vrot.slane %v5228_v28, 5 }
 0x141   : > { %v4180_v56 = vld [vmem:[#allocation2 + $0xc8] sm:$0x1]  ;;  %v3771_v24 = vshll.u32 %v3390_v57, 16  ;;  %v5193_v2 = vsel %vm14632_vm15, %v5188_v10, %v5192_v17  ;;  %v5130_v17 = vld [vmem:[#allocation2 + $0x38] sm:$0x1]  ;;  %v5207_v27 = vsel %vm14632_vm15, %v5202_v12, %v5206_v63  ;;  %13875 = vmatmul.mubr.msk.bf16.gmra.mxu1 %vm1312_vm9, %v12792_v61  ;;  %v2292_v13 = vadd.f32 %v2260_v52, %v15698_v33 }
 0x142   : > { %v4339_v46 = vrot.slane %v4180_v56, 5  ;;  %v15858_v60 = vcombine.low %v5183_v42, %v5193_v2  ;;  %v5132_v57 = vld [vmem:[#allocation2 + $0x40] sm:$0xf]  ;;  %13878 = vmatprep.mubr.msk.bf16.mxu1 %vm1312_vm9, %v12793_v41  ;;  %v5238_v37 = vshll.u32 %v5130_v17, 16  ;;  %v5133_v61 = vld [vmem:[#allocation2 + $0x44] sm:$0x1]  ;;  %v5225_v25 = vor.u32 %v5224_v22, %v5221_v38  ;;  %v15890_v2 = vpop.f32.mrf.mxu1 }
 0x143   : > { %v3773_v53 = vrot.slane %v3771_v24, 5  ;;  %v5243_v56 = vshrl.u32 %v5131_v55, 16  ;;  %v5246_v24 = vshll.u32 %v5131_v55, 16  ;;  %v5252_v50 = vshll.u32 %v5132_v57, 16  ;;  %2324 = vst.msk [vmem:[#allocation4 + $0x20] sm:$0xff] %vm1526_vm1, %v2292_v13 }
 0x144   : > { %v15843_v31 = vsel %vm15123_vm10, %v4338_v14, %v4339_v46  ;;  %v2257_v14 = vld [vmem:[#allocation4 + $0x8] sm:$0xff]  ;;  %v5240_v46 = vrot.slane %v5238_v37, 5  ;;  %v5256_v41 = vshrl.u32 %v5132_v57, 16  ;;  %v5262_v10 = vshll.u32 %v5133_v61, 16  ;;  %v13702_v12 = vpop.f32.mrf.mxu0  ;;  %v5136_v55 = vld [vmem:[#allocation2 + $0x50] sm:$0x1] }
 0x145   : > { %v12794_v35 = vcombine.low %v15816_v43, %v15843_v31  ;;  %v3774_v36 = vsel %vm14632_vm15, %v15740_v11, %v3773_v53  ;;  %v2289_v48 = vadd.f32 %v2257_v14, %v15657_v49  ;;  %v2294_v11 = vadd.f32 %v15675_v29, %v2262_v23  ;;  %v14350_v53 = vld [vmem:[#allocation2 + $0x24] sm:$0xff]   ;;  %1549 = vst.msk [vmem:[#allocation4 + $0xb0] sm:$0xff] %vm1526_vm1, %v13702_v12  ;;  %v5137_v28 = vld [vmem:[#allocation2 + $0x54] sm:$0xf]  ;;  %v5138_v61 = vld [vmem:[#allocation2 + $0x58] sm:$0xf] }
 0x146   : > { %v12745_v0 = vcombine.low %v3764_v26, %v3774_v36  ;;  %v5217_v49 = vsel %vm14632_vm15, %v5212_v3, %v5216_v30  ;;  %v5232_v26 = vshrl.u32 %v5129_v54, 16  ;;  %v5245_v45 = vrot.slane %v5243_v56, 4  ;;  %v2263_v30 = vld [vmem:[#allocation4 + $0x38] sm:$0xff]  ;;  %v2266_v23 = vld [vmem:[#allocation4 + $0x50] sm:$0xff] }
 0x147   : > { %2321 = vst.msk [vmem:[#allocation4 + $0x8] sm:$0xff] %vm1526_vm1, %v2289_v48  ;;  %v15882_v29 = vcombine.low %v5207_v27, %v5217_v49  ;;  %2326 = vst.msk [vmem:[#allocation4 + $0x30] sm:$0xff] %vm1526_vm1, %v2294_v11  ;;  %v5248_v62 = vrot.slane %v5246_v24, 5  ;;  %v5254_v42 = vrot.slane %v5252_v50, 5  ;;  %v5258_v19 = vrot.slane %v5256_v41, 4  ;;  %v2261_v48 = vld [vmem:[#allocation4 + $0x28] sm:$0xff]  ;;  %v1479_v27 = vpop.f32.mrf.mxu0 }
 0x148   : > { %13845 = vmatmul.mubr.msk.bf16.gmra.mxu0 %vm1312_vm9, %v12745_v0  ;;  %v5234_v63 = vrot.slane %v5232_v26, 4  ;;  %v2295_v5 = vadd.f32 %v15719_v47, %v2263_v30  ;;  %v5226_v14 = vrot.slane %v5225_v25, 4  ;;  %v5264_v3 = vrot.slane %v5262_v10, 5  ;;  %1547 = vst.msk [vmem:[#allocation4 + $0xa0] sm:$0xff] %vm1526_vm1, %v1479_v27  ;;  %v14352_v25 = vld [vmem:[#allocation2 + $0x3c] sm:$0xff]   ;;  %v2264_v30 = vld [vmem:[#allocation4 + $0x40] sm:$0xff] }
 0x149   : > { %13884 = vmatprep.mubr.msk.bf16.mxu0 %vm1312_vm9, %v14349_v40  ;;  %v5135_v40 = vld [vmem:[#allocation2 + $0x4c] sm:$0xf]  ;;  %v5249_v36 = vor.u32 %v5248_v62, %v5245_v45  ;;  %v5259_v17 = vor.u32 %v5258_v19, %v5254_v42  ;;  %v2293_v33 = vadd.f32 %v2261_v48, %v15730_v44  ;;  %v2298_v47 = vadd.f32 %v15795_v1, %v2266_v23  ;;  %v13703_v26 = vpop.f32.mrf.mxu0  ;;  %v5140_v12 = vld [vmem:[#allocation2 + $0x60] sm:$0xf]  ;;  %v5141_v48 = vld [vmem:[#allocation2 + $0x64] sm:$0xf] }
 0x14a   : > { %v5235_v8 = vor.u32 %v5234_v63, %v5230_v15  ;;  %2327 = vst.msk [vmem:[#allocation4 + $0x38] sm:$0xff] %vm1526_vm1, %v2295_v5  ;;  %v5267_v0 = vshrl.u32 %v5134_v34, 16  ;;  %13879 = vmatmul.mubr.msk.bf16.gmra.mxu1 %vm1312_vm9, %v12794_v35  ;;  %v5231_v11 = vsel %vm14632_vm15, %v5226_v14, %v5230_v15  ;;  %v5270_v51 = vshll.u32 %v5134_v34, 16  ;;  %v15911_v35 = vpop.f32.mrf.mxu1  ;;  %1550 = vst.msk [vmem:[#allocation4 + $0xb8] sm:$0xff] %vm1526_vm1, %v13703_v26  ;;  %v5139_v15 = vld [vmem:[#allocation2 + $0x5c] sm:$0x1] }
 0x14b   : > { %v5250_v49 = vrot.slane %v5249_v36, 4  ;;  %13918 = vmatprep.mubr.msk.bf16.mxu1 %vm1312_vm9, %v15858_v60  ;;  %v5260_v1 = vrot.slane %v5259_v17, 4  ;;  %2325 = vst.msk [vmem:[#allocation4 + $0x28] sm:$0xff] %vm1526_vm1, %v2293_v33  ;;  %2330 = vst.msk [vmem:[#allocation4 + $0x50] sm:$0xff] %vm1526_vm1, %v2298_v47  ;;  %v5276_v31 = vshll.u32 %v5135_v40, 16  ;;  %v5280_v60 = vshrl.u32 %v5135_v40, 16 }
 0x14c   : > { %v5236_v54 = vrot.slane %v5235_v8, 4  ;;  %v5269_v43 = vrot.slane %v5267_v0, 4  ;;  %v5272_v38 = vrot.slane %v5270_v51, 5  ;;  %v5286_v37 = vshll.u32 %v5136_v55, 16  ;;  %v15923_v34 = vpop.f32.mrf.mxu1  ;;  %v2267_v40 = vld [vmem:[#allocation4 + $0x58] sm:$0xff]  ;;  %v2270_v47 = vld [vmem:[#allocation4 + $0x70] sm:$0xff] }
 0x14d   : > { %v5255_v57 = vsel %vm14632_vm15, %v5250_v49, %v5254_v42  ;;  %v5265_v56 = vsel %vm14632_vm15, %v5260_v1, %v5264_v3  ;;  %v5278_v22 = vrot.slane %v5276_v31, 5  ;;  %v5291_v63 = vshrl.u32 %v5137_v28, 16  ;;  %v2265_v3 = vld [vmem:[#allocation4 + $0x48] sm:$0xff]  ;;  %v5142_v0 = vld [vmem:[#allocation2 + $0x68] sm:$0x1] }
 0x14e   : > { %v5241_v20 = vsel %vm14632_vm15, %v5236_v54, %v5240_v46  ;;  %v5294_v24 = vshll.u32 %v5137_v28, 16  ;;  %v1482_v46 = vpop.f32.mrf.mxu0  ;;  %v5273_v45 = vor.u32 %v5272_v38, %v5269_v43  ;;  %v5282_v50 = vrot.slane %v5280_v60, 4 }
 0x14f   : > { %v12847_v44 = vcombine.low %v5231_v11, %v5241_v20  ;;  %v5288_v41 = vrot.slane %v5286_v37, 5  ;;  %1548 = vst.msk [vmem:[#allocation4 + $0xa8] sm:$0xff] %vm1526_vm1, %v1482_v46  ;;  %v5293_v8 = vrot.slane %v5291_v63, 4  ;;  %v5300_v10 = vshll.u32 %v5138_v61, 16  ;;  %v5143_v11 = vld [vmem:[#allocation2 + $0x6c] sm:$0xf] }
 0x150   : > { %13885 = vmatmul.mubr.msk.bf16.vlgmr.msra.gmra.mxu0 %vm1312_vm9, %v14350_v53  ;;  %v5296_v62 = vrot.slane %v5294_v24, 5  ;;  %v5304_v52 = vshrl.u32 %v5138_v61, 16  ;;  %v14353_v53 = vld [vmem:[#allocation2 + $0x48] sm:$0xff]   ;;  %v5274_v42 = vrot.slane %v5273_v45, 4  ;;  %v5283_v19 = vor.u32 %v5282_v50, %v5278_v22  ;;  %v13732_v20 = vpop.f32.mrf.mxu1  ;;  %v14354_v37 = vld [vmem:[#allocation2 + $0x54] sm:$0xff]   ;;  %v14355_v46 = vld [vmem:[#allocation2 + $0x60] sm:$0xff]  }
 0x151   : > { %13951 = vmatpush3.bf16.msra.mxu0 %v15754_v21  ;;  %13888 = vmatprep.mubr.msk.bf16.mxu0 %vm1312_vm9, %v14351_v6  ;;  %v15920_v21 = vcombine.low %v5255_v57, %v5265_v56  ;;  %v5310_v13 = vshll.u32 %v5139_v15, 16  ;;  %v2296_v5 = vadd.f32 %v2264_v30, %v15823_v39  ;;  %v5302_v14 = vrot.slane %v5300_v10, 5  ;;  %v5145_v56 = vld [vmem:[#allocation2 + $0x74] sm:$0x1] }
 0x152   : > { %v5297_v6 = vor.u32 %v5296_v62, %v5293_v8  ;;  %v5306_v54 = vrot.slane %v5304_v52, 4  ;;  %v2299_v36 = vadd.f32 %v15837_v18, %v2267_v40  ;;  %13919 = vmatmul.mubr.msk.bf16.vlgmr.msra.gmra.mxu1 %vm1312_vm9, %v15882_v29  ;;  %v5279_v23 = vsel %vm14632_vm15, %v5274_v42, %v5278_v22  ;;  %v15946_v24 = vpop.f32.mrf.mxu1  ;;  %v5146_v8 = vld [vmem:[#allocation2 + $0x78] sm:$0xf]  ;;  %v2268_v42 = vld [vmem:[#allocation4 + $0x60] sm:$0xff] }
 0x153   : > { %v5284_v17 = vrot.slane %v5283_v19, 4  ;;  %v5312_v33 = vrot.slane %v5310_v13, 5  ;;  %2328 = vst.msk [vmem:[#allocation4 + $0x40] sm:$0xff] %vm1526_vm1, %v2296_v5  ;;  %v2297_v39 = vadd.f32 %v2265_v3, %v15853_v16  ;;  %13922 = vmatprep.mubr.msk.bf16.mxu1 %vm1312_vm9, %v12847_v44  ;;  %v2302_v29 = vadd.f32 %v15885_v32, %v2270_v47  ;;  %v5144_v44 = vld [vmem:[#allocation2 + $0x70] sm:$0xf] }
 0x154   : > { %v5298_v18 = vrot.slane %v5297_v6, 4  ;;  %v5307_v55 = vor.u32 %v5306_v54, %v5302_v14  ;;  %2331 = vst.msk [vmem:[#allocation4 + $0x58] sm:$0xff] %vm1526_vm1, %v2299_v36  ;;  %v5315_v27 = vshrl.u32 %v5140_v12, 16  ;;  %v5318_v49 = vshll.u32 %v5140_v12, 16  ;;  %v2271_v12 = vld [vmem:[#allocation4 + $0x78] sm:$0xff]  ;;  %v2269_v6 = vld [vmem:[#allocation4 + $0x68] sm:$0xff] }
 0x155   : > { %v5289_v16 = vsel %vm14632_vm15, %v5284_v17, %v5288_v41  ;;  %2329 = vst.msk [vmem:[#allocation4 + $0x48] sm:$0xff] %vm1526_vm1, %v2297_v39  ;;  %v5324_v51 = vshll.u32 %v5141_v48, 16  ;;  %v5328_v28 = vshrl.u32 %v5141_v48, 16  ;;  %2334 = vst.msk [vmem:[#allocation4 + $0x70] sm:$0xff] %vm1526_vm1, %v2302_v29  ;;  %v5334_v60 = vshll.u32 %v5142_v0, 16  ;;  %v13706_v62 = vpop.f32.mrf.mxu0 }
 0x156   : > { %v12849_v1 = vcombine.low %v5279_v23, %v5289_v16  ;;  %v5303_v43 = vsel %vm14632_vm15, %v5298_v18, %v5302_v14  ;;  %v5308_v32 = vrot.slane %v5307_v55, 4  ;;  %v5317_v31 = vrot.slane %v5315_v27, 4  ;;  %1553 = vst.msk [vmem:[#allocation4 + $0xd0] sm:$0xff] %vm1526_vm1, %v13706_v62  ;;  %v2274_v23 = vld [vmem:[#allocation4 + $0x90] sm:$0xff]  ;;  %v2272_v62 = vld [vmem:[#allocation4 + $0x80] sm:$0xff] }
 0x157   : > { %v5320_v26 = vrot.slane %v5318_v49, 5  ;;  %v5326_v57 = vrot.slane %v5324_v51, 5  ;;  %v5330_v38 = vrot.slane %v5328_v28, 4  ;;  %v5339_v22 = vshrl.u32 %v5143_v11, 16  ;;  %v1495_v14 = vpop.f32.mrf.mxu0  ;;  %v5148_v17 = vld [vmem:[#allocation2 + $0x80] sm:$0x1] }
 0x158   : > { %13889 = vmatmul.mubr.msk.bf16.gmra.mxu0 %vm1312_vm9, %v14352_v25  ;;  %v5313_v61 = vsel %vm14632_vm15, %v5308_v32, %v5312_v33  ;;  %v5342_v15 = vshll.u32 %v5143_v11, 16  ;;  %v5348_v63 = vshll.u32 %v5144_v44, 16  ;;  %v5336_v25 = vrot.slane %v5334_v60, 5  ;;  %v13733_v33 = vpop.f32.mrf.mxu1  ;;  %1551 = vst.msk [vmem:[#allocation4 + $0xc0] sm:$0xff] %vm1526_vm1, %v1495_v14  ;;  %v5149_v18 = vld [vmem:[#allocation2 + $0x84] sm:$0xf] }
 0x159   : > { %13892 = vmatprep.mubr.msk.bf16.mxu0 %vm1312_vm9, %v14353_v53  ;;  %v15948_v45 = vcombine.low %v5303_v43, %v5313_v61  ;;  %v5321_v50 = vor.u32 %v5320_v26, %v5317_v31  ;;  %v5331_v41 = vor.u32 %v5330_v38, %v5326_v57  ;;  %v5341_v10 = vrot.slane %v5339_v22, 4  ;;  %v2273_v14 = vld [vmem:[#allocation4 + $0x88] sm:$0xff] }
 0x15a   : > { %v5344_v52 = vrot.slane %v5342_v15, 5  ;;  %v15950_v30 = vrot.slane %v5348_v63, 5  ;;  %v5352_v53 = vshrl.u32 %v5144_v44, 16  ;;  %13923 = vmatmul.mubr.msk.bf16.gmra.mxu1 %vm1312_vm9, %v15920_v21  ;;  %v5358_v5 = vshll.u32 %v5145_v56, 16  ;;  %v5147_v21 = vld [vmem:[#allocation2 + $0x7c] sm:$0xf] }
 0x15b   : > { %v5322_v19 = vrot.slane %v5321_v50, 4  ;;  %v5332_v13 = vrot.slane %v5331_v41, 4  ;;  %v2300_v40 = vadd.f32 %v2268_v42, %v15890_v2  ;;  %13926 = vmatprep.mubr.msk.bf16.mxu1 %vm1312_vm9, %v12849_v1  ;;  %v2303_v3 = vadd.f32 %v15911_v35, %v2271_v12  ;;  %v14356_v44 = vld [vmem:[#allocation2 + $0x6c] sm:$0xff]   ;;  %v14357_v1 = vld [vmem:[#allocation2 + $0x78] sm:$0xff]  }
 0x15c   : > { %v5345_v54 = vor.u32 %v5344_v52, %v5341_v10  ;;  %v5354_v36 = vrot.slane %v5352_v53, 4  ;;  %v2301_v48 = vadd.f32 %v2269_v6, %v15923_v34  ;;  %v5360_v47 = vrot.slane %v5358_v5, 5  ;;  %v13707_v34 = vpop.f32.mrf.mxu0  ;;  %v5151_v56 = vld [vmem:[#allocation2 + $0x8c] sm:$0x1]  ;;  %v5152_v10 = vld [vmem:[#allocation2 + $0x90] sm:$0xf] }
 0x15d   : > { %v5327_v2 = vsel %vm14632_vm15, %v5322_v19, %v5326_v57  ;;  %v5337_v39 = vsel %vm14632_vm15, %v5332_v13, %v5336_v25  ;;  %2332 = vst.msk [vmem:[#allocation4 + $0x60] sm:$0xff] %vm1526_vm1, %v2300_v40  ;;  %v2306_v35 = vadd.f32 %v13732_v20, %v2274_v23  ;;  %2335 = vst.msk [vmem:[#allocation4 + $0x78] sm:$0xff] %vm1526_vm1, %v2303_v3  ;;  %v5363_v27 = vshrl.u32 %v5146_v8, 16  ;;  %v5150_v20 = vld [vmem:[#allocation2 + $0x88] sm:$0xf]  ;;  %v2196_v57 = vpop.f32.mrf.mxu1 }
 0x15e   : > { %v12851_v55 = vcombine.low %v5327_v2, %v5337_v39  ;;  %v5346_v29 = vrot.slane %v5345_v54, 4  ;;  %v5355_v0 = vor.u32 %v5354_v36, %v15950_v30  ;;  %2333 = vst.msk [vmem:[#allocation4 + $0x68] sm:$0xff] %vm1526_vm1, %v2301_v48  ;;  %1554 = vst.msk [vmem:[#allocation4 + $0xd8] sm:$0xff] %vm1526_vm1, %v13707_v34  ;;  %v5366_v11 = vshll.u32 %v5146_v8, 16  ;;  %v1498_v28 = vpop.f32.mrf.mxu0  ;;  %v2275_v19 = vld [vmem:[#allocation4 + $0x98] sm:$0xff]  ;;  %v2278_v54 = vld [vmem:[#allocation4 + $0xb0] sm:$0xff] }
 0x15f   : > { %2338 = vst.msk [vmem:[#allocation4 + $0x90] sm:$0xff] %vm1526_vm1, %v2306_v35  ;;  %v5372_v16 = vshll.u32 %v5147_v21, 16  ;;  %v5376_v49 = vshrl.u32 %v5147_v21, 16  ;;  %v5382_v51 = vshll.u32 %v5148_v17, 16  ;;  %v5365_v31 = vrot.slane %v5363_v27, 4  ;;  %1552 = vst.msk [vmem:[#allocation4 + $0xc8] sm:$0xff] %vm1526_vm1, %v1498_v28 }
 0x160   : > { %13893 = vmatmul.mubr.msk.bf16.gmra.mxu0 %vm1312_vm9, %v14354_v37  ;;  %v5351_v43 = vsel %vm14632_vm15, %v5346_v29, %v15950_v30  ;;  %v5356_v32 = vrot.slane %v5355_v0, 4  ;;  %v5387_v26 = vshrl.u32 %v5149_v18, 16  ;;  %v5368_v38 = vrot.slane %v5366_v11, 5  ;;  %v5153_v5 = vld [vmem:[#allocation2 + $0x94] sm:$0xf]  ;;  %v14358_v35 = vld [vmem:[#allocation2 + $0x84] sm:$0xff]  }
 0x161   : > { %13896 = vmatprep.mubr.msk.bf16.mxu0 %vm1312_vm9, %v14355_v46  ;;  %v5374_v60 = vrot.slane %v5372_v16, 5  ;;  %v5378_v37 = vrot.slane %v5376_v49, 4  ;;  %v5384_v61 = vrot.slane %v5382_v51, 5  ;;  %v5390_v63 = vshll.u32 %v5149_v18, 16  ;;  %v13736_v13 = vpop.f32.mrf.mxu1  ;;  %v5154_v21 = vld [vmem:[#allocation2 + $0x98] sm:$0x1] }
 0x162   : > { %v5361_v22 = vsel %vm14632_vm15, %v5356_v32, %v5360_v47  ;;  %v5389_v15 = vrot.slane %v5387_v26, 4  ;;  %v5396_v46 = vshll.u32 %v5150_v20, 16  ;;  %13927 = vmatmul.mubr.msk.bf16.gmra.mxu1 %vm1312_vm9, %v15948_v45  ;;  %v5369_v41 = vor.u32 %v5368_v38, %v5365_v31  ;;  %v5155_v47 = vld [vmem:[#allocation2 + $0x9c] sm:$0xf]  ;;  %v14359_v18 = vld [vmem:[#allocation2 + $0x90] sm:$0xff]  }
 0x163   : > { %v12852_v50 = vcombine.low %v5351_v43, %v5361_v22  ;;  %v5379_v25 = vor.u32 %v5378_v37, %v5374_v60  ;;  %v5400_v8 = vshrl.u32 %v5150_v20, 16  ;;  %13930 = vmatprep.mubr.msk.bf16.mxu1 %vm1312_vm9, %v12851_v55  ;;  %v5392_v52 = vrot.slane %v5390_v63, 5  ;;  %v2209_v17 = vpop.f32.mrf.mxu1  ;;  %v5156_v51 = vld [vmem:[#allocation2 + $0xa0] sm:$0xf]  ;;  %v5157_v43 = vld [vmem:[#allocation2 + $0xa4] sm:$0x1] }
 0x164   : > { %v5398_v30 = vrot.slane %v5396_v46, 5  ;;  %v5406_v53 = vshll.u32 %v5151_v56, 16  ;;  %v2304_v42 = vadd.f32 %v2272_v62, %v15946_v24  ;;  %v5370_v45 = vrot.slane %v5369_v41, 4  ;;  %v343_v22 = vld [vmem:[#allocation2 + $0xcc] sm:$0x1] }
 0x165   : > { %v5380_v40 = vrot.slane %v5379_v25, 4  ;;  %v5402_v12 = vrot.slane %v5400_v8, 4  ;;  %v2307_v6 = vadd.f32 %v13733_v33, %v2275_v19  ;;  %v5393_v36 = vor.u32 %v5392_v52, %v5389_v15  ;;  %v13737_v20 = vpop.f32.mrf.mxu1  ;;  %v5158_v15 = vld [vmem:[#allocation2 + $0xa8] sm:$0xf]  ;;  %v2276_v25 = vld [vmem:[#allocation4 + $0xa0] sm:$0xff] }
 0x166   : > { %v5408_v3 = vrot.slane %v5406_v53, 5  ;;  %2336 = vst.msk [vmem:[#allocation4 + $0x80] sm:$0xff] %vm1526_vm1, %v2304_v42  ;;  %v2305_v48 = vadd.f32 %v2273_v14, %v2196_v57  ;;  %v2310_v23 = vadd.f32 %v13736_v13, %v2278_v54  ;;  %v5375_v24 = vsel %vm14632_vm15, %v5370_v45, %v5374_v60  ;;  %v2279_v8 = vld [vmem:[#allocation4 + $0xb8] sm:$0xff]  ;;  %v2277_v45 = vld [vmem:[#allocation4 + $0xa8] sm:$0xff] }
 0x167   : > { %v5385_v2 = vsel %vm14632_vm15, %v5380_v40, %v5384_v61  ;;  %v5403_v39 = vor.u32 %v5402_v12, %v5398_v30  ;;  %2339 = vst.msk [vmem:[#allocation4 + $0x98] sm:$0xff] %vm1526_vm1, %v2307_v6  ;;  %v5411_v33 = vshrl.u32 %v5152_v10, 16  ;;  %v5394_v55 = vrot.slane %v5393_v36, 4  ;;  %v2212_v62 = vpop.f32.mrf.mxu1  ;;  %v5159_v12 = vld [vmem:[#allocation2 + $0xac] sm:$0xf]  ;;  %v14360_v6 = vld [vmem:[#allocation2 + $0x9c] sm:$0xff]  }
 0x168   : > { %13897 = vmatmul.mubr.msk.bf16.gmra.mxu0 %vm1312_vm9, %v14356_v44  ;;  %v12853_v34 = vcombine.low %v5375_v24, %v5385_v2  ;;  %2337 = vst.msk [vmem:[#allocation4 + $0x88] sm:$0xff] %vm1526_vm1, %v2305_v48  ;;  %2342 = vst.msk [vmem:[#allocation4 + $0xb0] sm:$0xff] %vm1526_vm1, %v2310_v23  ;;  %v5414_v29 = vshll.u32 %v5152_v10, 16  ;;  %v5420_v0 = vshll.u32 %v5153_v5, 16  ;;  %v5424_v16 = vshrl.u32 %v5153_v5, 16  ;;  %v14361_v23 = vld [vmem:[#allocation2 + $0xa8] sm:$0xff]  }
 0x169   : > { %13900 = vmatprep.mubr.msk.bf16.mxu0 %vm1312_vm9, %v14357_v1  ;;  %v5404_v27 = vrot.slane %v5403_v39, 4  ;;  %v5413_v11 = vrot.slane %v5411_v33, 4  ;;  %v5430_v49 = vshll.u32 %v5154_v21, 16  ;;  %v5399_v28 = vsel %vm14632_vm15, %v5394_v55, %v5398_v30  ;;  %v5161_v33 = vld [vmem:[#allocation2 + $0xb4] sm:$0xf] }
 0x16a   : > { %v5416_v44 = vrot.slane %v5414_v29, 5  ;;  %v5422_v1 = vrot.slane %v5420_v0, 5  ;;  %v5435_v32 = vshrl.u32 %v5155_v47, 16  ;;  %13931 = vmatmul.mubr.msk.bf16.gmra.mxu1 %vm1312_vm9, %v12852_v50  ;;  %v5426_v26 = vrot.slane %v5424_v16, 4 }
 0x16b   : > { %v5409_v31 = vsel %vm14632_vm15, %v5404_v27, %v5408_v3  ;;  %v5432_v57 = vrot.slane %v5430_v49, 5  ;;  %v5438_v38 = vshll.u32 %v5155_v47, 16  ;;  %13934 = vmatprep.mubr.msk.bf16.mxu1 %vm1312_vm9, %v12853_v34  ;;  %v5444_v56 = vshll.u32 %v5156_v51, 16  ;;  %v13710_v40 = vpop.f32.mrf.mxu0  ;;  %v5160_v3 = vld [vmem:[#allocation2 + $0xb0] sm:$0x1] }
 0x16c   : > { %v12854_v60 = vcombine.low %v5399_v28, %v5409_v31  ;;  %v5417_v37 = vor.u32 %v5416_v44, %v5413_v11  ;;  %v5437_v61 = vrot.slane %v5435_v32, 4  ;;  %v5427_v63 = vor.u32 %v5426_v26, %v5422_v1  ;;  %1557 = vst.msk [vmem:[#allocation4 + $0xf0] sm:$0xff] %vm1526_vm1, %v13710_v40  ;;  %v5912_v26 = vld [vmem:[#allocation2 + $0x18] sm:$0xe] }
 0x16d   : > { %v5440_v46 = vrot.slane %v5438_v38, 5  ;;  %v5448_v50 = vshrl.u32 %v5156_v51, 16  ;;  %v5454_v41 = vshll.u32 %v5157_v43, 16  ;;  %v5446_v52 = vrot.slane %v5444_v56, 5  ;;  %v1511_v39 = vpop.f32.mrf.mxu0  ;;  %v5163_v51 = vld [vmem:[#allocation2 + $0xbc] sm:$0x1] }
 0x16e   : > { %v5418_v10 = vrot.slane %v5417_v37, 4  ;;  %v2308_v30 = vadd.f32 %v2276_v25, %v2209_v17  ;;  %v2311_v53 = vadd.f32 %v13737_v20, %v2279_v8  ;;  %v5428_v42 = vrot.slane %v5427_v63, 4  ;;  %1555 = vst.msk [vmem:[#allocation4 + $0xe0] sm:$0xff] %vm1526_vm1, %v1511_v39  ;;  %v5914_v56 = vld [vmem:[#allocation2 + $0x20] sm:$0x1]  ;;  %v14362_v8 = vld [vmem:[#allocation2 + $0xb4] sm:$0xff]  }
 0x16f   : > { %v5441_v19 = vor.u32 %v5440_v46, %v5437_v61  ;;  %v5450_v13 = vrot.slane %v5448_v50, 4  ;;  %v5456_v5 = vrot.slane %v5454_v41, 5  ;;  %v2309_v54 = vadd.f32 %v2277_v45, %v2212_v62  ;;  %v13711_v11 = vpop.f32.mrf.mxu0  ;;  %v5916_v25 = vld [vmem:[#allocation2 + $0x28] sm:$0xf]  ;;  %v5917_v45 = vld [vmem:[#allocation2 + $0x2c] sm:$0x1] }
 0x170   : > { %13901 = vmatmul.mubr.msk.bf16.gmra.mxu0 %vm1312_vm9, %v14358_v35  ;;  %v5423_v14 = vsel %vm14632_vm15, %v5418_v10, %v5422_v1  ;;  %2340 = vst.msk [vmem:[#allocation4 + $0xa0] sm:$0xff] %vm1526_vm1, %v2308_v30  ;;  %2343 = vst.msk [vmem:[#allocation4 + $0xb8] sm:$0xff] %vm1526_vm1, %v2311_v53  ;;  %v344_v36 = vsel %vm14500_vm4, 0, %v343_v22  ;;  %v5459_v48 = vshrl.u32 %v5158_v15, 16  ;;  %v5433_v21 = vsel %vm14632_vm15, %v5428_v42, %v5432_v57  ;;  %v5913_v57 = vld [vmem:[#allocation2 + $0x1c] sm:$0xf] }
 0x171   : > { %13904 = vmatprep.mubr.msk.bf16.mxu0 %vm1312_vm9, %v14359_v18  ;;  %v5442_v17 = vrot.slane %v5441_v19, 4  ;;  %v5451_v24 = vor.u32 %v5450_v13, %v5446_v52  ;;  %345 = vst [vmem:[#allocation2 + $0xcc] sm:$0x1] %v344_v36  ;;  %v5462_v2 = vshll.u32 %v5158_v15, 16  ;;  %v12855_v47 = vcombine.low %v5423_v14, %v5433_v21  ;;  %2341 = vst.msk [vmem:[#allocation4 + $0xa8] sm:$0xff] %vm1526_vm1, %v2309_v54  ;;  %v1514_v31 = vpop.f32.mrf.mxu0  ;;  %v14363_v53 = vld [vmem:[#allocation2 + $0xc0] sm:$0xff]  }
 0x172   : > { %v5461_v35 = vrot.slane %v5459_v48, 4  ;;  %v5468_v18 = vshll.u32 %v5159_v12, 16  ;;  %v5472_v34 = vshrl.u32 %v5159_v12, 16  ;;  %13935 = vmatmul.mubr.msk.bf16.gmra.mxu1 %vm1312_vm9, %v12854_v60  ;;  %v5478_v27 = vshll.u32 %v5160_v3, 16  ;;  %1558 = vst.msk [vmem:[#allocation4 + $0xf8] sm:$0xff] %vm1526_vm1, %v13711_v11  ;;  %1556 = vst.msk [vmem:[#allocation4 + $0xe8] sm:$0xff] %vm1526_vm1, %v1514_v31 }
 0x173   : > { %v5447_v55 = vsel %vm14632_vm15, %v5442_v17, %v5446_v52  ;;  %v5452_v29 = vrot.slane %v5451_v24, 4  ;;  %v5464_v0 = vrot.slane %v5462_v2, 5  ;;  %13938 = vmatprep.mubr.msk.bf16.mxu1 %vm1312_vm9, %v12855_v47  ;;  %v5483_v20 = vshrl.u32 %v5161_v33, 16  ;;  %v5915_v22 = vld [vmem:[#allocation2 + $0x24] sm:$0xe]  ;;  %v13750_v41 = vpop.f32.mrf.mxu0 }
 0x174   : > { %v5470_v16 = vrot.slane %v5468_v18, 5  ;;  %v5474_v49 = vrot.slane %v5472_v34, 4  ;;  %v5486_v28 = vshll.u32 %v5161_v33, 16  ;;  %v5480_v43 = vrot.slane %v5478_v27, 5  ;;  %v2827_v36 = vld [vmem:[#allocation4 + $0x10] sm:$0xff] }
 0x175   : > { %v5457_v44 = vsel %vm14632_vm15, %v5452_v29, %v5456_v5  ;;  %v5465_v1 = vor.u32 %v5464_v0, %v5461_v35  ;;  %v5492_v32 = vshll.u32 %v5162_v4, 16  ;;  %v5485_v37 = vrot.slane %v5483_v20, 4  ;;  %v2698_v40 = vpop.f32.mrf.mxu0  ;;  %v5164_v3 = vld [vmem:[#allocation2 + $0xc0] sm:$0xf]  ;;  %v5165_v24 = vld [vmem:[#allocation2 + $0xc4] sm:$0xf] }
 0x176   : > { %v12856_v38 = vcombine.low %v5447_v55, %v5457_v44  ;;  %v5475_v60 = vor.u32 %v5474_v49, %v5470_v16  ;;  %v5488_v61 = vrot.slane %v5486_v28, 5  ;;  %v5496_v46 = vshrl.u32 %v5162_v4, 16  ;;  %v2282_v34 = vld [vmem:[#allocation4 + $0xd0] sm:$0xff]  ;;  %v399_v28 = vld [vmem:[#allocation2 + $0xd4] sm:$0x1] }
 0x177   : > { %v5466_v15 = vrot.slane %v5465_v1, 4  ;;  %v5494_v63 = vrot.slane %v5492_v32, 5  ;;  %v5502_v50 = vshll.u32 %v5163_v51, 16  ;;  %v12877_v52 = vrot.slane %v5912_v26, 9  ;;  %v16030_v2 = vpop.f32.mrf.mxu0  ;;  %v5166_v51 = vld [vmem:[#allocation2 + $0xc8] sm:$0x1] }
 0x178   : > { %13905 = vmatmul.mubr.msk.bf16.gmra.mxu0 %vm1312_vm9, %v14360_v6  ;;  %v5476_v62 = vrot.slane %v5475_v60, 4  ;;  %v5489_v10 = vor.u32 %v5488_v61, %v5485_v37  ;;  %v6010_v30 = vrot.slane %v5913_v57, 5  ;;  %v5498_v19 = vrot.slane %v5496_v46, 4  ;;  %v5167_v57 = vld [vmem:[#allocation2 + $0xcc] sm:$0xf] }
 0x179   : > { %13908 = vmatprep.mubr.msk.bf16.mxu0 %vm1312_vm9, %v14361_v23  ;;  %v5471_v42 = vsel %vm14632_vm15, %v5466_v15, %v5470_v16  ;;  %v5504_v13 = vrot.slane %v5502_v50, 5  ;;  %v6013_v5 = vrot.slane %v5914_v56, 5  ;;  %v2859_v21 = vadd.f32 %v13750_v41, %v2827_v36  ;;  %v16044_v27 = vpop.f32.mrf.mxu0 }
 0x17a   : > { %v5481_v12 = vsel %vm14632_vm15, %v5476_v62, %v5480_v43  ;;  %v5490_v6 = vrot.slane %v5489_v10, 4  ;;  %v16027_v14 = vsel %vm15123_vm10, %v12877_v52, %v6010_v30  ;;  %v6012_v54 = vrot.slane %v6010_v30, 4  ;;  %13939 = vmatmul.mubr.msk.bf16.gmra.mxu1 %vm1312_vm9, %v12856_v38  ;;  %v13740_v18 = vpop.f32.mrf.mxu1  ;;  %v2280_v43 = vld [vmem:[#allocation4 + $0xc0] sm:$0xff] }
 0x17b   : > { %v12857_v48 = vcombine.low %v5471_v42, %v5481_v12  ;;  %v5499_v23 = vor.u32 %v5498_v19, %v5494_v63  ;;  %v12878_v17 = vrot.slane %v5915_v22, 9  ;;  %v6017_v47 = vrot.slane %v5916_v25, 5  ;;  %2891 = vst.msk [vmem:[#allocation4 + $0x10] sm:$0xff] %vm1526_vm1, %v2859_v21  ;;  %v14364_v38 = vld [vmem:[#allocation2 + $0xcc] sm:$0xff]  }
 0x17c   : > { %v5495_v39 = vsel %vm14632_vm15, %v5490_v6, %v5494_v63  ;;  %v16037_v33 = vsel %vm15123_vm10, %v6012_v54, %v6013_v5  ;;  %v6020_v35 = vrot.slane %v5917_v45, 5  ;;  %v5507_v29 = vshrl.u32 %v5164_v3, 16  ;;  %v2225_v1 = vpop.f32.mrf.mxu1  ;;  %v2283_v63 = vld [vmem:[#allocation4 + $0xd8] sm:$0xff]  ;;  %v5168_v62 = vld [vmem:[#allocation2 + $0xd0] sm:$0xf]  ;;  %v2281_v5 = vld [vmem:[#allocation4 + $0xc8] sm:$0xff] }
 0x17d   : > { %13942 = vmatprep.mubr.msk.bf16.mxu1 %vm1312_vm9, %v12857_v48  ;;  %v5500_v4 = vrot.slane %v5499_v23, 4  ;;  %v12894_v55 = vcombine.low %v16027_v14, %v16037_v33  ;;  %v5510_v0 = vshll.u32 %v5164_v3, 16  ;;  %v2314_v11 = vadd.f32 %v13740_v18, %v2282_v34  ;;  %v13754_v22 = vpop.f32.mrf.mxu0  ;;  %v5918_v42 = vld [vmem:[#allocation2 + $0x30] sm:$0xe]  ;;  %v5919_v54 = vld [vmem:[#allocation2 + $0x34] sm:$0xf] }
 0x17e   : > { %v16048_v16 = vsel %vm15123_vm10, %v12878_v17, %v6017_v47  ;;  %v6019_v49 = vrot.slane %v6017_v47, 4  ;;  %v5516_v20 = vshll.u32 %v5165_v24, 16  ;;  %v5509_v32 = vrot.slane %v5507_v29, 4  ;;  %v13741_v15 = vpop.f32.mrf.mxu1  ;;  %v2828_v48 = vld [vmem:[#allocation4 + $0x18] sm:$0xff]  ;;  %v5920_v23 = vld [vmem:[#allocation2 + $0x38] sm:$0x1] }
 0x17f   : > { %v5505_v44 = vsel %vm14632_vm15, %v5500_v4, %v5504_v13  ;;  %v5512_v31 = vrot.slane %v5510_v0, 5  ;;  %v5520_v26 = vshrl.u32 %v5165_v24, 16  ;;  %2346 = vst.msk [vmem:[#allocation4 + $0xd0] sm:$0xff] %vm1526_vm1, %v2314_v11  ;;  %v2312_v37 = vadd.f32 %v2280_v43, %v2225_v1  ;;  %v2714_v19 = vpop.f32.mrf.mxu0  ;;  %v2826_v47 = vld [vmem:[#allocation4 + $0x8] sm:$0xff]  ;;  %v5922_v0 = vld [vmem:[#allocation2 + $0x40] sm:$0xf] }
 0x180   : > { %13909 = vmatmul.mubr.msk.bf16.gmra.mxu0 %vm1312_vm9, %v14362_v8  ;;  %v12858_v60 = vcombine.low %v5495_v39, %v5505_v44  ;;  %v16055_v61 = vsel %vm15123_vm10, %v6019_v49, %v6020_v35  ;;  %v5518_v56 = vrot.slane %v5516_v20, 5  ;;  %v5526_v25 = vshll.u32 %v5166_v51, 16  ;;  %v2825_v8 = vld [vmem:[#allocation4] sm:$0xff]  ;;  %v2228_v13 = vpop.f32.mrf.mxu1  ;;  %v5921_v35 = vld [vmem:[#allocation2 + $0x3c] sm:$0xe]  ;;  %v2831_v20 = vld [vmem:[#allocation4 + $0x30] sm:$0xff] }
 0x181   : > { %13912 = vmatprep.mubr.msk.bf16.mxu0 %vm1312_vm9, %v14363_v53  ;;  %v12895_v46 = vcombine.low %v16048_v16, %v16055_v61  ;;  %v5513_v50 = vor.u32 %v5512_v31, %v5509_v32  ;;  %v5522_v41 = vrot.slane %v5520_v26, 4  ;;  %2344 = vst.msk [vmem:[#allocation4 + $0xc0] sm:$0xff] %vm1526_vm1, %v2312_v37  ;;  %v2315_v10 = vadd.f32 %v13741_v15, %v2283_v63  ;;  %v13755_v21 = vpop.f32.mrf.mxu0  ;;  %v5924_v32 = vld [vmem:[#allocation2 + $0x48] sm:$0xe]  ;;  %v5925_v31 = vld [vmem:[#allocation2 + $0x4c] sm:$0xf] }
 0x182   : > { %v2857_v52 = vadd.f32 %v2825_v8, %v2698_v40  ;;  %v400_v30 = vsel %vm14528_vm8, 0, %v399_v28  ;;  %v5531_v53 = vshrl.u32 %v5167_v57, 16  ;;  %13943 = vmatmul.mubr.msk.bf16.gmra.mxu1 %vm1312_vm9, %v12858_v60  ;;  %v5528_v6 = vrot.slane %v5526_v25, 5  ;;  %v5923_v28 = vld [vmem:[#allocation2 + $0x44] sm:$0x1]  ;;  %v2832_v15 = vld [vmem:[#allocation4 + $0x38] sm:$0xff]  ;;  %vm16312_vm8 = vmand %vm405_vm6, %vm346_vm5 }
 0x183   : > { %v5514_v45 = vrot.slane %v5513_v50, 4  ;;  %v5523_v12 = vor.u32 %v5522_v41, %v5518_v56  ;;  %401 = vst [vmem:[#allocation2 + $0xd4] sm:$0x1] %v400_v30  ;;  %v5534_v14 = vshll.u32 %v5167_v57, 16  ;;  %2347 = vst.msk [vmem:[#allocation4 + $0xd8] sm:$0xff] %vm1526_vm1, %v2315_v10  ;;  %v2313_v40 = vadd.f32 %v2281_v5, %v2228_v13  ;;  %v2717_v11 = vpop.f32.mrf.mxu0  ;;  %v2830_v5 = vld [vmem:[#allocation4 + $0x28] sm:$0xff] }
 0x184   : > { %2889 = vst.msk [vmem:[#allocation4] sm:$0xff] %vm1526_vm1, %v2857_v52  ;;  %v5533_v9 = vrot.slane %v5531_v53, 4  ;;  %v5540_v36 = vshll.u32 %v5168_v62, 16  ;;  %v5544_v3 = vshrl.u32 %v5168_v62, 16  ;;  %v2860_v33 = vadd.f32 %v16030_v2, %v2828_v48  ;;  %v5926_v8 = vld [vmem:[#allocation2 + $0x50] sm:$0x1] }
 0x185   : > { %v5519_v17 = vsel %vm14632_vm15, %v5514_v45, %v5518_v56  ;;  %v5524_v24 = vrot.slane %v5523_v12, 4  ;;  %v5536_v39 = vrot.slane %v5534_v14, 5  ;;  %2345 = vst.msk [vmem:[#allocation4 + $0xc8] sm:$0xff] %vm1526_vm1, %v2313_v40  ;;  %v2858_v4 = vadd.f32 %v2826_v47, %v16044_v27  ;;  %v13758_v26 = vpop.f32.mrf.mxu0  ;;  %v2829_v56 = vld [vmem:[#allocation4 + $0x20] sm:$0xff]  ;;  %v2286_v52 = vld [vmem:[#allocation4 + $0xf0] sm:$0xff] }
 0x186   : > { %v16071_v18 = vrot.slane %v5540_v36, 5  ;;  %v5546_v34 = vrot.slane %v5544_v3, 4  ;;  %v12879_v29 = vrot.slane %v5918_v42, 9  ;;  %2892 = vst.msk [vmem:[#allocation4 + $0x18] sm:$0xff] %vm1526_vm1, %v2860_v33  ;;  %v6024_v51 = vrot.slane %v5919_v54, 5  ;;  %v2284_v48 = vld [vmem:[#allocation4 + $0xe0] sm:$0xff] }
 0x187   : > { %v5537_v49 = vor.u32 %v5536_v39, %v5533_v9  ;;  %v6027_v2 = vrot.slane %v5920_v23, 5  ;;  %2890 = vst.msk [vmem:[#allocation4 + $0x8] sm:$0xff] %vm1526_vm1, %v2858_v4  ;;  %v2863_v43 = vadd.f32 %v13754_v22, %v2831_v20  ;;  %v12880_v27 = vrot.slane %v5921_v35, 9  ;;  %v2730_v62 = vpop.f32.mrf.mxu0  ;;  %v16092_v45 = vld [vmem:[#allocation2 + $0x54] sm:$0xe] }
 0x188   : > { %13913 = vmatmul.mubr.msk.bf16.gmra.mxu0 %vm1312_vm9, %v14364_v38  ;;  %v5547_v1 = vor.u32 %v5546_v34, %v16071_v18  ;;  %v6025_v38 = vsel %vm15123_vm10, %v12879_v29, %v6024_v51  ;;  %v6026_v60 = vrot.slane %v6024_v51, 4  ;;  %v6031_v37 = vrot.slane %v5922_v0, 5  ;;  %v16100_v54 = vld [vmem:[#allocation2 + $0x58] sm:$0xf]  ;;  %v16102_v40 = vld [vmem:[#allocation2 + $0x5c] sm:$0x1] }
 0x189   : > { %13952 = vmatprep.mubr.msk.bf16.mxu0 %vm1312_vm9, %v12894_v55  ;;  %v5529_v55 = vsel %vm14632_vm15, %v5524_v24, %v5528_v6  ;;  %v5538_v57 = vrot.slane %v5537_v49, 4  ;;  %2895 = vst.msk [vmem:[#allocation4 + $0x30] sm:$0xff] %vm1526_vm1, %v2863_v43  ;;  %v6034_v41 = vrot.slane %v5923_v28, 5  ;;  %v2861_v22 = vadd.f32 %v2829_v56, %v2714_v19  ;;  %v13744_v10 = vpop.f32.mrf.mxu1  ;;  %v13759_v9 = vpop.f32.mrf.mxu0  ;;  %v5930_v47 = vld [vmem:[#allocation2 + $0x60] sm:$0xe]  ;;  %v2287_v34 = vld [vmem:[#allocation4 + $0xf8] sm:$0xff] }
 0x18a   : > { %v12859_v44 = vcombine.low %v5519_v17, %v5529_v55  ;;  %v5169_v63 = vld [vmem:[#allocation2 + $0xd4] sm:$0x1]  ;;  %v5548_v50 = vrot.slane %v5547_v1, 4  ;;  %v2864_v25 = vadd.f32 %v13755_v21, %v2832_v15  ;;  %v6028_v42 = vsel %vm15123_vm10, %v6026_v60, %v6027_v2  ;;  %v5932_v55 = vld [vmem:[#allocation2 + $0x68] sm:$0x1]  ;;  %v2834_v1 = vld [vmem:[#allocation4 + $0x48] sm:$0xff] }
 0x18b   : > { %v5543_v30 = vsel %vm14632_vm15, %v5538_v57, %v16071_v18  ;;  %v5550_v53 = vshll.u32 %v5169_v63, 16  ;;  %v16090_v13 = vsel %vm15123_vm10, %v12880_v27, %v6031_v37  ;;  %v2318_v19 = vadd.f32 %v13744_v10, %v2286_v52  ;;  %2893 = vst.msk [vmem:[#allocation4 + $0x20] sm:$0xff] %vm1526_vm1, %v2861_v22  ;;  %v2241_v3 = vpop.f32.mrf.mxu1  ;;  %v2733_v33 = vpop.f32.mrf.mxu0  ;;  %v2833_v28 = vld [vmem:[#allocation4 + $0x40] sm:$0xff]  ;;  %v2839_v63 = vld [vmem:[#allocation4 + $0x70] sm:$0xff] }
 0x18c   : > { %13946 = vmatprep.mubr.msk.bf16.mxu1 %vm1312_vm9, %v12859_v44  ;;  %v12896_v12 = vcombine.low %v6025_v38, %v6028_v42  ;;  %v6033_v6 = vrot.slane %v6031_v37, 4  ;;  %2896 = vst.msk [vmem:[#allocation4 + $0x38] sm:$0xff] %vm1526_vm1, %v2864_v25  ;;  %v2862_v14 = vadd.f32 %v2830_v5, %v2717_v11  ;;  %v12881_v23 = vrot.slane %v5924_v32, 9  ;;  %v5931_v11 = vld [vmem:[#allocation2 + $0x64] sm:$0xf]  ;;  %v2836_v44 = vld [vmem:[#allocation4 + $0x58] sm:$0xff] }
 0x18d   : > { %v5552_v36 = vrot.slane %v5550_v53, 5  ;;  %v6038_v16 = vrot.slane %v5925_v31, 5  ;;  %v6041_v61 = vrot.slane %v5926_v8, 5  ;;  %2350 = vst.msk [vmem:[#allocation4 + $0xf0] sm:$0xff] %vm1526_vm1, %v2318_v19  ;;  %v2316_v21 = vadd.f32 %v2284_v48, %v2241_v3  ;;  %v13745_v18 = vpop.f32.mrf.mxu1  ;;  %v13762_v43 = vpop.f32.mrf.mxu0  ;;  %v2285_v32 = vld [vmem:[#allocation4 + $0xe8] sm:$0xff]  ;;  %v3249_v31 = vld [vmem:[#allocation4 + $0x10] sm:$0xff] }
 0x18e   : > { %v6035_v17 = vsel %vm15123_vm10, %v6033_v6, %v6034_v41  ;;  %2894 = vst.msk [vmem:[#allocation4 + $0x28] sm:$0xff] %vm1526_vm1, %v2862_v14  ;;  %v12882_v39 = vrot.slane %v16092_v45, 9  ;;  %v2319_v51 = vadd.f32 %v13745_v18, %v2287_v34  ;;  %v6045_v2 = vrot.slane %v16100_v54, 5  ;;  %v3247_v25 = vld [vmem:[#allocation4] sm:$0xff]  ;;  %v16130_v53 = vld [vmem:[#allocation2 + $0x6c] sm:$0xe] }
 0x18f   : > { %v5553_v35 = vsel %vm14632_vm15, %v5548_v50, %v5552_v36  ;;  %v12897_v4 = vcombine.low %v16090_v13, %v6035_v17  ;;  %v6039_v29 = vsel %vm15123_vm10, %v12881_v23, %v6038_v16  ;;  %v6040_v0 = vrot.slane %v6038_v16, 4  ;;  %2348 = vst.msk [vmem:[#allocation4 + $0xe0] sm:$0xff] %vm1526_vm1, %v2316_v21  ;;  %v2244_v27 = vpop.f32.mrf.mxu1  ;;  %v16123_v50 = vld [vmem:[#allocation2 + $0x70] sm:$0xf]  ;;  %v2746_v41 = vpop.f32.mrf.mxu0  ;;  %v3250_v5 = vld [vmem:[#allocation4 + $0x18] sm:$0xff]  ;;  %v2838_v16 = vld [vmem:[#allocation4 + $0x68] sm:$0xff] }
 0x190   : > { %13953 = vmatmul.mubr.msk.bf16.vlgmr.msra.gmra.mxu0 %vm1312_vm9, %v12895_v46  ;;  %v2835_v46 = vld [vmem:[#allocation4 + $0x50] sm:$0xff]  ;;  %v12860_v49 = vcombine.low %v5543_v30, %v5553_v35  ;;  %v6048_v20 = vrot.slane %v16102_v40, 5  ;;  %v2865_v57 = vadd.f32 %v2833_v28, %v2730_v62  ;;  %v2868_v38 = vadd.f32 %v13759_v9, %v2836_v44  ;;  %2351 = vst.msk [vmem:[#allocation4 + $0xf8] sm:$0xff] %vm1526_vm1, %v2319_v51  ;;  %v2837_v14 = vld [vmem:[#allocation4 + $0x60] sm:$0xff]  ;;  %v16139_v54 = vld [vmem:[#allocation2 + $0x7c] sm:$0xf] }
 0x191   : > { %13956 = vmatprep.mubr.msk.bf16.mxu0 %vm1312_vm9, %v12896_v12  ;;  %v2867_v24 = vadd.f32 %v13758_v26, %v2835_v46  ;;  %v6042_v26 = vsel %vm15123_vm10, %v6040_v0, %v6041_v61  ;;  %v2866_v60 = vadd.f32 %v2834_v1, %v2733_v33  ;;  %v2317_v37 = vadd.f32 %v2285_v32, %v2244_v27  ;;  %v13784_v22 = vpop.f32.mrf.mxu1  ;;  %v13763_v42 = vpop.f32.mrf.mxu0  ;;  %v5935_v36 = vld [vmem:[#allocation2 + $0x74] sm:$0x1]  ;;  %v2840_v48 = vld [vmem:[#allocation4 + $0x78] sm:$0xff]  ;;  %v3248_v46 = vld [vmem:[#allocation4 + $0x8] sm:$0xff] }
 0x192   : > { %13947 = vmatmul.mubr.msk.bf16.gmra.mxu1 %vm1312_vm9, %v12860_v49  ;;  %v12898_v56 = vcombine.low %v6039_v29, %v6042_v26  ;;  %v6047_v15 = vrot.slane %v6045_v2, 4  ;;  %2897 = vst.msk [vmem:[#allocation4 + $0x40] sm:$0xff] %vm1526_vm1, %v2865_v57  ;;  %2900 = vst.msk [vmem:[#allocation4 + $0x58] sm:$0xff] %vm1526_vm1, %v2868_v38  ;;  %v12883_v8 = vrot.slane %v5930_v47, 9  ;;  %v6052_v62 = vrot.slane %v5931_v11, 5  ;;  %v2843_v29 = vld [vmem:[#allocation4 + $0x90] sm:$0xff] }
 0x193   : > { %2899 = vst.msk [vmem:[#allocation4 + $0x50] sm:$0xff] %vm1526_vm1, %v2867_v24  ;;  %2898 = vst.msk [vmem:[#allocation4 + $0x48] sm:$0xff] %vm1526_vm1, %v2866_v60  ;;  %v6055_v10 = vrot.slane %v5932_v55, 5  ;;  %v2871_v52 = vadd.f32 %v13762_v43, %v2839_v63  ;;  %v3281_v30 = vadd.f32 %v13784_v22, %v3249_v31  ;;  %v3120_v13 = vpop.f32.mrf.mxu1  ;;  %v6046_v45 = vsel %vm15123_vm10, %v12882_v39, %v6045_v2  ;;  %v2749_v23 = vpop.f32.mrf.mxu0  ;;  %v5936_v39 = vld [vmem:[#allocation2 + $0x78] sm:$0xe]  ;;  %v3253_v11 = vld [vmem:[#allocation4 + $0x30] sm:$0xff] }
 0x194   : > { %2349 = vst.msk [vmem:[#allocation4 + $0xe8] sm:$0xff] %vm1526_vm1, %v2317_v37  ;;  %v6049_v19 = vsel %vm15123_vm10, %v6047_v15, %v6048_v20  ;;  %v6054_v12 = vrot.slane %v6052_v62, 4  ;;  %v6059_v6 = vrot.slane %v16123_v50, 5  ;;  %v3279_v40 = vadd.f32 %v3247_v25, %v3120_v13  ;;  %v5938_v33 = vld [vmem:[#allocation2 + $0x80] sm:$0x1]  ;;  %v2841_v32 = vld [vmem:[#allocation4 + $0x80] sm:$0xff] }
 0x195   : > { %2903 = vst.msk [vmem:[#allocation4 + $0x70] sm:$0xff] %vm1526_vm1, %v2871_v52  ;;  %3313 = vst.msk [vmem:[#allocation4 + $0x10] sm:$0xff] %vm1526_vm1, %v3281_v30  ;;  %v6053_v9 = vsel %vm15123_vm10, %v12883_v8, %v6052_v62  ;;  %v2869_v3 = vadd.f32 %v2837_v14, %v2746_v41  ;;  %v13785_v61 = vpop.f32.mrf.mxu1  ;;  %v2872_v17 = vadd.f32 %v13763_v42, %v2840_v48  ;;  %v12884_v18 = vrot.slane %v16130_v53, 9  ;;  %v16153_v43 = vld [vmem:[#allocation2 + $0x88] sm:$0xf]  ;;  %v3251_v26 = vld [vmem:[#allocation4 + $0x20] sm:$0xff] }
 0x196   : > { %v6056_v21 = vsel %vm15123_vm10, %v6054_v12, %v6055_v10  ;;  %v2870_v24 = vadd.f32 %v2838_v16, %v2749_v23  ;;  %3311 = vst.msk [vmem:[#allocation4] sm:$0xff] %vm1526_vm1, %v3279_v40  ;;  %v3282_v47 = vadd.f32 %v13785_v61, %v3250_v5  ;;  %v12899_v35 = vcombine.low %v6046_v45, %v6049_v19  ;;  %v16156_v38 = vld [vmem:[#allocation2 + $0x94] sm:$0xf]  ;;  %v3254_v63 = vld [vmem:[#allocation4 + $0x38] sm:$0xff]  ;;  %v5939_v22 = vld [vmem:[#allocation2 + $0x84] sm:$0xe] }
 0x197   : > { %2901 = vst.msk [vmem:[#allocation4 + $0x60] sm:$0xff] %vm1526_vm1, %v2869_v3  ;;  %v6066_v34 = vrot.slane %v16139_v54, 5  ;;  %v3123_v0 = vpop.f32.mrf.mxu1  ;;  %v12900_v55 = vcombine.low %v6053_v9, %v6056_v21  ;;  %v6061_v49 = vrot.slane %v6059_v6, 4  ;;  %v6062_v51 = vrot.slane %v5935_v36, 5  ;;  %2904 = vst.msk [vmem:[#allocation4 + $0x78] sm:$0xff] %vm1526_vm1, %v2872_v17  ;;  %v2842_v42 = vld [vmem:[#allocation4 + $0x88] sm:$0xff] }
 0x198   : > { %13957 = vmatmul.mubr.msk.bf16.gmra.mxu0 %vm1312_vm9, %v12897_v4  ;;  %v13766_v4 = vpop.f32.mrf.mxu0  ;;  %2902 = vst.msk [vmem:[#allocation4 + $0x68] sm:$0xff] %vm1526_vm1, %v2870_v24  ;;  %3314 = vst.msk [vmem:[#allocation4 + $0x18] sm:$0xff] %vm1526_vm1, %v3282_v47  ;;  %v3280_v20 = vadd.f32 %v3248_v46, %v3123_v0  ;;  %v12885_v28 = vrot.slane %v5936_v39, 9  ;;  %v6069_v1 = vrot.slane %v5938_v33, 5  ;;  %v6060_v50 = vsel %vm15123_vm10, %v12884_v18, %v6059_v6  ;;  %v5941_v30 = vld [vmem:[#allocation2 + $0x8c] sm:$0x1] }
 0x199   : > { %13960 = vmatprep.mubr.msk.bf16.mxu0 %vm1312_vm9, %v12898_v56  ;;  %v2875_v2 = vadd.f32 %v13766_v4, %v2843_v29  ;;  %v6068_v44 = vrot.slane %v6066_v34, 4  ;;  %v13788_v31 = vpop.f32.mrf.mxu1  ;;  %v2844_v56 = vld [vmem:[#allocation4 + $0x98] sm:$0xff]  ;;  %v6063_v41 = vsel %vm15123_vm10, %v6061_v49, %v6062_v51  ;;  %v6073_v25 = vrot.slane %v16153_v43, 5  ;;  %v3252_v45 = vld [vmem:[#allocation4 + $0x28] sm:$0xff]  ;;  %v5942_v12 = vld [vmem:[#allocation2 + $0x90] sm:$0xe] }
 0x19a   : > { %v2762_v27 = vpop.f32.mrf.mxu0  ;;  %3312 = vst.msk [vmem:[#allocation4 + $0x8] sm:$0xff] %vm1526_vm1, %v3280_v20  ;;  %v3285_v60 = vadd.f32 %v13788_v31, %v3253_v11  ;;  %v6067_v10 = vsel %vm15123_vm10, %v12885_v28, %v6066_v34  ;;  %v6080_v13 = vrot.slane %v16156_v38, 5  ;;  %v5944_v6 = vld [vmem:[#allocation2 + $0x98] sm:$0x1]  ;;  %v12901_v54 = vcombine.low %v6060_v50, %v6063_v41  ;;  %v2847_v36 = vld [vmem:[#allocation4 + $0xb0] sm:$0xff]  ;;  %v3255_v34 = vld [vmem:[#allocation4 + $0x40] sm:$0xff] }
 0x19b   : > { %2907 = vst.msk [vmem:[#allocation4 + $0x90] sm:$0xff] %vm1526_vm1, %v2875_v2  ;;  %v2873_v57 = vadd.f32 %v2841_v32, %v2762_v27  ;;  %v3136_v15 = vpop.f32.mrf.mxu1  ;;  %v6070_v52 = vsel %vm15123_vm10, %v6068_v44, %v6069_v1  ;;  %v12886_v40 = vrot.slane %v5939_v22, 9  ;;  %v3257_v48 = vld [vmem:[#allocation4 + $0x50] sm:$0xff]  ;;  %v6075_v16 = vrot.slane %v6073_v25, 4  ;;  %v16180_v29 = vld [vmem:[#allocation2 + $0xac] sm:$0xf] }
 0x19c   : > { %v13767_v37 = vpop.f32.mrf.mxu0  ;;  %3317 = vst.msk [vmem:[#allocation4 + $0x30] sm:$0xff] %vm1526_vm1, %v3285_v60  ;;  %v3283_v62 = vadd.f32 %v3251_v26, %v3136_v15  ;;  %v12902_v23 = vcombine.low %v6067_v10, %v6070_v52  ;;  %v6076_v61 = vrot.slane %v5941_v30, 5  ;;  %v12887_v17 = vrot.slane %v5942_v12, 9  ;;  %v16177_v33 = vld [vmem:[#allocation2 + $0xa0] sm:$0xf]  ;;  %v3258_v51 = vld [vmem:[#allocation4 + $0x58] sm:$0xff] }
 0x19d   : > { %2905 = vst.msk [vmem:[#allocation4 + $0x80] sm:$0xff] %vm1526_vm1, %v2873_v57  ;;  %v2876_v8 = vadd.f32 %v13767_v37, %v2844_v56  ;;  %v13789_v5 = vpop.f32.mrf.mxu1  ;;  %v6082_v24 = vrot.slane %v6080_v13, 4  ;;  %v6083_v39 = vrot.slane %v5944_v6, 5  ;;  %v6074_v2 = vsel %vm15123_vm10, %v12886_v40, %v6073_v25  ;;  %v5945_v28 = vld [vmem:[#allocation2 + $0x9c] sm:$0xe]  ;;  %v3261_v10 = vld [vmem:[#allocation4 + $0x70] sm:$0xff] }
 0x19e   : > { %v2765_v53 = vpop.f32.mrf.mxu0  ;;  %3315 = vst.msk [vmem:[#allocation4 + $0x20] sm:$0xff] %vm1526_vm1, %v3283_v62  ;;  %v3286_v14 = vadd.f32 %v13789_v5, %v3254_v63  ;;  %v6077_v20 = vsel %vm15123_vm10, %v6075_v16, %v6076_v61  ;;  %v6087_v44 = vrot.slane %v16177_v33, 5  ;;  %v6081_v27 = vsel %vm15123_vm10, %v12887_v17, %v6080_v13  ;;  %v5947_v31 = vld [vmem:[#allocation2 + $0xa4] sm:$0x1]  ;;  %v2846_v57 = vld [vmem:[#allocation4 + $0xa8] sm:$0xff]  ;;  %v3259_v40 = vld [vmem:[#allocation4 + $0x60] sm:$0xff] }
 0x19f   : > { %2908 = vst.msk [vmem:[#allocation4 + $0x98] sm:$0xff] %vm1526_vm1, %v2876_v8  ;;  %v2874_v19 = vadd.f32 %v2842_v42, %v2765_v53  ;;  %v3139_v3 = vpop.f32.mrf.mxu1  ;;  %v6084_v32 = vsel %vm15123_vm10, %v6082_v24, %v6083_v39  ;;  %v6094_v38 = vrot.slane %v16180_v29, 5  ;;  %v3256_v37 = vld [vmem:[#allocation4 + $0x48] sm:$0xff]  ;;  %v5948_v15 = vld [vmem:[#allocation2 + $0xa8] sm:$0xe]  ;;  %v12903_v41 = vcombine.low %v6074_v2, %v6077_v20  ;;  %v2851_v8 = vld [vmem:[#allocation4 + $0xd0] sm:$0xff] }
 0x1a0   : > { %13961 = vmatmul.mubr.msk.bf16.gmra.mxu0 %vm1312_vm9, %v12899_v35  ;;  %v13770_v9 = vpop.f32.mrf.mxu0  ;;  %3318 = vst.msk [vmem:[#allocation4 + $0x38] sm:$0xff] %vm1526_vm1, %v3286_v14  ;;  %v3284_v21 = vadd.f32 %v3252_v45, %v3139_v3  ;;  %v2845_v35 = vld [vmem:[#allocation4 + $0xa0] sm:$0xff]  ;;  %v12888_v22 = vrot.slane %v5945_v28, 9  ;;  %v12904_v52 = vcombine.low %v6081_v27, %v6084_v32  ;;  %v6089_v30 = vrot.slane %v6087_v44, 4  ;;  %v16201_v12 = vld [vmem:[#allocation2 + $0xb8] sm:$0xf] }
 0x1a1   : > { %13964 = vmatprep.mubr.msk.bf16.mxu0 %vm1312_vm9, %v12900_v55  ;;  %2906 = vst.msk [vmem:[#allocation4 + $0x88] sm:$0xff] %vm1526_vm1, %v2874_v19  ;;  %v2879_v46 = vadd.f32 %v13770_v9, %v2847_v36  ;;  %v13792_v18 = vpop.f32.mrf.mxu1  ;;  %v2848_v55 = vld [vmem:[#allocation4 + $0xb8] sm:$0xff]  ;;  %v5950_v63 = vld [vmem:[#allocation2 + $0xb0] sm:$0x1]  ;;  %v6090_v53 = vrot.slane %v5947_v31, 5  ;;  %v12889_v5 = vrot.slane %v5948_v15, 9 }
 0x1a2   : > { %v2778_v47 = vpop.f32.mrf.mxu0  ;;  %3316 = vst.msk [vmem:[#allocation4 + $0x28] sm:$0xff] %vm1526_vm1, %v3284_v21  ;;  %v3289_v0 = vadd.f32 %v13792_v18, %v3257_v48  ;;  %v6096_v45 = vrot.slane %v6094_v38, 4  ;;  %v6097_v19 = vrot.slane %v5950_v63, 5  ;;  %v2849_v14 = vld [vmem:[#allocation4 + $0xc0] sm:$0xff]  ;;  %v16204_v36 = vld [vmem:[#allocation2 + $0xc4] sm:$0xf] }
 0x1a3   : > { %2911 = vst.msk [vmem:[#allocation4 + $0xb0] sm:$0xff] %vm1526_vm1, %v2879_v46  ;;  %v2877_v4 = vadd.f32 %v2845_v35, %v2778_v47  ;;  %v3152_v49 = vpop.f32.mrf.mxu1  ;;  %v3262_v61 = vld [vmem:[#allocation4 + $0x78] sm:$0xff]  ;;  %v6088_v46 = vsel %vm15123_vm10, %v12888_v22, %v6087_v44  ;;  %v6091_v21 = vsel %vm15123_vm10, %v6089_v30, %v6090_v53  ;;  %v5951_v17 = vld [vmem:[#allocation2 + $0xb4] sm:$0xe]  ;;  %v6101_v24 = vrot.slane %v16201_v12, 5  ;;  %v3265_v27 = vld [vmem:[#allocation4 + $0x90] sm:$0xff] }
 0x1a4   : > { %v13771_v11 = vpop.f32.mrf.mxu0  ;;  %3321 = vst.msk [vmem:[#allocation4 + $0x50] sm:$0xff] %vm1526_vm1, %v3289_v0  ;;  %v3287_v43 = vadd.f32 %v3255_v34, %v3152_v49  ;;  %v6095_v47 = vsel %vm15123_vm10, %v12889_v5, %v6094_v38  ;;  %v6098_v35 = vsel %vm15123_vm10, %v6096_v45, %v6097_v19  ;;  %v5953_v18 = vld [vmem:[#allocation2 + $0xbc] sm:$0x1]  ;;  %v6108_v29 = vrot.slane %v16204_v36, 5  ;;  %v5954_v49 = vld [vmem:[#allocation2 + $0xc0] sm:$0xe] }
 0x1a5   : > { %2909 = vst.msk [vmem:[#allocation4 + $0xa0] sm:$0xff] %vm1526_vm1, %v2877_v4  ;;  %v2880_v1 = vadd.f32 %v13771_v11, %v2848_v55  ;;  %v13793_v60 = vpop.f32.mrf.mxu1  ;;  %v2850_v4 = vld [vmem:[#allocation4 + $0xc8] sm:$0xff]  ;;  %v12905_v20 = vcombine.low %v6088_v46, %v6091_v21  ;;  %v12890_v28 = vrot.slane %v5951_v17, 9  ;;  %v12906_v32 = vcombine.low %v6095_v47, %v6098_v35  ;;  %v16224_v38 = vld [vmem:[#allocation2 + $0xd0] sm:$0xf]  ;;  %v4039_v17 = vld [vmem:[#allocation4 + $0x10] sm:$0xff] }
 0x1a6   : > { %v2781_v26 = vpop.f32.mrf.mxu0  ;;  %3319 = vst.msk [vmem:[#allocation4 + $0x40] sm:$0xff] %vm1526_vm1, %v3287_v43  ;;  %v3290_v50 = vadd.f32 %v13793_v60, %v3258_v51  ;;  %v3260_v11 = vld [vmem:[#allocation4 + $0x68] sm:$0xff]  ;;  %v5956_v51 = vld [vmem:[#allocation2 + $0xc8] sm:$0x1]  ;;  %v6103_v31 = vrot.slane %v6101_v24, 4  ;;  %v3263_v22 = vld [vmem:[#allocation4 + $0x80] sm:$0xff] }
 0x1a7   : > { %2912 = vst.msk [vmem:[#allocation4 + $0xb8] sm:$0xff] %vm1526_vm1, %v2880_v1  ;;  %v2878_v56 = vadd.f32 %v2846_v57, %v2781_v26  ;;  %v3155_v62 = vpop.f32.mrf.mxu1  ;;  %v2855_v1 = vld [vmem:[#allocation4 + $0xf0] sm:$0xff]  ;;  %v6104_v26 = vrot.slane %v5953_v18, 5  ;;  %v6111_v15 = vrot.slane %v5956_v51, 5  ;;  %v3266_v53 = vld [vmem:[#allocation4 + $0x98] sm:$0xff]  ;;  %vm402_vm4 = vcmask 60416  }
 0x1a8   : > { %13965 = vmatmul.mubr.msk.bf16.gmra.mxu0 %vm1312_vm9, %v12901_v54  ;;  %v13774_v25 = vpop.f32.mrf.mxu0  ;;  %3322 = vst.msk [vmem:[#allocation4 + $0x58] sm:$0xff] %vm1526_vm1, %v3290_v50  ;;  %v3288_v13 = vadd.f32 %v3256_v37, %v3155_v62  ;;  %v12891_v37 = vrot.slane %v5954_v49, 9  ;;  %v2853_v50 = vld [vmem:[#allocation4 + $0xe0] sm:$0xff]  ;;  %v6115_v62 = vrot.slane %v16224_v38, 5  ;;  %v5957_v5 = vld [vmem:[#allocation2 + $0xcc] sm:$0xe]  ;;  %vm16545_vm6 = vmand %vm402_vm4, %vm346_vm5 }
 0x1a9   : > { %13968 = vmatprep.mubr.msk.bf16.mxu0 %vm1312_vm9, %v12902_v23  ;;  %2910 = vst.msk [vmem:[#allocation4 + $0xa8] sm:$0xff] %vm1526_vm1, %v2878_v56  ;;  %v2883_v42 = vadd.f32 %v13774_v25, %v2851_v8  ;;  %v13796_v54 = vpop.f32.mrf.mxu1  ;;  %v2852_v23 = vld [vmem:[#allocation4 + $0xd8] sm:$0xff]  ;;  %v6110_v56 = vrot.slane %v6108_v29, 4  ;;  %v3264_v36 = vld [vmem:[#allocation4 + $0x88] sm:$0xff] }
 0x1aa   : > { %v2794_v6 = vpop.f32.mrf.mxu0  ;;  %3320 = vst.msk [vmem:[#allocation4 + $0x48] sm:$0xff] %vm1526_vm1, %v3288_v13  ;;  %v3293_v3 = vadd.f32 %v13796_v54, %v3261_v10  ;;  %v6105_v13 = vsel %vm15123_vm10, %v6103_v31, %v6104_v26  ;;  %v6109_v12 = vsel %vm15123_vm10, %v12891_v37, %v6108_v29  ;;  %v6117_v46 = vrot.slane %v6115_v62, 4  ;;  %v4037_v29 = vld [vmem:[#allocation4] sm:$0xff]  ;;  %v4038_v31 = vld [vmem:[#allocation4 + $0x8] sm:$0xff] }
 0x1ab   : > { %2915 = vst.msk [vmem:[#allocation4 + $0xd0] sm:$0xff] %vm1526_vm1, %v2883_v42  ;;  %v2881_v9 = vadd.f32 %v2849_v14, %v2794_v6  ;;  %v3168_v16 = vpop.f32.mrf.mxu1  ;;  %v6102_v42 = vsel %vm15123_vm10, %v12890_v28, %v6101_v24  ;;  %v6112_v6 = vsel %vm15123_vm10, %v6110_v56, %v6111_v15  ;;  %v5959_v14 = vld [vmem:[#allocation2 + $0xd4] sm:$0x1]  ;;  %v4043_v15 = vld [vmem:[#allocation4 + $0x30] sm:$0xff] }
 0x1ac   : > { %v13775_v48 = vpop.f32.mrf.mxu0  ;;  %3325 = vst.msk [vmem:[#allocation4 + $0x70] sm:$0xff] %vm1526_vm1, %v3293_v3  ;;  %v3291_v33 = vadd.f32 %v3259_v40, %v3168_v16  ;;  %v2854_v40 = vld [vmem:[#allocation4 + $0xe8] sm:$0xff]  ;;  %v12907_v16 = vcombine.low %v6102_v42, %v6105_v13  ;;  %v6118_v47 = vrot.slane %v5959_v14, 5  ;;  %v4044_v42 = vld [vmem:[#allocation4 + $0x38] sm:$0xff] }
 0x1ad   : > { %2913 = vst.msk [vmem:[#allocation4 + $0xc0] sm:$0xff] %vm1526_vm1, %v2881_v9  ;;  %v2884_v39 = vadd.f32 %v13775_v48, %v2852_v23  ;;  %v13797_v0 = vpop.f32.mrf.mxu1  ;;  %v7181_v48 = vld [vmem:[%s18292_s6] sm:$0xf] }
 0x1ae   : > { %v2797_v34 = vpop.f32.mrf.mxu0  ;;  %3323 = vst.msk [vmem:[#allocation4 + $0x60] sm:$0xff] %vm1526_vm1, %v3291_v33  ;;  %v3294_v2 = vadd.f32 %v13797_v0, %v3262_v61  ;;  %v12892_v61 = vrot.slane %v5957_v5, 9  ;;  %14299 = vmatprep.subr.msk.bf16.mxu1 %vm7310_vm0, %v7181_v48  ;;  %v12908_v33 = vcombine.low %v6109_v12, %v6112_v6  ;;  %v7312_v18 = vsel %vm7310_vm0, %v7181_v48, 0  ;;  %v3270_v28 = vld [vmem:[#allocation4 + $0xb8] sm:$0xff]  ;;  %v4042_v6 = vld [vmem:[#allocation4 + $0x28] sm:$0xff] }
 0x1af   : > { %2916 = vst.msk [vmem:[#allocation4 + $0xd8] sm:$0xff] %vm1526_vm1, %v2884_v39  ;;  %v2882_v55 = vadd.f32 %v2850_v4, %v2797_v34  ;;  %v3171_v43 = vpop.f32.mrf.mxu1  ;;  %v3269_v39 = vld [vmem:[#allocation4 + $0xb0] sm:$0xff]  ;;  %13985 = vmatpush3.bf16.msra.mxu1 %v7312_v18 }
 0x1b0   : > { %13969 = vmatmul.mubr.msk.bf16.gmra.mxu0 %vm1312_vm9, %v12903_v41  ;;  %v13778_v44 = vpop.f32.mrf.mxu0  ;;  %3326 = vst.msk [vmem:[#allocation4 + $0x78] sm:$0xff] %vm1526_vm1, %v3294_v2  ;;  %v3292_v60 = vadd.f32 %v3260_v11, %v3171_v43  ;;  %v3267_v11 = vld [vmem:[#allocation4 + $0xa0] sm:$0xff]  ;;  %v4040_v2 = vld [vmem:[#allocation4 + $0x18] sm:$0xff] }
 0x1b1   : > { %13972 = vmatprep.mubr.msk.bf16.mxu0 %vm1312_vm9, %v12904_v52  ;;  %2914 = vst.msk [vmem:[#allocation4 + $0xc8] sm:$0xff] %vm1526_vm1, %v2882_v55  ;;  %v2887_v57 = vadd.f32 %v13778_v44, %v2855_v1  ;;  %v13800_v41 = vpop.f32.mrf.mxu1  ;;  %v2856_v52 = vld [vmem:[#allocation4 + $0xf8] sm:$0xff]  ;;  %v6116_v44 = vsel %vm15123_vm10, %v12892_v61, %v6115_v62  ;;  %v6119_v1 = vsel %vm15123_vm10, %v6117_v46, %v6118_v47 }
 0x1b2   : > { %v2810_v63 = vpop.f32.mrf.mxu0  ;;  %3324 = vst.msk [vmem:[#allocation4 + $0x68] sm:$0xff] %vm1526_vm1, %v3292_v60  ;;  %v3297_v8 = vadd.f32 %v13800_v41, %v3265_v27  ;;  %v12909_v37 = vcombine.low %v6116_v44, %v6119_v1 }
 0x1b3   : > { %2919 = vst.msk [vmem:[#allocation4 + $0xf0] sm:$0xff] %vm1526_vm1, %v2887_v57  ;;  %v2885_v25 = vadd.f32 %v2853_v50, %v2810_v63  ;;  %v3184_v30 = vpop.f32.mrf.mxu1  ;;  %v3268_v57 = vld [vmem:[#allocation4 + $0xa8] sm:$0xff]  ;;  %v3273_v50 = vld [vmem:[#allocation4 + $0xd0] sm:$0xff] }
 0x1b4   : > { %v13779_v10 = vpop.f32.mrf.mxu0  ;;  %3329 = vst.msk [vmem:[#allocation4 + $0x90] sm:$0xff] %vm1526_vm1, %v3297_v8  ;;  %v3295_v19 = vadd.f32 %v3263_v22, %v3184_v30  ;;  %v4041_v8 = vld [vmem:[#allocation4 + $0x20] sm:$0xff] }
 0x1b5   : > { %2917 = vst.msk [vmem:[#allocation4 + $0xe0] sm:$0xff] %vm1526_vm1, %v2885_v25  ;;  %v2888_v45 = vadd.f32 %v13779_v10, %v2856_v52  ;;  %v13801_v9 = vpop.f32.mrf.mxu1  ;;  %v3271_v10 = vld [vmem:[#allocation4 + $0xc0] sm:$0xff] }
 0x1b6   : > { %v2813_v54 = vpop.f32.mrf.mxu0  ;;  %3327 = vst.msk [vmem:[#allocation4 + $0x80] sm:$0xff] %vm1526_vm1, %v3295_v19  ;;  %v3298_v23 = vadd.f32 %v13801_v9, %v3266_v53  ;;  %v3274_v5 = vld [vmem:[#allocation4 + $0xd8] sm:$0xff] }
 0x1b7   : > { %2920 = vst.msk [vmem:[#allocation4 + $0xf8] sm:$0xff] %vm1526_vm1, %v2888_v45  ;;  %v2886_v3 = vadd.f32 %v2854_v40, %v2813_v54  ;;  %v3187_v24 = vpop.f32.mrf.mxu1 }
 0x1b8   : > { %13973 = vmatmul.mubr.msk.bf16.gmra.mxu0 %vm1312_vm9, %v12905_v20  ;;  %v13818_v21 = vpop.f32.mrf.mxu0  ;;  %3330 = vst.msk [vmem:[#allocation4 + $0x98] sm:$0xff] %vm1526_vm1, %v3298_v23  ;;  %v3296_v34 = vadd.f32 %v3264_v36, %v3187_v24  ;;  %v3272_v54 = vld [vmem:[#allocation4 + $0xc8] sm:$0xff] }
 0x1b9   : > { %13976 = vmatprep.mubr.msk.bf16.mxu0 %vm1312_vm9, %v12906_v32  ;;  %2918 = vst.msk [vmem:[#allocation4 + $0xe8] sm:$0xff] %vm1526_vm1, %v2886_v3  ;;  %v4071_v35 = vadd.f32 %v13818_v21, %v4039_v17  ;;  %v13804_v0 = vpop.f32.mrf.mxu1  ;;  %v4047_v3 = vld [vmem:[#allocation4 + $0x50] sm:$0xff]  ;;  %v4045_v21 = vld [vmem:[#allocation4 + $0x40] sm:$0xff] }
 0x1ba   : > { %v3910_v4 = vpop.f32.mrf.mxu0  ;;  %3328 = vst.msk [vmem:[#allocation4 + $0x88] sm:$0xff] %vm1526_vm1, %v3296_v34  ;;  %v3301_v49 = vadd.f32 %v13804_v0, %v3269_v39  ;;  %v3277_v23 = vld [vmem:[#allocation4 + $0xf0] sm:$0xff] }
 0x1bb   : > { %4103 = vst.msk [vmem:[#allocation4 + $0x10] sm:$0xff] %vm1526_vm1, %v4071_v35  ;;  %v4069_v55 = vadd.f32 %v4037_v29, %v3910_v4  ;;  %v3200_v20 = vpop.f32.mrf.mxu1  ;;  %v4048_v35 = vld [vmem:[#allocation4 + $0x58] sm:$0xff] }
 0x1bc   : > { %v13819_v51 = vpop.f32.mrf.mxu0  ;;  %3333 = vst.msk [vmem:[#allocation4 + $0xb0] sm:$0xff] %vm1526_vm1, %v3301_v49  ;;  %v3299_v27 = vadd.f32 %v3267_v11, %v3200_v20  ;;  %v3275_v24 = vld [vmem:[#allocation4 + $0xe0] sm:$0xff]  ;;  %v4046_v11 = vld [vmem:[#allocation4 + $0x48] sm:$0xff] }
 0x1bd   : > { %4101 = vst.msk [vmem:[#allocation4] sm:$0xff] %vm1526_vm1, %v4069_v55  ;;  %v4072_v43 = vadd.f32 %v13819_v51, %v4040_v2  ;;  %v13805_v26 = vpop.f32.mrf.mxu1 }
 0x1be   : > { %v3913_v32 = vpop.f32.mrf.mxu0  ;;  %3331 = vst.msk [vmem:[#allocation4 + $0xa0] sm:$0xff] %vm1526_vm1, %v3299_v27  ;;  %v3302_v60 = vadd.f32 %v13805_v26, %v3270_v28  ;;  %v3278_v34 = vld [vmem:[#allocation4 + $0xf8] sm:$0xff]  ;;  %v4051_v28 = vld [vmem:[#allocation4 + $0x70] sm:$0xff] }
 0x1bf   : > { %4104 = vst.msk [vmem:[#allocation4 + $0x18] sm:$0xff] %vm1526_vm1, %v4072_v43  ;;  %v4070_v38 = vadd.f32 %v4038_v31, %v3913_v32  ;;  %v3203_v63 = vpop.f32.mrf.mxu1  ;;  %v4049_v31 = vld [vmem:[#allocation4 + $0x60] sm:$0xff] }
 0x1c0   : > { %13977 = vmatmul.mubr.msk.bf16.gmra.mxu0 %vm1312_vm9, %v12907_v16  ;;  %v13822_v56 = vpop.f32.mrf.mxu0  ;;  %3334 = vst.msk [vmem:[#allocation4 + $0xb8] sm:$0xff] %vm1526_vm1, %v3302_v60  ;;  %v3300_v22 = vadd.f32 %v3268_v57, %v3203_v63  ;;  %v3276_v49 = vld [vmem:[#allocation4 + $0xe8] sm:$0xff] }
 0x1c1   : > { %13980 = vmatprep.mubr.msk.bf16.mxu0 %vm1312_vm9, %v12908_v33  ;;  %4102 = vst.msk [vmem:[#allocation4 + $0x8] sm:$0xff] %vm1526_vm1, %v4070_v38  ;;  %v4075_v41 = vadd.f32 %v13822_v56, %v4043_v15  ;;  %v13808_v62 = vpop.f32.mrf.mxu1  ;;  %v4052_v56 = vld [vmem:[#allocation4 + $0x78] sm:$0xff] }
 0x1c2   : > { %v3926_v25 = vpop.f32.mrf.mxu0  ;;  %3332 = vst.msk [vmem:[#allocation4 + $0xa8] sm:$0xff] %vm1526_vm1, %v3300_v22  ;;  %v3305_v30 = vadd.f32 %v13808_v62, %v3273_v50  ;;  %v4605_v1 = vld [vmem:[#allocation4 + $0x10] sm:$0xff] }
 0x1c3   : > { %4107 = vst.msk [vmem:[#allocation4 + $0x30] sm:$0xff] %vm1526_vm1, %v4075_v41  ;;  %v4073_v52 = vadd.f32 %v4041_v8, %v3926_v25  ;;  %v3216_v13 = vpop.f32.mrf.mxu1  ;;  %v4050_v25 = vld [vmem:[#allocation4 + $0x68] sm:$0xff] }
 0x1c4   : > { %v13823_v53 = vpop.f32.mrf.mxu0  ;;  %3337 = vst.msk [vmem:[#allocation4 + $0xd0] sm:$0xff] %vm1526_vm1, %v3305_v30  ;;  %v3303_v19 = vadd.f32 %v3271_v10, %v3216_v13  ;;  %v4603_v57 = vld [vmem:[#allocation4] sm:$0xff] }
 0x1c5   : > { %4105 = vst.msk [vmem:[#allocation4 + $0x20] sm:$0xff] %vm1526_vm1, %v4073_v52  ;;  %v4076_v45 = vadd.f32 %v13823_v53, %v4044_v42  ;;  %v13809_v14 = vpop.f32.mrf.mxu1  ;;  %v4055_v53 = vld [vmem:[#allocation4 + $0x90] sm:$0xff] }
 0x1c6   : > { %v3929_v12 = vpop.f32.mrf.mxu0  ;;  %3335 = vst.msk [vmem:[#allocation4 + $0xc0] sm:$0xff] %vm1526_vm1, %v3303_v19  ;;  %v3306_v9 = vadd.f32 %v13809_v14, %v3274_v5  ;;  %v4606_v63 = vld [vmem:[#allocation4 + $0x18] sm:$0xff] }
 0x1c7   : > { %4108 = vst.msk [vmem:[#allocation4 + $0x38] sm:$0xff] %vm1526_vm1, %v4076_v45  ;;  %v4074_v40 = vadd.f32 %v4042_v6, %v3929_v12  ;;  %v3219_v48 = vpop.f32.mrf.mxu1  ;;  %v4053_v12 = vld [vmem:[#allocation4 + $0x80] sm:$0xff] }
 0x1c8   : > { %13981 = vmatmul.mubr.msk.bf16.gmra.mxu0 %vm1312_vm9, %v12909_v37  ;;  %v13826_v36 = vpop.f32.mrf.mxu0  ;;  %3338 = vst.msk [vmem:[#allocation4 + $0xd8] sm:$0xff] %vm1526_vm1, %v3306_v9  ;;  %v3304_v61 = vadd.f32 %v3272_v54, %v3219_v48  ;;  %v4604_v62 = vld [vmem:[#allocation4 + $0x8] sm:$0xff] }
 0x1c9   : > { %4106 = vst.msk [vmem:[#allocation4 + $0x28] sm:$0xff] %vm1526_vm1, %v4074_v40  ;;  %v4079_v16 = vadd.f32 %v13826_v36, %v4047_v3  ;;  %v13812_v17 = vpop.f32.mrf.mxu1  ;;  %v4056_v36 = vld [vmem:[#allocation4 + $0x98] sm:$0xff] }
 0x1ca   : > { %v3942_v46 = vpop.f32.mrf.mxu0  ;;  %3336 = vst.msk [vmem:[#allocation4 + $0xc8] sm:$0xff] %vm1526_vm1, %v3304_v61  ;;  %v3309_v33 = vadd.f32 %v13812_v17, %v3277_v23  ;;  %v4609_v13 = vld [vmem:[#allocation4 + $0x30] sm:$0xff] }
 0x1cb   : > { %4111 = vst.msk [vmem:[#allocation4 + $0x50] sm:$0xff] %vm1526_vm1, %v4079_v16  ;;  %v4077_v39 = vadd.f32 %v4045_v21, %v3942_v46  ;;  %v3232_v18 = vpop.f32.mrf.mxu1  ;;  %v4054_v46 = vld [vmem:[#allocation4 + $0x88] sm:$0xff] }
 0x1cc   : > { %v13827_v47 = vpop.f32.mrf.mxu0  ;;  %3341 = vst.msk [vmem:[#allocation4 + $0xf0] sm:$0xff] %vm1526_vm1, %v3309_v33  ;;  %v3307_v29 = vadd.f32 %v3275_v24, %v3232_v18  ;;  %v4607_v14 = vld [vmem:[#allocation4 + $0x20] sm:$0xff] }
 0x1cd   : > { %4109 = vst.msk [vmem:[#allocation4 + $0x40] sm:$0xff] %vm1526_vm1, %v4077_v39  ;;  %v4080_v4 = vadd.f32 %v13827_v47, %v4048_v35  ;;  %v13813_v55 = vpop.f32.mrf.mxu1  ;;  %v4059_v47 = vld [vmem:[#allocation4 + $0xb0] sm:$0xff] }
 0x1ce   : > { %v3945_v0 = vpop.f32.mrf.mxu0  ;;  %3339 = vst.msk [vmem:[#allocation4 + $0xe0] sm:$0xff] %vm1526_vm1, %v3307_v29  ;;  %v3310_v2 = vadd.f32 %v13813_v55, %v3278_v34  ;;  %v4610_v48 = vld [vmem:[#allocation4 + $0x38] sm:$0xff] }
 0x1cf   : > { %4112 = vst.msk [vmem:[#allocation4 + $0x58] sm:$0xff] %vm1526_vm1, %v4080_v4  ;;  %v4078_v51 = vadd.f32 %v4046_v11, %v3945_v0  ;;  %v3235_v44 = vpop.f32.mrf.mxu1  ;;  %v416_v4 = vld [vmem:[#allocation3 + $0xc] sm:$0x1]  ;;  %v4057_v11 = vld [vmem:[#allocation4 + $0xa0] sm:$0xff] }
 0x1d0   : > { %v13830_v20 = vpop.f32.mrf.mxu0  ;;  %3342 = vst.msk [vmem:[#allocation4 + $0xf8] sm:$0xff] %vm1526_vm1, %v3310_v2  ;;  %v3308_v27 = vadd.f32 %v3276_v49, %v3235_v44  ;;  %v4608_v17 = vld [vmem:[#allocation4 + $0x28] sm:$0xff]  ;;  %v417_v55 = vsel %vm14519_vm7, 0, %v416_v4  ;;  %v4060_v44 = vld [vmem:[#allocation4 + $0xb8] sm:$0xff] }
 0x1d1   : > { %4110 = vst.msk [vmem:[#allocation4 + $0x48] sm:$0xff] %vm1526_vm1, %v4078_v51  ;;  %v4083_v43 = vadd.f32 %v13830_v20, %v4051_v28  ;;  %v13852_v26 = vpop.f32.mrf.mxu1  ;;  %418 = vst [vmem:[#allocation3 + $0xc] sm:$0x1] %v417_v55 }
 0x1d2   : > { %v3958_v32 = vpop.f32.mrf.mxu0  ;;  %3340 = vst.msk [vmem:[#allocation4 + $0xe8] sm:$0xff] %vm1526_vm1, %v3308_v27  ;;  %v4637_v60 = vadd.f32 %v13852_v26, %v4605_v1  ;;  %v4613_v18 = vld [vmem:[#allocation4 + $0x50] sm:$0xff]  ;;  %v18329_v1 = vmov 0   ;;  %v471_v26 = vld [vmem:[#allocation3 + $0x14] sm:$0x1] }
 0x1d3   : > { %4115 = vst.msk [vmem:[#allocation4 + $0x70] sm:$0xff] %vm1526_vm1, %v4083_v43  ;;  %v4081_v38 = vadd.f32 %v4049_v31, %v3958_v32  ;;  %v4476_v15 = vpop.f32.mrf.mxu1  ;;  %v18330_v43 = vmov 0 }
 0x1d4   : > { %v13831_v37 = vpop.f32.mrf.mxu0  ;;  %4669 = vst.msk [vmem:[#allocation4 + $0x10] sm:$0xff] %vm1526_vm1, %v4637_v60  ;;  %v4635_v41 = vadd.f32 %v4603_v57, %v4476_v15  ;;  %v4611_v51 = vld [vmem:[#allocation4 + $0x40] sm:$0xff]  ;;  %v18331_v43 = vsel %vm16312_vm8, 4294967295, %v18330_v43  ;;  %v4058_v60 = vld [vmem:[#allocation4 + $0xa8] sm:$0xff] }
 0x1d5   : > { %4113 = vst.msk [vmem:[#allocation4 + $0x60] sm:$0xff] %vm1526_vm1, %v4081_v38  ;;  %v4084_v50 = vadd.f32 %v13831_v37, %v4052_v56  ;;  %v13853_v8 = vpop.f32.mrf.mxu1  ;;  %18332 = vst [vmem:[#allocation8_spill] sm:$0xff] %v18331_v43  ;;  %v472_v37 = vsel %vm16312_vm8, 0, %v471_v26 }
 0x1d6   : > { %v3961_v22 = vpop.f32.mrf.mxu0  ;;  %4667 = vst.msk [vmem:[#allocation4] sm:$0xff] %vm1526_vm1, %v4635_v41  ;;  %v4638_v52 = vadd.f32 %v13853_v8, %v4606_v63  ;;  %v4614_v32 = vld [vmem:[#allocation4 + $0x58] sm:$0xff]  ;;  %473 = vst [vmem:[#allocation3 + $0x14] sm:$0x1] %v472_v37 }
 0x1d7   : > { %4116 = vst.msk [vmem:[#allocation4 + $0x78] sm:$0xff] %vm1526_vm1, %v4084_v50  ;;  %v4082_v10 = vadd.f32 %v4050_v25, %v3961_v22  ;;  %v4479_v42 = vpop.f32.mrf.mxu1  ;;  %v419_v50 = vld [vmem:[#allocation3 + $0x18] sm:$0x1] }
 0x1d8   : > { %v13834_v30 = vpop.f32.mrf.mxu0  ;;  %4670 = vst.msk [vmem:[#allocation4 + $0x18] sm:$0xff] %vm1526_vm1, %v4638_v52  ;;  %v4636_v45 = vadd.f32 %v4604_v62, %v4479_v42  ;;  %v4612_v15 = vld [vmem:[#allocation4 + $0x48] sm:$0xff]  ;;  %v420_v22 = vsel %vm14519_vm7, 0, %v419_v50 }
 0x1d9   : > { %4114 = vst.msk [vmem:[#allocation4 + $0x68] sm:$0xff] %vm1526_vm1, %v4082_v10  ;;  %v4087_v5 = vadd.f32 %v13834_v30, %v4055_v53  ;;  %v13856_v6 = vpop.f32.mrf.mxu1  ;;  %421 = vst [vmem:[#allocation3 + $0x18] sm:$0x1] %v420_v22  ;;  %v4063_v10 = vld [vmem:[#allocation4 + $0xd0] sm:$0xff] }
 0x1da   : > { %v3974_v19 = vpop.f32.mrf.mxu0  ;;  %4668 = vst.msk [vmem:[#allocation4 + $0x8] sm:$0xff] %vm1526_vm1, %v4636_v45  ;;  %v4641_v40 = vadd.f32 %v13856_v6, %v4609_v13  ;;  %v4617_v8 = vld [vmem:[#allocation4 + $0x70] sm:$0xff] }
 0x1db   : > { %4119 = vst.msk [vmem:[#allocation4 + $0x90] sm:$0xff] %vm1526_vm1, %v4087_v5  ;;  %v4085_v54 = vadd.f32 %v4053_v12, %v3974_v19  ;;  %v4492_v3 = vpop.f32.mrf.mxu1  ;;  %v4061_v12 = vld [vmem:[#allocation4 + $0xc0] sm:$0xff]  ;;  %v477_v6 = vld [vmem:[#allocation3 + $0x2c] sm:$0x1] }
 0x1dc   : > { %v13835_v9 = vpop.f32.mrf.mxu0  ;;  %4673 = vst.msk [vmem:[#allocation4 + $0x30] sm:$0xff] %vm1526_vm1, %v4641_v40  ;;  %v4639_v16 = vadd.f32 %v4607_v14, %v4492_v3  ;;  %v4615_v30 = vld [vmem:[#allocation4 + $0x60] sm:$0xff]  ;;  %v478_v40 = vsel %vm16312_vm8, 0, %v477_v6 }
 0x1dd   : > { %4117 = vst.msk [vmem:[#allocation4 + $0x80] sm:$0xff] %vm1526_vm1, %v4085_v54  ;;  %v4088_v23 = vadd.f32 %v13835_v9, %v4056_v36  ;;  %v13857_v21 = vpop.f32.mrf.mxu1  ;;  %479 = vst [vmem:[#allocation3 + $0x2c] sm:$0x1] %v478_v40 }
 0x1de   : > { %v3977_v61 = vpop.f32.mrf.mxu0  ;;  %4671 = vst.msk [vmem:[#allocation4 + $0x20] sm:$0xff] %vm1526_vm1, %v4639_v16  ;;  %v4642_v39 = vadd.f32 %v13857_v21, %v4610_v48  ;;  %v4618_v45 = vld [vmem:[#allocation4 + $0x78] sm:$0xff] }
 0x1df   : > { %4120 = vst.msk [vmem:[#allocation4 + $0x98] sm:$0xff] %vm1526_vm1, %v4088_v23  ;;  %v4086_v24 = vadd.f32 %v4054_v46, %v3977_v61  ;;  %v4495_v35 = vpop.f32.mrf.mxu1  ;;  %v4064_v48 = vld [vmem:[#allocation4 + $0xd8] sm:$0xff] }
 0x1e0   : > { %v13838_v33 = vpop.f32.mrf.mxu0  ;;  %4674 = vst.msk [vmem:[#allocation4 + $0x38] sm:$0xff] %vm1526_vm1, %v4642_v39  ;;  %v4640_v29 = vadd.f32 %v4608_v17, %v4495_v35  ;;  %v4616_v36 = vld [vmem:[#allocation4 + $0x68] sm:$0xff] }
 0x1e1   : > { %4118 = vst.msk [vmem:[#allocation4 + $0x88] sm:$0xff] %vm1526_vm1, %v4086_v24  ;;  %v4091_v34 = vadd.f32 %v13838_v33, %v4059_v47  ;;  %v13860_v49 = vpop.f32.mrf.mxu1  ;;  %v4062_v17 = vld [vmem:[#allocation4 + $0xc8] sm:$0xff] }
 0x1e2   : > { %v3990_v0 = vpop.f32.mrf.mxu0  ;;  %4672 = vst.msk [vmem:[#allocation4 + $0x28] sm:$0xff] %vm1526_vm1, %v4640_v29  ;;  %v4645_v20 = vadd.f32 %v13860_v49, %v4613_v18  ;;  %v4621_v46 = vld [vmem:[#allocation4 + $0x90] sm:$0xff] }
 0x1e3   : > { %4123 = vst.msk [vmem:[#allocation4 + $0xb0] sm:$0xff] %vm1526_vm1, %v4091_v34  ;;  %v4089_v2 = vadd.f32 %v4057_v11, %v3990_v0  ;;  %v4508_v27 = vpop.f32.mrf.mxu1  ;;  %v483_v0 = vld [vmem:[#allocation3 + $0x44] sm:$0x1] }
 0x1e4   : > { %v13839_v28 = vpop.f32.mrf.mxu0  ;;  %403 = vst.msk [vmem:[#allocation3] sm:$0xf] %vm402_vm4, %v18329_v1  ;;  %404 = vst.msk [vmem:[#allocation3 + $0x4] sm:$0xf] %vm402_vm4, %v18329_v1  ;;  %v4643_v57 = vadd.f32 %v4611_v51, %v4508_v27  ;;  %v4619_v47 = vld [vmem:[#allocation4 + $0x80] sm:$0xff]  ;;  %v484_v51 = vsel %vm16312_vm8, 0, %v483_v0 }
 0x1e5   : > { %408 = vst.msk [vmem:[#allocation3 + $0xcc] sm:$0xf] %vm402_vm4, %v18329_v1  ;;  %409 = vst.msk [vmem:[#allocation3 + $0xd0] sm:$0xf] %vm402_vm4, %v18329_v1  ;;  %v4092_v31 = vadd.f32 %v13839_v28, %v4060_v44  ;;  %v13861_v56 = vpop.f32.mrf.mxu1 }
 0x1e6   : > { %4121 = vst.msk [vmem:[#allocation4 + $0xa0] sm:$0xff] %vm1526_vm1, %v4089_v2  ;;  %4677 = vst.msk [vmem:[#allocation4 + $0x50] sm:$0xff] %vm1526_vm1, %v4645_v20  ;;  %v3993_v38 = vpop.f32.mrf.mxu0  ;;  %v4646_v41 = vadd.f32 %v13861_v56, %v4614_v32  ;;  %v4622_v34 = vld [vmem:[#allocation4 + $0x98] sm:$0xff]  ;;  %v422_v32 = vld [vmem:[#allocation3 + $0x24] sm:$0x1] }
 0x1e7   : > { %4124 = vst.msk [vmem:[#allocation4 + $0xb8] sm:$0xff] %vm1526_vm1, %v4092_v31  ;;  %v4090_v63 = vadd.f32 %v4058_v60, %v3993_v38  ;;  %4675 = vst.msk [vmem:[#allocation4 + $0x40] sm:$0xff] %vm1526_vm1, %v4643_v57  ;;  %v4511_v25 = vpop.f32.mrf.mxu1  ;;  %v425_v20 = vld [vmem:[#allocation3 + $0x30] sm:$0x1]  ;;  %v423_v57 = vsel %vm14519_vm7, 0, %v422_v32 }
 0x1e8   : > { %4678 = vst.msk [vmem:[#allocation4 + $0x58] sm:$0xff] %vm1526_vm1, %v4646_v41  ;;  %v4644_v62 = vadd.f32 %v4612_v15, %v4511_v25  ;;  %v13842_v53 = vpop.f32.mrf.mxu0  ;;  %v4620_v49 = vld [vmem:[#allocation4 + $0x88] sm:$0xff]  ;;  %485 = vst [vmem:[#allocation3 + $0x44] sm:$0x1] %v484_v51  ;;  %v426_v1 = vsel %vm14519_vm7, 0, %v425_v20 }
 0x1e9   : > { %4122 = vst.msk [vmem:[#allocation4 + $0xa8] sm:$0xff] %vm1526_vm1, %v4090_v63  ;;  %v13864_v52 = vpop.f32.mrf.mxu1  ;;  %v4095_v13 = vadd.f32 %v13842_v53, %v4063_v10  ;;  %427 = vst [vmem:[#allocation3 + $0x30] sm:$0x1] %v426_v1 }
 0x1ea   : > { %4676 = vst.msk [vmem:[#allocation4 + $0x48] sm:$0xff] %vm1526_vm1, %v4644_v62  ;;  %v4649_v42 = vadd.f32 %v13864_v52, %v4617_v8  ;;  %v4006_v19 = vpop.f32.mrf.mxu0  ;;  %v4625_v44 = vld [vmem:[#allocation4 + $0xb0] sm:$0xff]  ;;  %424 = vst [vmem:[#allocation3 + $0x24] sm:$0x1] %v423_v57 }
 0x1eb   : > { %v4524_v5 = vpop.f32.mrf.mxu1  ;;  %4127 = vst.msk [vmem:[#allocation4 + $0xd0] sm:$0xff] %vm1526_vm1, %v4095_v13  ;;  %v4093_v54 = vadd.f32 %v4061_v12, %v4006_v19  ;;  %v413_v4 = vld [vmem:[#allocation3] sm:$0x1]  ;;  %v468_v62 = vld [vmem:[#allocation3 + $0x8] sm:$0x1] }
 0x1ec   : > { %4681 = vst.msk [vmem:[#allocation4 + $0x70] sm:$0xff] %vm1526_vm1, %v4649_v42  ;;  %v4647_v14 = vadd.f32 %v4615_v30, %v4524_v5  ;;  %v13843_v3 = vpop.f32.mrf.mxu0  ;;  %v414_v11 = vsel %vm14519_vm7, 0, %v413_v4  ;;  %v469_v30 = vsel %vm16312_vm8, 0, %v468_v62  ;;  %v4067_v42 = vld [vmem:[#allocation4 + $0xf0] sm:$0xff]  ;;  %v489_v12 = vld [vmem:[#allocation3 + $0x5c] sm:$0x1] }
 0x1ed   : > { %v13865_v9 = vpop.f32.mrf.mxu1  ;;  %4125 = vst.msk [vmem:[#allocation4 + $0xc0] sm:$0xff] %vm1526_vm1, %v4093_v54  ;;  %v4096_v16 = vadd.f32 %v13843_v3, %v4064_v48  ;;  %415 = vst [vmem:[#allocation3] sm:$0x1] %v414_v11  ;;  %v4623_v26 = vld [vmem:[#allocation4 + $0xa0] sm:$0xff]  ;;  %v490_v40 = vsel %vm16312_vm8, 0, %v489_v12 }
 0x1ee   : > { %4679 = vst.msk [vmem:[#allocation4 + $0x60] sm:$0xff] %vm1526_vm1, %v4647_v14  ;;  %v4650_v23 = vadd.f32 %v13865_v9, %v4618_v45  ;;  %v4009_v21 = vpop.f32.mrf.mxu0  ;;  %v4626_v37 = vld [vmem:[#allocation4 + $0xb8] sm:$0xff]  ;;  %470 = vst [vmem:[#allocation3 + $0x8] sm:$0x1] %v469_v30  ;;  %v4065_v14 = vld [vmem:[#allocation4 + $0xe0] sm:$0xff] }
 0x1ef   : > { %v4527_v61 = vpop.f32.mrf.mxu1  ;;  %4128 = vst.msk [vmem:[#allocation4 + $0xd8] sm:$0xff] %vm1526_vm1, %v4096_v16  ;;  %v4094_v39 = vadd.f32 %v4062_v17, %v4009_v21  ;;  %v12992_v9 = vld [vmem:[%s18292_s6 + $0x4] sm:$0xf]  ;;  %491 = vst [vmem:[#allocation3 + $0x5c] sm:$0x1] %v490_v40  ;;  %v4068_v21 = vld [vmem:[#allocation4 + $0xf8] sm:$0xff] }
 0x1f0   : > { %4682 = vst.msk [vmem:[#allocation4 + $0x78] sm:$0xff] %vm1526_vm1, %v4650_v23  ;;  %v4648_v24 = vadd.f32 %v4616_v36, %v4527_v61  ;;  %v4624_v50 = vld [vmem:[#allocation4 + $0xa8] sm:$0xff]  ;;  %14300 = vmatprep.subr.msk.bf16.mxu0 %vm7310_vm0, %v12992_v9  ;;  %v8038_v23 = vsel %vm7310_vm0, %v12992_v9, 0  ;;  %v5029_v30 = vld [vmem:[#allocation4 + $0x18] sm:$0xff] }
 0x1f1   : > { %v13868_v33 = vpop.f32.mrf.mxu1  ;;  %4126 = vst.msk [vmem:[#allocation4 + $0xc8] sm:$0xff] %vm1526_vm1, %v4094_v39  ;;  %v7508_v61 = vld [vmem:[#allocation3 + $0x4] sm:$0xf]  ;;  %14019 = vmatpush3.bf16.msra.mxu0 %v8038_v23 }
 0x1f2   : > { %4680 = vst.msk [vmem:[#allocation4 + $0x68] sm:$0xff] %vm1526_vm1, %v4648_v24  ;;  %v4653_v35 = vadd.f32 %v13868_v33, %v4621_v46  ;;  %v4629_v25 = vld [vmem:[#allocation4 + $0xd0] sm:$0xff]  ;;  %v7565_v33 = vshll.u32 %v7508_v61, 16 }
 0x1f3   : > { %v4540_v18 = vpop.f32.mrf.mxu1 }
 0x1f4   : > { %4685 = vst.msk [vmem:[#allocation4 + $0x90] sm:$0xff] %vm1526_vm1, %v4653_v35  ;;  %v4651_v29 = vadd.f32 %v4619_v47, %v4540_v18  ;;  %v14365_v15 = vld [vmem:[#allocation3] sm:$0xff]   ;;  %v4627_v52 = vld [vmem:[#allocation4 + $0xc0] sm:$0xff]  ;;  %v7569_v18 = vshrl.u32 %v7508_v61, 16 }
 0x1f5   : > { %v13869_v55 = vpop.f32.mrf.mxu1  ;;  %13986 = vmatprep.mubr.msk.bf16.mxu1 %vm1526_vm1, %v14365_v15  ;;  %v7507_v16 = vld [vmem:[#allocation3] sm:$0xf]  ;;  %v7509_v20 = vld [vmem:[#allocation3 + $0x8] sm:$0x1]  ;;  %v5026_v15 = vld [vmem:[#allocation4] sm:$0xff] }
 0x1f6   : > { %4683 = vst.msk [vmem:[#allocation4 + $0x80] sm:$0xff] %vm1526_vm1, %v4651_v29  ;;  %v4654_v2 = vadd.f32 %v13869_v55, %v4622_v34  ;;  %v4630_v19 = vld [vmem:[#allocation4 + $0xd8] sm:$0xff]  ;;  %v7556_v24 = vshrl.u32 %v7507_v16, 16  ;;  %v7559_v39 = vshll.u32 %v7507_v16, 16  ;;  %v474_v34 = vld [vmem:[#allocation3 + $0x20] sm:$0x1] }
 0x1f7   : > { %v4543_v28 = vpop.f32.mrf.mxu1  ;;  %v4066_v29 = vld [vmem:[#allocation4 + $0xe8] sm:$0xff] }
 0x1f8   : > { %4686 = vst.msk [vmem:[#allocation4 + $0x98] sm:$0xff] %vm1526_vm1, %v4654_v2  ;;  %v4652_v27 = vadd.f32 %v4620_v49, %v4543_v28  ;;  %v4628_v48 = vld [vmem:[#allocation4 + $0xc8] sm:$0xff]  ;;  %v7558_v11 = vrot.slane %v7556_v24, 4  ;;  %v7561_v55 = vrot.slane %v7559_v39, 5  ;;  %v7567_v49 = vrot.slane %v7565_v33, 5 }
 0x1f9   : > { %v13872_v31 = vpop.f32.mrf.mxu1  ;;  %v7571_v28 = vrot.slane %v7569_v18, 4 }
 0x1fa   : > { %4684 = vst.msk [vmem:[#allocation4 + $0x88] sm:$0xff] %vm1526_vm1, %v4652_v27  ;;  %v4657_v38 = vadd.f32 %v13872_v31, %v4625_v44  ;;  %v475_v44 = vsel %vm16312_vm8, 0, %v474_v34  ;;  %v5028_v27 = vld [vmem:[#allocation4 + $0x10] sm:$0xff]  ;;  %v7562_v32 = vor.u32 %v7561_v55, %v7558_v11  ;;  %v7575_v31 = vshll.u32 %v7509_v20, 16  ;;  %v16392_v34 = vld [vmem:[%s18292_s6 + $0x8] sm:$0xf] }
 0x1fb   : > { %v4556_v60 = vpop.f32.mrf.mxu1  ;;  %476 = vst [vmem:[#allocation3 + $0x20] sm:$0x1] %v475_v44  ;;  %14301 = vmatprep.subr.msk.bf16.mxu1 %vm7310_vm0, %v16392_v34  ;;  %v501_v11 = vld [vmem:[#allocation3 + $0x8c] sm:$0x1] }
 0x1fc   : > { %4689 = vst.msk [vmem:[#allocation4 + $0xb0] sm:$0xff] %vm1526_vm1, %v4657_v38  ;;  %v4655_v56 = vadd.f32 %v4623_v26, %v4556_v60  ;;  %v495_v38 = vld [vmem:[#allocation3 + $0x74] sm:$0x1]  ;;  %v7572_v60 = vor.u32 %v7571_v28, %v7567_v49 }
 0x1fd   : > { %v13873_v63 = vpop.f32.mrf.mxu1 }
 0x1fe   : > { %4687 = vst.msk [vmem:[#allocation4 + $0xa0] sm:$0xff] %vm1526_vm1, %v4655_v56  ;;  %v4658_v41 = vadd.f32 %v13873_v63, %v4626_v37  ;;  %v496_v63 = vsel %vm16312_vm8, 0, %v495_v38  ;;  %v7573_v62 = vrot.slane %v7572_v60, 4 }
 0x1ff   : > { %v4559_v22 = vpop.f32.mrf.mxu1  ;;  %497 = vst [vmem:[#allocation3 + $0x74] sm:$0x1] %v496_v63 }
 0x200   : > { %4690 = vst.msk [vmem:[#allocation4 + $0xb8] sm:$0xff] %vm1526_vm1, %v4658_v41  ;;  %v4656_v8 = vadd.f32 %v4624_v50, %v4559_v22  ;;  %v7563_v50 = vrot.slane %v7562_v32, 4  ;;  %v7577_v41 = vrot.slane %v7575_v31, 5  ;;  %v5036_v32 = vld [vmem:[#allocation4 + $0x50] sm:$0xff] }
 0x201   : > { %v13876_v10 = vpop.f32.mrf.mxu1 }
 0x202   : > { %4688 = vst.msk [vmem:[#allocation4 + $0xa8] sm:$0xff] %vm1526_vm1, %v4656_v8  ;;  %v4661_v13 = vadd.f32 %v13876_v10, %v4629_v25 }
 0x203   : > { %v4572_v45 = vpop.f32.mrf.mxu1 }
 0x204   : > { %4693 = vst.msk [vmem:[#allocation4 + $0xd0] sm:$0xff] %vm1526_vm1, %v4661_v13  ;;  %v4659_v54 = vadd.f32 %v4627_v52, %v4572_v45  ;;  %v7578_v45 = vsel %vm14632_vm15, %v7573_v62, %v7577_v41 }
 0x205   : > { %v13877_v3 = vpop.f32.mrf.mxu1 }
 0x206   : > { %4691 = vst.msk [vmem:[#allocation4 + $0xc0] sm:$0xff] %vm1526_vm1, %v4659_v54  ;;  %v4662_v17 = vadd.f32 %v13877_v3, %v4630_v19 }
 0x207   : > { %v4575_v35 = vpop.f32.mrf.mxu1 }
 0x208   : > { %v13846_v53 = vpop.f32.mrf.mxu0  ;;  %4694 = vst.msk [vmem:[#allocation4 + $0xd8] sm:$0xff] %vm1526_vm1, %v4662_v17  ;;  %v4660_v0 = vadd.f32 %v4628_v48, %v4575_v35  ;;  %v5032_v48 = vld [vmem:[#allocation4 + $0x30] sm:$0xff]  ;;  %v5033_v35 = vld [vmem:[#allocation4 + $0x38] sm:$0xff] }
 0x209   : > { %v4099_v5 = vadd.f32 %v13846_v53, %v4067_v42  ;;  %v7568_v53 = vsel %vm14632_vm15, %v7563_v50, %v7567_v49  ;;  %v5031_v49 = vld [vmem:[#allocation4 + $0x28] sm:$0xff] }
 0x20a   : > { %v4022_v6 = vpop.f32.mrf.mxu0  ;;  %v13880_v2 = vpop.f32.mrf.mxu1  ;;  %4692 = vst.msk [vmem:[#allocation4 + $0xc8] sm:$0xff] %vm1526_vm1, %v4660_v0 }
 0x20b   : > { %4131 = vst.msk [vmem:[#allocation4 + $0xf0] sm:$0xff] %vm1526_vm1, %v4099_v5  ;;  %v4097_v36 = vadd.f32 %v4065_v14, %v4022_v6  ;;  %v5027_v6 = vld [vmem:[#allocation4 + $0x8] sm:$0xff]  ;;  %v12993_v14 = vcombine.low %v7568_v53, %v7578_v45 }
 0x20c   : > { %v13847_v46 = vpop.f32.mrf.mxu0  ;;  %v4588_v57 = vpop.f32.mrf.mxu1 }
 0x20d   : > { %4129 = vst.msk [vmem:[#allocation4 + $0xe0] sm:$0xff] %vm1526_vm1, %v4097_v36  ;;  %v4100_v47 = vadd.f32 %v13847_v46, %v4068_v21  ;;  %14020 = vmatprep.mubr.msk.bf16.mxu0 %vm1526_vm1, %v12993_v14  ;;  %v5030_v21 = vld [vmem:[#allocation4 + $0x20] sm:$0xff] }
 0x20e   : > { %v4025_v4 = vpop.f32.mrf.mxu0  ;;  %v13881_v8 = vpop.f32.mrf.mxu1 }
 0x20f   : > { %4132 = vst.msk [vmem:[#allocation4 + $0xf8] sm:$0xff] %vm1526_vm1, %v4100_v47  ;;  %v4098_v51 = vadd.f32 %v4066_v29, %v4025_v4 }
 0x210   : > { %v13886_v1 = vpop.f32.mrf.mxu0  ;;  %v4591_v5 = vpop.f32.mrf.mxu1 }
 0x211   : > { %4130 = vst.msk [vmem:[#allocation4 + $0xe8] sm:$0xff] %vm1526_vm1, %v4098_v51  ;;  %v5060_v26 = vadd.f32 %v13886_v1, %v5028_v27  ;;  %v480_v1 = vld [vmem:[#allocation3 + $0x38] sm:$0x1] }
 0x212   : > { %v4633_v37 = vld [vmem:[#allocation4 + $0xf0] sm:$0xff]  ;;  %v4899_v56 = vpop.f32.mrf.mxu0  ;;  %v13920_v9 = vpop.f32.mrf.mxu1 }
 0x213   : > { %5092 = vst.msk [vmem:[#allocation4 + $0x10] sm:$0xff] %vm1526_vm1, %v5060_v26  ;;  %v4665_v22 = vadd.f32 %v13880_v2, %v4633_v37  ;;  %v5058_v25 = vadd.f32 %v5026_v15, %v4899_v56  ;;  %v502_v2 = vsel %vm16312_vm8, 0, %v501_v11  ;;  %v481_v26 = vsel %vm16312_vm8, 0, %v480_v1  ;;  %v5034_v56 = vld [vmem:[#allocation4 + $0x40] sm:$0xff] }
 0x214   : > { %v4631_v10 = vld [vmem:[#allocation4 + $0xe0] sm:$0xff]  ;;  %v13887_v52 = vpop.f32.mrf.mxu0  ;;  %v5689_v61 = vpop.f32.mrf.mxu1  ;;  %503 = vst [vmem:[#allocation3 + $0x8c] sm:$0x1] %v502_v2  ;;  %482 = vst [vmem:[#allocation3 + $0x38] sm:$0x1] %v481_v26  ;;  %v5044_v2 = vld [vmem:[#allocation4 + $0x90] sm:$0xff] }
 0x215   : > { %4697 = vst.msk [vmem:[#allocation4 + $0xf0] sm:$0xff] %vm1526_vm1, %v4665_v22  ;;  %5090 = vst.msk [vmem:[#allocation4] sm:$0xff] %vm1526_vm1, %v5058_v25  ;;  %v4663_v42 = vadd.f32 %v4631_v10, %v4588_v57  ;;  %v5061_v13 = vadd.f32 %v13887_v52, %v5029_v30  ;;  %v431_v22 = vld [vmem:[#allocation3 + $0x48] sm:$0x1] }
 0x216   : > { %v4634_v19 = vld [vmem:[#allocation4 + $0xf8] sm:$0xff]  ;;  %v4902_v12 = vpop.f32.mrf.mxu0  ;;  %v13921_v33 = vpop.f32.mrf.mxu1  ;;  %v432_v10 = vsel %vm14519_vm7, 0, %v431_v22 }
 0x217   : > { %4695 = vst.msk [vmem:[#allocation4 + $0xe0] sm:$0xff] %vm1526_vm1, %v4663_v42  ;;  %5093 = vst.msk [vmem:[#allocation4 + $0x18] sm:$0xff] %vm1526_vm1, %v5061_v13  ;;  %v4666_v54 = vadd.f32 %v13881_v8, %v4634_v19  ;;  %v5059_v40 = vadd.f32 %v5027_v6, %v4902_v12  ;;  %v5037_v8 = vld [vmem:[#allocation4 + $0x58] sm:$0xff]  ;;  %v428_v42 = vld [vmem:[#allocation3 + $0x3c] sm:$0x1] }
 0x218   : > { %v4632_v36 = vld [vmem:[#allocation4 + $0xe8] sm:$0xff]  ;;  %v13890_v3 = vpop.f32.mrf.mxu0  ;;  %v5692_v0 = vpop.f32.mrf.mxu1  ;;  %433 = vst [vmem:[#allocation3 + $0x48] sm:$0x1] %v432_v10  ;;  %v429_v19 = vsel %vm14519_vm7, 0, %v428_v42 }
 0x219   : > { %4698 = vst.msk [vmem:[#allocation4 + $0xf8] sm:$0xff] %vm1526_vm1, %v4666_v54  ;;  %5091 = vst.msk [vmem:[#allocation4 + $0x8] sm:$0xff] %vm1526_vm1, %v5059_v40  ;;  %v4664_v23 = vadd.f32 %v4632_v36, %v4591_v5  ;;  %v5064_v16 = vadd.f32 %v13890_v3, %v5032_v48  ;;  %v5035_v5 = vld [vmem:[#allocation4 + $0x48] sm:$0xff]  ;;  %v5040_v40 = vld [vmem:[#allocation4 + $0x70] sm:$0xff] }
 0x21a   : > { %v4915_v46 = vpop.f32.mrf.mxu0  ;;  %v5818_v17 = vld [vmem:[#allocation4 + $0x10] sm:$0xff]  ;;  %v13924_v44 = vpop.f32.mrf.mxu1  ;;  %430 = vst [vmem:[#allocation3 + $0x3c] sm:$0x1] %v429_v19 }
 0x21b   : > { %4696 = vst.msk [vmem:[#allocation4 + $0xe8] sm:$0xff] %vm1526_vm1, %v4664_v23  ;;  %5096 = vst.msk [vmem:[#allocation4 + $0x30] sm:$0xff] %vm1526_vm1, %v5064_v16  ;;  %v5062_v24 = vadd.f32 %v5030_v21, %v4915_v46  ;;  %v5850_v39 = vadd.f32 %v13920_v9, %v5818_v17  ;;  %v5038_v16 = vld [vmem:[#allocation4 + $0x60] sm:$0xff]  ;;  %v5048_v19 = vld [vmem:[#allocation4 + $0xb0] sm:$0xff] }
 0x21c   : > { %v13891_v47 = vpop.f32.mrf.mxu0  ;;  %v5816_v18 = vld [vmem:[#allocation4] sm:$0xff]  ;;  %v5705_v60 = vpop.f32.mrf.mxu1 }
 0x21d   : > { %5094 = vst.msk [vmem:[#allocation4 + $0x20] sm:$0xff] %vm1526_vm1, %v5062_v24  ;;  %5882 = vst.msk [vmem:[#allocation4 + $0x10] sm:$0xff] %vm1526_vm1, %v5850_v39  ;;  %v5065_v4 = vadd.f32 %v13891_v47, %v5033_v35  ;;  %v5848_v29 = vadd.f32 %v5816_v18, %v5689_v61  ;;  %v5041_v39 = vld [vmem:[#allocation4 + $0x78] sm:$0xff] }
 0x21e   : > { %v4918_v55 = vpop.f32.mrf.mxu0  ;;  %v5819_v51 = vld [vmem:[#allocation4 + $0x18] sm:$0xff]  ;;  %v13925_v41 = vpop.f32.mrf.mxu1 }
 0x21f   : > { %5097 = vst.msk [vmem:[#allocation4 + $0x38] sm:$0xff] %vm1526_vm1, %v5065_v4  ;;  %5880 = vst.msk [vmem:[#allocation4] sm:$0xff] %vm1526_vm1, %v5848_v29  ;;  %v5063_v20 = vadd.f32 %v5031_v49, %v4918_v55  ;;  %v5851_v28 = vadd.f32 %v13921_v33, %v5819_v51  ;;  %v5039_v29 = vld [vmem:[#allocation4 + $0x68] sm:$0xff] }
 0x220   : > { %v13894_v27 = vpop.f32.mrf.mxu0  ;;  %v5817_v31 = vld [vmem:[#allocation4 + $0x8] sm:$0xff]  ;;  %v5708_v53 = vpop.f32.mrf.mxu1 }
 0x221   : > { %5095 = vst.msk [vmem:[#allocation4 + $0x28] sm:$0xff] %vm1526_vm1, %v5063_v20  ;;  %5883 = vst.msk [vmem:[#allocation4 + $0x18] sm:$0xff] %vm1526_vm1, %v5851_v28  ;;  %v5068_v57 = vadd.f32 %v13894_v27, %v5036_v32  ;;  %v5849_v38 = vadd.f32 %v5817_v31, %v5692_v0  ;;  %v5042_v32 = vld [vmem:[#allocation4 + $0x80] sm:$0xff] }
 0x222   : > { %v4931_v37 = vpop.f32.mrf.mxu0  ;;  %v5822_v15 = vld [vmem:[#allocation4 + $0x30] sm:$0xff]  ;;  %v13928_v14 = vpop.f32.mrf.mxu1 }
 0x223   : > { %5100 = vst.msk [vmem:[#allocation4 + $0x50] sm:$0xff] %vm1526_vm1, %v5068_v57  ;;  %5881 = vst.msk [vmem:[#allocation4 + $0x8] sm:$0xff] %vm1526_vm1, %v5849_v38  ;;  %v5066_v63 = vadd.f32 %v5034_v56, %v4931_v37  ;;  %v5854_v50 = vadd.f32 %v13924_v44, %v5822_v15  ;;  %v5045_v56 = vld [vmem:[#allocation4 + $0x98] sm:$0xff] }
 0x224   : > { %v13895_v25 = vpop.f32.mrf.mxu0  ;;  %v5820_v62 = vld [vmem:[#allocation4 + $0x20] sm:$0xff]  ;;  %v5721_v48 = vpop.f32.mrf.mxu1 }
 0x225   : > { %5098 = vst.msk [vmem:[#allocation4 + $0x40] sm:$0xff] %vm1526_vm1, %v5066_v63  ;;  %5886 = vst.msk [vmem:[#allocation4 + $0x30] sm:$0xff] %vm1526_vm1, %v5854_v50  ;;  %v5069_v52 = vadd.f32 %v13895_v25, %v5037_v8  ;;  %v5852_v30 = vadd.f32 %v5820_v62, %v5705_v60  ;;  %v486_v60 = vld [vmem:[#allocation3 + $0x50] sm:$0x1]  ;;  %v507_v25 = vld [vmem:[#allocation3 + $0xa4] sm:$0x1] }
 0x226   : > { %v4934_v13 = vpop.f32.mrf.mxu0  ;;  %v5823_v45 = vld [vmem:[#allocation4 + $0x38] sm:$0xff]  ;;  %v13929_v17 = vpop.f32.mrf.mxu1  ;;  %v487_v63 = vsel %vm16312_vm8, 0, %v486_v60  ;;  %v5043_v62 = vld [vmem:[#allocation4 + $0x88] sm:$0xff] }
 0x227   : > { %5101 = vst.msk [vmem:[#allocation4 + $0x58] sm:$0xff] %vm1526_vm1, %v5069_v52  ;;  %5884 = vst.msk [vmem:[#allocation4 + $0x20] sm:$0xff] %vm1526_vm1, %v5852_v30  ;;  %v5067_v12 = vadd.f32 %v5035_v5, %v4934_v13  ;;  %v5855_v6 = vadd.f32 %v13925_v41, %v5823_v45  ;;  %v508_v52 = vsel %vm16312_vm8, 0, %v507_v25  ;;  %v437_v30 = vld [vmem:[#allocation3 + $0x60] sm:$0x1] }
 0x228   : > { %v13898_v54 = vpop.f32.mrf.mxu0  ;;  %v5821_v9 = vld [vmem:[#allocation4 + $0x28] sm:$0xff]  ;;  %v5724_v18 = vpop.f32.mrf.mxu1  ;;  %488 = vst [vmem:[#allocation3 + $0x50] sm:$0x1] %v487_v63  ;;  %509 = vst [vmem:[#allocation3 + $0xa4] sm:$0x1] %v508_v52  ;;  %v438_v5 = vsel %vm14519_vm7, 0, %v437_v30 }
 0x229   : > { %5099 = vst.msk [vmem:[#allocation4 + $0x48] sm:$0xff] %vm1526_vm1, %v5067_v12  ;;  %5887 = vst.msk [vmem:[#allocation4 + $0x38] sm:$0xff] %vm1526_vm1, %v5855_v6  ;;  %v5072_v36 = vadd.f32 %v13898_v54, %v5040_v40  ;;  %v5853_v3 = vadd.f32 %v5821_v9, %v5708_v53  ;;  %v434_v6 = vld [vmem:[#allocation3 + $0x54] sm:$0x1]  ;;  %v5051_v25 = vld [vmem:[#allocation4 + $0xc8] sm:$0xff] }
 0x22a   : > { %v4947_v23 = vpop.f32.mrf.mxu0  ;;  %v5826_v61 = vld [vmem:[#allocation4 + $0x50] sm:$0xff]  ;;  %v13932_v49 = vpop.f32.mrf.mxu1  ;;  %439 = vst [vmem:[#allocation3 + $0x60] sm:$0x1] %v438_v5  ;;  %v435_v9 = vsel %vm14519_vm7, 0, %v434_v6  ;;  %v513_v6 = vld [vmem:[#allocation3 + $0xbc] sm:$0x1] }
 0x22b   : > { %5104 = vst.msk [vmem:[#allocation4 + $0x70] sm:$0xff] %vm1526_vm1, %v5072_v36  ;;  %5885 = vst.msk [vmem:[#allocation4 + $0x28] sm:$0xff] %vm1526_vm1, %v5853_v3  ;;  %v5070_v46 = vadd.f32 %v5038_v16, %v4947_v23  ;;  %v5858_v21 = vadd.f32 %v13928_v14, %v5826_v61  ;;  %v5046_v3 = vld [vmem:[#allocation4 + $0xa0] sm:$0xff] }
 0x22c   : > { %v13899_v24 = vpop.f32.mrf.mxu0  ;;  %v5824_v33 = vld [vmem:[#allocation4 + $0x40] sm:$0xff]  ;;  %v5737_v1 = vpop.f32.mrf.mxu1  ;;  %436 = vst [vmem:[#allocation3 + $0x54] sm:$0x1] %v435_v9 }
 0x22d   : > { %5102 = vst.msk [vmem:[#allocation4 + $0x60] sm:$0xff] %vm1526_vm1, %v5070_v46  ;;  %5890 = vst.msk [vmem:[#allocation4 + $0x50] sm:$0xff] %vm1526_vm1, %v5858_v21  ;;  %v5073_v47 = vadd.f32 %v13899_v24, %v5041_v39  ;;  %v5856_v35 = vadd.f32 %v5824_v33, %v5721_v48  ;;  %v5049_v21 = vld [vmem:[#allocation4 + $0xb8] sm:$0xff] }
 0x22e   : > { %v4950_v4 = vpop.f32.mrf.mxu0  ;;  %v5827_v0 = vld [vmem:[#allocation4 + $0x58] sm:$0xff]  ;;  %v13933_v38 = vpop.f32.mrf.mxu1 }
 0x22f   : > { %5105 = vst.msk [vmem:[#allocation4 + $0x78] sm:$0xff] %vm1526_vm1, %v5073_v47  ;;  %5888 = vst.msk [vmem:[#allocation4 + $0x40] sm:$0xff] %vm1526_vm1, %v5856_v35  ;;  %v5071_v11 = vadd.f32 %v5039_v29, %v4950_v4  ;;  %v5859_v55 = vadd.f32 %v13929_v17, %v5827_v0  ;;  %v5047_v35 = vld [vmem:[#allocation4 + $0xa8] sm:$0xff] }
 0x230   : > { %v13902_v51 = vpop.f32.mrf.mxu0  ;;  %v5825_v20 = vld [vmem:[#allocation4 + $0x48] sm:$0xff]  ;;  %v5740_v22 = vpop.f32.mrf.mxu1 }
 0x231   : > { %5103 = vst.msk [vmem:[#allocation4 + $0x68] sm:$0xff] %vm1526_vm1, %v5071_v11  ;;  %5891 = vst.msk [vmem:[#allocation4 + $0x58] sm:$0xff] %vm1526_vm1, %v5859_v55  ;;  %v5076_v28 = vadd.f32 %v13902_v51, %v5044_v2  ;;  %v5857_v44 = vadd.f32 %v5825_v20, %v5724_v18  ;;  %v516_v11 = vld [vmem:[#allocation3 + $0xc8] sm:$0x1] }
 0x232   : > { %v4963_v27 = vpop.f32.mrf.mxu0  ;;  %v5830_v31 = vld [vmem:[#allocation4 + $0x70] sm:$0xff]  ;;  %v13936_v13 = vpop.f32.mrf.mxu1  ;;  %v517_v2 = vsel %vm16312_vm8, 0, %v516_v11 }
 0x233   : > { %5108 = vst.msk [vmem:[#allocation4 + $0x90] sm:$0xff] %vm1526_vm1, %v5076_v28  ;;  %5889 = vst.msk [vmem:[#allocation4 + $0x48] sm:$0xff] %vm1526_vm1, %v5857_v44  ;;  %v5074_v26 = vadd.f32 %v5042_v32, %v4963_v27  ;;  %v5862_v57 = vadd.f32 %v13932_v49, %v5830_v31  ;;  %v5052_v49 = vld [vmem:[#allocation4 + $0xd0] sm:$0xff]  ;;  %v5050_v27 = vld [vmem:[#allocation4 + $0xc0] sm:$0xff] }
 0x234   : > { %v13903_v37 = vpop.f32.mrf.mxu0  ;;  %v5828_v15 = vld [vmem:[#allocation4 + $0x60] sm:$0xff]  ;;  %v5753_v40 = vpop.f32.mrf.mxu1  ;;  %518 = vst [vmem:[#allocation3 + $0xc8] sm:$0x1] %v517_v2  ;;  %v492_v31 = vld [vmem:[#allocation3 + $0x68] sm:$0x1] }
 0x235   : > { %5106 = vst.msk [vmem:[#allocation4 + $0x80] sm:$0xff] %vm1526_vm1, %v5074_v26  ;;  %5894 = vst.msk [vmem:[#allocation4 + $0x70] sm:$0xff] %vm1526_vm1, %v5862_v57  ;;  %v5077_v50 = vadd.f32 %v13903_v37, %v5045_v56  ;;  %v5860_v41 = vadd.f32 %v5828_v15, %v5737_v1  ;;  %v493_v60 = vsel %vm16312_vm8, 0, %v492_v31  ;;  %v5053_v56 = vld [vmem:[#allocation4 + $0xd8] sm:$0xff] }
 0x236   : > { %v4966_v8 = vpop.f32.mrf.mxu0  ;;  %v5831_v10 = vld [vmem:[#allocation4 + $0x78] sm:$0xff]  ;;  %v13937_v61 = vpop.f32.mrf.mxu1  ;;  %494 = vst [vmem:[#allocation3 + $0x68] sm:$0x1] %v493_v60 }
 0x237   : > { %5109 = vst.msk [vmem:[#allocation4 + $0x98] sm:$0xff] %vm1526_vm1, %v5077_v50  ;;  %5892 = vst.msk [vmem:[#allocation4 + $0x60] sm:$0xff] %vm1526_vm1, %v5860_v41  ;;  %v5075_v53 = vadd.f32 %v5043_v62, %v4966_v8  ;;  %v5863_v42 = vadd.f32 %v13933_v38, %v5831_v10  ;;  %v443_v62 = vld [vmem:[#allocation3 + $0x78] sm:$0x1]  ;;  %v6385_v31 = vld [vmem:[#allocation4 + $0x18] sm:$0xff] }
 0x238   : > { %v13906_v45 = vpop.f32.mrf.mxu0  ;;  %v5829_v12 = vld [vmem:[#allocation4 + $0x68] sm:$0xff]  ;;  %v5756_v33 = vpop.f32.mrf.mxu1 }
 0x239   : > { %5107 = vst.msk [vmem:[#allocation4 + $0x88] sm:$0xff] %vm1526_vm1, %v5075_v53  ;;  %5895 = vst.msk [vmem:[#allocation4 + $0x78] sm:$0xff] %vm1526_vm1, %v5863_v42  ;;  %v5080_v14 = vadd.f32 %v13906_v45, %v5048_v19  ;;  %v5861_v54 = vadd.f32 %v5829_v12, %v5740_v22  ;;  %v444_v53 = vsel %vm14519_vm7, 0, %v443_v62 }
 0x23a   : > { %v4979_v36 = vpop.f32.mrf.mxu0  ;;  %v5834_v48 = vld [vmem:[#allocation4 + $0x90] sm:$0xff]  ;;  %v13940_v0 = vpop.f32.mrf.mxu1  ;;  %445 = vst [vmem:[#allocation3 + $0x78] sm:$0x1] %v444_v53 }
 0x23b   : > { %5112 = vst.msk [vmem:[#allocation4 + $0xb0] sm:$0xff] %vm1526_vm1, %v5080_v14  ;;  %5893 = vst.msk [vmem:[#allocation4 + $0x68] sm:$0xff] %vm1526_vm1, %v5861_v54  ;;  %v5078_v23 = vadd.f32 %v5046_v3, %v4979_v36  ;;  %v5866_v16 = vadd.f32 %v13936_v13, %v5834_v48  ;;  %v5056_v13 = vld [vmem:[#allocation4 + $0xf0] sm:$0xff]  ;;  %v514_v36 = vsel %vm16312_vm8, 0, %v513_v6  ;;  %v6386_v6 = vld [vmem:[#allocation4 + $0x20] sm:$0xff] }
 0x23c   : > { %v13907_v46 = vpop.f32.mrf.mxu0  ;;  %v5832_v17 = vld [vmem:[#allocation4 + $0x80] sm:$0xff]  ;;  %v5769_v44 = vpop.f32.mrf.mxu1  ;;  %v440_v14 = vld [vmem:[#allocation3 + $0x6c] sm:$0x1]  ;;  %515 = vst [vmem:[#allocation3 + $0xbc] sm:$0x1] %v514_v36 }
 0x23d   : > { %5110 = vst.msk [vmem:[#allocation4 + $0xa0] sm:$0xff] %vm1526_vm1, %v5078_v23  ;;  %5898 = vst.msk [vmem:[#allocation4 + $0x90] sm:$0xff] %vm1526_vm1, %v5866_v16  ;;  %v5081_v24 = vadd.f32 %v13907_v46, %v5049_v21  ;;  %v5864_v39 = vadd.f32 %v5832_v17, %v5753_v40  ;;  %v5054_v40 = vld [vmem:[#allocation4 + $0xe0] sm:$0xff]  ;;  %v441_v3 = vsel %vm14519_vm7, 0, %v440_v14  ;;  %v5057_v46 = vld [vmem:[#allocation4 + $0xf8] sm:$0xff] }
 0x23e   : > { %v4982_v47 = vpop.f32.mrf.mxu0  ;;  %v5835_v18 = vld [vmem:[#allocation4 + $0x98] sm:$0xff]  ;;  %v13941_v38 = vpop.f32.mrf.mxu1  ;;  %442 = vst [vmem:[#allocation3 + $0x6c] sm:$0x1] %v441_v3 }
 0x23f   : > { %5113 = vst.msk [vmem:[#allocation4 + $0xb8] sm:$0xff] %vm1526_vm1, %v5081_v24  ;;  %5896 = vst.msk [vmem:[#allocation4 + $0x80] sm:$0xff] %vm1526_vm1, %v5864_v39  ;;  %v5079_v4 = vadd.f32 %v5047_v35, %v4982_v47  ;;  %v5867_v29 = vadd.f32 %v13937_v61, %v5835_v18  ;;  %v498_v18 = vld [vmem:[#allocation3 + $0x80] sm:$0x1] }
 0x240   : > { %v13910_v55 = vpop.f32.mrf.mxu0  ;;  %v5833_v51 = vld [vmem:[#allocation4 + $0x88] sm:$0xff]  ;;  %v5772_v41 = vpop.f32.mrf.mxu1 }
 0x241   : > { %5111 = vst.msk [vmem:[#allocation4 + $0xa8] sm:$0xff] %vm1526_vm1, %v5079_v4  ;;  %5899 = vst.msk [vmem:[#allocation4 + $0x98] sm:$0xff] %vm1526_vm1, %v5867_v29  ;;  %v5084_v20 = vadd.f32 %v13910_v55, %v5052_v49  ;;  %v5865_v28 = vadd.f32 %v5833_v51, %v5756_v33  ;;  %v5055_v33 = vld [vmem:[#allocation4 + $0xe8] sm:$0xff]  ;;  %v6384_v49 = vld [vmem:[#allocation4 + $0x10] sm:$0xff] }
 0x242   : > { %v4995_v1 = vpop.f32.mrf.mxu0  ;;  %v5838_v32 = vld [vmem:[#allocation4 + $0xb0] sm:$0xff]  ;;  %v13944_v30 = vpop.f32.mrf.mxu1 }
 0x243   : > { %5116 = vst.msk [vmem:[#allocation4 + $0xd0] sm:$0xff] %vm1526_vm1, %v5084_v20  ;;  %5897 = vst.msk [vmem:[#allocation4 + $0x88] sm:$0xff] %vm1526_vm1, %v5865_v28  ;;  %v5082_v26 = vadd.f32 %v5050_v27, %v4995_v1  ;;  %v5870_v57 = vadd.f32 %v13940_v0, %v5838_v32  ;;  %v499_v0 = vsel %vm16312_vm8, 0, %v498_v18  ;;  %v6382_v28 = vld [vmem:[#allocation4] sm:$0xff]  ;;  %v449_v1 = vld [vmem:[#allocation3 + $0x90] sm:$0x1] }
 0x244   : > { %v13911_v37 = vpop.f32.mrf.mxu0  ;;  %v5836_v15 = vld [vmem:[#allocation4 + $0xa0] sm:$0xff]  ;;  %v5785_v12 = vpop.f32.mrf.mxu1  ;;  %500 = vst [vmem:[#allocation3 + $0x80] sm:$0x1] %v499_v0 }
 0x245   : > { %5114 = vst.msk [vmem:[#allocation4 + $0xc0] sm:$0xff] %vm1526_vm1, %v5082_v26  ;;  %5902 = vst.msk [vmem:[#allocation4 + $0xb0] sm:$0xff] %vm1526_vm1, %v5870_v57  ;;  %v5085_v63 = vadd.f32 %v13911_v37, %v5053_v56  ;;  %v5868_v50 = vadd.f32 %v5836_v15, %v5769_v44  ;;  %v446_v26 = vld [vmem:[#allocation3 + $0x84] sm:$0x1]  ;;  %v450_v57 = vsel %vm14519_vm7, 0, %v449_v1 }
 0x246   : > { %v4998_v22 = vpop.f32.mrf.mxu0  ;;  %v5839_v8 = vld [vmem:[#allocation4 + $0xb8] sm:$0xff]  ;;  %v13945_v16 = vpop.f32.mrf.mxu1  ;;  %v447_v60 = vsel %vm14519_vm7, 0, %v446_v26  ;;  %451 = vst [vmem:[#allocation3 + $0x90] sm:$0x1] %v450_v57  ;;  %v6390_v57 = vld [vmem:[#allocation4 + $0x40] sm:$0xff] }
 0x247   : > { %5117 = vst.msk [vmem:[#allocation4 + $0xd8] sm:$0xff] %vm1526_vm1, %v5085_v63  ;;  %5900 = vst.msk [vmem:[#allocation4 + $0xa0] sm:$0xff] %vm1526_vm1, %v5868_v50  ;;  %v5083_v10 = vadd.f32 %v5051_v25, %v4998_v22  ;;  %v5871_v52 = vadd.f32 %v13941_v38, %v5839_v8  ;;  %v6383_v63 = vld [vmem:[#allocation4 + $0x8] sm:$0xff]  ;;  %v16488_v50 = vld [vmem:[%s18290_s4] ss:$0 sm:$0xff] }
 0x248   : > { %v13914_v42 = vpop.f32.mrf.mxu0  ;;  %v5837_v5 = vld [vmem:[#allocation4 + $0xa8] sm:$0xff]  ;;  %v5788_v35 = vpop.f32.mrf.mxu1  ;;  %448 = vst [vmem:[#allocation3 + $0x84] sm:$0x1] %v447_v60 }
 0x249   : > { %5115 = vst.msk [vmem:[#allocation4 + $0xc8] sm:$0xff] %vm1526_vm1, %v5083_v10  ;;  %5903 = vst.msk [vmem:[#allocation4 + $0xb8] sm:$0xff] %vm1526_vm1, %v5871_v52  ;;  %v5088_v45 = vadd.f32 %v13914_v42, %v5056_v13  ;;  %v5869_v19 = vadd.f32 %v5837_v5, %v5772_v41  ;;  %v6388_v10 = vld [vmem:[#allocation4 + $0x30] sm:$0xff]  ;;  %v504_v52 = vld [vmem:[#allocation3 + $0x98] sm:$0x1] }
 0x24a   : > { %v5011_v54 = vpop.f32.mrf.mxu0  ;;  %v5842_v9 = vld [vmem:[#allocation4 + $0xd0] sm:$0xff]  ;;  %v505_v13 = vsel %vm16312_vm8, 0, %v504_v52 }
 0x24b   : > { %5120 = vst.msk [vmem:[#allocation4 + $0xf0] sm:$0xff] %vm1526_vm1, %v5088_v45  ;;  %5901 = vst.msk [vmem:[#allocation4 + $0xa8] sm:$0xff] %vm1526_vm1, %v5869_v19  ;;  %v5086_v48 = vadd.f32 %v5054_v40, %v5011_v54  ;;  %v5874_v23 = vadd.f32 %v13944_v30, %v5842_v9  ;;  %v16494_v30 = vld [vmem:[%s18291_s5] ss:$0 sm:$0xff] }
 0x24c   : > { %v13915_v61 = vpop.f32.mrf.mxu0  ;;  %v5840_v21 = vld [vmem:[#allocation4 + $0xc0] sm:$0xff]  ;;  %506 = vst [vmem:[#allocation3 + $0x98] sm:$0x1] %v505_v13 }
 0x24d   : > { %5118 = vst.msk [vmem:[#allocation4 + $0xe0] sm:$0xff] %vm1526_vm1, %v5086_v48  ;;  %5906 = vst.msk [vmem:[#allocation4 + $0xd0] sm:$0xff] %vm1526_vm1, %v5874_v23  ;;  %v5089_v17 = vadd.f32 %v13915_v61, %v5057_v46  ;;  %v5872_v24 = vadd.f32 %v5840_v21, %v5785_v12  ;;  %v6389_v48 = vld [vmem:[#allocation4 + $0x38] sm:$0xff]  ;;  %v455_v23 = vld [vmem:[#allocation3 + $0xa8] sm:$0x1] }
 0x24e   : > { %v5014_v39 = vpop.f32.mrf.mxu0  ;;  %v5843_v47 = vld [vmem:[#allocation4 + $0xd8] sm:$0xff] }
 0x24f   : > { %5121 = vst.msk [vmem:[#allocation4 + $0xf8] sm:$0xff] %vm1526_vm1, %v5089_v17  ;;  %5904 = vst.msk [vmem:[#allocation4 + $0xc0] sm:$0xff] %vm1526_vm1, %v5872_v24  ;;  %v5087_v4 = vadd.f32 %v5055_v33, %v5014_v39  ;;  %v5875_v29 = vadd.f32 %v13945_v16, %v5843_v47  ;;  %v6387_v39 = vld [vmem:[#allocation4 + $0x28] sm:$0xff]  ;;  %v452_v33 = vld [vmem:[#allocation3 + $0x9c] sm:$0x1]  ;;  %v456_v47 = vsel %vm14519_vm7, 0, %v455_v23 }
 0x250   : > { %v5841_v11 = vld [vmem:[#allocation4 + $0xc8] sm:$0xff]  ;;  %v13954_v55 = vpop.f32.mrf.mxu0  ;;  %457 = vst [vmem:[#allocation3 + $0xa8] sm:$0x1] %v456_v47 }
 0x251   : > { %5119 = vst.msk [vmem:[#allocation4 + $0xe8] sm:$0xff] %vm1526_vm1, %v5087_v4  ;;  %5907 = vst.msk [vmem:[#allocation4 + $0xd8] sm:$0xff] %vm1526_vm1, %v5875_v29  ;;  %v5873_v51 = vadd.f32 %v5841_v11, %v5788_v35  ;;  %v6416_v2 = vadd.f32 %v13954_v55, %v6384_v49  ;;  %v453_v55 = vsel %vm14519_vm7, 0, %v452_v33 }
 0x252   : > { %v6255_v20 = vpop.f32.mrf.mxu0  ;;  %v5846_v27 = vld [vmem:[#allocation4 + $0xf0] sm:$0xff]  ;;  %v13948_v37 = vpop.f32.mrf.mxu1  ;;  %454 = vst [vmem:[#allocation3 + $0x9c] sm:$0x1] %v453_v55 }
 0x253   : > { %5905 = vst.msk [vmem:[#allocation4 + $0xc8] sm:$0xff] %vm1526_vm1, %v5873_v51  ;;  %6448 = vst.msk [vmem:[#allocation4 + $0x10] sm:$0xff] %vm1526_vm1, %v6416_v2  ;;  %v6414_v44 = vadd.f32 %v6382_v28, %v6255_v20  ;;  %v5878_v41 = vadd.f32 %v13948_v37, %v5846_v27  ;;  %v6392_v28 = vld [vmem:[#allocation4 + $0x50] sm:$0xff] }
 0x254   : > { %v13955_v32 = vpop.f32.mrf.mxu0  ;;  %v5844_v56 = vld [vmem:[#allocation4 + $0xe0] sm:$0xff]  ;;  %v5801_v25 = vpop.f32.mrf.mxu1 }
 0x255   : > { %6446 = vst.msk [vmem:[#allocation4] sm:$0xff] %vm1526_vm1, %v6414_v44  ;;  %v6417_v38 = vadd.f32 %v13955_v32, %v6385_v31  ;;  %5910 = vst.msk [vmem:[#allocation4 + $0xf0] sm:$0xff] %vm1526_vm1, %v5878_v41  ;;  %v5876_v53 = vadd.f32 %v5844_v56, %v5801_v25 }
 0x256   : > { %v6258_v15 = vpop.f32.mrf.mxu0  ;;  %v5847_v8 = vld [vmem:[#allocation4 + $0xf8] sm:$0xff]  ;;  %v13949_v45 = vpop.f32.mrf.mxu1 }
 0x257   : > { %6449 = vst.msk [vmem:[#allocation4 + $0x18] sm:$0xff] %vm1526_vm1, %v6417_v38  ;;  %v6415_v22 = vadd.f32 %v6383_v63, %v6258_v15  ;;  %5908 = vst.msk [vmem:[#allocation4 + $0xe0] sm:$0xff] %vm1526_vm1, %v5876_v53  ;;  %v5879_v54 = vadd.f32 %v13949_v45, %v5847_v8  ;;  %v510_v38 = vld [vmem:[#allocation3 + $0xb0] sm:$0x1] }
 0x258   : > { %v13958_v62 = vpop.f32.mrf.mxu0  ;;  %v5845_v19 = vld [vmem:[#allocation4 + $0xe8] sm:$0xff]  ;;  %v5804_v36 = vpop.f32.mrf.mxu1  ;;  %v511_v41 = vsel %vm16312_vm8, 0, %v510_v38 }
 0x259   : > { %6447 = vst.msk [vmem:[#allocation4 + $0x8] sm:$0xff] %vm1526_vm1, %v6415_v22  ;;  %v6420_v42 = vadd.f32 %v13958_v62, %v6388_v10  ;;  %5911 = vst.msk [vmem:[#allocation4 + $0xf8] sm:$0xff] %vm1526_vm1, %v5879_v54  ;;  %v5877_v46 = vadd.f32 %v5845_v19, %v5804_v36  ;;  %v6393_v62 = vld [vmem:[#allocation4 + $0x58] sm:$0xff]  ;;  %v16527_v10 = vsel %vm7310_vm0, %v16392_v34, 0  ;;  %v7037_v54 = vld [vmem:[#allocation3 + $0xc] sm:$0xf] }
 0x25a   : > { %v6480_v5 = vld [vmem:[#allocation4 + $0x10] sm:$0xff]  ;;  %v6271_v12 = vpop.f32.mrf.mxu0  ;;  %512 = vst [vmem:[#allocation3 + $0xb0] sm:$0x1] %v511_v41 }
 0x25b   : > { %v6518_v14 = vmul.f32 %v16488_v50, %v6480_v5  ;;  %6452 = vst.msk [vmem:[#allocation4 + $0x30] sm:$0xff] %vm1526_vm1, %v6420_v42  ;;  %v6418_v40 = vadd.f32 %v6386_v6, %v6271_v12  ;;  %5909 = vst.msk [vmem:[#allocation4 + $0xe8] sm:$0xff] %vm1526_vm1, %v5877_v46 }
 0x25c   : > { %v6478_v9 = vld [vmem:[#allocation4] sm:$0xff]  ;;  %v13959_v3 = vpop.f32.mrf.mxu0 }
 0x25d   : > { %v6556_v16 = vadd.f32 %v16494_v30, %v6518_v14  ;;  %v6516_v61 = vmul.f32 %v16488_v50, %v6478_v9  ;;  %6450 = vst.msk [vmem:[#allocation4 + $0x20] sm:$0xff] %vm1526_vm1, %v6418_v40  ;;  %v6421_v21 = vadd.f32 %v13959_v3, %v6389_v48 }
 0x25e   : > { %v6481_v17 = vld [vmem:[#allocation4 + $0x18] sm:$0xff]  ;;  %v6274_v24 = vpop.f32.mrf.mxu0 }
 0x25f   : > { %v6588_v35 = vmax.f32 %v6556_v16, 0.0  ;;  %v6554_v18 = vadd.f32 %v16494_v30, %v6516_v61  ;;  %v6519_v4 = vmul.f32 %v16488_v50, %v6481_v17  ;;  %6453 = vst.msk [vmem:[#allocation4 + $0x38] sm:$0xff] %vm1526_vm1, %v6421_v21  ;;  %v6419_v29 = vadd.f32 %v6387_v39, %v6274_v24 }
 0x260   : > { %v6479_v0 = vld [vmem:[#allocation4 + $0x8] sm:$0xff]  ;;  %v13962_v11 = vpop.f32.mrf.mxu0 }
 0x261   : > { %v13342_v49 = vpack.c.bf16 %v6588_v35, %v6588_v35  ;;  %v6586_v51 = vmax.f32 %v6554_v18, 0.0  ;;  %v6557_v2 = vadd.f32 %v16494_v30, %v6519_v4  ;;  %v6517_v20 = vmul.f32 %v16488_v50, %v6479_v0  ;;  %6451 = vst.msk [vmem:[#allocation4 + $0x28] sm:$0xff] %vm1526_vm1, %v6419_v29 }
 0x262   : > { %v6484_v44 = vld [vmem:[#allocation4 + $0x30] sm:$0xff]  ;;  %v6424_v1 = vadd.f32 %v13962_v11, %v6392_v28  ;;  %v6287_v27 = vpop.f32.mrf.mxu0  ;;  %v7041_v28 = vld [vmem:[#allocation3 + $0x14] sm:$0x1] }
 0x263   : > { %v6732_v32 = vshrl.u32 %v13342_v49, 16  ;;  %v13340_v31 = vpack.c.bf16 %v6586_v51, %v6586_v51  ;;  %v6589_v26 = vmax.f32 %v6557_v2, 0.0  ;;  %v6555_v60 = vadd.f32 %v16494_v30, %v6517_v20  ;;  %v6391_v2 = vld [vmem:[#allocation4 + $0x48] sm:$0xff] }
 0x264   : > { %v6522_v37 = vmul.f32 %v16488_v50, %v6484_v44  ;;  %v6482_v56 = vld [vmem:[#allocation4 + $0x20] sm:$0xff]  ;;  %6456 = vst.msk [vmem:[#allocation4 + $0x50] sm:$0xff] %vm1526_vm1, %v6424_v1  ;;  %v6422_v15 = vadd.f32 %v6390_v57, %v6287_v27  ;;  %v13963_v63 = vpop.f32.mrf.mxu0  ;;  %v6735_v19 = vshll.u32 %v13342_v49, 16 }
 0x265   : > { %v16523_v22 = vrot.slane %v6732_v32, 7  ;;  %v6715_v25 = vshrl.u32 %v13340_v31, 16  ;;  %v13343_v8 = vpack.c.bf16 %v6589_v26, %v6589_v26  ;;  %v6587_v52 = vmax.f32 %v6555_v60, 0.0 }
 0x266   : > { %v6560_v53 = vadd.f32 %v16494_v30, %v6522_v37  ;;  %v6520_v42 = vmul.f32 %v16488_v50, %v6482_v56  ;;  %v6485_v13 = vld [vmem:[#allocation4 + $0x38] sm:$0xff]  ;;  %6454 = vst.msk [vmem:[#allocation4 + $0x40] sm:$0xff] %vm1526_vm1, %v6422_v15  ;;  %v6425_v5 = vadd.f32 %v13963_v63, %v6393_v62  ;;  %v6290_v45 = vpop.f32.mrf.mxu0  ;;  %v6718_v6 = vshll.u32 %v13340_v31, 16 }
 0x267   : > { %v6717_v12 = vrot.slane %v6715_v25, 7  ;;  %v6740_v14 = vshrl.u32 %v13343_v8, 16  ;;  %v13341_v40 = vpack.c.bf16 %v6587_v52, %v6587_v52  ;;  %v6523_v36 = vmul.f32 %v16488_v50, %v6485_v13 }
 0x268   : > { %v6592_v9 = vmax.f32 %v6560_v53, 0.0  ;;  %v6558_v34 = vadd.f32 %v16494_v30, %v6520_v42  ;;  %v6483_v3 = vld [vmem:[#allocation4 + $0x28] sm:$0xff]  ;;  %6457 = vst.msk [vmem:[#allocation4 + $0x58] sm:$0xff] %vm1526_vm1, %v6425_v5  ;;  %v16535_v48 = vpop.f32.mrf.mxu0  ;;  %v16538_v23 = vor.u32 %v6735_v19, %v16523_v22  ;;  %v6743_v17 = vshll.u32 %v13343_v8, 16 }
 0x269   : > { %v6720_v16 = vor.u32 %v6718_v6, %v6717_v12  ;;  %v16540_v61 = vrot.slane %v6740_v14, 7  ;;  %v6521_v46 = vmul.f32 %v16488_v50, %v6483_v3  ;;  %v6723_v24 = vshrl.u32 %v13341_v40, 16 }
 0x26a   : > { %v13346_v39 = vpack.c.bf16 %v6592_v9, %v6592_v9  ;;  %v6590_v33 = vmax.f32 %v6558_v34, 0.0  ;;  %v6303_v47 = vpop.f32.mrf.mxu0  ;;  %v6721_v35 = vrot.slane %v6717_v12, 4  ;;  %v6726_v4 = vshll.u32 %v13341_v40, 16 }
 0x26b   : > { %v7038_v18 = vsel %vm16545_vm6, %v6720_v16, %v7037_v54  ;;  %v6561_v29 = vadd.f32 %v16494_v30, %v6523_v36  ;;  %v6488_v0 = vld [vmem:[#allocation4 + $0x50] sm:$0xff]  ;;  %v16553_v11 = vor.u32 %v6743_v17, %v16540_v61  ;;  %v6725_v55 = vrot.slane %v6723_v24, 7  ;;  %v6394_v17 = vld [vmem:[#allocation4 + $0x60] sm:$0xff] }
 0x26c   : > { %7039 = vst [vmem:[#allocation3 + $0xc] sm:$0xf] %v7038_v18  ;;  %v6766_v49 = vshrl.u32 %v13346_v39, 16  ;;  %v13344_v51 = vpack.c.bf16 %v6590_v33, %v6590_v33  ;;  %v13967_v20 = vpop.f32.mrf.mxu0  ;;  %v6559_v1 = vadd.f32 %v16494_v30, %v6521_v46  ;;  %v6526_v27 = vmul.f32 %v16488_v50, %v6488_v0  ;;  %v6396_v46 = vld [vmem:[#allocation4 + $0x70] sm:$0xff] }
 0x26d   : > { %v6593_v44 = vmax.f32 %v6561_v29, 0.0  ;;  %v6423_v32 = vadd.f32 %v6391_v2, %v6290_v45  ;;  %v6728_v31 = vor.u32 %v6726_v4, %v6725_v55  ;;  %v6730_v26 = vrot.slane %v6725_v55, 4  ;;  %v6486_v41 = vld [vmem:[#allocation4 + $0x40] sm:$0xff]  ;;  %v13074_v4 = vld [vmem:[%s18292_s6 + $0xc] sm:$0xf] }
 0x26e   : > { %v16557_v57 = vrot.slane %v6766_v49, 7  ;;  %v6749_v38 = vshrl.u32 %v13344_v51, 16  ;;  %v6306_v60 = vpop.f32.mrf.mxu0  ;;  %v6591_v15 = vmax.f32 %v6559_v1, 0.0  ;;  %v6564_v63 = vadd.f32 %v16494_v30, %v6526_v27  ;;  %14302 = vmatprep.subr.msk.bf16.mxu0 %vm7310_vm0, %v13074_v4  ;;  %v7055_v2 = vld [vmem:[#allocation3 + $0x2c] sm:$0x1] }
 0x26f   : > { %v13347_v56 = vpack.c.bf16 %v6593_v44, %v6593_v44  ;;  %v6489_v25 = vld [vmem:[#allocation4 + $0x58] sm:$0xff]  ;;  %6455 = vst.msk [vmem:[#allocation4 + $0x48] sm:$0xff] %vm1526_vm1, %v6423_v32  ;;  %v6729_v62 = vsel %vm14602_vm14, %v6721_v35, %v6728_v31  ;;  %v7042_v52 = vsel %vm14519_vm7, %v6730_v26, %v7041_v28  ;;  %v6769_v53 = vshll.u32 %v13346_v39, 16 }
 0x270   : > { %v16566_v42 = vrot.slane %v6749_v38, 7  ;;  %v13970_v13 = vpop.f32.mrf.mxu0  ;;  %7040 = vst.msk [vmem:[#allocation3 + $0x10] sm:$0xf] %vm402_vm4, %v6729_v62  ;;  %7043 = vst [vmem:[#allocation3 + $0x14] sm:$0x1] %v7042_v52  ;;  %v6752_v5 = vshll.u32 %v13344_v51, 16  ;;  %v13345_v19 = vpack.c.bf16 %v6591_v15, %v6591_v15  ;;  %v6524_v54 = vmul.f32 %v16488_v50, %v6486_v41 }
 0x271   : > { %v6774_v45 = vshrl.u32 %v13347_v56, 16  ;;  %v6596_v12 = vmax.f32 %v6564_v63, 0.0  ;;  %v16570_v6 = vor.u32 %v6769_v53, %v16557_v57  ;;  %v6777_v14 = vshll.u32 %v13347_v56, 16  ;;  %v6397_v51 = vld [vmem:[#allocation4 + $0x78] sm:$0xff]  ;;  %v6395_v56 = vld [vmem:[#allocation4 + $0x68] sm:$0xff]  ;;  %v6400_v15 = vld [vmem:[#allocation4 + $0x90] sm:$0xff] }
 0x272   : > { %v6527_v40 = vmul.f32 %v16488_v50, %v6489_v25  ;;  %v6319_v9 = vpop.f32.mrf.mxu0  ;;  %v16575_v34 = vor.u32 %v6752_v5, %v16566_v42  ;;  %v6757_v3 = vshrl.u32 %v13345_v19, 16  ;;  %v6562_v24 = vadd.f32 %v16494_v30, %v6524_v54  ;;  %v6398_v52 = vld [vmem:[#allocation4 + $0x80] sm:$0xff]  ;;  %v6401_v54 = vld [vmem:[#allocation4 + $0x98] sm:$0xff] }
 0x273   : > { %v16577_v36 = vrot.slane %v6774_v45, 7  ;;  %v16579_v16 = vpack.c.bf16 %v6596_v12, %v6596_v12  ;;  %v6428_v33 = vadd.f32 %v16535_v48, %v6396_v46  ;;  %v6426_v35 = vadd.f32 %v6394_v17, %v6303_v47 }
 0x274   : > { %v6565_v39 = vadd.f32 %v16494_v30, %v6527_v40  ;;  %v13971_v18 = vpop.f32.mrf.mxu0  ;;  %v6755_v29 = vrot.slane %v16566_v42, 4  ;;  %v6759_v55 = vrot.slane %v6757_v3, 7  ;;  %v6760_v49 = vshll.u32 %v13345_v19, 16  ;;  %v6399_v40 = vld [vmem:[#allocation4 + $0x88] sm:$0xff]  ;;  %v6404_v3 = vld [vmem:[#allocation4 + $0xb0] sm:$0xff] }
 0x275   : > { %v16589_v0 = vor.u32 %v6777_v14, %v16577_v36  ;;  %v6800_v28 = vshrl.u32 %v16579_v16, 16  ;;  %v6594_v48 = vmax.f32 %v6562_v24, 0.0  ;;  %6460 = vst.msk [vmem:[#allocation4 + $0x70] sm:$0xff] %vm1526_vm1, %v6428_v33  ;;  %6458 = vst.msk [vmem:[#allocation4 + $0x60] sm:$0xff] %vm1526_vm1, %v6426_v35  ;;  %v6429_v1 = vadd.f32 %v13967_v20, %v6397_v51  ;;  %v7044_v20 = vld [vmem:[#allocation3 + $0x18] sm:$0xf] }
 0x276   : > { %v6597_v47 = vmax.f32 %v6565_v39, 0.0  ;;  %v6487_v44 = vld [vmem:[#allocation4 + $0x48] sm:$0xff]  ;;  %v6322_v27 = vpop.f32.mrf.mxu0  ;;  %v6764_v31 = vrot.slane %v6759_v55, 4  ;;  %v6803_v26 = vshll.u32 %v16579_v16, 16  ;;  %v6427_v25 = vadd.f32 %v6395_v56, %v6306_v60  ;;  %v6402_v35 = vld [vmem:[#allocation4 + $0xa0] sm:$0xff] }
 0x277   : > { %v6525_v38 = vmul.f32 %v16488_v50, %v6487_v44  ;;  %v13348_v63 = vpack.c.bf16 %v6594_v48, %v6594_v48  ;;  %6461 = vst.msk [vmem:[#allocation4 + $0x78] sm:$0xff] %vm1526_vm1, %v6429_v1  ;;  %v6432_v62 = vadd.f32 %v13970_v13, %v6400_v15  ;;  %v14366_v5 = vld [vmem:[#allocation3 + $0xc] sm:$0xff]   ;;  %v6762_v45 = vor.u32 %v6760_v49, %v6759_v55 }
 0x278   : > { %v13351_v41 = vpack.c.bf16 %v6597_v47, %v6597_v47  ;;  %v13974_v53 = vpop.f32.mrf.mxu0  ;;  %v7056_v19 = vsel %vm14519_vm7, %v6764_v31, %v7055_v2  ;;  %v6430_v14 = vadd.f32 %v6398_v52, %v6319_v9  ;;  %v16602_v16 = vrot.slane %v6800_v28, 7  ;;  %6459 = vst.msk [vmem:[#allocation4 + $0x68] sm:$0xff] %vm1526_vm1, %v6427_v25  ;;  %13987 = vmatmul.mubr.msk.bf16.vlgmr.msra.gmra.mxu1 %vm1526_vm1, %v14366_v5  ;;  %v6405_v28 = vld [vmem:[#allocation4 + $0xb8] sm:$0xff]  ;;  %v6403_v25 = vld [vmem:[#allocation4 + $0xa8] sm:$0xff] }
 0x279   : > { %v6563_v12 = vadd.f32 %v16494_v30, %v6525_v38  ;;  %7057 = vst [vmem:[#allocation3 + $0x2c] sm:$0x1] %v7056_v19  ;;  %v6783_v46 = vshrl.u32 %v13348_v63, 16  ;;  %v6786_v60 = vshll.u32 %v13348_v63, 16  ;;  %6464 = vst.msk [vmem:[#allocation4 + $0x90] sm:$0xff] %vm1526_vm1, %v6432_v62  ;;  %v6433_v9 = vadd.f32 %v13971_v18, %v6401_v54  ;;  %14053 = vmatpush3.bf16.msra.mxu1 %v16527_v10 }
 0x27a   : > { %v6808_v13 = vshrl.u32 %v13351_v41, 16  ;;  %v6335_v17 = vpop.f32.mrf.mxu0  ;;  %6462 = vst.msk [vmem:[#allocation4 + $0x80] sm:$0xff] %vm1526_vm1, %v6430_v14  ;;  %v6431_v39 = vadd.f32 %v6399_v40, %v6322_v27  ;;  %v6436_v33 = vadd.f32 %v13974_v53, %v6404_v3  ;;  %v6811_v49 = vshll.u32 %v13351_v41, 16  ;;  %v7051_v27 = vld [vmem:[#allocation3 + $0x24] sm:$0xf] }
 0x27b   : > { %v6595_v24 = vmax.f32 %v6563_v12, 0.0  ;;  %v16609_v4 = vrot.slane %v6783_v46, 7  ;;  %v6434_v51 = vadd.f32 %v6402_v35, %v6335_v17  ;;  %6465 = vst.msk [vmem:[#allocation4 + $0x98] sm:$0xff] %vm1526_vm1, %v6433_v9  ;;  %v7045_v10 = vsel %vm16545_vm6, %v16538_v23, %v7044_v20  ;;  %v6408_v20 = vld [vmem:[#allocation4 + $0xd0] sm:$0xff]  ;;  %v7069_v46 = vld [vmem:[#allocation3 + $0x44] sm:$0x1] }
 0x27c   : > { %v16611_v55 = vrot.slane %v6808_v13, 7  ;;  %v13975_v2 = vpop.f32.mrf.mxu0  ;;  %v6492_v47 = vld [vmem:[#allocation4 + $0x70] sm:$0xff]  ;;  %v6490_v44 = vld [vmem:[#allocation4 + $0x60] sm:$0xff]  ;;  %6463 = vst.msk [vmem:[#allocation4 + $0x88] sm:$0xff] %vm1526_vm1, %v6431_v39  ;;  %6468 = vst.msk [vmem:[#allocation4 + $0xb0] sm:$0xff] %vm1526_vm1, %v6436_v33  ;;  %v6763_v1 = vsel %vm14602_vm14, %v6755_v29, %v6762_v45  ;;  %v16626_v31 = vor.u32 %v6803_v26, %v16602_v16  ;;  %v6738_v15 = vrot.slane %v16523_v22, 4 }
 0x27d   : > { %v16613_v48 = vpack.c.bf16 %v6595_v24, %v6595_v24  ;;  %v6437_v18 = vadd.f32 %v13975_v2, %v6405_v28  ;;  %v16629_v38 = vor.u32 %v6786_v60, %v16609_v4  ;;  %6466 = vst.msk [vmem:[#allocation4 + $0xa0] sm:$0xff] %vm1526_vm1, %v6434_v51  ;;  %7046 = vst [vmem:[#allocation3 + $0x18] sm:$0xf] %v7045_v10  ;;  %v13107_v22 = vld [vmem:[%s18292_s6 + $0x10] sm:$0xf] }
 0x27e   : > { %v6338_v23 = vpop.f32.mrf.mxu0  ;;  %7054 = vst.msk [vmem:[#allocation3 + $0x28] sm:$0xf] %vm402_vm4, %v6763_v1  ;;  %v16636_v42 = vor.u32 %v6811_v49, %v16611_v55  ;;  %v6530_v26 = vmul.f32 %v16488_v50, %v6492_v47  ;;  %v6528_v63 = vmul.f32 %v16488_v50, %v6490_v44  ;;  %v6493_v41 = vld [vmem:[#allocation4 + $0x78] sm:$0xff]  ;;  %v6746_v52 = vsel %vm14602_vm14, %v6738_v15, %v16553_v11 }
 0x27f   : > { %v6791_v29 = vshrl.u32 %v16613_v48, 16  ;;  %6469 = vst.msk [vmem:[#allocation4 + $0xb8] sm:$0xff] %vm1526_vm1, %v6437_v18  ;;  %v6531_v62 = vmul.f32 %v16488_v50, %v6493_v41  ;;  %v6435_v53 = vadd.f32 %v6403_v25, %v6338_v23  ;;  %v7052_v45 = vsel %vm16545_vm6, %v16575_v34, %v7051_v27  ;;  %14303 = vmatprep.subr.msk.bf16.mxu1 %vm7310_vm0, %v13107_v22  ;;  %v6491_v54 = vld [vmem:[#allocation4 + $0x68] sm:$0xff] }
 0x280   : > { %v13978_v5 = vpop.f32.mrf.mxu0  ;;  %v6568_v12 = vadd.f32 %v16494_v30, %v6530_v26  ;;  %v6566_v14 = vadd.f32 %v16494_v30, %v6528_v63  ;;  %v6496_v40 = vld [vmem:[#allocation4 + $0x90] sm:$0xff]  ;;  %7047 = vst.msk [vmem:[#allocation3 + $0x1c] sm:$0xf] %vm402_vm4, %v6746_v52  ;;  %7053 = vst [vmem:[#allocation3 + $0x24] sm:$0xf] %v7052_v45  ;;  %v6529_v34 = vmul.f32 %v16488_v50, %v6491_v54  ;;  %v6794_v24 = vshll.u32 %v16613_v48, 16 }
 0x281   : > { %v6793_v19 = vrot.slane %v6791_v29, 7  ;;  %v6440_v3 = vadd.f32 %v13978_v5, %v6408_v20  ;;  %v6569_v60 = vadd.f32 %v16494_v30, %v6531_v62  ;;  %v6534_v13 = vmul.f32 %v16488_v50, %v6496_v40  ;;  %v6494_v17 = vld [vmem:[#allocation4 + $0x80] sm:$0xff]  ;;  %6467 = vst.msk [vmem:[#allocation4 + $0xa8] sm:$0xff] %vm1526_vm1, %v6435_v53 }
 0x282   : > { %v6600_v39 = vmax.f32 %v6568_v12, 0.0  ;;  %v6598_v33 = vmax.f32 %v6566_v14, 0.0  ;;  %v6567_v49 = vadd.f32 %v16494_v30, %v6529_v34  ;;  %v6532_v2 = vmul.f32 %v16488_v50, %v6494_v17  ;;  %v6497_v28 = vld [vmem:[#allocation4 + $0x98] sm:$0xff] }
 0x283   : > { %v6798_v9 = vrot.slane %v6793_v19, 4  ;;  %6472 = vst.msk [vmem:[#allocation4 + $0xd0] sm:$0xff] %vm1526_vm1, %v6440_v3  ;;  %v6601_v35 = vmax.f32 %v6569_v60, 0.0  ;;  %v6572_v51 = vadd.f32 %v16494_v30, %v6534_v13  ;;  %v6535_v48 = vmul.f32 %v16488_v50, %v6497_v28  ;;  %v6500_v60 = vld [vmem:[#allocation4 + $0xb0] sm:$0xff] }
 0x284   : > { %v13354_v44 = vpack.c.bf16 %v6600_v39, %v6600_v39  ;;  %v13352_v10 = vpack.c.bf16 %v6598_v33, %v6598_v33  ;;  %v6599_v1 = vmax.f32 %v6567_v49, 0.0  ;;  %v6570_v15 = vadd.f32 %v16494_v30, %v6532_v2  ;;  %v6498_v39 = vld [vmem:[#allocation4 + $0xa0] sm:$0xff] }
 0x285   : > { %v7070_v47 = vsel %vm14519_vm7, %v6798_v9, %v7069_v46  ;;  %v13355_v18 = vpack.c.bf16 %v6601_v35, %v6601_v35  ;;  %v6604_v27 = vmax.f32 %v6572_v51, 0.0  ;;  %v6772_v63 = vrot.slane %v16557_v57, 4  ;;  %v6495_v46 = vld [vmem:[#allocation4 + $0x88] sm:$0xff]  ;;  %v7083_v49 = vld [vmem:[#allocation3 + $0x5c] sm:$0x1] }
 0x286   : > { %7071 = vst [vmem:[#allocation3 + $0x44] sm:$0x1] %v7070_v47  ;;  %v6834_v23 = vshrl.u32 %v13354_v44, 16  ;;  %v6837_v29 = vshll.u32 %v13354_v44, 16  ;;  %v6817_v26 = vshrl.u32 %v13352_v10, 16  ;;  %v6820_v41 = vshll.u32 %v13352_v10, 16 }
 0x287   : > { %v6842_v25 = vshrl.u32 %v13355_v18, 16  ;;  %v13353_v22 = vpack.c.bf16 %v6599_v1, %v6599_v1  ;;  %v13358_v62 = vpack.c.bf16 %v6604_v27, %v6604_v27  ;;  %v14367_v52 = vld [vmem:[#allocation3 + $0x18] sm:$0xff]   ;;  %v14368_v53 = vld [vmem:[#allocation3 + $0x24] sm:$0xff]   ;;  %v6602_v45 = vmax.f32 %v6570_v15, 0.0  ;;  %v6501_v44 = vld [vmem:[#allocation4 + $0xb8] sm:$0xff] }
 0x288   : > { %v16671_v5 = vrot.slane %v6834_v23, 7  ;;  %v16673_v20 = vrot.slane %v6817_v26, 7  ;;  %v6573_v12 = vadd.f32 %v16494_v30, %v6535_v48  ;;  %v16676_v14 = vor.u32 %v6794_v24, %v6793_v19  ;;  %13990 = vmatprep.mubr.msk.bf16.mxu1 %vm1526_vm1, %v14367_v52  ;;  %v6499_v26 = vld [vmem:[#allocation4 + $0xa8] sm:$0xff] }
 0x289   : > { %v16678_v54 = vrot.slane %v6842_v25, 7  ;;  %v6825_v40 = vshrl.u32 %v13353_v22, 16  ;;  %v6868_v3 = vshrl.u32 %v13358_v62, 16  ;;  %v6845_v17 = vshll.u32 %v13355_v18, 16  ;;  %13991 = vmatmul.mubr.msk.bf16.gmra.mxu1 %vm1526_vm1, %v14368_v53  ;;  %v7048_v48 = vld [vmem:[#allocation3 + $0x20] sm:$0x1] }
 0x28a   : > { %v16682_v34 = vor.u32 %v6837_v29, %v16671_v5  ;;  %v16685_v13 = vor.u32 %v6820_v41, %v16673_v20  ;;  %v6828_v9 = vshll.u32 %v13353_v22, 16  ;;  %v6871_v35 = vshll.u32 %v13358_v62, 16 }
 0x28b   : > { %v6827_v24 = vrot.slane %v6825_v40, 7  ;;  %v16689_v33 = vrot.slane %v6868_v3, 7  ;;  %v13356_v51 = vpack.c.bf16 %v6602_v45, %v6602_v45  ;;  %v6605_v2 = vmax.f32 %v6573_v12, 0.0 }
 0x28c   : > { %v6533_v28 = vmul.f32 %v16488_v50, %v6495_v46  ;;  %v6538_v47 = vmul.f32 %v16488_v50, %v6500_v60  ;;  %v16694_v10 = vor.u32 %v6845_v17, %v16678_v54  ;;  %v6536_v1 = vmul.f32 %v16488_v50, %v6498_v39 }
 0x28d   : > { %v6832_v18 = vrot.slane %v6827_v24, 4  ;;  %v16698_v27 = vor.u32 %v6828_v9, %v6827_v24  ;;  %v6851_v15 = vshrl.u32 %v13356_v51, 16  ;;  %v13359_v23 = vpack.c.bf16 %v6605_v2, %v6605_v2 }
 0x28e   : > { %v6571_v29 = vadd.f32 %v16494_v30, %v6533_v28  ;;  %v6576_v25 = vadd.f32 %v16494_v30, %v6538_v47  ;;  %v6574_v22 = vadd.f32 %v16494_v30, %v6536_v1  ;;  %v6539_v62 = vmul.f32 %v16488_v50, %v6501_v44  ;;  %v6504_v47 = vld [vmem:[#allocation4 + $0xd0] sm:$0xff]  ;;  %v6351_v44 = vpop.f32.mrf.mxu0 }
 0x28f   : > { %v7084_v41 = vsel %vm14519_vm7, %v6832_v18, %v7083_v49  ;;  %v16707_v52 = vor.u32 %v6871_v35, %v16689_v33  ;;  %v16709_v53 = vrot.slane %v6851_v15, 7  ;;  %v6876_v45 = vshrl.u32 %v13359_v23, 16 }
 0x290   : > { %7085 = vst [vmem:[#allocation3 + $0x5c] sm:$0x1] %v7084_v41  ;;  %v6603_v12 = vmax.f32 %v6571_v29, 0.0  ;;  %v6608_v40 = vmax.f32 %v6576_v25, 0.0  ;;  %v6606_v3 = vmax.f32 %v6574_v22, 0.0  ;;  %v6577_v46 = vadd.f32 %v16494_v30, %v6539_v62 }
 0x291   : > { %v6537_v60 = vmul.f32 %v16488_v50, %v6499_v26  ;;  %v6854_v17 = vshll.u32 %v13356_v51, 16  ;;  %v16713_v9 = vrot.slane %v6876_v45, 7  ;;  %v6879_v39 = vshll.u32 %v13359_v23, 16 }
 0x292   : > { %v13357_v24 = vpack.c.bf16 %v6603_v12, %v6603_v12  ;;  %v13362_v49 = vpack.c.bf16 %v6608_v40, %v6608_v40  ;;  %v13360_v2 = vpack.c.bf16 %v6606_v3, %v6606_v3  ;;  %v6609_v28 = vmax.f32 %v6577_v46, 0.0  ;;  %v6406_v12 = vld [vmem:[#allocation4 + $0xc0] sm:$0xff]  ;;  %v7097_v40 = vld [vmem:[#allocation3 + $0x74] sm:$0x1] }
 0x293   : > { %18336 = vst [vmem:[#allocation6_spill] sm:$0xff] %v16713_v9  ;;  %v6575_v35 = vadd.f32 %v16494_v30, %v6537_v60  ;;  %v16717_v18 = vor.u32 %v6854_v17, %v16709_v53  ;;  %v16721_v15 = vor.u32 %v6879_v39, %v16713_v9  ;;  %v6542_v45 = vmul.f32 %v16488_v50, %v6504_v47  ;;  %v7058_v39 = vld [vmem:[#allocation3 + $0x30] sm:$0xf] }
 0x294   : > { %v6859_v51 = vshrl.u32 %v13357_v24, 16  ;;  %v6862_v29 = vshll.u32 %v13357_v24, 16  ;;  %v6902_v26 = vshrl.u32 %v13362_v49, 16  ;;  %v6905_v23 = vshll.u32 %v13362_v49, 16  ;;  %v13979_v24 = vpop.f32.mrf.mxu0 }
 0x295   : > { %v6885_v41 = vshrl.u32 %v13360_v2, 16  ;;  %v13363_v22 = vpack.c.bf16 %v6609_v28, %v6609_v28  ;;  %v6607_v62 = vmax.f32 %v6575_v35, 0.0  ;;  %v6438_v60 = vadd.f32 %v6406_v12, %v6351_v44 }
 0x296   : > { %v6861_v25 = vrot.slane %v6859_v51, 7  ;;  %v16724_v3 = vrot.slane %v6902_v26, 7  ;;  %v6780_v17 = vsel %vm14602_vm14, %v6772_v63, %v16589_v0  ;;  %v6888_v35 = vshll.u32 %v13360_v2, 16  ;;  %v7510_v51 = vld [vmem:[#allocation3 + $0xc] sm:$0xf] }
 0x297   : > { %v16726_v46 = vrot.slane %v6885_v41, 7  ;;  %v6910_v47 = vshrl.u32 %v13363_v22, 16  ;;  %7061 = vst.msk [vmem:[#allocation3 + $0x34] sm:$0xf] %vm402_vm4, %v6780_v17  ;;  %v6913_v41 = vshll.u32 %v13363_v22, 16  ;;  %v13361_v57 = vpack.c.bf16 %v6607_v62, %v6607_v62  ;;  %v6354_v17 = vpop.f32.mrf.mxu0 }
 0x298   : > { %v6866_v28 = vrot.slane %v6861_v25, 4  ;;  %v16735_v26 = vor.u32 %v6862_v29, %v6861_v25  ;;  %v16738_v44 = vor.u32 %v6905_v23, %v16724_v3  ;;  %6470 = vst.msk [vmem:[#allocation4 + $0xc0] sm:$0xff] %vm1526_vm1, %v6438_v60  ;;  %v7511_v0 = vld [vmem:[#allocation3 + $0x10] sm:$0xf]  ;;  %v6580_v2 = vadd.f32 %v16494_v30, %v6542_v45  ;;  %v7512_v22 = vld [vmem:[#allocation3 + $0x14] sm:$0x1] }
 0x299   : > { %v16744_v12 = vor.u32 %v6888_v35, %v16726_v46  ;;  %v7059_v29 = vsel %vm16545_vm6, %v16570_v6, %v7058_v39  ;;  %v16750_v23 = vrot.slane %v6910_v47, 7  ;;  %v6893_v25 = vshrl.u32 %v13361_v57, 16  ;;  %v6409_v6 = vld [vmem:[#allocation4 + $0xd8] sm:$0xff]  ;;  %v7111_v39 = vld [vmem:[#allocation3 + $0x8c] sm:$0x1]  ;;  %v13982_v37 = vpop.f32.mrf.mxu0 }
 0x29a   : > { %v7098_v63 = vsel %vm14519_vm7, %v6866_v28, %v7097_v40  ;;  %7060 = vst [vmem:[#allocation3 + $0x30] sm:$0xf] %v7059_v29  ;;  %v7580_v62 = vshrl.u32 %v7510_v51, 16  ;;  %v7583_v60 = vshll.u32 %v7510_v51, 16  ;;  %v6896_v28 = vshll.u32 %v13361_v57, 16 }
 0x29b   : > { %7099 = vst [vmem:[#allocation3 + $0x74] sm:$0x1] %v7098_v63  ;;  %18337 = vst [vmem:[#allocation9_spill] sm:$0xff] %v16750_v23  ;;  %v6612_v35 = vmax.f32 %v6580_v2, 0.0  ;;  %v7589_v49 = vshll.u32 %v7511_v0, 16  ;;  %v6895_v45 = vrot.slane %v6893_v25, 7  ;;  %v6441_v32 = vadd.f32 %v13979_v24, %v6409_v6  ;;  %v6367_v58 = vpop.f32.mrf.mxu0 }
 0x29c   : > { %v7582_v1 = vrot.slane %v7580_v62, 4  ;;  %v7585_v11 = vrot.slane %v7583_v60, 5  ;;  %v7593_v19 = vshrl.u32 %v7511_v0, 16  ;;  %v7599_v29 = vshll.u32 %v7512_v22, 16  ;;  %v7513_v2 = vld [vmem:[#allocation3 + $0x18] sm:$0xf] }
 0x29d   : > { %v16753_v47 = vpack.c.bf16 %v6612_v35, %v6612_v35  ;;  %v7591_v63 = vrot.slane %v7589_v49, 5  ;;  %v16756_v51 = vor.u32 %v6913_v41, %v16750_v23  ;;  %v6900_v56 = vrot.slane %v6895_v45, 4  ;;  %6473 = vst.msk [vmem:[#allocation4 + $0xd8] sm:$0xff] %vm1526_vm1, %v6441_v32  ;;  %v7514_v41 = vld [vmem:[#allocation3 + $0x1c] sm:$0xf] }
 0x29e   : > { %v7586_v40 = vor.u32 %v7585_v11, %v7582_v1  ;;  %v7595_v57 = vrot.slane %v7593_v19, 4  ;;  %v16759_v62 = vor.u32 %v6896_v28, %v6895_v45  ;;  %v18338_v49 = vrot.slane %v16540_v61, 4  ;;  %v6407_v28 = vld [vmem:[#allocation4 + $0xc8] sm:$0xff] }
 0x29f   : > { %v6936_v0 = vshrl.u32 %v16753_v47, 16  ;;  %v6502_v60 = vld [vmem:[#allocation4 + $0xc0] sm:$0xff]  ;;  %v7112_v11 = vsel %vm14519_vm7, %v6900_v56, %v7111_v39  ;;  %v7601_v45 = vrot.slane %v7599_v29, 5  ;;  %v7604_v6 = vshrl.u32 %v7513_v2, 16  ;;  %v7072_v56 = vld [vmem:[#allocation3 + $0x48] sm:$0xf] }
 0x2a0   : > { %v7049_v24 = vsel %vm14519_vm7, %v18338_v49, %v7048_v48  ;;  %v6540_v19 = vmul.f32 %v16488_v50, %v6502_v60  ;;  %v7587_v1 = vrot.slane %v7586_v40, 4  ;;  %v7596_v22 = vor.u32 %v7595_v57, %v7591_v63  ;;  %7113 = vst [vmem:[#allocation3 + $0x8c] sm:$0x1] %v7112_v11  ;;  %v6412_v29 = vld [vmem:[#allocation4 + $0xf0] sm:$0xff] }
 0x2a1   : > { %7050 = vst [vmem:[#allocation3 + $0x20] sm:$0x1] %v7049_v24  ;;  %v14369_v35 = vld [vmem:[#allocation3 + $0x30] sm:$0xff]   ;;  %v7607_v32 = vshll.u32 %v7513_v2, 16  ;;  %v6439_v25 = vadd.f32 %v6407_v28, %v6354_v17  ;;  %v16770_v61 = vrot.slane %v6936_v0, 7  ;;  %v7613_v43 = vshll.u32 %v7514_v41, 16 }
 0x2a2   : > { %v6578_v48 = vadd.f32 %v16494_v30, %v6540_v19  ;;  %v7597_v49 = vrot.slane %v7596_v22, 4  ;;  %13994 = vmatprep.mubr.msk.bf16.mxu1 %vm1526_vm1, %v14369_v35  ;;  %v7592_v40 = vsel %vm14632_vm15, %v7587_v1, %v7591_v63  ;;  %v7606_v39 = vrot.slane %v7604_v6, 4  ;;  %v7065_v17 = vld [vmem:[#allocation3 + $0x3c] sm:$0xf]  ;;  %v7516_v1 = vld [vmem:[#allocation3 + $0x24] sm:$0xf] }
 0x2a3   : > { %v7609_v57 = vrot.slane %v7607_v32, 5  ;;  %v7617_v60 = vshrl.u32 %v7514_v41, 16  ;;  %6471 = vst.msk [vmem:[#allocation4 + $0xc8] sm:$0xff] %vm1526_vm1, %v6439_v25  ;;  %v7615_v24 = vrot.slane %v7613_v43, 5  ;;  %v6444_v11 = vadd.f32 %v13982_v37, %v6412_v29  ;;  %v6410_v19 = vld [vmem:[#allocation4 + $0xe0] sm:$0xff] }
 0x2a4   : > { %v6610_v2 = vmax.f32 %v6578_v48, 0.0  ;;  %v7602_v0 = vsel %vm14632_vm15, %v7597_v49, %v7601_v45  ;;  %v6442_v23 = vadd.f32 %v6410_v19, %v6367_v58  ;;  %v6505_v63 = vld [vmem:[#allocation4 + $0xd8] sm:$0xff]  ;;  %v18339_v25 = vrot.slane %v16609_v4, 4 }
 0x2a5   : > { %v12994_v22 = vcombine.low %v7592_v40, %v7602_v0  ;;  %v7610_v28 = vor.u32 %v7609_v57, %v7606_v39  ;;  %v7619_v35 = vrot.slane %v7617_v60, 4  ;;  %6476 = vst.msk [vmem:[#allocation4 + $0xf0] sm:$0xff] %vm1526_vm1, %v6444_v11  ;;  %v7066_v43 = vsel %vm16545_vm6, %v16629_v38, %v7065_v17  ;;  %v7517_v38 = vld [vmem:[#allocation3 + $0x28] sm:$0xf]  ;;  %v13983_v0 = vpop.f32.mrf.mxu0 }
 0x2a6   : > { %v13364_v9 = vpack.c.bf16 %v6610_v2, %v6610_v2  ;;  %v6797_v41 = vsel %vm14602_vm14, %v18339_v25, %v16676_v14  ;;  %v6806_v37 = vrot.slane %v16602_v16, 4  ;;  %v6939_v45 = vshll.u32 %v16753_v47, 16  ;;  %6474 = vst.msk [vmem:[#allocation4 + $0xe0] sm:$0xff] %vm1526_vm1, %v6442_v23  ;;  %7067 = vst [vmem:[#allocation3 + $0x3c] sm:$0xf] %v7066_v43 }
 0x2a7   : > { %14021 = vmatmul.mubr.msk.bf16.vlgmr.msra.gmra.mxu0 %vm1526_vm1, %v12994_v22  ;;  %v6543_v58 = vmul.f32 %v16488_v50, %v6505_v63  ;;  %v7620_v32 = vor.u32 %v7619_v35, %v7615_v24  ;;  %7068 = vst.msk [vmem:[#allocation3 + $0x40] sm:$0xf] %vm402_vm4, %v6797_v41  ;;  %v7073_v4 = vsel %vm16545_vm6, %v16626_v31, %v7072_v56  ;;  %v7611_v14 = vrot.slane %v7610_v28, 4  ;;  %v6413_v35 = vld [vmem:[#allocation4 + $0xf8] sm:$0xff]  ;;  %v7062_v63 = vld [vmem:[#allocation3 + $0x38] sm:$0x1] }
 0x2a8   : > { %v7515_v6 = vld [vmem:[#allocation3 + $0x20] sm:$0x1]  ;;  %v6919_v16 = vshrl.u32 %v13364_v9, 16  ;;  %v6814_v47 = vsel %vm14602_vm14, %v6806_v37, %v16636_v42  ;;  %7074 = vst [vmem:[#allocation3 + $0x48] sm:$0xf] %v7073_v4  ;;  %v16801_v50 = vor.u32 %v6939_v45, %v16770_v61  ;;  %v7628_v40 = vshrl.u32 %v7516_v1, 16 }
 0x2a9   : > { %v7623_v48 = vshll.u32 %v7515_v6, 16  ;;  %v6581_v23 = vadd.f32 %v16494_v30, %v6543_v58  ;;  %v7621_v49 = vrot.slane %v7620_v32, 4  ;;  %7075 = vst.msk [vmem:[#allocation3 + $0x4c] sm:$0xf] %vm402_vm4, %v6814_v47  ;;  %v7631_v57 = vshll.u32 %v7516_v1, 16 }
 0x2aa   : > { %v16805_v39 = vrot.slane %v6919_v16, 7  ;;  %v6503_v56 = vld [vmem:[#allocation4 + $0xc8] sm:$0xff]  ;;  %v7637_v60 = vshll.u32 %v7517_v38, 16  ;;  %v16810_v42 = vld [vmem:[%s18290_s4] ss:$0 sm:$0xff]  ;;  %v7630_v2 = vrot.slane %v7628_v40, 4  ;;  %v7616_v19 = vsel %vm14632_vm15, %v7611_v14, %v7615_v24 }
 0x2ab   : > { %v7625_v31 = vrot.slane %v7623_v48, 5  ;;  %v6613_v29 = vmax.f32 %v6581_v23, 0.0  ;;  %v6541_v17 = vmul.f32 %v16810_v42, %v6503_v56  ;;  %v7641_v30 = vshrl.u32 %v7517_v38, 16  ;;  %v16820_v43 = vld [vmem:[%s18291_s5] ss:$0 sm:$0xff] }
 0x2ac   : > { %v6922_v11 = vshll.u32 %v13364_v9, 16  ;;  %v7633_v28 = vrot.slane %v7631_v57, 5  ;;  %v6508_v1 = vld [vmem:[#allocation4 + $0xf0] sm:$0xff]  ;;  %v7639_v45 = vrot.slane %v7637_v60, 5  ;;  %v6445_v4 = vadd.f32 %v13983_v0, %v6413_v35 }
 0x2ad   : > { %v7626_v22 = vsel %vm14632_vm15, %v7621_v49, %v7625_v31  ;;  %v13367_v25 = vpack.c.bf16 %v6613_v29, %v6613_v29  ;;  %v6579_v37 = vadd.f32 %v16820_v43, %v6541_v17  ;;  %v7518_v9 = vld [vmem:[#allocation3 + $0x2c] sm:$0x1]  ;;  %v6546_v24 = vmul.f32 %v16810_v42, %v6508_v1  ;;  %v6506_v58 = vld [vmem:[#allocation4 + $0xe0] sm:$0xff] }
 0x2ae   : > { %v12995_v41 = vcombine.low %v7616_v19, %v7626_v22  ;;  %v7634_v6 = vor.u32 %v7633_v28, %v7630_v2  ;;  %v7643_v32 = vrot.slane %v7641_v30, 4  ;;  %v16825_v38 = vor.u32 %v6922_v11, %v16805_v39  ;;  %v14370_v47 = vld [vmem:[#allocation3 + $0x3c] sm:$0xff]   ;;  %6477 = vst.msk [vmem:[#allocation4 + $0xf8] sm:$0xff] %vm1526_vm1, %v6445_v4  ;;  %v7519_v30 = vld [vmem:[#allocation3 + $0x30] sm:$0xf] }
 0x2af   : > { %v6944_v16 = vshrl.u32 %v13367_v25, 16  ;;  %v6611_v14 = vmax.f32 %v6579_v37, 0.0  ;;  %v6544_v48 = vmul.f32 %v16810_v42, %v6506_v58  ;;  %v6584_v23 = vadd.f32 %v16820_v43, %v6546_v24  ;;  %13995 = vmatmul.mubr.msk.bf16.gmra.mxu1 %vm1526_vm1, %v14370_v47  ;;  %v7520_v28 = vld [vmem:[#allocation3 + $0x34] sm:$0xf] }
 0x2b0   : > { %14024 = vmatprep.mubr.msk.bf16.mxu0 %vm1526_vm1, %v12995_v41  ;;  %v14371_v49 = vld [vmem:[#allocation3 + $0x48] sm:$0xff]   ;;  %v7635_v40 = vrot.slane %v7634_v6, 4  ;;  %v7644_v31 = vor.u32 %v7643_v32, %v7639_v45  ;;  %v7647_v56 = vshll.u32 %v7518_v9, 16  ;;  %v18340_v17 = vrot.slane %v16577_v36, 4 }
 0x2b1   : > { %v16831_v57 = vrot.slane %v6944_v16, 7  ;;  %v13365_v60 = vpack.c.bf16 %v6611_v14, %v6611_v14  ;;  %v6582_v29 = vadd.f32 %v16820_v43, %v6544_v48  ;;  %v6925_v0 = vrot.slane %v16805_v39, 4  ;;  %13998 = vmatprep.mubr.msk.bf16.mxu1 %vm1526_vm1, %v14371_v49  ;;  %v7125_v14 = vld [vmem:[#allocation3 + $0xa4] sm:$0x1] }
 0x2b2   : > { %v7063_v2 = vsel %vm14519_vm7, %v18340_v17, %v7062_v63  ;;  %v6616_v11 = vmax.f32 %v6584_v23, 0.0  ;;  %v7645_v19 = vrot.slane %v7644_v31, 4  ;;  %v7649_v22 = vrot.slane %v7647_v56, 5  ;;  %v6370_v23 = vpop.f32.mrf.mxu0 }
 0x2b3   : > { %7064 = vst [vmem:[#allocation3 + $0x38] sm:$0x1] %v7063_v2  ;;  %v6947_v35 = vshll.u32 %v13367_v25, 16  ;;  %v6951_v41 = vrot.slane %v16831_v57, 4  ;;  %v6927_v37 = vshrl.u32 %v13365_v60, 16  ;;  %v7640_v36 = vsel %vm14632_vm15, %v7635_v40, %v7639_v45 }
 0x2b4   : > { %v16844_v1 = vpack.c.bf16 %v6616_v11, %v6616_v11  ;;  %v6614_v63 = vmax.f32 %v6582_v29, 0.0  ;;  %v7650_v9 = vsel %vm14632_vm15, %v7645_v19, %v7649_v22  ;;  %v7652_v24 = vshrl.u32 %v7519_v30, 16 }
 0x2b5   : > { %v6929_v58 = vrot.slane %v6927_v37, 7  ;;  %v12996_v6 = vcombine.low %v7640_v36, %v7650_v9  ;;  %v7655_v32 = vshll.u32 %v7519_v30, 16  ;;  %v7661_v4 = vshll.u32 %v7520_v28, 16  ;;  %v6509_v40 = vld [vmem:[#allocation4 + $0xf8] sm:$0xff]  ;;  %v6411_v30 = vld [vmem:[#allocation4 + $0xe8] sm:$0xff] }
 0x2b6   : > { %v6930_v16 = vshll.u32 %v13365_v60, 16  ;;  %v6970_v25 = vshrl.u32 %v16844_v1, 16  ;;  %v13368_v48 = vpack.c.bf16 %v6614_v63, %v6614_v63  ;;  %v7654_v47 = vrot.slane %v7652_v24, 4  ;;  %v7079_v36 = vld [vmem:[#allocation3 + $0x54] sm:$0xf] }
 0x2b7   : > { %v16850_v45 = vor.u32 %v6947_v35, %v16831_v57  ;;  %v6934_v49 = vrot.slane %v6929_v58, 4  ;;  %14025 = vmatmul.mubr.msk.bf16.gmra.mxu0 %vm1526_vm1, %v12996_v6  ;;  %v7657_v31 = vrot.slane %v7655_v32, 5  ;;  %v7663_v56 = vrot.slane %v7661_v4, 5  ;;  %v7086_v63 = vld [vmem:[#allocation3 + $0x60] sm:$0xf] }
 0x2b8   : > { %v16853_v29 = vrot.slane %v6970_v25, 7  ;;  %v6953_v17 = vshrl.u32 %v13368_v48, 16  ;;  %v6956_v2 = vshll.u32 %v13368_v48, 16  ;;  %v6547_v60 = vmul.f32 %v16810_v42, %v6509_v40  ;;  %v7523_v40 = vld [vmem:[#allocation3 + $0x40] sm:$0xf] }
 0x2b9   : > { %v7126_v11 = vsel %vm14519_vm7, %v6934_v49, %v7125_v14  ;;  %v7658_v22 = vor.u32 %v7657_v31, %v7654_v47  ;;  %v7665_v35 = vshrl.u32 %v7520_v28, 16  ;;  %v6443_v37 = vadd.f32 %v6411_v30, %v6370_v23  ;;  %v7524_v30 = vld [vmem:[#allocation3 + $0x44] sm:$0x1] }
 0x2ba   : > { %v7521_v19 = vld [vmem:[#allocation3 + $0x38] sm:$0x1]  ;;  %v16858_v9 = vor.u32 %v6930_v16, %v6929_v58  ;;  %7127 = vst [vmem:[#allocation3 + $0xa4] sm:$0x1] %v7126_v11  ;;  %v6976_v24 = vrot.slane %v16853_v29, 4  ;;  %v16861_v6 = vrot.slane %v6953_v17, 7  ;;  %v6585_v32 = vadd.f32 %v16820_v43, %v6547_v60 }
 0x2bb   : > { %v7659_v4 = vrot.slane %v7658_v22, 4  ;;  %v7667_v25 = vrot.slane %v7665_v35, 4  ;;  %v7671_v48 = vshll.u32 %v7521_v19, 16  ;;  %6475 = vst.msk [vmem:[#allocation4 + $0xe8] sm:$0xff] %vm1526_vm1, %v6443_v37  ;;  %v18341_v28 = vrot.slane %v16673_v20, 4 }
 0x2bc   : > { %v7522_v58 = vld [vmem:[#allocation3 + $0x3c] sm:$0xf]  ;;  %v16871_v16 = vor.u32 %v6956_v2, %v16861_v6  ;;  %v6959_v47 = vrot.slane %v16861_v6, 4  ;;  %v6617_v23 = vmax.f32 %v6585_v32, 0.0  ;;  %v7080_v49 = vsel %vm16545_vm6, %v16685_v13, %v7079_v36  ;;  %v7076_v37 = vld [vmem:[#allocation3 + $0x50] sm:$0x1] }
 0x2bd   : > { %v6831_v14 = vsel %vm14602_vm14, %v18341_v28, %v16698_v27  ;;  %v7664_v20 = vsel %vm14632_vm15, %v7659_v4, %v7663_v56  ;;  %v7668_v31 = vor.u32 %v7667_v25, %v7663_v56  ;;  %v7673_v17 = vrot.slane %v7671_v48, 5  ;;  %7081 = vst [vmem:[#allocation3 + $0x54] sm:$0xf] %v7080_v49  ;;  %v7525_v25 = vld [vmem:[#allocation3 + $0x48] sm:$0xf] }
 0x2be   : > { %7082 = vst.msk [vmem:[#allocation3 + $0x58] sm:$0xf] %vm402_vm4, %v6831_v14  ;;  %v6840_v27 = vrot.slane %v16671_v5, 4  ;;  %v13371_v2 = vpack.c.bf16 %v6617_v23, %v6617_v23  ;;  %v7087_v60 = vsel %vm16545_vm6, %v16682_v34, %v7086_v63  ;;  %v7676_v11 = vshrl.u32 %v7522_v58, 16 }
 0x2bf   : > { %v7679_v19 = vshll.u32 %v7522_v58, 16  ;;  %v7669_v13 = vrot.slane %v7668_v31, 4  ;;  %7088 = vst [vmem:[#allocation3 + $0x60] sm:$0xf] %v7087_v60  ;;  %v7685_v35 = vshll.u32 %v7523_v40, 16  ;;  %v7689_v56 = vshrl.u32 %v7523_v40, 16 }
 0x2c0   : > { %v6848_v22 = vsel %vm14602_vm14, %v6840_v27, %v16694_v10  ;;  %v6978_v36 = vshrl.u32 %v13371_v2, 16  ;;  %v6981_v32 = vshll.u32 %v13371_v2, 16  ;;  %v7678_v5 = vrot.slane %v7676_v11, 4  ;;  %v7146_v58 = vld [vmem:[#allocation3 + $0xc8] sm:$0x1] }
 0x2c1   : > { %7089 = vst.msk [vmem:[#allocation3 + $0x64] sm:$0xf] %vm402_vm4, %v6848_v22  ;;  %v7681_v4 = vrot.slane %v7679_v19, 5  ;;  %v7674_v34 = vsel %vm14632_vm15, %v7669_v13, %v7673_v17  ;;  %v7687_v63 = vrot.slane %v7685_v35, 5  ;;  %v7691_v48 = vrot.slane %v7689_v56, 4 }
 0x2c2   : > { %v7695_v28 = vshll.u32 %v7524_v30, 16  ;;  %v6980_v14 = vrot.slane %v6978_v36, 7  ;;  %v12997_v10 = vcombine.low %v7664_v20, %v7674_v34  ;;  %v6507_v23 = vld [vmem:[#allocation4 + $0xe8] sm:$0xff]  ;;  %v18342_v40 = vrot.slane %v16611_v55, 4  ;;  %v7526_v27 = vld [vmem:[#allocation3 + $0x4c] sm:$0xf] }
 0x2c3   : > { %v7682_v49 = vor.u32 %v7681_v4, %v7678_v5  ;;  %v6545_v2 = vmul.f32 %v16810_v42, %v6507_v23  ;;  %v7692_v60 = vor.u32 %v7691_v48, %v7687_v63  ;;  %v7700_v17 = vshrl.u32 %v7525_v25, 16  ;;  %v7093_v19 = vld [vmem:[#allocation3 + $0x6c] sm:$0xf]  ;;  %v7100_v55 = vld [vmem:[#allocation3 + $0x78] sm:$0xf] }
 0x2c4   : > { %v7077_v31 = vsel %vm14519_vm7, %v18342_v40, %v7076_v37  ;;  %v7697_v11 = vrot.slane %v7695_v28, 5  ;;  %v16895_v13 = vor.u32 %v6981_v32, %v6980_v14  ;;  %v6985_v30 = vrot.slane %v6980_v14, 4  ;;  %14028 = vmatprep.mubr.msk.bf16.mxu0 %vm1526_vm1, %v12997_v10  ;;  %v7528_v28 = vld [vmem:[#allocation3 + $0x54] sm:$0xf] }
 0x2c5   : > { %7078 = vst [vmem:[#allocation3 + $0x50] sm:$0x1] %v7077_v31  ;;  %v14372_v20 = vld [vmem:[#allocation3 + $0x54] sm:$0xff]   ;;  %v7683_v22 = vrot.slane %v7682_v49, 4  ;;  %v7703_v35 = vshll.u32 %v7525_v25, 16  ;;  %v6583_v56 = vadd.f32 %v16820_v43, %v6545_v2  ;;  %v7693_v37 = vrot.slane %v7692_v60, 4 }
 0x2c6   : > { %v7702_v36 = vrot.slane %v7700_v17, 4  ;;  %v7709_v5 = vshll.u32 %v7526_v27, 16  ;;  %v7529_v42 = vld [vmem:[#allocation3 + $0x58] sm:$0xf]  ;;  %v7147_v4 = vsel %vm14519_vm7, %v6985_v30, %v7146_v58  ;;  %13999 = vmatmul.mubr.msk.bf16.gmra.mxu1 %vm1526_vm1, %v14372_v20  ;;  %v7713_v48 = vshrl.u32 %v7526_v27, 16 }
 0x2c7   : > { %v7688_v32 = vsel %vm14632_vm15, %v7683_v22, %v7687_v63  ;;  %v7705_v34 = vrot.slane %v7703_v35, 5  ;;  %7148 = vst [vmem:[#allocation3 + $0xc8] sm:$0x1] %v7147_v4  ;;  %v6615_v25 = vmax.f32 %v6583_v56, 0.0  ;;  %v7698_v43 = vsel %vm14632_vm15, %v7693_v37, %v7697_v11  ;;  %v7090_v11 = vld [vmem:[#allocation3 + $0x68] sm:$0x1] }
 0x2c8   : > { %v14373_v14 = vld [vmem:[#allocation3 + $0x60] sm:$0xff]   ;;  %v7711_v10 = vrot.slane %v7709_v5, 5  ;;  %v18343_v23 = vrot.slane %v16709_v53, 4  ;;  %v12998_v49 = vcombine.low %v7688_v32, %v7698_v43  ;;  %v7715_v31 = vrot.slane %v7713_v48, 4 }
 0x2c9   : > { %v7706_v40 = vor.u32 %v7705_v34, %v7702_v36  ;;  %v7094_v63 = vsel %vm16545_vm6, %v16717_v18, %v7093_v19  ;;  %v13369_v27 = vpack.c.bf16 %v6615_v25, %v6615_v25  ;;  %14002 = vmatprep.mubr.msk.bf16.mxu1 %vm1526_vm1, %v14373_v14  ;;  %v6874_v2 = vrot.slane %v16689_v33, 4  ;;  %v7531_v37 = vld [vmem:[#allocation3 + $0x60] sm:$0xf]  ;;  %v7532_v32 = vld [vmem:[#allocation3 + $0x64] sm:$0xf] }
 0x2ca   : > { %v6865_v58 = vsel %vm14602_vm14, %v18343_v23, %v16735_v26  ;;  %7095 = vst [vmem:[#allocation3 + $0x6c] sm:$0xf] %v7094_v63  ;;  %v7101_v53 = vsel %vm16545_vm6, %v16707_v52, %v7100_v55  ;;  %v7530_v26 = vld [vmem:[#allocation3 + $0x5c] sm:$0x1]  ;;  %v7724_v60 = vshrl.u32 %v7528_v28, 16  ;;  %14029 = vmatmul.mubr.msk.bf16.gmra.mxu0 %vm1526_vm1, %v12998_v49  ;;  %v7716_v18 = vor.u32 %v7715_v31, %v7711_v10 }
 0x2cb   : > { %7096 = vst.msk [vmem:[#allocation3 + $0x70] sm:$0xf] %vm402_vm4, %v6865_v58  ;;  %v7707_v30 = vrot.slane %v7706_v40, 4  ;;  %7102 = vst [vmem:[#allocation3 + $0x78] sm:$0xf] %v7101_v53  ;;  %v7727_v19 = vshll.u32 %v7528_v28, 16  ;;  %v6882_v33 = vsel %vm14602_vm14, %v6874_v2, %v16721_v15 }
 0x2cc   : > { %v7527_v17 = vld [vmem:[#allocation3 + $0x50] sm:$0x1]  ;;  %v7733_v20 = vshll.u32 %v7529_v42, 16  ;;  %v6961_v22 = vshrl.u32 %v13369_v27, 16  ;;  %v6964_v35 = vshll.u32 %v13369_v27, 16  ;;  %v7717_v36 = vrot.slane %v7716_v18, 4 }
 0x2cd   : > { %v7719_v56 = vshll.u32 %v7527_v17, 16  ;;  %v7139_v52 = vld [vmem:[#allocation3 + $0xbc] sm:$0x1]  ;;  %v7712_v55 = vsel %vm14632_vm15, %v7707_v30, %v7711_v10  ;;  %7103 = vst.msk [vmem:[#allocation3 + $0x7c] sm:$0xf] %vm402_vm4, %v6882_v33  ;;  %v7726_v5 = vrot.slane %v7724_v60, 4 }
 0x2ce   : > { %v7729_v4 = vrot.slane %v7727_v19, 5  ;;  %v6963_v34 = vrot.slane %v6961_v22, 7  ;;  %v7735_v28 = vrot.slane %v7733_v20, 5  ;;  %v7737_v25 = vshrl.u32 %v7529_v42, 16  ;;  %v7114_v49 = vld [vmem:[#allocation3 + $0x90] sm:$0xf] }
 0x2cf   : > { %v7721_v48 = vrot.slane %v7719_v56, 5  ;;  %v7743_v43 = vshll.u32 %v7530_v26, 16  ;;  %v18344_v23 = vrot.slane %v16678_v54, 4  ;;  %v7748_v58 = vshrl.u32 %v7531_v37, 16  ;;  %v7107_v27 = vld [vmem:[#allocation3 + $0x84] sm:$0xf] }
 0x2d0   : > { %v7730_v14 = vor.u32 %v7729_v4, %v7726_v5  ;;  %v16931_v10 = vor.u32 %v6964_v35, %v6963_v34  ;;  %v6968_v40 = vrot.slane %v6963_v34, 4  ;;  %v7739_v63 = vrot.slane %v7737_v25, 4 }
 0x2d1   : > { %v7091_v15 = vsel %vm14519_vm7, %v18344_v23, %v7090_v11  ;;  %v7722_v31 = vsel %vm14632_vm15, %v7717_v36, %v7721_v48  ;;  %v7745_v26 = vrot.slane %v7743_v43, 5  ;;  %v7750_v60 = vrot.slane %v7748_v58, 4  ;;  %v7534_v18 = vld [vmem:[#allocation3 + $0x6c] sm:$0xf]  ;;  %v7536_v48 = vld [vmem:[#allocation3 + $0x74] sm:$0x1] }
 0x2d2   : > { %7092 = vst [vmem:[#allocation3 + $0x68] sm:$0x1] %v7091_v15  ;;  %v12999_v2 = vcombine.low %v7712_v55, %v7722_v31  ;;  %v14374_v42 = vld [vmem:[#allocation3 + $0x6c] sm:$0xff]   ;;  %v7731_v53 = vrot.slane %v7730_v14, 4  ;;  %v7140_v54 = vsel %vm14519_vm7, %v6968_v40, %v7139_v52  ;;  %v7740_v11 = vor.u32 %v7739_v63, %v7735_v28  ;;  %v7104_v14 = vld [vmem:[#allocation3 + $0x80] sm:$0x1] }
 0x2d3   : > { %v7751_v17 = vshll.u32 %v7531_v37, 16  ;;  %v7757_v30 = vshll.u32 %v7532_v32, 16  ;;  %7141 = vst [vmem:[#allocation3 + $0xbc] sm:$0x1] %v7140_v54  ;;  %14003 = vmatmul.mubr.msk.bf16.gmra.mxu1 %vm1526_vm1, %v14374_v42  ;;  %v7761_v20 = vshrl.u32 %v7532_v32, 16  ;;  %v18345_v22 = vrot.slane %v16726_v46, 4 }
 0x2d4   : > { %14032 = vmatprep.mubr.msk.bf16.mxu0 %vm1526_vm1, %v12999_v2  ;;  %v7736_v19 = vsel %vm14632_vm15, %v7731_v53, %v7735_v28  ;;  %v7108_v56 = vsel %vm16545_vm6, %v16744_v12, %v7107_v27  ;;  %v7535_v33 = vld [vmem:[#allocation3 + $0x70] sm:$0xf]  ;;  %v14375_v37 = vld [vmem:[#allocation3 + $0x78] sm:$0xff]   ;;  %v7741_v52 = vrot.slane %v7740_v11, 4  ;;  %v7115_v5 = vsel %vm16545_vm6, %v16738_v44, %v7114_v49 }
 0x2d5   : > { %v6899_v35 = vsel %vm14602_vm14, %v18345_v22, %v16759_v62  ;;  %v7753_v55 = vrot.slane %v7751_v17, 5  ;;  %v7759_v36 = vrot.slane %v7757_v30, 5  ;;  %7109 = vst [vmem:[#allocation3 + $0x84] sm:$0xf] %v7108_v56  ;;  %v7763_v46 = vrot.slane %v7761_v20, 4  ;;  %14006 = vmatprep.mubr.msk.bf16.mxu1 %vm1526_vm1, %v14375_v37 }
 0x2d6   : > { %7110 = vst.msk [vmem:[#allocation3 + $0x88] sm:$0xf] %vm402_vm4, %v6899_v35  ;;  %v6908_v4 = vrot.slane %v16724_v3, 4  ;;  %7116 = vst [vmem:[#allocation3 + $0x90] sm:$0xf] %v7115_v5  ;;  %v7772_v62 = vshrl.u32 %v7534_v18, 16  ;;  %v7746_v12 = vsel %vm14632_vm15, %v7741_v52, %v7745_v26  ;;  %v6933_v56 = vsel %vm14602_vm14, %v6925_v0, %v16858_v9 }
 0x2d7   : > { %v7775_v32 = vshll.u32 %v7534_v18, 16  ;;  %v7754_v34 = vor.u32 %v7753_v55, %v7750_v60  ;;  %v7781_v28 = vshll.u32 %v7535_v33, 16  ;;  %v7785_v25 = vshrl.u32 %v7535_v33, 16  ;;  %v7537_v58 = vld [vmem:[#allocation3 + $0x78] sm:$0xf] }
 0x2d8   : > { %v13000_v43 = vcombine.low %v7736_v19, %v7746_v12  ;;  %v7764_v15 = vor.u32 %v7763_v46, %v7759_v36  ;;  %v6916_v3 = vsel %vm14602_vm14, %v6908_v4, %v16756_v51  ;;  %v7774_v44 = vrot.slane %v7772_v62, 4  ;;  %v7121_v27 = vld [vmem:[#allocation3 + $0x9c] sm:$0xf]  ;;  %v7128_v51 = vld [vmem:[#allocation3 + $0xa8] sm:$0xf] }
 0x2d9   : > { %v7533_v23 = vld [vmem:[#allocation3 + $0x68] sm:$0x1]  ;;  %v7755_v49 = vrot.slane %v7754_v34, 4  ;;  %7117 = vst.msk [vmem:[#allocation3 + $0x94] sm:$0xf] %vm402_vm4, %v6916_v3  ;;  %v7777_v31 = vrot.slane %v7775_v32, 5  ;;  %v7122_v33 = vsel %vm16545_vm6, %v16825_v38, %v7121_v27  ;;  %v7129_v32 = vsel %vm16545_vm6, %v16801_v50, %v7128_v51 }
 0x2da   : > { %v7767_v40 = vshll.u32 %v7533_v23, 16  ;;  %v7783_v63 = vrot.slane %v7781_v28, 5  ;;  %14033 = vmatmul.mubr.msk.bf16.gmra.mxu0 %vm1526_vm1, %v13000_v43  ;;  %v7765_v2 = vrot.slane %v7764_v15, 4  ;;  %v7787_v42 = vrot.slane %v7785_v25, 4  ;;  %v18346_v26 = vld [vmem:[#allocation6_spill] sm:$0xff]  ;;  %v18348_v51 = vld [vmem:[#allocation9_spill] sm:$0xff] }
 0x2db   : > { %v7791_v53 = vshll.u32 %v7536_v48, 16  ;;  %v18347_v60 = vrot.slane %v18346_v26, 4  ;;  %v7760_v11 = vsel %vm14632_vm15, %v7755_v49, %v7759_v36  ;;  %v7778_v30 = vor.u32 %v7777_v31, %v7774_v44  ;;  %v7538_v18 = vld [vmem:[#allocation3 + $0x7c] sm:$0xf]  ;;  %7123 = vst [vmem:[#allocation3 + $0x9c] sm:$0xf] %v7122_v33 }
 0x2dc   : > { %v7769_v17 = vrot.slane %v7767_v40, 5  ;;  %v7796_v19 = vshrl.u32 %v7537_v58, 16  ;;  %v7788_v22 = vor.u32 %v7787_v42, %v7783_v63  ;;  %v7799_v36 = vshll.u32 %v7537_v58, 16  ;;  %7124 = vst.msk [vmem:[#allocation3 + $0xa0] sm:$0xf] %vm402_vm4, %v6933_v56 }
 0x2dd   : > { %v7105_v54 = vsel %vm14519_vm7, %v18347_v60, %v7104_v14  ;;  %v14376_v20 = vld [vmem:[#allocation3 + $0x84] sm:$0xff]   ;;  %v7793_v35 = vrot.slane %v7791_v53, 5  ;;  %v7779_v52 = vrot.slane %v7778_v30, 4  ;;  %v7805_v46 = vshll.u32 %v7538_v18, 16  ;;  %v7542_v34 = vld [vmem:[#allocation3 + $0x8c] sm:$0x1] }
 0x2de   : > { %7106 = vst [vmem:[#allocation3 + $0x80] sm:$0x1] %v7105_v54  ;;  %v7770_v37 = vsel %vm14632_vm15, %v7765_v2, %v7769_v17  ;;  %v7798_v55 = vrot.slane %v7796_v19, 4  ;;  %14007 = vmatmul.mubr.msk.bf16.gmra.mxu1 %vm1526_vm1, %v14376_v20  ;;  %v7789_v39 = vrot.slane %v7788_v22, 4  ;;  %v7809_v4 = vshrl.u32 %v7538_v18, 16 }
 0x2df   : > { %v13001_v5 = vcombine.low %v7760_v11, %v7770_v37  ;;  %v7540_v0 = vld [vmem:[#allocation3 + $0x84] sm:$0xf]  ;;  %v7784_v9 = vsel %vm14632_vm15, %v7779_v52, %v7783_v63  ;;  %v7801_v38 = vrot.slane %v7799_v36, 5  ;;  %v6942_v62 = vrot.slane %v16770_v61, 4  ;;  %v7541_v12 = vld [vmem:[#allocation3 + $0x88] sm:$0xf] }
 0x2e0   : > { %v7118_v48 = vld [vmem:[#allocation3 + $0x98] sm:$0x1]  ;;  %v7132_v28 = vld [vmem:[#allocation3 + $0xb0] sm:$0x1]  ;;  %v7794_v14 = vsel %vm14632_vm15, %v7789_v39, %v7793_v35  ;;  %v7807_v43 = vrot.slane %v7805_v46, 5  ;;  %v7811_v23 = vrot.slane %v7809_v4, 4  ;;  %v6967_v30 = vsel %vm14602_vm14, %v6959_v47, %v16931_v10 }
 0x2e1   : > { %14036 = vmatprep.mubr.msk.bf16.mxu0 %vm1526_vm1, %v13001_v5  ;;  %v14377_v25 = vld [vmem:[#allocation3 + $0x90] sm:$0xff]   ;;  %7130 = vst [vmem:[#allocation3 + $0xa8] sm:$0xf] %v7129_v32  ;;  %v7820_v15 = vshrl.u32 %v7540_v0, 16  ;;  %v13002_v3 = vcombine.low %v7784_v9, %v7794_v14  ;;  %v7802_v61 = vor.u32 %v7801_v38, %v7798_v55  ;;  %v6950_v50 = vsel %vm14602_vm14, %v6942_v62, %v16850_v45  ;;  %v7548_v14 = vld [vmem:[#allocation3 + $0xa4] sm:$0x1] }
 0x2e2   : > { %v7823_v44 = vshll.u32 %v7540_v0, 16  ;;  %v7543_v58 = vld [vmem:[#allocation3 + $0x90] sm:$0xf]  ;;  %14010 = vmatprep.mubr.msk.bf16.mxu1 %vm1526_vm1, %v14377_v25  ;;  %v7812_v40 = vor.u32 %v7811_v23, %v7807_v43  ;;  %7131 = vst.msk [vmem:[#allocation3 + $0xac] sm:$0xf] %vm402_vm4, %v6950_v50  ;;  %v7829_v63 = vshll.u32 %v7541_v12, 16  ;;  %v7133_v18 = vsel %vm14519_vm7, %v6951_v41, %v7132_v28 }
 0x2e3   : > { %v7822_v31 = vrot.slane %v7820_v15, 4  ;;  %v7833_v27 = vshrl.u32 %v7541_v12, 16  ;;  %14037 = vmatmul.mubr.msk.bf16.gmra.mxu0 %vm1526_vm1, %v13002_v3  ;;  %v7803_v2 = vrot.slane %v7802_v61, 4  ;;  %v7839_v26 = vshll.u32 %v7542_v34, 16  ;;  %v7544_v60 = vld [vmem:[#allocation3 + $0x94] sm:$0xf] }
 0x2e4   : > { %v7825_v53 = vrot.slane %v7823_v44, 5  ;;  %v7813_v54 = vrot.slane %v7812_v40, 4  ;;  %v14378_v45 = vld [vmem:[#allocation3 + $0x9c] sm:$0xff]   ;;  %v18349_v11 = vrot.slane %v18348_v51, 4  ;;  %v7831_v35 = vrot.slane %v7829_v63, 5 }
 0x2e5   : > { %v7539_v49 = vld [vmem:[#allocation3 + $0x80] sm:$0x1]  ;;  %v7808_v19 = vsel %vm14632_vm15, %v7803_v2, %v7807_v43  ;;  %v458_v56 = vld [vmem:[#allocation3 + $0xb4] sm:$0x1]  ;;  %7138 = vst.msk [vmem:[#allocation3 + $0xb8] sm:$0xf] %vm402_vm4, %v6967_v30 }
 0x2e6   : > { %v7815_v42 = vshll.u32 %v7539_v49, 16  ;;  %v7119_v17 = vsel %vm14519_vm7, %v18349_v11, %v7118_v48  ;;  %v7826_v22 = vor.u32 %v7825_v53, %v7822_v31  ;;  %7134 = vst [vmem:[#allocation3 + $0xb0] sm:$0x1] %v7133_v18  ;;  %14011 = vmatmul.mubr.msk.bf16.gmra.mxu1 %vm1526_vm1, %v14378_v45  ;;  %v7835_v6 = vrot.slane %v7833_v27, 4  ;;  %v7546_v33 = vld [vmem:[#allocation3 + $0x9c] sm:$0xf] }
 0x2e7   : > { %7120 = vst [vmem:[#allocation3 + $0x98] sm:$0x1] %v7119_v17  ;;  %v7841_v47 = vrot.slane %v7839_v26, 5  ;;  %v7844_v10 = vshrl.u32 %v7543_v58, 16  ;;  %v7847_v57 = vshll.u32 %v7543_v58, 16  ;;  %v7853_v52 = vshll.u32 %v7544_v60, 16 }
 0x2e8   : > { %v7817_v20 = vrot.slane %v7815_v42, 5  ;;  %v7827_v37 = vrot.slane %v7826_v22, 4  ;;  %v7857_v55 = vshrl.u32 %v7544_v60, 16  ;;  %v7836_v5 = vor.u32 %v7835_v6, %v7831_v35  ;;  %v7547_v4 = vld [vmem:[#allocation3 + $0xa0] sm:$0xf] }
 0x2e9   : > { %v7846_v39 = vrot.slane %v7844_v10, 4  ;;  %v7849_v46 = vrot.slane %v7847_v57, 5  ;;  %v17017_v0 = vld [vmem:[%s18292_s6 + $0x14] sm:$0xf]  ;;  %v14379_v9 = vld [vmem:[#allocation3 + $0xa8] sm:$0xff]   ;;  %v7855_v62 = vrot.slane %v7853_v52, 5  ;;  %v6984_v31 = vsel %vm14602_vm14, %v6976_v24, %v16895_v13 }
 0x2ea   : > { %v7818_v41 = vsel %vm14632_vm15, %v7813_v54, %v7817_v20  ;;  %v7832_v38 = vsel %vm14632_vm15, %v7827_v37, %v7831_v35  ;;  %v7859_v32 = vrot.slane %v7857_v55, 4  ;;  %v14419_v12 = vld [vmem:[%s18292_s6 + $0xc] sm:$0xf]  ;;  %v7837_v48 = vrot.slane %v7836_v5, 4  ;;  %14014 = vmatprep.mubr.msk.bf16.mxu1 %vm1526_vm1, %v14379_v9  ;;  %v7549_v50 = vld [vmem:[#allocation3 + $0xa8] sm:$0xf] }
 0x2eb   : > { %v13003_v36 = vcombine.low %v7808_v19, %v7818_v41  ;;  %v9026_v34 = vsel %vm7310_vm0, %v14419_v12, 0  ;;  %v7850_v28 = vor.u32 %v7849_v46, %v7846_v39  ;;  %v459_v25 = vsel %vm14519_vm7, 0, %v458_v56  ;;  %v7550_v53 = vld [vmem:[#allocation3 + $0xac] sm:$0xf]  ;;  %7145 = vst.msk [vmem:[#allocation3 + $0xc4] sm:$0xf] %vm402_vm4, %v6984_v31 }
 0x2ec   : > { %14087 = vmatpush3.bf16.msra.mxu0 %v9026_v34  ;;  %v7868_v43 = vshrl.u32 %v7546_v33, 16  ;;  %v7860_v23 = vor.u32 %v7859_v32, %v7855_v62  ;;  %460 = vst [vmem:[#allocation3 + $0xb4] sm:$0x1] %v459_v25  ;;  %v7871_v15 = vshll.u32 %v7546_v33, 16  ;;  %v7877_v3 = vshll.u32 %v7547_v4, 16 }
 0x2ed   : > { %14040 = vmatprep.mubr.msk.bf16.mxu0 %vm1526_vm1, %v13003_v36  ;;  %v7881_v61 = vshrl.u32 %v7547_v4, 16  ;;  %14304 = vmatprep.subr.msk.bf16.mxu0 %vm7310_vm0, %v17017_v0  ;;  %v7842_v44 = vsel %vm14632_vm15, %v7837_v48, %v7841_v47  ;;  %v7851_v49 = vrot.slane %v7850_v28, 4  ;;  %v7887_v45 = vshll.u32 %v7548_v14, 16  ;;  %v8297_v24 = vld [vmem:[#allocation3] sm:$0xe] }
 0x2ee   : > { %v7545_v58 = vld [vmem:[#allocation3 + $0x98] sm:$0x1]  ;;  %v7870_v40 = vrot.slane %v7868_v43, 4  ;;  %v13004_v63 = vcombine.low %v7832_v38, %v7842_v44  ;;  %v7861_v27 = vrot.slane %v7860_v23, 4  ;;  %v7873_v42 = vrot.slane %v7871_v15, 5 }
 0x2ef   : > { %v7863_v2 = vshll.u32 %v7545_v58, 16  ;;  %v7856_v26 = vsel %vm14632_vm15, %v7851_v49, %v7855_v62  ;;  %v7879_v60 = vrot.slane %v7877_v3, 5  ;;  %v7883_v54 = vrot.slane %v7881_v61, 4  ;;  %v8298_v13 = vld [vmem:[#allocation3 + $0x4] sm:$0xf] }
 0x2f0   : > { %14041 = vmatmul.mubr.msk.bf16.gmra.mxu0 %vm1526_vm1, %v13004_v63  ;;  %v7874_v11 = vor.u32 %v7873_v42, %v7870_v40  ;;  %v7892_v17 = vshrl.u32 %v7549_v50, 16  ;;  %v7895_v8 = vshll.u32 %v7549_v50, 16  ;;  %v7889_v18 = vrot.slane %v7887_v45, 5  ;;  %v7551_v19 = vld [vmem:[#allocation3 + $0xb0] sm:$0x1] }
 0x2f1   : > { %v7865_v51 = vrot.slane %v7863_v2, 5  ;;  %v7884_v30 = vor.u32 %v7883_v54, %v7879_v60  ;;  %v7901_v20 = vshll.u32 %v7550_v53, 16  ;;  %v7905_v22 = vshrl.u32 %v7550_v53, 16  ;;  %v8299_v35 = vld [vmem:[#allocation3 + $0x8] sm:$0x1] }
 0x2f2   : > { %v7875_v6 = vrot.slane %v7874_v11, 4  ;;  %v7894_v47 = vrot.slane %v7892_v17, 4  ;;  %v7897_v10 = vrot.slane %v7895_v8, 5  ;;  %v8300_v55 = vld [vmem:[#allocation3 + $0xc] sm:$0xe]  ;;  %v7911_v4 = vshll.u32 %v7551_v19, 16 }
 0x2f3   : > { %v7866_v56 = vsel %vm14632_vm15, %v7861_v27, %v7865_v51  ;;  %v7135_v33 = vld [vmem:[#allocation3 + $0xb4] sm:$0xf]  ;;  %v7885_v41 = vrot.slane %v7884_v30, 4  ;;  %v7903_v37 = vrot.slane %v7901_v20, 5  ;;  %v7907_v52 = vrot.slane %v7905_v22, 4 }
 0x2f4   : > { %v13005_v57 = vcombine.low %v7856_v26, %v7866_v56  ;;  %v8301_v36 = vld [vmem:[#allocation3 + $0x10] sm:$0xf]  ;;  %v7136_v5 = vsel %vm16545_vm6, %v16871_v16, %v7135_v33  ;;  %v7880_v39 = vsel %vm14632_vm15, %v7875_v6, %v7879_v60  ;;  %v7898_v46 = vor.u32 %v7897_v10, %v7894_v47  ;;  %v8302_v12 = vld [vmem:[#allocation3 + $0x14] sm:$0x1]  ;;  %v7553_v25 = vld [vmem:[#allocation3 + $0xb8] sm:$0xf] }
 0x2f5   : > { %7137 = vst [vmem:[#allocation3 + $0xb4] sm:$0xf] %v7136_v5  ;;  %v7890_v9 = vsel %vm14632_vm15, %v7885_v41, %v7889_v18  ;;  %v7908_v38 = vor.u32 %v7907_v52, %v7903_v37  ;;  %v13025_v62 = vrot.slane %v8297_v24, 9  ;;  %v8395_v32 = vrot.slane %v8298_v13, 5  ;;  %v8303_v14 = vld [vmem:[#allocation3 + $0x18] sm:$0xe] }
 0x2f6   : > { %14044 = vmatprep.mubr.msk.bf16.mxu0 %vm1526_vm1, %v13005_v57  ;;  %v6973_v34 = vshll.u32 %v16844_v1, 16  ;;  %v13006_v48 = vcombine.low %v7880_v39, %v7890_v9  ;;  %v7899_v28 = vrot.slane %v7898_v46, 4  ;;  %v8398_v16 = vrot.slane %v8299_v35, 5  ;;  %v8304_v50 = vld [vmem:[#allocation3 + $0x1c] sm:$0xf] }
 0x2f7   : > { %v7909_v43 = vrot.slane %v7908_v38, 4  ;;  %v7913_v23 = vrot.slane %v7911_v4, 5  ;;  %v8396_v3 = vsel %vm15123_vm10, %v13025_v62, %v8395_v32  ;;  %v8397_v61 = vrot.slane %v8395_v32, 4  ;;  %v7554_v40 = vld [vmem:[#allocation3 + $0xbc] sm:$0x1] }
 0x2f8   : > { %14045 = vmatmul.mubr.msk.bf16.gmra.mxu0 %vm1526_vm1, %v13006_v48  ;;  %v7904_v44 = vsel %vm14632_vm15, %v7899_v28, %v7903_v37  ;;  %v13026_v58 = vrot.slane %v8300_v55, 9  ;;  %v8402_v49 = vrot.slane %v8301_v36, 5  ;;  %v8405_v1 = vrot.slane %v8302_v12, 5  ;;  %v8305_v42 = vld [vmem:[#allocation3 + $0x20] sm:$0x1] }
 0x2f9   : > { %v7914_v31 = vsel %vm14632_vm15, %v7909_v43, %v7913_v23  ;;  %v8399_v63 = vsel %vm15123_vm10, %v8397_v61, %v8398_v16  ;;  %v7925_v27 = vshll.u32 %v7553_v25, 16  ;;  %v7929_v2 = vshrl.u32 %v7553_v25, 16  ;;  %v14420_v54 = vld [vmem:[%s18292_s6 + $0x10] sm:$0xf]  ;;  %v8306_v51 = vld [vmem:[#allocation3 + $0x24] sm:$0xe] }
 0x2fa   : > { %v13007_v53 = vcombine.low %v7904_v44, %v7914_v31  ;;  %v13042_v26 = vcombine.low %v8396_v3, %v8399_v63  ;;  %v8404_v60 = vrot.slane %v8402_v49, 4  ;;  %v17066_v45 = vsel %vm7310_vm0, %v14420_v54, 0  ;;  %v8307_v13 = vld [vmem:[#allocation3 + $0x28] sm:$0xf]  ;;  %v8308_v30 = vld [vmem:[#allocation3 + $0x2c] sm:$0x1] }
 0x2fb   : > { %v17068_v11 = vrot.slane %v7925_v27, 5  ;;  %v7931_v17 = vrot.slane %v7929_v2, 4  ;;  %v7935_v8 = vshll.u32 %v7554_v40, 16  ;;  %v13027_v24 = vrot.slane %v8303_v14, 9  ;;  %v8310_v6 = vld [vmem:[#allocation3 + $0x34] sm:$0xf] }
 0x2fc   : > { %v17071_v18 = vor.u32 %v6973_v34, %v16853_v29  ;;  %v14380_v19 = vld [vmem:[#allocation3 + $0xb4] sm:$0xff]   ;;  %14048 = vmatprep.mubr.msk.bf16.mxu0 %vm1526_vm1, %v13007_v53  ;;  %v8403_v20 = vsel %vm15123_vm10, %v13026_v58, %v8402_v49  ;;  %v8406_v22 = vsel %vm15123_vm10, %v8404_v60, %v8405_v1  ;;  %v8409_v56 = vrot.slane %v8304_v50, 5  ;;  %v8309_v41 = vld [vmem:[#allocation3 + $0x30] sm:$0xe]  ;;  %v8312_v29 = vld [vmem:[#allocation3 + $0x3c] sm:$0xe] }
 0x2fd   : > { %v7552_v35 = vld [vmem:[#allocation3 + $0xb4] sm:$0xf]  ;;  %v13043_v47 = vcombine.low %v8403_v20, %v8406_v22  ;;  %v7932_v33 = vor.u32 %v7931_v17, %v17068_v11  ;;  %14015 = vmatmul.mubr.msk.bf16.gmra.mxu1 %vm1526_vm1, %v14380_v19  ;;  %v7937_v37 = vrot.slane %v7935_v8, 5  ;;  %v8412_v36 = vrot.slane %v8305_v42, 5  ;;  %v8311_v5 = vld [vmem:[#allocation3 + $0x38] sm:$0x1] }
 0x2fe   : > { %v7916_v10 = vshrl.u32 %v7552_v35, 16  ;;  %v7919_v57 = vshll.u32 %v7552_v35, 16  ;;  %v8410_v52 = vsel %vm15123_vm10, %v13027_v24, %v8409_v56  ;;  %v8411_v55 = vrot.slane %v8409_v56, 4  ;;  %v8313_v39 = vld [vmem:[#allocation3 + $0x40] sm:$0xf]  ;;  %14054 = vmatprep.mubr.msk.bf16.mxu1 %vm1526_vm1, %v13042_v26  ;;  %v14381_v19 = vld [vmem:[#allocation3 + $0xc] sm:$0xff]  }
 0x2ff   : > { %v7933_v9 = vrot.slane %v7932_v33, 4  ;;  %v13028_v38 = vrot.slane %v8306_v51, 9  ;;  %v8314_v62 = vld [vmem:[#allocation3 + $0x44] sm:$0x1]  ;;  %v8315_v32 = vld [vmem:[#allocation3 + $0x48] sm:$0xe] }
 0x300   : > { %v7918_v46 = vrot.slane %v7916_v10, 4  ;;  %v7921_v4 = vrot.slane %v7919_v57, 5  ;;  %v8316_v12 = vld [vmem:[#allocation3 + $0x4c] sm:$0xf]  ;;  %v8413_v34 = vsel %vm15123_vm10, %v8411_v55, %v8412_v36  ;;  %v8416_v48 = vrot.slane %v8307_v13, 5 }
 0x301   : > { %v8419_v28 = vrot.slane %v8308_v30, 5  ;;  %v13029_v16 = vrot.slane %v8309_v41, 9  ;;  %v7938_v14 = vsel %vm14632_vm15, %v7933_v9, %v7937_v37  ;;  %v13044_v43 = vcombine.low %v8410_v52, %v8413_v34  ;;  %v8318_v58 = vld [vmem:[#allocation3 + $0x54] sm:$0xe]  ;;  %v8319_v63 = vld [vmem:[#allocation3 + $0x58] sm:$0xf] }
 0x302   : > { %v7922_v25 = vor.u32 %v7921_v4, %v7918_v46  ;;  %v8423_v23 = vrot.slane %v8310_v6, 5  ;;  %v17089_v3 = vsel %vm15123_vm10, %v13028_v38, %v8416_v48  ;;  %v8418_v61 = vrot.slane %v8416_v48, 4  ;;  %v8320_v27 = vld [vmem:[#allocation3 + $0x5c] sm:$0x1]  ;;  %v8317_v53 = vld [vmem:[#allocation3 + $0x50] sm:$0x1] }
 0x303   : > { %v8426_v50 = vrot.slane %v8311_v5, 5  ;;  %v13030_v44 = vrot.slane %v8312_v29, 9  ;;  %v8430_v31 = vrot.slane %v8313_v39, 5  ;;  %v8433_v42 = vrot.slane %v8314_v62, 5  ;;  %v8321_v24 = vld [vmem:[#allocation3 + $0x60] sm:$0xe] }
 0x304   : > { %v7923_v49 = vrot.slane %v7922_v25, 4  ;;  %v17093_v1 = vsel %vm15123_vm10, %v13029_v16, %v8423_v23  ;;  %v8425_v40 = vrot.slane %v8423_v23, 4  ;;  %v17097_v2 = vsel %vm15123_vm10, %v8418_v61, %v8419_v28  ;;  %v8322_v13 = vld [vmem:[#allocation3 + $0x64] sm:$0xf]  ;;  %v17115_v30 = vld [vmem:[%s18292_s6 + $0x18] sm:$0xf] }
 0x305   : > { %v13031_v26 = vrot.slane %v8315_v32, 9  ;;  %v8437_v60 = vrot.slane %v8316_v12, 5  ;;  %v13045_v51 = vcombine.low %v17089_v3, %v17097_v2  ;;  %v17110_v8 = vsel %vm15123_vm10, %v13030_v44, %v8430_v31  ;;  %14055 = vmatmul.mubr.msk.bf16.vlgmr.msra.gmra.mxu1 %vm1526_vm1, %v13043_v47  ;;  %v8324_v56 = vld [vmem:[#allocation3 + $0x6c] sm:$0xe]  ;;  %v8326_v6 = vld [vmem:[#allocation3 + $0x74] sm:$0x1] }
 0x306   : > { %v7928_v54 = vsel %vm14632_vm15, %v7923_v49, %v17068_v11  ;;  %v17106_v17 = vsel %vm15123_vm10, %v8425_v40, %v8426_v50  ;;  %v8432_v22 = vrot.slane %v8430_v31, 4  ;;  %14121 = vmatpush3.bf16.msra.mxu1 %v17066_v45  ;;  %14058 = vmatprep.mubr.msk.bf16.mxu1 %vm1526_vm1, %v13044_v43  ;;  %v8440_v57 = vrot.slane %v8317_v53, 5  ;;  %v8323_v41 = vld [vmem:[#allocation3 + $0x68] sm:$0x1]  ;;  %v8325_v36 = vld [vmem:[#allocation3 + $0x70] sm:$0xf] }
 0x307   : > { %v13008_v11 = vcombine.low %v7928_v54, %v7938_v14  ;;  %v13046_v20 = vcombine.low %v17093_v1, %v17106_v17  ;;  %v17122_v35 = vsel %vm15123_vm10, %v13031_v26, %v8437_v60  ;;  %v8439_v10 = vrot.slane %v8437_v60, 4  ;;  %14305 = vmatprep.subr.msk.bf16.mxu1 %vm7310_vm0, %v17115_v30  ;;  %v8327_v4 = vld [vmem:[#allocation3 + $0x78] sm:$0xe]  ;;  %v8328_v9 = vld [vmem:[#allocation3 + $0x7c] sm:$0xf] }
 0x308   : > { %v13032_v33 = vrot.slane %v8318_v58, 9  ;;  %v8444_v47 = vrot.slane %v8319_v63, 5  ;;  %v17129_v29 = vsel %vm15123_vm10, %v8432_v22, %v8433_v42  ;;  %v8447_v37 = vrot.slane %v8320_v27, 5  ;;  %v8329_v34 = vld [vmem:[#allocation3 + $0x80] sm:$0x1]  ;;  %v14382_v42 = vld [vmem:[#allocation3 + $0x18] sm:$0xff]  }
 0x309   : > { %14049 = vmatmul.mubr.msk.bf16.gmra.mxu0 %vm1526_vm1, %v13008_v11  ;;  %v13033_v52 = vrot.slane %v8321_v24, 9  ;;  %v8451_v55 = vrot.slane %v8322_v13, 5  ;;  %v13047_v45 = vcombine.low %v17110_v8, %v17129_v29  ;;  %v17138_v5 = vsel %vm15123_vm10, %v8439_v10, %v8440_v57  ;;  %v8330_v48 = vld [vmem:[#allocation3 + $0x84] sm:$0xe]  ;;  %v8332_v28 = vld [vmem:[#allocation3 + $0x8c] sm:$0x1] }
 0x30a   : > { %14088 = vmatprep.mubr.msk.bf16.mxu0 %vm1526_vm1, %v14381_v19  ;;  %v17142_v39 = vsel %vm15123_vm10, %v13032_v33, %v8444_v47  ;;  %v8446_v46 = vrot.slane %v8444_v47, 4  ;;  %v13048_v38 = vcombine.low %v17122_v35, %v17138_v5  ;;  %v8454_v12 = vrot.slane %v8323_v41, 5  ;;  %v8331_v23 = vld [vmem:[#allocation3 + $0x88] sm:$0xf]  ;;  %v8333_v58 = vld [vmem:[#allocation3 + $0x90] sm:$0xe] }
 0x30b   : > { %v17148_v62 = vsel %vm15123_vm10, %v13033_v52, %v8451_v55  ;;  %v8453_v32 = vrot.slane %v8451_v55, 4  ;;  %v13034_v25 = vrot.slane %v8324_v56, 9  ;;  %v8458_v14 = vrot.slane %v8325_v36, 5  ;;  %v8334_v49 = vld [vmem:[#allocation3 + $0x94] sm:$0xf]  ;;  %v14383_v24 = vld [vmem:[#allocation3 + $0x24] sm:$0xff]  }
 0x30c   : > { %v17152_v16 = vsel %vm15123_vm10, %v8446_v46, %v8447_v37  ;;  %v8461_v43 = vrot.slane %v8326_v6, 5  ;;  %v13035_v50 = vrot.slane %v8327_v4, 9  ;;  %v8465_v44 = vrot.slane %v8328_v9, 5  ;;  %v8335_v27 = vld [vmem:[#allocation3 + $0x98] sm:$0x1] }
 0x30d   : > { %v13049_v3 = vcombine.low %v17142_v39, %v17152_v16  ;;  %v17158_v61 = vsel %vm15123_vm10, %v8453_v32, %v8454_v12  ;;  %v17164_v40 = vsel %vm15123_vm10, %v13034_v25, %v8458_v14  ;;  %v8460_v31 = vrot.slane %v8458_v14, 4  ;;  %v8338_v2 = vld [vmem:[#allocation3 + $0xa4] sm:$0x1]  ;;  %14059 = vmatmul.mubr.msk.bf16.gmra.mxu1 %vm1526_vm1, %v13045_v51  ;;  %v8336_v17 = vld [vmem:[#allocation3 + $0x9c] sm:$0xe] }
 0x30e   : > { %v13050_v1 = vcombine.low %v17148_v62, %v17158_v61  ;;  %v8468_v63 = vrot.slane %v8329_v34, 5  ;;  %v17169_v53 = vsel %vm15123_vm10, %v13035_v50, %v8465_v44  ;;  %v8467_v26 = vrot.slane %v8465_v44, 4  ;;  %14062 = vmatprep.mubr.msk.bf16.mxu1 %vm1526_vm1, %v13046_v20  ;;  %v8337_v51 = vld [vmem:[#allocation3 + $0xa0] sm:$0xf]  ;;  %v8339_v57 = vld [vmem:[#allocation3 + $0xa8] sm:$0xe] }
 0x30f   : > { %v13036_v60 = vrot.slane %v8330_v48, 9  ;;  %v8472_v54 = vrot.slane %v8331_v23, 5  ;;  %v17174_v13 = vsel %vm15123_vm10, %v8460_v31, %v8461_v43  ;;  %v8475_v11 = vrot.slane %v8332_v28, 5  ;;  %v8340_v33 = vld [vmem:[#allocation3 + $0xac] sm:$0xf] }
 0x310   : > { %v13037_v19 = vrot.slane %v8333_v58, 9  ;;  %v8479_v22 = vrot.slane %v8334_v49, 5  ;;  %v13051_v56 = vcombine.low %v17164_v40, %v17174_v13  ;;  %v17181_v6 = vsel %vm15123_vm10, %v8467_v26, %v8468_v63  ;;  %v8341_v55 = vld [vmem:[#allocation3 + $0xb0] sm:$0x1]  ;;  %v9285_v36 = vld [vmem:[#allocation3 + $0xc] sm:$0xf] }
 0x311   : > { %14089 = vmatmul.mubr.msk.bf16.vlgmr.msra.gmra.mxu0 %vm1526_vm1, %v14382_v42  ;;  %v17185_v20 = vsel %vm15123_vm10, %v13036_v60, %v8472_v54  ;;  %v8474_v10 = vrot.slane %v8472_v54, 4  ;;  %v13052_v47 = vcombine.low %v17169_v53, %v17181_v6  ;;  %v8482_v52 = vrot.slane %v8335_v27, 5  ;;  %v8342_v12 = vld [vmem:[#allocation3 + $0xb4] sm:$0xe]  ;;  %v8343_v14 = vld [vmem:[#allocation3 + $0xb8] sm:$0xf] }
 0x312   : > { %14092 = vmatprep.mubr.msk.bf16.mxu0 %vm1526_vm1, %v14383_v24  ;;  %v17192_v41 = vsel %vm15123_vm10, %v13037_v19, %v8479_v22  ;;  %v8481_v37 = vrot.slane %v8479_v22, 4  ;;  %v13038_v4 = vrot.slane %v8336_v17, 9  ;;  %v8486_v9 = vrot.slane %v8337_v51, 5  ;;  %v8344_v43 = vld [vmem:[#allocation3 + $0xbc] sm:$0x1]  ;;  %v14384_v26 = vld [vmem:[#allocation3 + $0x30] sm:$0xff]  }
 0x313   : > { %v17196_v46 = vsel %vm15123_vm10, %v8474_v10, %v8475_v11  ;;  %v8489_v32 = vrot.slane %v8338_v2, 5  ;;  %v13039_v28 = vrot.slane %v8339_v57, 9  ;;  %v8493_v25 = vrot.slane %v8340_v33, 5  ;;  %v9286_v49 = vld [vmem:[#allocation3 + $0x10] sm:$0xf] }
 0x314   : > { %v13053_v34 = vcombine.low %v17185_v20, %v17196_v46  ;;  %v17202_v48 = vsel %vm15123_vm10, %v8481_v37, %v8482_v52  ;;  %v17208_v50 = vsel %vm15123_vm10, %v13038_v4, %v8486_v9  ;;  %v8488_v44 = vrot.slane %v8486_v9, 4  ;;  %v9287_v42 = vld [vmem:[#allocation3 + $0x14] sm:$0x1]  ;;  %v9288_v11 = vld [vmem:[#allocation3 + $0x18] sm:$0xf] }
 0x315   : > { %v13054_v23 = vcombine.low %v17192_v41, %v17202_v48  ;;  %v8496_v58 = vrot.slane %v8341_v55, 5  ;;  %v17212_v31 = vsel %vm15123_vm10, %v13039_v28, %v8493_v25  ;;  %v8495_v63 = vrot.slane %v8493_v25, 4  ;;  %14063 = vmatmul.mubr.msk.bf16.gmra.mxu1 %vm1526_vm1, %v13047_v45  ;;  %v9289_v22 = vld [vmem:[#allocation3 + $0x1c] sm:$0xf]  ;;  %v9290_v55 = vld [vmem:[#allocation3 + $0x20] sm:$0x1] }
 0x316   : > { %v10382_v27 = vsel %vm7310_vm0, %v17017_v0, 0  ;;  %v13040_v2 = vrot.slane %v8342_v12, 9  ;;  %v17222_v60 = vsel %vm15123_vm10, %v8488_v44, %v8489_v32  ;;  %v8500_v54 = vrot.slane %v8343_v14, 5  ;;  %14066 = vmatprep.mubr.msk.bf16.mxu1 %vm1526_vm1, %v13048_v38  ;;  %v14385_v0 = vld [vmem:[#allocation3 + $0x3c] sm:$0xff]  }
 0x317   : > { %14155 = vmatpush3.bf16.msra.mxu0 %v10382_v27  ;;  %v8503_v17 = vrot.slane %v8344_v43, 5  ;;  %v9334_v24 = vshrl.u32 %v9285_v36, 16  ;;  %v13055_v8 = vcombine.low %v17208_v50, %v17222_v60  ;;  %v17232_v29 = vsel %vm15123_vm10, %v8495_v63, %v8496_v58  ;;  %v461_v14 = vld [vmem:[#allocation3 + $0xc0] sm:$0x1]  ;;  %v9291_v43 = vld [vmem:[#allocation3 + $0x24] sm:$0xf] }
 0x318   : > { %v9337_v45 = vshll.u32 %v9285_v36, 16  ;;  %v9343_v19 = vshll.u32 %v9286_v49, 16  ;;  %v13056_v51 = vcombine.low %v17212_v31, %v17232_v29  ;;  %v17239_v35 = vsel %vm15123_vm10, %v13040_v2, %v8500_v54 }
 0x319   : > { %14093 = vmatmul.mubr.msk.bf16.gmra.mxu0 %vm1526_vm1, %v14384_v26  ;;  %v8502_v5 = vrot.slane %v8500_v54, 4  ;;  %v9336_v38 = vrot.slane %v9334_v24, 4  ;;  %v9347_v33 = vshrl.u32 %v9286_v49, 16  ;;  %v9353_v37 = vshll.u32 %v9287_v42, 16  ;;  %v9292_v54 = vld [vmem:[#allocation3 + $0x28] sm:$0xf] }
 0x31a   : > { %14096 = vmatprep.mubr.msk.bf16.mxu0 %vm1526_vm1, %v14385_v0  ;;  %v9339_v10 = vrot.slane %v9337_v45, 5  ;;  %v9345_v57 = vrot.slane %v9343_v19, 5  ;;  %v9358_v36 = vshrl.u32 %v9288_v11, 16  ;;  %v9361_v4 = vshll.u32 %v9288_v11, 16  ;;  %v9293_v45 = vld [vmem:[#allocation3 + $0x2c] sm:$0x1] }
 0x31b   : > { %v17244_v52 = vsel %vm15123_vm10, %v8502_v5, %v8503_v17  ;;  %v9367_v9 = vshll.u32 %v9289_v22, 16  ;;  %v9349_v28 = vrot.slane %v9347_v33, 4  ;;  %v9355_v25 = vrot.slane %v9353_v37, 5  ;;  %v14386_v17 = vld [vmem:[#allocation3 + $0x48] sm:$0xff]  }
 0x31c   : > { %v13057_v32 = vcombine.low %v17239_v35, %v17244_v52  ;;  %v9340_v12 = vor.u32 %v9339_v10, %v9336_v38  ;;  %v9360_v44 = vrot.slane %v9358_v36, 4  ;;  %v9363_v58 = vrot.slane %v9361_v4, 5  ;;  %v10076_v38 = vld [vmem:[#allocation3 + $0x10] sm:$0xf]  ;;  %v10077_v36 = vld [vmem:[#allocation3 + $0x14] sm:$0x1] }
 0x31d   : > { %v9369_v49 = vrot.slane %v9367_v9, 5  ;;  %v9371_v63 = vshrl.u32 %v9289_v22, 16  ;;  %v9350_v2 = vor.u32 %v9349_v28, %v9345_v57  ;;  %v9377_v42 = vshll.u32 %v9290_v55, 16  ;;  %14067 = vmatmul.mubr.msk.bf16.gmra.mxu1 %vm1526_vm1, %v13049_v3  ;;  %v10075_v22 = vld [vmem:[#allocation3 + $0xc] sm:$0xe]  ;;  %v14395_v35 = vld [vmem:[#allocation3 + $0xb4] sm:$0xff]  }
 0x31e   : > { %v9341_v27 = vrot.slane %v9340_v12, 4  ;;  %v17250_v26 = vsel %vm7310_vm0, %v17115_v30, 0  ;;  %v9364_v24 = vor.u32 %v9363_v58, %v9360_v44  ;;  %v462_v0 = vsel %vm14519_vm7, 0, %v461_v14  ;;  %14070 = vmatprep.mubr.msk.bf16.mxu1 %vm1526_vm1, %v13050_v1  ;;  %v14387_v30 = vld [vmem:[#allocation3 + $0x54] sm:$0xff]   ;;  %v9294_v4 = vld [vmem:[#allocation3 + $0x30] sm:$0xf] }
 0x31f   : > { %v9373_v11 = vrot.slane %v9371_v63, 4  ;;  %v9382_v19 = vshrl.u32 %v9291_v43, 16  ;;  %v9351_v16 = vrot.slane %v9350_v2, 4  ;;  %v9379_v3 = vrot.slane %v9377_v42, 5  ;;  %463 = vst [vmem:[#allocation3 + $0xc0] sm:$0x1] %v462_v0 }
 0x320   : > { %v9346_v39 = vsel %vm14632_vm15, %v9341_v27, %v9345_v57  ;;  %v9385_v5 = vshll.u32 %v9291_v43, 16  ;;  %v9365_v10 = vrot.slane %v9364_v24, 4  ;;  %v9391_v55 = vshll.u32 %v9292_v54, 16  ;;  %v9295_v27 = vld [vmem:[#allocation3 + $0x34] sm:$0xf] }
 0x321   : > { %14097 = vmatmul.mubr.msk.bf16.gmra.mxu0 %vm1526_vm1, %v14386_v17  ;;  %v9374_v33 = vor.u32 %v9373_v11, %v9369_v49  ;;  %v9384_v37 = vrot.slane %v9382_v19, 4  ;;  %v9356_v62 = vsel %vm14632_vm15, %v9351_v16, %v9355_v25  ;;  %v9395_v1 = vshrl.u32 %v9292_v54, 16  ;;  %v9296_v0 = vld [vmem:[#allocation3 + $0x38] sm:$0x1]  ;;  %v14388_v19 = vld [vmem:[#allocation3 + $0x60] sm:$0xff]  }
 0x322   : > { %14100 = vmatprep.mubr.msk.bf16.mxu0 %vm1526_vm1, %v14387_v30  ;;  %v9387_v61 = vrot.slane %v9385_v5, 5  ;;  %v9401_v57 = vshll.u32 %v9293_v45, 16  ;;  %v17268_v9 = vcombine.low %v9346_v39, %v9356_v62  ;;  %v9370_v12 = vsel %vm14632_vm15, %v9365_v10, %v9369_v49  ;;  %v9297_v49 = vld [vmem:[#allocation3 + $0x3c] sm:$0xf]  ;;  %v14389_v5 = vld [vmem:[#allocation3 + $0x6c] sm:$0xff]  }
 0x323   : > { %v9375_v28 = vrot.slane %v9374_v33, 4  ;;  %v9393_v14 = vrot.slane %v9391_v55, 5  ;;  %v9397_v44 = vrot.slane %v9395_v1, 4  ;;  %v13140_v63 = vrot.slane %v10075_v22, 9  ;;  %v10078_v10 = vld [vmem:[#allocation3 + $0x18] sm:$0xe] }
 0x324   : > { %v9388_v43 = vor.u32 %v9387_v61, %v9384_v37  ;;  %v9403_v58 = vrot.slane %v9401_v57, 5  ;;  %v10173_v25 = vrot.slane %v10076_v38, 5  ;;  %v10176_v42 = vrot.slane %v10077_v36, 5  ;;  %v9298_v37 = vld [vmem:[#allocation3 + $0x40] sm:$0xf] }
 0x325   : > { %v9380_v2 = vsel %vm14632_vm15, %v9375_v28, %v9379_v3  ;;  %v9406_v54 = vshrl.u32 %v9294_v4, 16  ;;  %v9398_v11 = vor.u32 %v9397_v44, %v9393_v14  ;;  %v9409_v45 = vshll.u32 %v9294_v4, 16  ;;  %14071 = vmatmul.mubr.msk.bf16.gmra.mxu1 %vm1526_vm1, %v13051_v56  ;;  %v10079_v55 = vld [vmem:[#allocation3 + $0x1c] sm:$0xf]  ;;  %v9299_v62 = vld [vmem:[#allocation3 + $0x44] sm:$0x1] }
 0x326   : > { %v17274_v17 = vcombine.low %v9370_v12, %v9380_v2  ;;  %v9389_v24 = vrot.slane %v9388_v43, 4  ;;  %v7142_v22 = vld [vmem:[#allocation3 + $0xc0] sm:$0xf]  ;;  %v17282_v30 = vsel %vm15123_vm10, %v13140_v63, %v10173_v25  ;;  %v10175_v39 = vrot.slane %v10173_v25, 4  ;;  %14074 = vmatprep.mubr.msk.bf16.mxu1 %vm1526_vm1, %v13052_v47  ;;  %v10082_v2 = vld [vmem:[#allocation3 + $0x28] sm:$0xf] }
 0x327   : > { %v9408_v16 = vrot.slane %v9406_v54, 4  ;;  %v9415_v3 = vshll.u32 %v9295_v27, 16  ;;  %v7143_v40 = vsel %vm16545_vm6, %v17071_v18, %v7142_v22  ;;  %v9399_v56 = vrot.slane %v9398_v11, 4  ;;  %v10080_v1 = vld [vmem:[#allocation3 + $0x20] sm:$0x1] }
 0x328   : > { %v9394_v13 = vsel %vm14632_vm15, %v9389_v24, %v9393_v14  ;;  %v9411_v38 = vrot.slane %v9409_v45, 5  ;;  %7144 = vst [vmem:[#allocation3 + $0xc0] sm:$0xf] %v7143_v40  ;;  %v17296_v33 = vsel %vm15123_vm10, %v10175_v39, %v10176_v42  ;;  %v9419_v6 = vshrl.u32 %v9295_v27, 16  ;;  %v10081_v14 = vld [vmem:[#allocation3 + $0x24] sm:$0xe] }
 0x329   : > { %14101 = vmatmul.mubr.msk.bf16.gmra.mxu0 %vm1526_vm1, %v14388_v19  ;;  %v9417_v53 = vrot.slane %v9415_v3, 5  ;;  %v9425_v47 = vshll.u32 %v9296_v0, 16  ;;  %v9404_v21 = vsel %vm14632_vm15, %v9399_v56, %v9403_v58  ;;  %v13157_v18 = vcombine.low %v17282_v30, %v17296_v33  ;;  %v10083_v24 = vld [vmem:[#allocation3 + $0x2c] sm:$0x1]  ;;  %v9300_v22 = vld [vmem:[#allocation3 + $0x48] sm:$0xf] }
 0x32a   : > { %14104 = vmatprep.mubr.msk.bf16.mxu0 %vm1526_vm1, %v14389_v5  ;;  %v9412_v36 = vor.u32 %v9411_v38, %v9408_v16  ;;  %v9430_v61 = vshrl.u32 %v9297_v49, 16  ;;  %v17303_v57 = vcombine.low %v9394_v13, %v9404_v21  ;;  %v9421_v4 = vrot.slane %v9419_v6, 4  ;;  %v17314_v40 = vld [vmem:[%s18292_s6 + $0x1c] sm:$0xf] }
 0x32b   : > { %v9427_v12 = vrot.slane %v9425_v47, 5  ;;  %v9433_v28 = vshll.u32 %v9297_v49, 16  ;;  %v9439_v63 = vshll.u32 %v9298_v37, 16  ;;  %v9443_v27 = vshrl.u32 %v9298_v37, 16  ;;  %v14390_v49 = vld [vmem:[#allocation3 + $0x78] sm:$0xff]   ;;  %v14391_v13 = vld [vmem:[#allocation3 + $0x84] sm:$0xff]   ;;  %14306 = vmatprep.subr.msk.bf16.mxu0 %vm7310_vm0, %v17314_v40 }
 0x32c   : > { %v9413_v43 = vrot.slane %v9412_v36, 4  ;;  %v9432_v44 = vrot.slane %v9430_v61, 4  ;;  %v9422_v25 = vor.u32 %v9421_v4, %v9417_v53  ;;  %v9449_v42 = vshll.u32 %v9299_v62, 16  ;;  %v9302_v37 = vld [vmem:[#allocation3 + $0x50] sm:$0x1] }
 0x32d   : > { %v9435_v58 = vrot.slane %v9433_v28, 5  ;;  %v13141_v54 = vrot.slane %v10078_v10, 9  ;;  %v9441_v0 = vrot.slane %v9439_v63, 5  ;;  %v9445_v45 = vrot.slane %v9443_v27, 4  ;;  %14075 = vmatmul.mubr.msk.bf16.gmra.mxu1 %vm1526_vm1, %v13053_v34 }
 0x32e   : > { %v9418_v11 = vsel %vm14632_vm15, %v9413_v43, %v9417_v53  ;;  %v10180_v19 = vrot.slane %v10079_v55, 5  ;;  %v9423_v39 = vrot.slane %v9422_v25, 4  ;;  %v9451_v3 = vrot.slane %v9449_v42, 5  ;;  %14078 = vmatprep.mubr.msk.bf16.mxu1 %vm1526_vm1, %v13054_v23  ;;  %v9301_v23 = vld [vmem:[#allocation3 + $0x4c] sm:$0xf]  ;;  %v14392_v42 = vld [vmem:[#allocation3 + $0x90] sm:$0xff]  }
 0x32f   : > { %v9436_v16 = vor.u32 %v9435_v58, %v9432_v44  ;;  %v10183_v5 = vrot.slane %v10080_v1, 5  ;;  %v9446_v56 = vor.u32 %v9445_v45, %v9441_v0  ;;  %v13142_v34 = vrot.slane %v10081_v14, 9  ;;  %v9303_v1 = vld [vmem:[#allocation3 + $0x54] sm:$0xf]  ;;  %v9304_v43 = vld [vmem:[#allocation3 + $0x58] sm:$0xf] }
 0x330   : > { %v17322_v20 = vsel %vm15123_vm10, %v13141_v54, %v10180_v19  ;;  %v10182_v46 = vrot.slane %v10180_v19, 4  ;;  %v9428_v38 = vsel %vm14632_vm15, %v9423_v39, %v9427_v12  ;;  %v10187_v41 = vrot.slane %v10082_v2, 5  ;;  %v9305_v25 = vld [vmem:[#allocation3 + $0x5c] sm:$0x1]  ;;  %v10084_v58 = vld [vmem:[#allocation3 + $0x30] sm:$0xe] }
 0x331   : > { %14105 = vmatmul.mubr.msk.bf16.gmra.mxu0 %vm1526_vm1, %v14390_v49  ;;  %v9437_v10 = vrot.slane %v9436_v16, 4  ;;  %v10190_v48 = vrot.slane %v10083_v24, 5  ;;  %v17330_v53 = vcombine.low %v9418_v11, %v9428_v38  ;;  %v9447_v6 = vrot.slane %v9446_v56, 4  ;;  %v10085_v45 = vld [vmem:[#allocation3 + $0x34] sm:$0xf] }
 0x332   : > { %14108 = vmatprep.mubr.msk.bf16.mxu0 %vm1526_vm1, %v14391_v13  ;;  %v17334_v47 = vsel %vm15123_vm10, %v10182_v46, %v10183_v5  ;;  %v9454_v55 = vshrl.u32 %v9300_v22, 16  ;;  %v17342_v62 = vsel %vm15123_vm10, %v13142_v34, %v10187_v41  ;;  %v10189_v61 = vrot.slane %v10187_v41, 4  ;;  %v10086_v16 = vld [vmem:[#allocation3 + $0x38] sm:$0x1]  ;;  %v10087_v34 = vld [vmem:[#allocation3 + $0x3c] sm:$0xe] }
 0x333   : > { %v9442_v21 = vsel %vm14632_vm15, %v9437_v10, %v9441_v0  ;;  %v13158_v36 = vcombine.low %v17322_v20, %v17334_v47  ;;  %v9452_v4 = vsel %vm14632_vm15, %v9447_v6, %v9451_v3  ;;  %v9457_v28 = vshll.u32 %v9300_v22, 16  ;;  %v14393_v3 = vld [vmem:[#allocation3 + $0x9c] sm:$0xff]  }
 0x334   : > { %v9456_v12 = vrot.slane %v9454_v55, 4  ;;  %v9463_v14 = vshll.u32 %v9301_v23, 16  ;;  %v17346_v44 = vcombine.low %v9442_v21, %v9452_v4  ;;  %v17350_v63 = vsel %vm15123_vm10, %v10189_v61, %v10190_v48  ;;  %v10088_v10 = vld [vmem:[#allocation3 + $0x40] sm:$0xf] }
 0x335   : > { %v9467_v27 = vshrl.u32 %v9301_v23, 16  ;;  %v9473_v2 = vshll.u32 %v9302_v37, 16  ;;  %v13159_v54 = vcombine.low %v17342_v62, %v17350_v63  ;;  %v9459_v24 = vrot.slane %v9457_v28, 5  ;;  %14079 = vmatmul.mubr.msk.bf16.gmra.mxu1 %vm1526_vm1, %v13055_v8  ;;  %v9306_v21 = vld [vmem:[#allocation3 + $0x60] sm:$0xf] }
 0x336   : > { %v9465_v11 = vrot.slane %v9463_v14, 5  ;;  %v9478_v0 = vshrl.u32 %v9303_v1, 16  ;;  %v9481_v49 = vshll.u32 %v9303_v1, 16  ;;  %v9487_v39 = vshll.u32 %v9304_v43, 16  ;;  %14082 = vmatprep.mubr.msk.bf16.mxu1 %vm1526_vm1, %v13056_v51  ;;  %v10089_v51 = vld [vmem:[#allocation3 + $0x44] sm:$0x1] }
 0x337   : > { %v9469_v19 = vrot.slane %v9467_v27, 4  ;;  %v9475_v22 = vrot.slane %v9473_v2, 5  ;;  %v9460_v5 = vor.u32 %v9459_v24, %v9456_v12  ;;  %v9491_v56 = vshrl.u32 %v9304_v43, 16  ;;  %v9307_v28 = vld [vmem:[#allocation3 + $0x64] sm:$0xf] }
 0x338   : > { %v9480_v13 = vrot.slane %v9478_v0, 4  ;;  %v9497_v46 = vshll.u32 %v9305_v25, 16  ;;  %v9483_v60 = vrot.slane %v9481_v49, 5  ;;  %v9489_v8 = vrot.slane %v9487_v39, 5  ;;  %v9308_v14 = vld [vmem:[#allocation3 + $0x68] sm:$0x1]  ;;  %v13988_v43 = vpop.f32.mrf.mxu1 }
 0x339   : > { %14109 = vmatmul.mubr.msk.bf16.gmra.mxu0 %vm1526_vm1, %v14392_v42  ;;  %v9470_v50 = vor.u32 %v9469_v19, %v9465_v11  ;;  %v13143_v38 = vrot.slane %v10084_v58, 9  ;;  %v9461_v41 = vrot.slane %v9460_v5, 4  ;;  %v9493_v48 = vrot.slane %v9491_v56, 4  ;;  %v9309_v42 = vld [vmem:[#allocation3 + $0x6c] sm:$0xf]  ;;  %7477 = vst.msk [vmem:[#allocation5 + $0x10] sm:$0xff] %vm1526_vm1, %v13988_v43 }
 0x33a   : > { %14112 = vmatprep.mubr.msk.bf16.mxu0 %vm1526_vm1, %v14393_v3  ;;  %v9499_v31 = vrot.slane %v9497_v46, 5  ;;  %v10194_v29 = vrot.slane %v10085_v45, 5  ;;  %v9484_v6 = vor.u32 %v9483_v60, %v9480_v13  ;;  %v10197_v37 = vrot.slane %v10086_v16, 5  ;;  %v7348_v19 = vpop.f32.mrf.mxu1  ;;  %v9310_v5 = vld [vmem:[#allocation3 + $0x70] sm:$0xf] }
 0x33b   : > { %v9471_v23 = vrot.slane %v9470_v50, 4  ;;  %v13144_v55 = vrot.slane %v10087_v34, 9  ;;  %v9466_v61 = vsel %vm14632_vm15, %v9461_v41, %v9465_v11  ;;  %v9494_v1 = vor.u32 %v9493_v48, %v9489_v8  ;;  %7475 = vst.msk [vmem:[#allocation5] sm:$0xff] %vm1526_vm1, %v7348_v19  ;;  %v9311_v46 = vld [vmem:[#allocation3 + $0x74] sm:$0x1] }
 0x33c   : > { %v17368_v4 = vsel %vm15123_vm10, %v13143_v38, %v10194_v29  ;;  %v10196_v12 = vrot.slane %v10194_v29, 4  ;;  %v9485_v2 = vrot.slane %v9484_v6, 4  ;;  %v10201_v25 = vrot.slane %v10088_v10, 5  ;;  %v13989_v34 = vpop.f32.mrf.mxu1  ;;  %v10091_v10 = vld [vmem:[#allocation3 + $0x4c] sm:$0xf] }
 0x33d   : > { %v9476_v27 = vsel %vm14632_vm15, %v9471_v23, %v9475_v22  ;;  %v10204_v58 = vrot.slane %v10089_v51, 5  ;;  %v9495_v11 = vrot.slane %v9494_v1, 4  ;;  %v9502_v45 = vshrl.u32 %v9306_v21, 16  ;;  %14083 = vmatmul.mubr.msk.bf16.gmra.mxu1 %vm1526_vm1, %v13057_v32  ;;  %v14394_v22 = vld [vmem:[#allocation3 + $0xa8] sm:$0xff]   ;;  %7478 = vst.msk [vmem:[#allocation5 + $0x18] sm:$0xff] %vm1526_vm1, %v13989_v34 }
 0x33e   : > { %v17373_v24 = vcombine.low %v9466_v61, %v9476_v27  ;;  %v17377_v0 = vsel %vm15123_vm10, %v10196_v12, %v10197_v37  ;;  %v9490_v49 = vsel %vm14632_vm15, %v9485_v2, %v9489_v8  ;;  %v17389_v16 = vsel %vm15123_vm10, %v13144_v55, %v10201_v25  ;;  %14122 = vmatprep.mubr.msk.bf16.mxu1 %vm1526_vm1, %v17268_v9  ;;  %v10090_v9 = vld [vmem:[#allocation3 + $0x48] sm:$0xe]  ;;  %v10092_v51 = vld [vmem:[#allocation3 + $0x50] sm:$0x1]  ;;  %v7351_v23 = vpop.f32.mrf.mxu1  ;;  %v10093_v61 = vld [vmem:[#allocation3 + $0x54] sm:$0xe] }
 0x33f   : > { %v13160_v39 = vcombine.low %v17368_v4, %v17377_v0  ;;  %v10203_v3 = vrot.slane %v10201_v25, 4  ;;  %v9500_v52 = vsel %vm14632_vm15, %v9495_v11, %v9499_v31  ;;  %v9504_v32 = vrot.slane %v9502_v45, 4  ;;  %7476 = vst.msk [vmem:[#allocation5 + $0x8] sm:$0xff] %vm1526_vm1, %v7351_v23  ;;  %v10094_v43 = vld [vmem:[#allocation3 + $0x58] sm:$0xf] }
 0x340   : > { %v9505_v13 = vshll.u32 %v9306_v21, 16  ;;  %v9511_v56 = vshll.u32 %v9307_v28, 16  ;;  %v17397_v50 = vcombine.low %v9490_v49, %v9500_v52  ;;  %v9515_v8 = vshrl.u32 %v9307_v28, 16  ;;  %v10095_v27 = vld [vmem:[#allocation3 + $0x5c] sm:$0x1] }
 0x341   : > { %14113 = vmatmul.mubr.msk.bf16.gmra.mxu0 %vm1526_vm1, %v14394_v22  ;;  %v17401_v60 = vsel %vm15123_vm10, %v10203_v3, %v10204_v58  ;;  %v9521_v38 = vshll.u32 %v9308_v14, 16  ;;  %v9526_v29 = vshrl.u32 %v9309_v42, 16  ;;  %v9529_v55 = vshll.u32 %v9309_v42, 16  ;;  %v9312_v45 = vld [vmem:[#allocation3 + $0x78] sm:$0xf] }
 0x342   : > { %14116 = vmatprep.mubr.msk.bf16.mxu0 %vm1526_vm1, %v14395_v35  ;;  %v13161_v41 = vcombine.low %v17389_v16, %v17401_v60  ;;  %v9507_v48 = vrot.slane %v9505_v13, 5  ;;  %v9513_v31 = vrot.slane %v9511_v56, 5  ;;  %v9517_v6 = vrot.slane %v9515_v8, 4  ;;  %v17411_v42 = vld [vmem:[%s18292_s6 + $0x20] sm:$0xf] }
 0x343   : > { %v9523_v37 = vrot.slane %v9521_v38, 5  ;;  %v9535_v21 = vshll.u32 %v9310_v5, 16  ;;  %v9528_v12 = vrot.slane %v9526_v29, 4  ;;  %v9539_v28 = vshrl.u32 %v9310_v5, 16  ;;  %v14396_v5 = vld [vmem:[#allocation3 + $0xc0] sm:$0xff]  }
 0x344   : > { %v9508_v1 = vor.u32 %v9507_v48, %v9504_v32  ;;  %v9545_v14 = vshll.u32 %v9311_v46, 16  ;;  %v9518_v2 = vor.u32 %v9517_v6, %v9513_v31  ;;  %v9531_v25 = vrot.slane %v9529_v55, 5  ;;  %v9314_v29 = vld [vmem:[#allocation3 + $0x80] sm:$0x1]  ;;  %v9315_v23 = vld [vmem:[#allocation3 + $0x84] sm:$0xf] }
 0x345   : > { %v9537_v58 = vrot.slane %v9535_v21, 5  ;;  %v13145_v11 = vrot.slane %v10090_v9, 9  ;;  %v9541_v22 = vrot.slane %v9539_v28, 4  ;;  %v10208_v3 = vrot.slane %v10091_v10, 5  ;;  %14123 = vmatmul.mubr.msk.bf16.vlgmr.msra.gmra.mxu1 %vm1526_vm1, %v17274_v17  ;;  %v9313_v10 = vld [vmem:[#allocation3 + $0x7c] sm:$0xf] }
 0x346   : > { %v9509_v19 = vrot.slane %v9508_v1, 4  ;;  %v9547_v49 = vrot.slane %v9545_v14, 5  ;;  %v9519_v35 = vrot.slane %v9518_v2, 4  ;;  %v9532_v52 = vor.u32 %v9531_v25, %v9528_v12  ;;  %14189 = vmatpush3.bf16.msra.mxu1 %v17250_v26  ;;  %14126 = vmatprep.mubr.msk.bf16.mxu1 %vm1526_vm1, %v17303_v57  ;;  %v9317_v55 = vld [vmem:[#allocation3 + $0x8c] sm:$0x1] }
 0x347   : > { %v10211_v32 = vrot.slane %v10092_v51, 5  ;;  %v13146_v13 = vrot.slane %v10093_v61, 9  ;;  %v9542_v46 = vor.u32 %v9541_v22, %v9537_v58  ;;  %v17422_v34 = vsel %vm15123_vm10, %v13145_v11, %v10208_v3  ;;  %14307 = vmatprep.subr.msk.bf16.mxu1 %vm7310_vm0, %v17411_v42  ;;  %v10096_v28 = vld [vmem:[#allocation3 + $0x60] sm:$0xe]  ;;  %v10097_v25 = vld [vmem:[#allocation3 + $0x64] sm:$0xf] }
 0x348   : > { %v9514_v56 = vsel %vm14632_vm15, %v9509_v19, %v9513_v31  ;;  %v10210_v8 = vrot.slane %v10208_v3, 4  ;;  %v9524_v17 = vsel %vm14632_vm15, %v9519_v35, %v9523_v37  ;;  %v9533_v38 = vrot.slane %v9532_v52, 4  ;;  %v10098_v3 = vld [vmem:[#allocation3 + $0x68] sm:$0x1]  ;;  %v10107_v16 = vld [vmem:[#allocation3 + $0x8c] sm:$0x1] }
 0x349   : > { %14117 = vmatmul.mubr.msk.bf16.gmra.mxu0 %vm1526_vm1, %v14396_v5  ;;  %v10215_v9 = vrot.slane %v10094_v43, 5  ;;  %v10218_v26 = vrot.slane %v10095_v27, 5  ;;  %v17433_v57 = vcombine.low %v9514_v56, %v9524_v17  ;;  %v9543_v48 = vrot.slane %v9542_v46, 4  ;;  %v10099_v17 = vld [vmem:[#allocation3 + $0x6c] sm:$0xe] }
 0x34a   : > { %14156 = vmatprep.mubr.msk.bf16.mxu0 %vm1526_vm1, %v13157_v18  ;;  %v17437_v31 = vsel %vm15123_vm10, %v10210_v8, %v10211_v32  ;;  %v9550_v51 = vshrl.u32 %v9312_v45, 16  ;;  %v9538_v6 = vsel %vm14632_vm15, %v9533_v38, %v9537_v58  ;;  %v9316_v18 = vld [vmem:[#allocation3 + $0x88] sm:$0xf]  ;;  %v9553_v1 = vshll.u32 %v9312_v45, 16  ;;  %v13992_v58 = vpop.f32.mrf.mxu1 }
 0x34b   : > { %v13162_v37 = vcombine.low %v17422_v34, %v17437_v31  ;;  %v17445_v30 = vsel %vm15123_vm10, %v13146_v13, %v10215_v9  ;;  %v10217_v33 = vrot.slane %v10215_v9, 4  ;;  %v9548_v21 = vsel %vm14632_vm15, %v9543_v48, %v9547_v49  ;;  %7481 = vst.msk [vmem:[#allocation5 + $0x30] sm:$0xff] %vm1526_vm1, %v13992_v58  ;;  %v9326_v31 = vld [vmem:[#allocation3 + $0xb0] sm:$0x1] }
 0x34c   : > { %v9552_v61 = vrot.slane %v9550_v51, 4  ;;  %v9559_v12 = vshll.u32 %v9313_v10, 16  ;;  %v17449_v14 = vcombine.low %v9538_v6, %v9548_v21  ;;  %v9563_v27 = vshrl.u32 %v9313_v10, 16  ;;  %v7364_v32 = vpop.f32.mrf.mxu1  ;;  %v10100_v10 = vld [vmem:[#allocation3 + $0x70] sm:$0xf] }
 0x34d   : > { %v17453_v43 = vsel %vm15123_vm10, %v10217_v33, %v10218_v26  ;;  %v9569_v2 = vshll.u32 %v9314_v29, 16  ;;  %v9555_v19 = vrot.slane %v9553_v1, 5  ;;  %v9574_v49 = vshrl.u32 %v9315_v23, 16  ;;  %14127 = vmatmul.mubr.msk.bf16.gmra.mxu1 %vm1526_vm1, %v17330_v53  ;;  %7479 = vst.msk [vmem:[#allocation5 + $0x20] sm:$0xff] %vm1526_vm1, %v7364_v32  ;;  %v10101_v6 = vld [vmem:[#allocation3 + $0x74] sm:$0x1] }
 0x34e   : > { %v13163_v11 = vcombine.low %v17445_v30, %v17453_v43  ;;  %v9561_v22 = vrot.slane %v9559_v12, 5  ;;  %v9565_v45 = vrot.slane %v9563_v27, 4  ;;  %v9577_v35 = vshll.u32 %v9315_v23, 16  ;;  %14130 = vmatprep.mubr.msk.bf16.mxu1 %vm1526_vm1, %v17346_v44  ;;  %v13993_v48 = vpop.f32.mrf.mxu1  ;;  %v9320_v1 = vld [vmem:[#allocation3 + $0x98] sm:$0x1] }
 0x34f   : > { %v9571_v5 = vrot.slane %v9569_v2, 5  ;;  %v9583_v52 = vshll.u32 %v9316_v18, 16  ;;  %v9556_v13 = vor.u32 %v9555_v19, %v9552_v61  ;;  %v9576_v56 = vrot.slane %v9574_v49, 4  ;;  %7482 = vst.msk [vmem:[#allocation5 + $0x38] sm:$0xff] %vm1526_vm1, %v13993_v48 }
 0x350   : > { %v9587_v46 = vshrl.u32 %v9316_v18, 16  ;;  %v9593_v8 = vshll.u32 %v9317_v55, 16  ;;  %v9566_v53 = vor.u32 %v9565_v45, %v9561_v22  ;;  %v9579_v38 = vrot.slane %v9577_v35, 5  ;;  %v9318_v18 = vld [vmem:[#allocation3 + $0x90] sm:$0xf]  ;;  %v7367_v55 = vpop.f32.mrf.mxu1 }
 0x351   : > { %14157 = vmatmul.mubr.msk.bf16.vlgmr.msra.gmra.mxu0 %vm1526_vm1, %v13158_v36  ;;  %v9585_v9 = vrot.slane %v9583_v52, 5  ;;  %v13147_v26 = vrot.slane %v10096_v28, 9  ;;  %v9557_v44 = vrot.slane %v9556_v13, 4  ;;  %v10222_v23 = vrot.slane %v10097_v25, 5  ;;  %7480 = vst.msk [vmem:[#allocation5 + $0x28] sm:$0xff] %vm1526_vm1, %v7367_v55 }
 0x352   : > { %14160 = vmatprep.mubr.msk.bf16.mxu0 %vm1526_vm1, %v13159_v54  ;;  %v9589_v29 = vrot.slane %v9587_v46, 4  ;;  %v9595_v51 = vrot.slane %v9593_v8, 5  ;;  %v9567_v20 = vrot.slane %v9566_v53, 4  ;;  %v9580_v47 = vor.u32 %v9579_v38, %v9576_v56  ;;  %v9319_v54 = vld [vmem:[#allocation3 + $0x94] sm:$0xf] }
 0x353   : > { %v10225_v36 = vrot.slane %v10098_v3, 5  ;;  %v13148_v33 = vrot.slane %v10099_v17, 9  ;;  %v9562_v21 = vsel %vm14632_vm15, %v9557_v44, %v9561_v22  ;;  %v17476_v62 = vsel %vm15123_vm10, %v13147_v26, %v10222_v23  ;;  %v9321_v25 = vld [vmem:[#allocation3 + $0x9c] sm:$0xf]  ;;  %v9322_v52 = vld [vmem:[#allocation3 + $0xa0] sm:$0xf] }
 0x354   : > { %v9590_v61 = vor.u32 %v9589_v29, %v9585_v9  ;;  %v10224_v63 = vrot.slane %v10222_v23, 4  ;;  %v9572_v12 = vsel %vm14632_vm15, %v9567_v20, %v9571_v5  ;;  %v9581_v28 = vrot.slane %v9580_v47, 4  ;;  %v9323_v46 = vld [vmem:[#allocation3 + $0xa4] sm:$0x1]  ;;  %v10102_v38 = vld [vmem:[#allocation3 + $0x78] sm:$0xe] }
 0x355   : > { %v10229_v27 = vrot.slane %v10100_v10, 5  ;;  %v10232_v2 = vrot.slane %v10101_v6, 5  ;;  %v17481_v58 = vcombine.low %v9562_v21, %v9572_v12  ;;  %v9598_v49 = vshrl.u32 %v9318_v18, 16  ;;  %14131 = vmatmul.mubr.msk.bf16.gmra.mxu1 %vm1526_vm1, %v17373_v24  ;;  %v10104_v10 = vld [vmem:[#allocation3 + $0x80] sm:$0x1] }
 0x356   : > { %v9591_v19 = vrot.slane %v9590_v61, 4  ;;  %v17485_v22 = vsel %vm15123_vm10, %v10224_v63, %v10225_v36  ;;  %v9586_v3 = vsel %vm14632_vm15, %v9581_v28, %v9585_v9  ;;  %14134 = vmatprep.mubr.msk.bf16.mxu1 %vm1526_vm1, %v17397_v50  ;;  %v9601_v24 = vshll.u32 %v9318_v18, 16  ;;  %v10103_v9 = vld [vmem:[#allocation3 + $0x7c] sm:$0xf]  ;;  %v10105_v23 = vld [vmem:[#allocation3 + $0x84] sm:$0xe] }
 0x357   : > { %v13164_v45 = vcombine.low %v17476_v62, %v17485_v22  ;;  %v17495_v5 = vsel %vm15123_vm10, %v13148_v33, %v10229_v27  ;;  %v10231_v35 = vrot.slane %v10229_v27, 4  ;;  %v9600_v13 = vrot.slane %v9598_v49, 4  ;;  %v10106_v33 = vld [vmem:[#allocation3 + $0x88] sm:$0xf] }
 0x358   : > { %v9596_v32 = vsel %vm14632_vm15, %v9591_v19, %v9595_v51  ;;  %v9607_v56 = vshll.u32 %v9319_v54, 16  ;;  %v9611_v53 = vshrl.u32 %v9319_v54, 16  ;;  %v9617_v50 = vshll.u32 %v9320_v1, 16  ;;  %v9324_v21 = vld [vmem:[#allocation3 + $0xa8] sm:$0xf] }
 0x359   : > { %14161 = vmatmul.mubr.msk.bf16.gmra.mxu0 %vm1526_vm1, %v13160_v39  ;;  %v17505_v8 = vcombine.low %v9586_v3, %v9596_v32  ;;  %v17509_v17 = vsel %vm15123_vm10, %v10231_v35, %v10232_v2  ;;  %v9603_v0 = vrot.slane %v9601_v24, 5  ;;  %v9622_v26 = vshrl.u32 %v9321_v25, 16  ;;  %v9325_v32 = vld [vmem:[#allocation3 + $0xac] sm:$0xf] }
 0x35a   : > { %14164 = vmatprep.mubr.msk.bf16.mxu0 %vm1526_vm1, %v13161_v41  ;;  %v13165_v4 = vcombine.low %v17495_v5, %v17509_v17  ;;  %v9609_v39 = vrot.slane %v9607_v56, 5  ;;  %v9613_v48 = vrot.slane %v9611_v53, 4  ;;  %v9619_v44 = vrot.slane %v9617_v50, 5  ;;  %v9327_v56 = vld [vmem:[#allocation3 + $0xb4] sm:$0xf] }
 0x35b   : > { %v9625_v29 = vshll.u32 %v9321_v25, 16  ;;  %v9631_v51 = vshll.u32 %v9322_v52, 16  ;;  %v9604_v6 = vor.u32 %v9603_v0, %v9600_v13  ;;  %v9624_v20 = vrot.slane %v9622_v26, 4  ;;  %v9329_v50 = vld [vmem:[#allocation3 + $0xbc] sm:$0x1] }
 0x35c   : > { %v9635_v47 = vshrl.u32 %v9322_v52, 16  ;;  %v9641_v36 = vshll.u32 %v9323_v46, 16  ;;  %v9614_v60 = vor.u32 %v9613_v48, %v9609_v39  ;;  %v13149_v55 = vrot.slane %v10102_v38, 9  ;;  %v10108_v26 = vld [vmem:[#allocation3 + $0x90] sm:$0xe] }
 0x35d   : > { %v9627_v41 = vrot.slane %v9625_v29, 5  ;;  %v9633_v18 = vrot.slane %v9631_v51, 5  ;;  %v9605_v61 = vrot.slane %v9604_v6, 4  ;;  %v10236_v1 = vrot.slane %v10103_v9, 5  ;;  %14135 = vmatmul.mubr.msk.bf16.gmra.mxu1 %vm1526_vm1, %v17433_v57  ;;  %v10109_v51 = vld [vmem:[#allocation3 + $0x94] sm:$0xf] }
 0x35e   : > { %v9637_v63 = vrot.slane %v9635_v47, 4  ;;  %v9643_v54 = vrot.slane %v9641_v36, 5  ;;  %v9615_v12 = vrot.slane %v9614_v60, 4  ;;  %v10239_v27 = vrot.slane %v10104_v10, 5  ;;  %14138 = vmatprep.mubr.msk.bf16.mxu1 %vm1526_vm1, %v17449_v14  ;;  %v10110_v36 = vld [vmem:[#allocation3 + $0x98] sm:$0x1] }
 0x35f   : > { %v9628_v28 = vor.u32 %v9627_v41, %v9624_v20  ;;  %v13150_v2 = vrot.slane %v10105_v23, 9  ;;  %v9610_v25 = vsel %vm14632_vm15, %v9605_v61, %v9609_v39  ;;  %v17525_v49 = vsel %vm15123_vm10, %v13149_v55, %v10236_v1  ;;  %v9330_v17 = vld [vmem:[#allocation3 + $0xc0] sm:$0xf] }
 0x360   : > { %v9638_v19 = vor.u32 %v9637_v63, %v9633_v18  ;;  %v10238_v3 = vrot.slane %v10236_v1, 4  ;;  %v9620_v57 = vsel %vm14632_vm15, %v9615_v12, %v9619_v44  ;;  %v10243_v52 = vrot.slane %v10106_v33, 5  ;;  %v10111_v63 = vld [vmem:[#allocation3 + $0x9c] sm:$0xe] }
 0x361   : > { %14165 = vmatmul.mubr.msk.bf16.gmra.mxu0 %vm1526_vm1, %v13162_v37  ;;  %v9629_v35 = vrot.slane %v9628_v28, 4  ;;  %v10246_v14 = vrot.slane %v10107_v16, 5  ;;  %v17537_v13 = vcombine.low %v9610_v25, %v9620_v57  ;;  %v9646_v37 = vshrl.u32 %v9324_v21, 16  ;;  %v10112_v28 = vld [vmem:[#allocation3 + $0xa0] sm:$0xf] }
 0x362   : > { %14168 = vmatprep.mubr.msk.bf16.mxu0 %vm1526_vm1, %v13163_v11  ;;  %v9639_v24 = vrot.slane %v9638_v19, 4  ;;  %v17541_v34 = vsel %vm15123_vm10, %v10238_v3, %v10239_v27  ;;  %v17549_v30 = vsel %vm15123_vm10, %v13150_v2, %v10243_v52  ;;  %v10245_v43 = vrot.slane %v10243_v52, 4  ;;  %v9328_v11 = vld [vmem:[#allocation3 + $0xb8] sm:$0xf]  ;;  %v10113_v19 = vld [vmem:[#allocation3 + $0xa4] sm:$0x1] }
 0x363   : > { %v9634_v46 = vsel %vm14632_vm15, %v9629_v35, %v9633_v18  ;;  %v13166_v53 = vcombine.low %v17525_v49, %v17541_v34  ;;  %v9648_v9 = vrot.slane %v9646_v37, 4  ;;  %v9649_v0 = vshll.u32 %v9324_v21, 16  ;;  %v10119_v34 = vld [vmem:[#allocation3 + $0xbc] sm:$0x1] }
 0x364   : > { %v9644_v38 = vsel %vm14632_vm15, %v9639_v24, %v9643_v54  ;;  %v9655_v39 = vshll.u32 %v9325_v32, 16  ;;  %v17555_v48 = vsel %vm15123_vm10, %v10245_v43, %v10246_v14  ;;  %v9659_v44 = vshrl.u32 %v9325_v32, 16 }
 0x365   : > { %v13120_v10 = vcombine.low %v9634_v46, %v9644_v38  ;;  %v9665_v29 = vshll.u32 %v9326_v31, 16  ;;  %v13167_v23 = vcombine.low %v17549_v30, %v17555_v48  ;;  %v9651_v6 = vrot.slane %v9649_v0, 5  ;;  %14139 = vmatmul.mubr.msk.bf16.gmra.mxu1 %vm1526_vm1, %v17481_v58  ;;  %v9331_v31 = vld [vmem:[#allocation3 + $0xc4] sm:$0xf] }
 0x366   : > { %v9657_v20 = vrot.slane %v9655_v39, 5  ;;  %v9670_v47 = vshrl.u32 %v9327_v56, 16  ;;  %v9661_v33 = vrot.slane %v9659_v44, 4  ;;  %v9673_v60 = vshll.u32 %v9327_v56, 16  ;;  %14142 = vmatprep.mubr.msk.bf16.mxu1 %vm1526_vm1, %v17505_v8  ;;  %v10121_v30 = vld [vmem:[#allocation3 + $0xc4] sm:$0xf] }
 0x367   : > { %v9667_v16 = vrot.slane %v9665_v29, 5  ;;  %v9679_v41 = vshll.u32 %v9328_v11, 16  ;;  %v9652_v18 = vor.u32 %v9651_v6, %v9648_v9  ;;  %v9683_v21 = vshrl.u32 %v9328_v11, 16  ;;  %v9332_v11 = vld [vmem:[#allocation3 + $0xc8] sm:$0x1] }
 0x368   : > { %v9672_v55 = vrot.slane %v9670_v47, 4  ;;  %v9689_v61 = vshll.u32 %v9329_v50, 16  ;;  %v9662_v54 = vor.u32 %v9661_v33, %v9657_v20  ;;  %v9675_v1 = vrot.slane %v9673_v60, 5  ;;  %v17585_v50 = vpop.f32.mrf.mxu0  ;;  %v10116_v6 = vld [vmem:[#allocation3 + $0xb0] sm:$0x1] }
 0x369   : > { %14169 = vmatmul.mubr.msk.bf16.gmra.mxu0 %vm1526_vm1, %v13164_v45  ;;  %v9681_v58 = vrot.slane %v9679_v41, 5  ;;  %v13151_v12 = vrot.slane %v10108_v26, 9  ;;  %v9653_v8 = vrot.slane %v9652_v18, 4  ;;  %v9685_v27 = vrot.slane %v9683_v21, 4  ;;  %v10114_v26 = vld [vmem:[#allocation3 + $0xa8] sm:$0xe] }
 0x36a   : > { %14172 = vmatprep.mubr.msk.bf16.mxu0 %vm1526_vm1, %v13165_v4  ;;  %v9691_v2 = vrot.slane %v9689_v61, 5  ;;  %v10250_v25 = vrot.slane %v10109_v51, 5  ;;  %v9663_v3 = vrot.slane %v9662_v54, 4  ;;  %v9676_v57 = vor.u32 %v9675_v1, %v9672_v55  ;;  %v10120_v54 = vld [vmem:[#allocation3 + $0xc0] sm:$0xe] }
 0x36b   : > { %v10253_v62 = vrot.slane %v10110_v36, 5  ;;  %v13152_v22 = vrot.slane %v10111_v63, 9  ;;  %v9658_v45 = vsel %vm14632_vm15, %v9653_v8, %v9657_v20  ;;  %v9686_v35 = vor.u32 %v9685_v27, %v9681_v58 }
 0x36c   : > { %v17575_v52 = vsel %vm15123_vm10, %v13151_v12, %v10250_v25  ;;  %v10252_v5 = vrot.slane %v10250_v25, 4  ;;  %v9668_v4 = vsel %vm14632_vm15, %v9663_v3, %v9667_v16  ;;  %v9677_v14 = vrot.slane %v9676_v57, 4  ;;  %v10117_v16 = vld [vmem:[#allocation3 + $0xb4] sm:$0xe] }
 0x36d   : > { %v10257_v32 = vrot.slane %v10112_v28, 5  ;;  %v10260_v24 = vrot.slane %v10113_v19, 5  ;;  %v13121_v37 = vcombine.low %v9658_v45, %v9668_v4  ;;  %v9687_v56 = vrot.slane %v9686_v35, 4  ;;  %14143 = vmatmul.mubr.msk.bf16.gmra.mxu1 %vm1526_vm1, %v17537_v13 }
 0x36e   : > { %v17581_v46 = vsel %vm15123_vm10, %v10252_v5, %v10253_v62  ;;  %v11595_v43 = vsel %vm7310_vm0, %v17314_v40, 0  ;;  %v9682_v38 = vsel %vm14632_vm15, %v9677_v14, %v9681_v58  ;;  %v10115_v40 = vld [vmem:[#allocation3 + $0xac] sm:$0xf]  ;;  %14146 = vmatprep.mubr.msk.bf16.mxu1 %vm1526_vm1, %v13120_v10  ;;  %v9694_v13 = vshrl.u32 %v9330_v17, 16  ;;  %v10118_v10 = vld [vmem:[#allocation3 + $0xb8] sm:$0xf] }
 0x36f   : > { %v13168_v9 = vcombine.low %v17575_v52, %v17581_v46  ;;  %v17595_v0 = vsel %vm15123_vm10, %v13152_v22, %v10257_v32  ;;  %v10259_v39 = vrot.slane %v10257_v32, 4  ;;  %14223 = vmatpush3.bf16.msra.mxu0 %v11595_v43  ;;  %v9692_v44 = vsel %vm14632_vm15, %v9687_v56, %v9691_v2  ;;  %v10122_v2 = vld [vmem:[#allocation3 + $0xc8] sm:$0x1]  ;;  %v13996_v25 = vpop.f32.mrf.mxu1  ;;  %v11064_v22 = vld [vmem:[#allocation3 + $0x18] sm:$0xf] }
 0x370   : > { %v9697_v29 = vshll.u32 %v9330_v17, 16  ;;  %v9703_v51 = vshll.u32 %v9331_v31, 16  ;;  %v13122_v20 = vcombine.low %v9682_v38, %v9692_v44  ;;  %v9707_v36 = vshrl.u32 %v9331_v31, 16  ;;  %7485 = vst.msk [vmem:[#allocation5 + $0x50] sm:$0xff] %vm1526_vm1, %v13996_v25  ;;  %v11065_v14 = vld [vmem:[#allocation3 + $0x1c] sm:$0xf] }
 0x371   : > { %14173 = vmatmul.mubr.msk.bf16.gmra.mxu0 %vm1526_vm1, %v13166_v53  ;;  %v10261_v47 = vsel %vm15123_vm10, %v10259_v39, %v10260_v24  ;;  %v9713_v33 = vshll.u32 %v9332_v11, 16  ;;  %v9696_v41 = vrot.slane %v9694_v13, 4  ;;  %v17611_v53 = vpop.f32.mrf.mxu0  ;;  %v13153_v61 = vrot.slane %v10114_v26, 9  ;;  %v7380_v32 = vpop.f32.mrf.mxu1  ;;  %v11066_v56 = vld [vmem:[#allocation3 + $0x20] sm:$0x1]  ;;  %v8203_v52 = vld [vmem:[#allocation5 + $0x10] sm:$0xff] }
 0x372   : > { %14176 = vmatprep.mubr.msk.bf16.mxu0 %vm1526_vm1, %v13167_v23  ;;  %v13169_v60 = vcombine.low %v17595_v0, %v10261_v47  ;;  %v9699_v18 = vrot.slane %v9697_v29, 5  ;;  %v9705_v49 = vrot.slane %v9703_v51, 5  ;;  %v9709_v55 = vrot.slane %v9707_v36, 4  ;;  %7483 = vst.msk [vmem:[#allocation5 + $0x40] sm:$0xff] %vm1526_vm1, %v7380_v32  ;;  %v11067_v46 = vld [vmem:[#allocation3 + $0x24] sm:$0xf] }
 0x373   : > { %v9715_v21 = vrot.slane %v9713_v33, 5  ;;  %v10264_v63 = vrot.slane %v10115_v40, 5  ;;  %v10267_v58 = vrot.slane %v10116_v6, 5  ;;  %v13154_v12 = vrot.slane %v10117_v16, 9  ;;  %v17625_v45 = vpop.f32.mrf.mxu0  ;;  %v13997_v39 = vpop.f32.mrf.mxu1  ;;  %v11068_v47 = vld [vmem:[#allocation3 + $0x28] sm:$0xf] }
 0x374   : > { %v9700_v1 = vor.u32 %v9699_v18, %v9696_v41  ;;  %v10271_v28 = vrot.slane %v10118_v10, 5  ;;  %v9710_v48 = vor.u32 %v9709_v55, %v9705_v49  ;;  %v10274_v27 = vrot.slane %v10119_v34, 5  ;;  %7486 = vst.msk [vmem:[#allocation5 + $0x58] sm:$0xff] %vm1526_vm1, %v13997_v39  ;;  %v11069_v36 = vld [vmem:[#allocation3 + $0x2c] sm:$0x1] }
 0x375   : > { %v17615_v23 = vsel %vm15123_vm10, %v13153_v61, %v10264_v63  ;;  %v10266_v8 = vrot.slane %v10264_v63, 4  ;;  %v17623_v62 = vsel %vm7310_vm0, %v17411_v42, 0  ;;  %14147 = vmatmul.mubr.msk.bf16.gmra.mxu1 %vm1526_vm1, %v13121_v37  ;;  %v13155_v17 = vrot.slane %v10120_v54, 9  ;;  %v7383_v33 = vpop.f32.mrf.mxu1  ;;  %v11070_v18 = vld [vmem:[#allocation3 + $0x30] sm:$0xf]  ;;  %v14397_v61 = vld [vmem:[#allocation3 + $0x18] sm:$0xff]  }
 0x376   : > { %v9701_v19 = vrot.slane %v9700_v1, 4  ;;  %v17619_v3 = vsel %vm15123_vm10, %v13154_v12, %v10271_v28  ;;  %v10273_v57 = vrot.slane %v10271_v28, 4  ;;  %v9711_v35 = vrot.slane %v9710_v48, 4  ;;  %14150 = vmatprep.mubr.msk.bf16.mxu1 %vm1526_vm1, %v13122_v20  ;;  %7484 = vst.msk [vmem:[#allocation5 + $0x48] sm:$0xff] %vm1526_vm1, %v7383_v33  ;;  %v11071_v48 = vld [vmem:[#allocation3 + $0x34] sm:$0xf] }
 0x377   : > { %v17631_v5 = vsel %vm15123_vm10, %v10266_v8, %v10267_v58  ;;  %v10278_v4 = vrot.slane %v10121_v30, 5  ;;  %v10281_v37 = vrot.slane %v10122_v2, 5  ;;  %v11113_v40 = vshrl.u32 %v11064_v22, 16 }
 0x378   : > { %v9706_v42 = vsel %vm14632_vm15, %v9701_v19, %v9705_v49  ;;  %v13170_v24 = vcombine.low %v17615_v23, %v17631_v5  ;;  %v10275_v31 = vsel %vm15123_vm10, %v10273_v57, %v10274_v27  ;;  %v9716_v43 = vsel %vm14632_vm15, %v9711_v35, %v9715_v21  ;;  %v11072_v19 = vld [vmem:[#allocation3 + $0x38] sm:$0x1] }
 0x379   : > { %14177 = vmatmul.mubr.msk.bf16.gmra.mxu0 %vm1526_vm1, %v13168_v9  ;;  %v13171_v11 = vcombine.low %v17619_v3, %v10275_v31  ;;  %v17650_v38 = vsel %vm15123_vm10, %v13155_v17, %v10278_v4  ;;  %v10280_v0 = vrot.slane %v10278_v4, 4  ;;  %v13123_v26 = vcombine.low %v9706_v42, %v9716_v43  ;;  %v17653_v9 = vpop.f32.mrf.mxu0  ;;  %v14398_v42 = vld [vmem:[#allocation3 + $0x24] sm:$0xff]   ;;  %v14399_v43 = vld [vmem:[#allocation3 + $0x30] sm:$0xff]  }
 0x37a   : > { %14180 = vmatprep.mubr.msk.bf16.mxu0 %vm1526_vm1, %v13169_v60  ;;  %v11116_v44 = vshll.u32 %v11064_v22, 16  ;;  %v11122_v13 = vshll.u32 %v11065_v14, 16  ;;  %v11126_v51 = vshrl.u32 %v11065_v14, 16  ;;  %v11132_v6 = vshll.u32 %v11066_v56, 16 }
 0x37b   : > { %v17658_v29 = vsel %vm15123_vm10, %v10280_v0, %v10281_v37  ;;  %v8235_v20 = vadd.f32 %v17585_v50, %v8203_v52  ;;  %v11115_v10 = vrot.slane %v11113_v40, 4  ;;  %v11137_v55 = vshrl.u32 %v11067_v46, 16  ;;  %v14026_v58 = vpop.f32.mrf.mxu0  ;;  %v8201_v40 = vld [vmem:[#allocation5] sm:$0xff] }
 0x37c   : > { %v13172_v16 = vcombine.low %v17650_v38, %v17658_v29  ;;  %v11118_v60 = vrot.slane %v11116_v44, 5  ;;  %v11124_v41 = vrot.slane %v11122_v13, 5  ;;  %v11128_v49 = vrot.slane %v11126_v51, 4  ;;  %v11073_v44 = vld [vmem:[#allocation3 + $0x3c] sm:$0xf] }
 0x37d   : > { %v11134_v34 = vrot.slane %v11132_v6, 5  ;;  %8267 = vst.msk [vmem:[#allocation5 + $0x10] sm:$0xff] %vm1526_vm1, %v8235_v20  ;;  %v11140_v21 = vshll.u32 %v11067_v46, 16  ;;  %v11146_v63 = vshll.u32 %v11068_v47, 16  ;;  %v11150_v54 = vshrl.u32 %v11068_v47, 16  ;;  %14151 = vmatmul.mubr.msk.bf16.gmra.mxu1 %vm1526_vm1, %v13123_v26  ;;  %v17671_v32 = vpop.f32.mrf.mxu0  ;;  %v8204_v6 = vld [vmem:[#allocation5 + $0x18] sm:$0xff] }
 0x37e   : > { %v11119_v50 = vor.u32 %v11118_v60, %v11115_v10  ;;  %v11156_v1 = vshll.u32 %v11069_v36, 16  ;;  %v11129_v12 = vor.u32 %v11128_v49, %v11124_v41  ;;  %v11139_v28 = vrot.slane %v11137_v55, 4  ;;  %14190 = vmatprep.mubr.msk.bf16.mxu1 %vm1526_vm1, %v14397_v61  ;;  %v8202_v20 = vld [vmem:[#allocation5 + $0x8] sm:$0xff]  ;;  %v11076_v49 = vld [vmem:[#allocation3 + $0x48] sm:$0xf] }
 0x37f   : > { %v11142_v30 = vrot.slane %v11140_v21, 5  ;;  %v11161_v23 = vshrl.u32 %v11070_v18, 16  ;;  %v11148_v27 = vrot.slane %v11146_v63, 5  ;;  %v11152_v2 = vrot.slane %v11150_v54, 4  ;;  %v11074_v47 = vld [vmem:[#allocation3 + $0x40] sm:$0xf] }
 0x380   : > { %v11120_v8 = vrot.slane %v11119_v50, 4  ;;  %v11158_v25 = vrot.slane %v11156_v1, 5  ;;  %v11130_v3 = vrot.slane %v11129_v12, 4  ;;  %v11164_v35 = vshll.u32 %v11070_v18, 16  ;;  %v11075_v18 = vld [vmem:[#allocation3 + $0x44] sm:$0x1] }
 0x381   : > { %14181 = vmatmul.mubr.msk.bf16.gmra.mxu0 %vm1526_vm1, %v13170_v24  ;;  %v11143_v57 = vor.u32 %v11142_v30, %v11139_v28  ;;  %v11163_v22 = vrot.slane %v11161_v23, 4  ;;  %v11153_v17 = vor.u32 %v11152_v2, %v11148_v27  ;;  %v11170_v4 = vshll.u32 %v11071_v48, 16  ;;  %v11078_v38 = vld [vmem:[#allocation3 + $0x50] sm:$0x1] }
 0x382   : > { %14184 = vmatprep.mubr.msk.bf16.mxu0 %vm1526_vm1, %v13171_v11  ;;  %v11125_v5 = vsel %vm14632_vm15, %v11120_v8, %v11124_v41  ;;  %v11174_v14 = vshrl.u32 %v11071_v48, 16  ;;  %v11135_v31 = vsel %vm14632_vm15, %v11130_v3, %v11134_v34  ;;  %v11166_v24 = vrot.slane %v11164_v35, 5  ;;  %v8207_v41 = vld [vmem:[#allocation5 + $0x30] sm:$0xff]  ;;  %v14027_v34 = vpop.f32.mrf.mxu0  ;;  %v14400_v8 = vld [vmem:[#allocation3 + $0x3c] sm:$0xff]  }
 0x383   : > { %v11144_v37 = vrot.slane %v11143_v57, 4  ;;  %v11180_v56 = vshll.u32 %v11072_v19, 16  ;;  %v13223_v0 = vcombine.low %v11125_v5, %v11135_v31  ;;  %v11154_v39 = vrot.slane %v11153_v17, 4  ;;  %v14401_v3 = vld [vmem:[#allocation3 + $0x48] sm:$0xff]   ;;  %v8205_v17 = vld [vmem:[#allocation5 + $0x20] sm:$0xff] }
 0x384   : > { %v11172_v26 = vrot.slane %v11170_v4, 5  ;;  %v11176_v11 = vrot.slane %v11174_v14, 4  ;;  %v11167_v52 = vor.u32 %v11166_v24, %v11163_v22  ;;  %v8233_v51 = vadd.f32 %v8201_v40, %v17611_v53  ;;  %v8093_v29 = vpop.f32.mrf.mxu0  ;;  %v8208_v4 = vld [vmem:[#allocation5 + $0x38] sm:$0xff]  ;;  %v8206_v40 = vld [vmem:[#allocation5 + $0x28] sm:$0xff] }
 0x385   : > { %v11149_v13 = vsel %vm14632_vm15, %v11144_v37, %v11148_v27  ;;  %v11182_v46 = vrot.slane %v11180_v56, 5  ;;  %v11159_v36 = vsel %vm14632_vm15, %v11154_v39, %v11158_v25  ;;  %v8236_v10 = vadd.f32 %v17625_v45, %v8204_v6  ;;  %14191 = vmatmul.mubr.msk.bf16.vlgmr.msra.gmra.mxu1 %vm1526_vm1, %v14398_v42  ;;  %v11079_v56 = vld [vmem:[#allocation3 + $0x54] sm:$0xf] }
 0x386   : > { %v11177_v33 = vor.u32 %v11176_v11, %v11172_v26  ;;  %v8234_v60 = vadd.f32 %v8202_v20, %v17653_v9  ;;  %v17683_v55 = vcombine.low %v11149_v13, %v11159_v36  ;;  %v11168_v53 = vrot.slane %v11167_v52, 4  ;;  %8265 = vst.msk [vmem:[#allocation5] sm:$0xff] %vm1526_vm1, %v8233_v51  ;;  %14257 = vmatpush3.bf16.msra.mxu1 %v17623_v62  ;;  %v8211_v13 = vld [vmem:[#allocation5 + $0x50] sm:$0xff]  ;;  %v11081_v20 = vld [vmem:[#allocation3 + $0x5c] sm:$0x1] }
 0x387   : > { %v8239_v21 = vadd.f32 %v14026_v58, %v8207_v41  ;;  %v11185_v61 = vshrl.u32 %v11073_v44, 16  ;;  %14194 = vmatprep.mubr.msk.bf16.mxu1 %vm1526_vm1, %v14399_v43  ;;  %8268 = vst.msk [vmem:[#allocation5 + $0x18] sm:$0xff] %vm1526_vm1, %v8236_v10  ;;  %v11188_v9 = vshll.u32 %v11073_v44, 16  ;;  %v11194_v50 = vshll.u32 %v11074_v47, 16  ;;  %v11077_v58 = vld [vmem:[#allocation3 + $0x4c] sm:$0xf] }
 0x388   : > { %v11178_v45 = vrot.slane %v11177_v33, 4  ;;  %8266 = vst.msk [vmem:[#allocation5 + $0x8] sm:$0xff] %vm1526_vm1, %v8234_v60  ;;  %v11198_v63 = vshrl.u32 %v11074_v47, 16  ;;  %v11173_v54 = vsel %vm14632_vm15, %v11168_v53, %v11172_v26  ;;  %v11204_v1 = vshll.u32 %v11075_v18, 16  ;;  %v11080_v43 = vld [vmem:[#allocation3 + $0x58] sm:$0xf] }
 0x389   : > { %14185 = vmatmul.mubr.msk.bf16.gmra.mxu0 %vm1526_vm1, %v13172_v16  ;;  %8271 = vst.msk [vmem:[#allocation5 + $0x30] sm:$0xff] %vm1526_vm1, %v8239_v21  ;;  %v11187_v62 = vrot.slane %v11185_v61, 4  ;;  %v11209_v12 = vshrl.u32 %v11076_v49, 16  ;;  %v11190_v30 = vrot.slane %v11188_v9, 5  ;;  %v11196_v48 = vrot.slane %v11194_v50, 5  ;;  %v14000_v16 = vpop.f32.mrf.mxu1 }
 0x38a   : > { %14224 = vmatprep.mubr.msk.bf16.mxu0 %vm1526_vm1, %v13223_v0  ;;  %v11183_v28 = vsel %vm14632_vm15, %v11178_v45, %v11182_v46  ;;  %v11200_v23 = vrot.slane %v11198_v63, 4  ;;  %v11206_v2 = vrot.slane %v11204_v1, 5  ;;  %v11212_v19 = vshll.u32 %v11076_v49, 16  ;;  %7489 = vst.msk [vmem:[#allocation5 + $0x70] sm:$0xff] %vm1526_vm1, %v14000_v16  ;;  %v14030_v44 = vpop.f32.mrf.mxu0  ;;  %v11082_v60 = vld [vmem:[#allocation3 + $0x60] sm:$0xf] }
 0x38b   : > { %v13225_v27 = vcombine.low %v11173_v54, %v11183_v28  ;;  %v11211_v25 = vrot.slane %v11209_v12, 4  ;;  %v11191_v57 = vor.u32 %v11190_v30, %v11187_v62  ;;  %v11218_v35 = vshll.u32 %v11077_v58, 16  ;;  %v7396_v14 = vpop.f32.mrf.mxu1  ;;  %v11083_v63 = vld [vmem:[#allocation3 + $0x64] sm:$0xf] }
 0x38c   : > { %v11201_v22 = vor.u32 %v11200_v23, %v11196_v48  ;;  %v11222_v5 = vshrl.u32 %v11077_v58, 16  ;;  %v11214_v42 = vrot.slane %v11212_v19, 5  ;;  %v11228_v31 = vshll.u32 %v11078_v38, 16  ;;  %7487 = vst.msk [vmem:[#allocation5 + $0x60] sm:$0xff] %vm1526_vm1, %v7396_v14  ;;  %v8106_v41 = vpop.f32.mrf.mxu0  ;;  %v11084_v58 = vld [vmem:[#allocation3 + $0x68] sm:$0x1] }
 0x38d   : > { %v8237_v37 = vadd.f32 %v8205_v17, %v17671_v32  ;;  %v8240_v24 = vadd.f32 %v14027_v34, %v8208_v4  ;;  %v11192_v0 = vrot.slane %v11191_v57, 4  ;;  %v11220_v26 = vrot.slane %v11218_v35, 5  ;;  %v14001_v52 = vpop.f32.mrf.mxu1  ;;  %14195 = vmatmul.mubr.msk.bf16.gmra.mxu1 %vm1526_vm1, %v14400_v8  ;;  %v14402_v38 = vld [vmem:[#allocation3 + $0x54] sm:$0xff]  }
 0x38e   : > { %v11202_v39 = vrot.slane %v11201_v22, 4  ;;  %v11224_v11 = vrot.slane %v11222_v5, 4  ;;  %v11215_v46 = vor.u32 %v11214_v42, %v11211_v25  ;;  %v11230_v51 = vrot.slane %v11228_v31, 5  ;;  %7490 = vst.msk [vmem:[#allocation5 + $0x78] sm:$0xff] %vm1526_vm1, %v14001_v52  ;;  %14198 = vmatprep.mubr.msk.bf16.mxu1 %vm1526_vm1, %v14401_v3  ;;  %v14031_v54 = vpop.f32.mrf.mxu0  ;;  %v14403_v25 = vld [vmem:[#allocation3 + $0x60] sm:$0xff]   ;;  %v8209_v35 = vld [vmem:[#allocation5 + $0x40] sm:$0xff] }
 0x38f   : > { %8269 = vst.msk [vmem:[#allocation5 + $0x20] sm:$0xff] %vm1526_vm1, %v8237_v37  ;;  %8272 = vst.msk [vmem:[#allocation5 + $0x38] sm:$0xff] %vm1526_vm1, %v8240_v24  ;;  %v8238_v32 = vadd.f32 %v8206_v40, %v8093_v29  ;;  %v8243_v6 = vadd.f32 %v14030_v44, %v8211_v13  ;;  %v11197_v47 = vsel %vm14632_vm15, %v11192_v0, %v11196_v48  ;;  %v11233_v10 = vshrl.u32 %v11079_v56, 16  ;;  %v7399_v18 = vpop.f32.mrf.mxu1  ;;  %v8212_v5 = vld [vmem:[#allocation5 + $0x58] sm:$0xff] }
 0x390   : > { %v11207_v36 = vsel %vm14632_vm15, %v11202_v39, %v11206_v2  ;;  %v11225_v33 = vor.u32 %v11224_v11, %v11220_v26  ;;  %v11216_v34 = vrot.slane %v11215_v46, 4  ;;  %v11236_v53 = vshll.u32 %v11079_v56, 16  ;;  %7488 = vst.msk [vmem:[#allocation5 + $0x68] sm:$0xff] %vm1526_vm1, %v7399_v18  ;;  %v11085_v2 = vld [vmem:[#allocation3 + $0x6c] sm:$0xf]  ;;  %v8109_v17 = vpop.f32.mrf.mxu0 }
 0x391   : > { %14225 = vmatmul.mubr.msk.bf16.vlgmr.msra.gmra.mxu0 %vm1526_vm1, %v17683_v55  ;;  %v13226_v49 = vcombine.low %v11197_v47, %v11207_v36  ;;  %8270 = vst.msk [vmem:[#allocation5 + $0x28] sm:$0xff] %vm1526_vm1, %v8238_v32  ;;  %8275 = vst.msk [vmem:[#allocation5 + $0x50] sm:$0xff] %vm1526_vm1, %v8243_v6  ;;  %v11242_v21 = vshll.u32 %v11080_v43, 16  ;;  %v11235_v45 = vrot.slane %v11233_v10, 4  ;;  %v11246_v9 = vshrl.u32 %v11080_v43, 16 }
 0x392   : > { %14228 = vmatprep.mubr.msk.bf16.mxu0 %vm1526_vm1, %v13225_v27  ;;  %v11226_v61 = vrot.slane %v11225_v33, 4  ;;  %v11252_v50 = vshll.u32 %v11081_v20, 16  ;;  %v11221_v55 = vsel %vm14632_vm15, %v11216_v34, %v11220_v26  ;;  %v11238_v62 = vrot.slane %v11236_v53, 5  ;;  %v11086_v24 = vld [vmem:[#allocation3 + $0x70] sm:$0xf]  ;;  %v8210_v26 = vld [vmem:[#allocation5 + $0x48] sm:$0xff] }
 0x393   : > { %v11244_v1 = vrot.slane %v11242_v21, 5  ;;  %v11257_v12 = vshrl.u32 %v11082_v60, 16  ;;  %v11248_v30 = vrot.slane %v11246_v9, 4  ;;  %v11260_v23 = vshll.u32 %v11082_v60, 16  ;;  %v14004_v4 = vpop.f32.mrf.mxu1  ;;  %v11087_v13 = vld [vmem:[#allocation3 + $0x74] sm:$0x1] }
 0x394   : > { %v11231_v28 = vsel %vm14632_vm15, %v11226_v61, %v11230_v51  ;;  %v11254_v48 = vrot.slane %v11252_v50, 5  ;;  %v11239_v16 = vor.u32 %v11238_v62, %v11235_v45  ;;  %v11266_v27 = vshll.u32 %v11083_v63, 16  ;;  %7493 = vst.msk [vmem:[#allocation5 + $0x90] sm:$0xff] %vm1526_vm1, %v14004_v4  ;;  %v11088_v47 = vld [vmem:[#allocation3 + $0x78] sm:$0xf]  ;;  %v8215_v21 = vld [vmem:[#allocation5 + $0x70] sm:$0xff] }
 0x395   : > { %v13227_v29 = vcombine.low %v11221_v55, %v11231_v28  ;;  %v11259_v8 = vrot.slane %v11257_v12, 4  ;;  %v11249_v19 = vor.u32 %v11248_v30, %v11244_v1  ;;  %v11262_v3 = vrot.slane %v11260_v23, 5  ;;  %14199 = vmatmul.mubr.msk.bf16.gmra.mxu1 %vm1526_vm1, %v14402_v38  ;;  %v7412_v11 = vpop.f32.mrf.mxu1  ;;  %v11089_v18 = vld [vmem:[#allocation3 + $0x7c] sm:$0xf]  ;;  %v14404_v50 = vld [vmem:[#allocation3 + $0x6c] sm:$0xff]  }
 0x396   : > { %v11270_v57 = vshrl.u32 %v11083_v63, 16  ;;  %v11276_v22 = vshll.u32 %v11084_v58, 16  ;;  %v11240_v14 = vrot.slane %v11239_v16, 4  ;;  %v11268_v42 = vrot.slane %v11266_v27, 5  ;;  %14202 = vmatprep.mubr.msk.bf16.mxu1 %vm1526_vm1, %v14403_v25  ;;  %7491 = vst.msk [vmem:[#allocation5 + $0x80] sm:$0xff] %vm1526_vm1, %v7412_v11  ;;  %v14405_v58 = vld [vmem:[#allocation3 + $0x78] sm:$0xff]  }
 0x397   : > { %v8241_v31 = vadd.f32 %v8209_v35, %v8106_v41  ;;  %v8244_v37 = vadd.f32 %v14031_v54, %v8212_v5  ;;  %v11250_v56 = vrot.slane %v11249_v19, 4  ;;  %v11263_v43 = vor.u32 %v11262_v3, %v11259_v8  ;;  %v14005_v36 = vpop.f32.mrf.mxu1  ;;  %v11090_v62 = vld [vmem:[#allocation3 + $0x80] sm:$0x1]  ;;  %v11091_v27 = vld [vmem:[#allocation3 + $0x84] sm:$0xf]  ;;  %v8216_v5 = vld [vmem:[#allocation5 + $0x78] sm:$0xff] }
 0x398   : > { %v11272_v0 = vrot.slane %v11270_v57, 4  ;;  %v11278_v39 = vrot.slane %v11276_v22, 5  ;;  %v11245_v40 = vsel %vm14632_vm15, %v11240_v14, %v11244_v1  ;;  %v8242_v44 = vadd.f32 %v8210_v26, %v8109_v17  ;;  %7494 = vst.msk [vmem:[#allocation5 + $0x98] sm:$0xff] %vm1526_vm1, %v14005_v36  ;;  %v8213_v22 = vld [vmem:[#allocation5 + $0x60] sm:$0xff] }
 0x399   : > { %14229 = vmatmul.mubr.msk.bf16.gmra.mxu0 %vm1526_vm1, %v13226_v49  ;;  %8273 = vst.msk [vmem:[#allocation5 + $0x40] sm:$0xff] %vm1526_vm1, %v8241_v31  ;;  %8276 = vst.msk [vmem:[#allocation5 + $0x58] sm:$0xff] %vm1526_vm1, %v8244_v37  ;;  %v11281_v52 = vshrl.u32 %v11085_v2, 16  ;;  %v11284_v46 = vshll.u32 %v11085_v2, 16  ;;  %v11255_v51 = vsel %vm14632_vm15, %v11250_v56, %v11254_v48  ;;  %v11264_v32 = vrot.slane %v11263_v43, 4  ;;  %v7415_v9 = vpop.f32.mrf.mxu1 }
 0x39a   : > { %14232 = vmatprep.mubr.msk.bf16.mxu0 %vm1526_vm1, %v13227_v29  ;;  %v11273_v6 = vor.u32 %v11272_v0, %v11268_v42  ;;  %v11290_v20 = vshll.u32 %v11086_v24, 16  ;;  %v13228_v33 = vcombine.low %v11245_v40, %v11255_v51  ;;  %8274 = vst.msk [vmem:[#allocation5 + $0x48] sm:$0xff] %vm1526_vm1, %v8242_v44  ;;  %v11294_v41 = vshrl.u32 %v11086_v24, 16  ;;  %v14034_v53 = vpop.f32.mrf.mxu0  ;;  %7492 = vst.msk [vmem:[#allocation5 + $0x88] sm:$0xff] %vm1526_vm1, %v7415_v9  ;;  %v11092_v2 = vld [vmem:[#allocation3 + $0x88] sm:$0xf] }
 0x39b   : > { %v11283_v10 = vrot.slane %v11281_v52, 4  ;;  %v11286_v60 = vrot.slane %v11284_v46, 5  ;;  %v11269_v49 = vsel %vm14632_vm15, %v11264_v32, %v11268_v42  ;;  %v11300_v45 = vshll.u32 %v11087_v13, 16  ;;  %v8214_v0 = vld [vmem:[#allocation5 + $0x68] sm:$0xff]  ;;  %v11094_v46 = vld [vmem:[#allocation3 + $0x90] sm:$0xf] }
 0x39c   : > { %v11274_v34 = vrot.slane %v11273_v6, 4  ;;  %v11292_v61 = vrot.slane %v11290_v20, 5  ;;  %v8247_v63 = vadd.f32 %v14034_v53, %v8215_v21  ;;  %v11296_v55 = vrot.slane %v11294_v41, 4  ;;  %v8122_v23 = vpop.f32.mrf.mxu0  ;;  %v14407_v53 = vld [vmem:[#allocation3 + $0x90] sm:$0xff]  }
 0x39d   : > { %v11287_v54 = vor.u32 %v11286_v60, %v11283_v10  ;;  %v11305_v1 = vshrl.u32 %v11088_v47, 16  ;;  %v11302_v28 = vrot.slane %v11300_v45, 5  ;;  %v11308_v30 = vshll.u32 %v11088_v47, 16  ;;  %14203 = vmatmul.mubr.msk.bf16.gmra.mxu1 %vm1526_vm1, %v14404_v50  ;;  %v11095_v47 = vld [vmem:[#allocation3 + $0x94] sm:$0xf]  ;;  %v8219_v60 = vld [vmem:[#allocation5 + $0x90] sm:$0xff] }
 0x39e   : > { %v11279_v12 = vsel %vm14632_vm15, %v11274_v34, %v11278_v39  ;;  %v11314_v48 = vshll.u32 %v11089_v18, 16  ;;  %8279 = vst.msk [vmem:[#allocation5 + $0x70] sm:$0xff] %vm1526_vm1, %v8247_v63  ;;  %v11297_v16 = vor.u32 %v11296_v55, %v11292_v61  ;;  %14206 = vmatprep.mubr.msk.bf16.mxu1 %vm1526_vm1, %v14405_v58  ;;  %v11318_v3 = vshrl.u32 %v11089_v18, 16  ;;  %v14035_v35 = vpop.f32.mrf.mxu0  ;;  %v14008_v17 = vpop.f32.mrf.mxu1  ;;  %v11093_v39 = vld [vmem:[#allocation3 + $0x8c] sm:$0x1] }
 0x39f   : > { %v13229_v38 = vcombine.low %v11269_v49, %v11279_v12  ;;  %v11288_v29 = vrot.slane %v11287_v54, 4  ;;  %v11307_v8 = vrot.slane %v11305_v1, 4  ;;  %v11310_v25 = vrot.slane %v11308_v30, 5  ;;  %7497 = vst.msk [vmem:[#allocation5 + $0xb0] sm:$0xff] %vm1526_vm1, %v14008_v17 }
 0x3a0   : > { %v17744_v19 = vrot.slane %v11314_v48, 5  ;;  %v11324_v57 = vshll.u32 %v11090_v62, 16  ;;  %v11298_v14 = vrot.slane %v11297_v16, 4  ;;  %v8245_v42 = vadd.f32 %v8213_v22, %v8122_v23  ;;  %v8125_v43 = vpop.f32.mrf.mxu0  ;;  %v7428_v11 = vpop.f32.mrf.mxu1  ;;  %v11096_v62 = vld [vmem:[#allocation3 + $0x98] sm:$0x1] }
 0x3a1   : > { %14233 = vmatmul.mubr.msk.bf16.gmra.mxu0 %vm1526_vm1, %v13228_v33  ;;  %v11293_v4 = vsel %vm14632_vm15, %v11288_v29, %v11292_v61  ;;  %v8248_v31 = vadd.f32 %v14035_v35, %v8216_v5  ;;  %v11311_v37 = vor.u32 %v11310_v25, %v11307_v8  ;;  %v11320_v24 = vrot.slane %v11318_v3, 4  ;;  %7495 = vst.msk [vmem:[#allocation5 + $0xa0] sm:$0xff] %vm1526_vm1, %v7428_v11  ;;  %v14406_v33 = vld [vmem:[#allocation3 + $0x84] sm:$0xff]   ;;  %v11097_v25 = vld [vmem:[#allocation3 + $0x9c] sm:$0xf]  ;;  %v8220_v35 = vld [vmem:[#allocation5 + $0x98] sm:$0xff] }
 0x3a2   : > { %14236 = vmatprep.mubr.msk.bf16.mxu0 %vm1526_vm1, %v13229_v38  ;;  %v11326_v56 = vrot.slane %v11324_v57, 5  ;;  %v11329_v26 = vshrl.u32 %v11091_v27, 16  ;;  %v11303_v40 = vsel %vm14632_vm15, %v11298_v14, %v11302_v28  ;;  %8277 = vst.msk [vmem:[#allocation5 + $0x60] sm:$0xff] %vm1526_vm1, %v8245_v42  ;;  %v8246_v44 = vadd.f32 %v8214_v0, %v8125_v43  ;;  %v14009_v36 = vpop.f32.mrf.mxu1  ;;  %v11098_v5 = vld [vmem:[#allocation3 + $0xa0] sm:$0xf] }
 0x3a3   : > { %8280 = vst.msk [vmem:[#allocation5 + $0x78] sm:$0xff] %vm1526_vm1, %v8248_v31  ;;  %v11332_v13 = vshll.u32 %v11091_v27, 16  ;;  %v11338_v52 = vshll.u32 %v11092_v2, 16  ;;  %v13230_v51 = vcombine.low %v11293_v4, %v11303_v40  ;;  %v11312_v32 = vrot.slane %v11311_v37, 4  ;;  %v14038_v10 = vpop.f32.mrf.mxu0  ;;  %7498 = vst.msk [vmem:[#allocation5 + $0xb8] sm:$0xff] %vm1526_vm1, %v14009_v36  ;;  %v8217_v27 = vld [vmem:[#allocation5 + $0x80] sm:$0xff] }
 0x3a4   : > { %v11321_v6 = vor.u32 %v11320_v24, %v17744_v19  ;;  %v11331_v20 = vrot.slane %v11329_v26, 4  ;;  %8278 = vst.msk [vmem:[#allocation5 + $0x68] sm:$0xff] %vm1526_vm1, %v8246_v44  ;;  %v11342_v49 = vshrl.u32 %v11092_v2, 16  ;;  %v11348_v34 = vshll.u32 %v11093_v39, 16  ;;  %v7431_v50 = vpop.f32.mrf.mxu1  ;;  %v8218_v24 = vld [vmem:[#allocation5 + $0x88] sm:$0xff] }
 0x3a5   : > { %v11334_v41 = vrot.slane %v11332_v13, 5  ;;  %v17758_v18 = vrot.slane %v11338_v52, 5  ;;  %v11317_v21 = vsel %vm14632_vm15, %v11312_v32, %v17744_v19  ;;  %v8251_v45 = vadd.f32 %v14038_v10, %v8219_v60  ;;  %14207 = vmatmul.mubr.msk.bf16.gmra.mxu1 %vm1526_vm1, %v14406_v33  ;;  %v8138_v58 = vpop.f32.mrf.mxu0  ;;  %7496 = vst.msk [vmem:[#allocation5 + $0xa8] sm:$0xff] %vm1526_vm1, %v7431_v50  ;;  %v11099_v39 = vld [vmem:[#allocation3 + $0xa4] sm:$0x1]  ;;  %v14408_v40 = vld [vmem:[#allocation3 + $0x9c] sm:$0xff]  }
 0x3a6   : > { %v11322_v61 = vrot.slane %v11321_v6, 4  ;;  %v11353_v9 = vshrl.u32 %v11094_v46, 16  ;;  %v11344_v54 = vrot.slane %v11342_v49, 4  ;;  %v11350_v55 = vrot.slane %v11348_v34, 5  ;;  %14210 = vmatprep.mubr.msk.bf16.mxu1 %vm1526_vm1, %v14407_v53  ;;  %v14012_v23 = vpop.f32.mrf.mxu1  ;;  %v14409_v32 = vld [vmem:[#allocation3 + $0xa8] sm:$0xff]  }
 0x3a7   : > { %v11335_v63 = vor.u32 %v11334_v41, %v11331_v20  ;;  %v11356_v1 = vshll.u32 %v11094_v46, 16  ;;  %8283 = vst.msk [vmem:[#allocation5 + $0x90] sm:$0xff] %vm1526_vm1, %v8251_v45  ;;  %v11362_v30 = vshll.u32 %v11095_v47, 16  ;;  %v11366_v48 = vshrl.u32 %v11095_v47, 16  ;;  %v14039_v2 = vpop.f32.mrf.mxu0  ;;  %7501 = vst.msk [vmem:[#allocation5 + $0xd0] sm:$0xff] %vm1526_vm1, %v14012_v23 }
 0x3a8   : > { %v11327_v12 = vsel %vm14632_vm15, %v11322_v61, %v11326_v56  ;;  %v11355_v28 = vrot.slane %v11353_v9, 4  ;;  %v11345_v16 = vor.u32 %v11344_v54, %v17758_v18  ;;  %v11372_v57 = vshll.u32 %v11096_v62, 16  ;;  %v7444_v17 = vpop.f32.mrf.mxu1  ;;  %v11101_v33 = vld [vmem:[#allocation3 + $0xac] sm:$0xf] }
 0x3a9   : > { %14237 = vmatmul.mubr.msk.bf16.gmra.mxu0 %vm1526_vm1, %v13230_v51  ;;  %v13231_v38 = vcombine.low %v11317_v21, %v11327_v12  ;;  %v11336_v29 = vrot.slane %v11335_v63, 4  ;;  %v11358_v8 = vrot.slane %v11356_v1, 5  ;;  %v11364_v19 = vrot.slane %v11362_v30, 5  ;;  %v8141_v37 = vpop.f32.mrf.mxu0  ;;  %7499 = vst.msk [vmem:[#allocation5 + $0xc0] sm:$0xff] %vm1526_vm1, %v7444_v17  ;;  %v11100_v51 = vld [vmem:[#allocation3 + $0xa8] sm:$0xf] }
 0x3aa   : > { %v11368_v3 = vrot.slane %v11366_v48, 4  ;;  %v8249_v22 = vadd.f32 %v8217_v27, %v8138_v58  ;;  %v11346_v14 = vrot.slane %v11345_v16, 4  ;;  %v8252_v31 = vadd.f32 %v14039_v2, %v8220_v35  ;;  %v14013_v11 = vpop.f32.mrf.mxu1  ;;  %v11102_v21 = vld [vmem:[#allocation3 + $0xb0] sm:$0x1]  ;;  %v8223_v63 = vld [vmem:[#allocation5 + $0xb0] sm:$0xff]  ;;  %v8221_v27 = vld [vmem:[#allocation5 + $0xa0] sm:$0xff] }
 0x3ab   : > { %14240 = vmatprep.mubr.msk.bf16.mxu0 %vm1526_vm1, %v13231_v38  ;;  %v11341_v4 = vsel %vm14632_vm15, %v11336_v29, %v17758_v18  ;;  %v11359_v42 = vor.u32 %v11358_v8, %v11355_v28  ;;  %v11374_v43 = vrot.slane %v11372_v57, 5  ;;  %v8250_v0 = vadd.f32 %v8218_v24, %v8141_v37  ;;  %7502 = vst.msk [vmem:[#allocation5 + $0xd8] sm:$0xff] %vm1526_vm1, %v14013_v11  ;;  %v464_v1 = vld [vmem:[#allocation3 + $0xcc] sm:$0x1]  ;;  %v11103_v48 = vld [vmem:[#allocation3 + $0xb4] sm:$0xf] }
 0x3ac   : > { %v11369_v56 = vor.u32 %v11368_v3, %v11364_v19  ;;  %8281 = vst.msk [vmem:[#allocation5 + $0x80] sm:$0xff] %vm1526_vm1, %v8249_v22  ;;  %v11377_v26 = vshrl.u32 %v11097_v25, 16  ;;  %v11351_v44 = vsel %vm14632_vm15, %v11346_v14, %v11350_v55  ;;  %8284 = vst.msk [vmem:[#allocation5 + $0x98] sm:$0xff] %vm1526_vm1, %v8252_v31  ;;  %v11380_v52 = vshll.u32 %v11097_v25, 16  ;;  %v7447_v10 = vpop.f32.mrf.mxu1  ;;  %v11104_v57 = vld [vmem:[#allocation3 + $0xb8] sm:$0xf] }
 0x3ad   : > { %v11360_v13 = vrot.slane %v11359_v42, 4  ;;  %v11386_v46 = vshll.u32 %v11098_v5, 16  ;;  %v13232_v6 = vcombine.low %v11341_v4, %v11351_v44  ;;  %8282 = vst.msk [vmem:[#allocation5 + $0x88] sm:$0xff] %vm1526_vm1, %v8250_v0  ;;  %v11390_v36 = vshrl.u32 %v11098_v5, 16  ;;  %14211 = vmatmul.mubr.msk.bf16.gmra.mxu1 %vm1526_vm1, %v14408_v40  ;;  %7500 = vst.msk [vmem:[#allocation5 + $0xc8] sm:$0xff] %vm1526_vm1, %v7447_v10  ;;  %v14410_v22 = vld [vmem:[#allocation3 + $0xb4] sm:$0xff]  }
 0x3ae   : > { %v11370_v20 = vrot.slane %v11369_v56, 4  ;;  %v11379_v47 = vrot.slane %v11377_v26, 4  ;;  %v11382_v41 = vrot.slane %v11380_v52, 5  ;;  %v11396_v49 = vshll.u32 %v11099_v39, 16  ;;  %14214 = vmatprep.mubr.msk.bf16.mxu1 %vm1526_vm1, %v14409_v32  ;;  %v14411_v35 = vld [vmem:[#allocation3 + $0xc0] sm:$0xff]   ;;  %v8224_v42 = vld [vmem:[#allocation5 + $0xb8] sm:$0xff] }
 0x3af   : > { %v11365_v60 = vsel %vm14632_vm15, %v11360_v13, %v11364_v19  ;;  %v11388_v18 = vrot.slane %v11386_v46, 5  ;;  %v11392_v53 = vrot.slane %v11390_v36, 4  ;;  %v11401_v61 = vshrl.u32 %v11100_v51, 16  ;;  %v11105_v56 = vld [vmem:[#allocation3 + $0xbc] sm:$0x1]  ;;  %v8222_v40 = vld [vmem:[#allocation5 + $0xa8] sm:$0xff] }
 0x3b0   : > { %v11375_v34 = vsel %vm14632_vm15, %v11370_v20, %v11374_v43  ;;  %v11404_v45 = vshll.u32 %v11100_v51, 16  ;;  %v14042_v50 = vpop.f32.mrf.mxu0  ;;  %v11383_v54 = vor.u32 %v11382_v41, %v11379_v47  ;;  %v11398_v55 = vrot.slane %v11396_v49, 5  ;;  %v11854_v0 = vld [vmem:[#allocation3 + $0x18] sm:$0xe]  ;;  %v11855_v52 = vld [vmem:[#allocation3 + $0x1c] sm:$0xf] }
 0x3b1   : > { %14241 = vmatmul.mubr.msk.bf16.gmra.mxu0 %vm1526_vm1, %v13232_v6  ;;  %v13233_v9 = vcombine.low %v11365_v60, %v11375_v34  ;;  %v11410_v62 = vshll.u32 %v11101_v33, 16  ;;  %v8255_v58 = vadd.f32 %v14042_v50, %v8223_v63  ;;  %v11393_v12 = vor.u32 %v11392_v53, %v11388_v18  ;;  %v11856_v20 = vld [vmem:[#allocation3 + $0x20] sm:$0x1]  ;;  %v8227_v10 = vld [vmem:[#allocation5 + $0xd0] sm:$0xff] }
 0x3b2   : > { %v11403_v28 = vrot.slane %v11401_v61, 4  ;;  %v11406_v30 = vrot.slane %v11404_v45, 5  ;;  %v11384_v23 = vrot.slane %v11383_v54, 4  ;;  %v11414_v29 = vshrl.u32 %v11101_v33, 16  ;;  %v8154_v8 = vpop.f32.mrf.mxu0  ;;  %v11106_v47 = vld [vmem:[#allocation3 + $0xc0] sm:$0xf] }
 0x3b3   : > { %14244 = vmatprep.mubr.msk.bf16.mxu0 %vm1526_vm1, %v13233_v9  ;;  %v17793_v38 = vrot.slane %v11410_v62, 5  ;;  %v11420_v16 = vshll.u32 %v11102_v21, 16  ;;  %8287 = vst.msk [vmem:[#allocation5 + $0xb0] sm:$0xff] %vm1526_vm1, %v8255_v58  ;;  %v11394_v2 = vrot.slane %v11393_v12, 4  ;;  %v8253_v19 = vadd.f32 %v8221_v27, %v8154_v8  ;;  %v11107_v61 = vld [vmem:[#allocation3 + $0xc4] sm:$0xf] }
 0x3b4   : > { %v11407_v25 = vor.u32 %v11406_v30, %v11403_v28  ;;  %v465_v3 = vsel %vm14519_vm7, 0, %v464_v1  ;;  %v11389_v5 = vsel %vm14632_vm15, %v11384_v23, %v11388_v18  ;;  %v11416_v17 = vrot.slane %v11414_v29, 4  ;;  %v14043_v14 = vpop.f32.mrf.mxu0  ;;  %v11108_v63 = vld [vmem:[#allocation3 + $0xc8] sm:$0x1] }
 0x3b5   : > { %v11422_v4 = vrot.slane %v11420_v16, 5  ;;  %466 = vst [vmem:[#allocation3 + $0xcc] sm:$0x1] %v465_v3  ;;  %v11425_v31 = vshrl.u32 %v11103_v48, 16  ;;  %v11399_v37 = vsel %vm14632_vm15, %v11394_v2, %v11398_v55  ;;  %8285 = vst.msk [vmem:[#allocation5 + $0xa0] sm:$0xff] %vm1526_vm1, %v8253_v19  ;;  %v8256_v7 = vadd.f32 %v14043_v14, %v8224_v42  ;;  %14215 = vmatmul.mubr.msk.bf16.gmra.mxu1 %vm1526_vm1, %v14410_v22  ;;  %v8225_v3 = vld [vmem:[#allocation5 + $0xc0] sm:$0xff] }
 0x3b6   : > { %v11408_v24 = vrot.slane %v11407_v25, 4  ;;  %v11428_v43 = vshll.u32 %v11103_v48, 16  ;;  %v13234_v39 = vcombine.low %v11389_v5, %v11399_v37  ;;  %v11417_v26 = vor.u32 %v11416_v17, %v17793_v38  ;;  %v8157_v11 = vpop.f32.mrf.mxu0  ;;  %14218 = vmatprep.mubr.msk.bf16.mxu1 %vm1526_vm1, %v14411_v35  ;;  %v11857_v16 = vld [vmem:[#allocation3 + $0x24] sm:$0xe]  ;;  %v11858_v8 = vld [vmem:[#allocation3 + $0x28] sm:$0xf] }
 0x3b7   : > { %v11427_v44 = vrot.slane %v11425_v31, 4  ;;  %v11434_v13 = vshll.u32 %v11104_v57, 16  ;;  %8288 = vst.msk [vmem:[#allocation5 + $0xb8] sm:$0xff] %vm1526_vm1, %v8256_v7  ;;  %v8254_v51 = vadd.f32 %v8222_v40, %v8157_v11  ;;  %v11438_v6 = vshrl.u32 %v11104_v57, 16  ;;  %v11859_v57 = vld [vmem:[#allocation3 + $0x2c] sm:$0x1] }
 0x3b8   : > { %v11413_v46 = vsel %vm14632_vm15, %v11408_v24, %v17793_v38  ;;  %v11430_v32 = vrot.slane %v11428_v43, 5  ;;  %v11418_v36 = vrot.slane %v11417_v26, 4  ;;  %v14046_v33 = vpop.f32.mrf.mxu0  ;;  %v11444_v41 = vshll.u32 %v11105_v56, 16  ;;  %v11860_v42 = vld [vmem:[#allocation3 + $0x30] sm:$0xe] }
 0x3b9   : > { %14245 = vmatmul.mubr.msk.bf16.gmra.mxu0 %vm1526_vm1, %v13234_v39  ;;  %v11436_v60 = vrot.slane %v11434_v13, 5  ;;  %v13255_v18 = vrot.slane %v11854_v0, 9  ;;  %8286 = vst.msk [vmem:[#allocation5 + $0xa8] sm:$0xff] %vm1526_vm1, %v8254_v51  ;;  %v8259_v49 = vadd.f32 %v14046_v33, %v8227_v10  ;;  %v11440_v53 = vrot.slane %v11438_v6, 4  ;;  %v11861_v31 = vld [vmem:[#allocation3 + $0x34] sm:$0xf] }
 0x3ba   : > { %v11431_v34 = vor.u32 %v11430_v32, %v11427_v44  ;;  %v11952_v21 = vrot.slane %v11855_v52, 5  ;;  %v11423_v45 = vsel %vm14632_vm15, %v11418_v36, %v11422_v4  ;;  %v11446_v9 = vrot.slane %v11444_v41, 5  ;;  %v8170_v55 = vpop.f32.mrf.mxu0  ;;  %v8228_v43 = vld [vmem:[#allocation5 + $0xd8] sm:$0xff]  ;;  %v8226_v0 = vld [vmem:[#allocation5 + $0xc8] sm:$0xff]  ;;  %v11862_v39 = vld [vmem:[#allocation3 + $0x38] sm:$0x1] }
 0x3bb   : > { %v11955_v50 = vrot.slane %v11856_v20, 5  ;;  %v11449_v54 = vshrl.u32 %v11106_v47, 16  ;;  %v13235_v62 = vcombine.low %v11413_v46, %v11423_v45  ;;  %8291 = vst.msk [vmem:[#allocation5 + $0xd0] sm:$0xff] %vm1526_vm1, %v8259_v49  ;;  %v11441_v12 = vor.u32 %v11440_v53, %v11436_v60  ;;  %v519_v52 = vld [vmem:[#allocation3 + $0xd4] sm:$0x1] }
 0x3bc   : > { %v14412_v1 = vld [vmem:[#allocation3 + $0xcc] sm:$0xff]   ;;  %v11432_v58 = vrot.slane %v11431_v34, 4  ;;  %v11953_v28 = vsel %vm15123_vm10, %v13255_v18, %v11952_v21  ;;  %v11954_v30 = vrot.slane %v11952_v21, 4  ;;  %v11452_v23 = vshll.u32 %v11106_v47, 16  ;;  %v14047_v29 = vpop.f32.mrf.mxu0 }
 0x3bd   : > { %v11451_v48 = vrot.slane %v11449_v54, 4  ;;  %v11458_v38 = vshll.u32 %v11107_v61, 16  ;;  %14248 = vmatprep.mubr.msk.bf16.mxu0 %vm1526_vm1, %v13235_v62  ;;  %v11442_v2 = vrot.slane %v11441_v12, 4  ;;  %v11462_v25 = vshrl.u32 %v11107_v61, 16  ;;  %v14016_v22 = vpop.f32.mrf.mxu1  ;;  %14219 = vmatmul.mubr.msk.bf16.gmra.mxu1 %vm1526_vm1, %v14412_v1  ;;  %v11109_v20 = vld [vmem:[#allocation3 + $0xcc] sm:$0xf] }
 0x3be   : > { %v11437_v27 = vsel %vm14632_vm15, %v11432_v58, %v11436_v60  ;;  %v11468_v19 = vshll.u32 %v11108_v63, 16  ;;  %v11956_v35 = vsel %vm15123_vm10, %v11954_v30, %v11955_v50  ;;  %v11454_v5 = vrot.slane %v11452_v23, 5  ;;  %v8173_v14 = vpop.f32.mrf.mxu0  ;;  %7505 = vst.msk [vmem:[#allocation5 + $0xf0] sm:$0xff] %vm1526_vm1, %v14016_v22  ;;  %v11110_v41 = vld [vmem:[#allocation3 + $0xd0] sm:$0xf]  ;;  %v8769_v30 = vld [vmem:[#allocation5 + $0x10] sm:$0xff] }
 0x3bf   : > { %v11460_v17 = vrot.slane %v11458_v38, 5  ;;  %v8257_v4 = vadd.f32 %v8225_v3, %v8170_v55  ;;  %v11447_v37 = vsel %vm14632_vm15, %v11442_v2, %v11446_v9  ;;  %v13272_v24 = vcombine.low %v11953_v28, %v11956_v35  ;;  %v7460_v11 = vpop.f32.mrf.mxu1  ;;  %v11864_v58 = vld [vmem:[#allocation3 + $0x40] sm:$0xf]  ;;  %v8767_v35 = vld [vmem:[#allocation5] sm:$0xff] }
 0x3c0   : > { %v11464_v7 = vrot.slane %v11462_v25, 4  ;;  %v11470_v56 = vrot.slane %v11468_v19, 5  ;;  %v13236_v26 = vcombine.low %v11437_v27, %v11447_v37  ;;  %v11455_v40 = vor.u32 %v11454_v5, %v11451_v48  ;;  %7503 = vst.msk [vmem:[#allocation5 + $0xe0] sm:$0xff] %vm1526_vm1, %v7460_v11  ;;  %v17848_v25 = vld [vmem:[#allocation3 + $0x48] sm:$0xe] }
 0x3c1   : > { %8289 = vst.msk [vmem:[#allocation5 + $0xc0] sm:$0xff] %vm1526_vm1, %v8257_v4  ;;  %v8260_v44 = vadd.f32 %v14047_v29, %v8228_v43  ;;  %v8258_v13 = vadd.f32 %v8226_v0, %v8173_v14  ;;  %14258 = vmatprep.mubr.msk.bf16.mxu1 %vm1526_vm1, %v13272_v24  ;;  %v13256_v51 = vrot.slane %v11857_v16, 9  ;;  %v11959_v32 = vrot.slane %v11858_v8, 5  ;;  %v14017_v36 = vpop.f32.mrf.mxu1  ;;  %v11863_v29 = vld [vmem:[#allocation3 + $0x3c] sm:$0xe] }
 0x3c2   : > { %v11465_v46 = vor.u32 %v11464_v7, %v11460_v17  ;;  %v11962_v6 = vrot.slane %v11859_v57, 5  ;;  %14249 = vmatmul.mubr.msk.bf16.gmra.mxu0 %vm1526_vm1, %v13236_v26  ;;  %v11456_v47 = vrot.slane %v11455_v40, 4  ;;  %v13257_v33 = vrot.slane %v11860_v42, 9  ;;  %7506 = vst.msk [vmem:[#allocation5 + $0xf8] sm:$0xff] %vm1526_vm1, %v14017_v36  ;;  %v11865_v16 = vld [vmem:[#allocation3 + $0x44] sm:$0x1] }
 0x3c3   : > { %8292 = vst.msk [vmem:[#allocation5 + $0xd8] sm:$0xff] %vm1526_vm1, %v8260_v44  ;;  %8290 = vst.msk [vmem:[#allocation5 + $0xc8] sm:$0xff] %vm1526_vm1, %v8258_v13  ;;  %v11966_v10 = vrot.slane %v11861_v31, 5  ;;  %v11969_v60 = vrot.slane %v11862_v39, 5  ;;  %v11960_v49 = vsel %vm15123_vm10, %v13256_v51, %v11959_v32  ;;  %v11961_v34 = vrot.slane %v11959_v32, 4  ;;  %v7463_v45 = vpop.f32.mrf.mxu1  ;;  %v8770_v39 = vld [vmem:[#allocation5 + $0x18] sm:$0xff] }
 0x3c4   : > { %v11466_v18 = vrot.slane %v11465_v46, 4  ;;  %v520_v21 = vsel %vm16312_vm8, 0, %v519_v52  ;;  %v11461_v61 = vsel %vm14632_vm15, %v11456_v47, %v11460_v17  ;;  %v11473_v63 = vshrl.u32 %v11109_v20, 16  ;;  %7504 = vst.msk [vmem:[#allocation5 + $0xe8] sm:$0xff] %vm1526_vm1, %v7463_v45  ;;  %v17850_v19 = vld [vmem:[#allocation3 + $0x4c] sm:$0xf] }
 0x3c5   : > { %v11967_v9 = vsel %vm15123_vm10, %v13257_v33, %v11966_v10  ;;  %v11968_v50 = vrot.slane %v11966_v10, 4  ;;  %521 = vst [vmem:[#allocation3 + $0xd4] sm:$0x1] %v520_v21  ;;  %v11963_v55 = vsel %vm15123_vm10, %v11961_v34, %v11962_v6  ;;  %v11476_v62 = vshll.u32 %v11109_v20, 16  ;;  %v14056_v28 = vpop.f32.mrf.mxu1  ;;  %v8231_v57 = vld [vmem:[#allocation5 + $0xf0] sm:$0xff]  ;;  %v8768_v33 = vld [vmem:[#allocation5 + $0x8] sm:$0xff] }
 0x3c6   : > { %v11471_v54 = vsel %vm14632_vm15, %v11466_v18, %v11470_v56  ;;  %v11482_v1 = vshll.u32 %v11110_v41, 16  ;;  %v13273_v48 = vcombine.low %v11960_v49, %v11963_v55  ;;  %v11475_v38 = vrot.slane %v11473_v63, 4  ;;  %v11868_v24 = vld [vmem:[#allocation3 + $0x50] sm:$0x1]  ;;  %v17874_v21 = vld [vmem:[#allocation3 + $0x64] sm:$0xf] }
 0x3c7   : > { %v13237_v12 = vcombine.low %v11461_v61, %v11471_v54  ;;  %v11970_v23 = vsel %vm15123_vm10, %v11968_v50, %v11969_v60  ;;  %v8801_v8 = vadd.f32 %v14056_v28, %v8769_v30  ;;  %v11478_v2 = vrot.slane %v11476_v62, 5  ;;  %v8640_v22 = vpop.f32.mrf.mxu1  ;;  %v8229_v43 = vld [vmem:[#allocation5 + $0xe0] sm:$0xff]  ;;  %v8773_v54 = vld [vmem:[#allocation5 + $0x30] sm:$0xff] }
 0x3c8   : > { %v13274_v27 = vcombine.low %v11967_v9, %v11970_v23  ;;  %14259 = vmatmul.mubr.msk.bf16.vlgmr.msra.gmra.mxu1 %vm1526_vm1, %v13273_v48  ;;  %v17854_v5 = vrot.slane %v11482_v1, 5  ;;  %v11486_v17 = vshrl.u32 %v11110_v41, 16  ;;  %v11973_v4 = vrot.slane %v11864_v58, 5  ;;  %v17867_v41 = vld [vmem:[#allocation3 + $0x58] sm:$0xf] }
 0x3c9   : > { %14252 = vmatprep.mubr.msk.bf16.mxu0 %vm1526_vm1, %v13237_v12  ;;  %v14050_v3 = vpop.f32.mrf.mxu0  ;;  %8833 = vst.msk [vmem:[#allocation5 + $0x10] sm:$0xff] %vm1526_vm1, %v8801_v8  ;;  %v8799_v42 = vadd.f32 %v8767_v35, %v8640_v22  ;;  %v11479_v31 = vor.u32 %v11478_v2, %v11475_v38  ;;  %v13258_v37 = vrot.slane %v11863_v29, 9  ;;  %v14057_v0 = vpop.f32.mrf.mxu1  ;;  %v11976_v11 = vrot.slane %v11865_v16, 5  ;;  %v8232_v47 = vld [vmem:[#allocation5 + $0xf8] sm:$0xff]  ;;  %v11871_v28 = vld [vmem:[#allocation3 + $0x5c] sm:$0x1] }
 0x3ca   : > { %v8263_v14 = vadd.f32 %v14050_v3, %v8231_v57  ;;  %14262 = vmatprep.mubr.msk.bf16.mxu1 %vm1526_vm1, %v13274_v27  ;;  %v11488_v7 = vrot.slane %v11486_v17, 4  ;;  %v11975_v26 = vrot.slane %v11973_v4, 4  ;;  %v11980_v40 = vrot.slane %v17850_v19, 5  ;;  %v11869_v12 = vld [vmem:[#allocation3 + $0x54] sm:$0xe]  ;;  %v8771_v27 = vld [vmem:[#allocation5 + $0x20] sm:$0xff] }
 0x3cb   : > { %v8186_v56 = vpop.f32.mrf.mxu0  ;;  %8831 = vst.msk [vmem:[#allocation5] sm:$0xff] %vm1526_vm1, %v8799_v42  ;;  %v11480_v13 = vrot.slane %v11479_v31, 4  ;;  %v8802_v46 = vadd.f32 %v14057_v0, %v8770_v39  ;;  %v13259_v51 = vrot.slane %v17848_v25, 9  ;;  %v8643_v36 = vpop.f32.mrf.mxu1  ;;  %v11974_v10 = vsel %vm15123_vm10, %v13258_v37, %v11973_v4  ;;  %v8230_v50 = vld [vmem:[#allocation5 + $0xe8] sm:$0xff]  ;;  %v11874_v2 = vld [vmem:[#allocation3 + $0x68] sm:$0x1] }
 0x3cc   : > { %8295 = vst.msk [vmem:[#allocation5 + $0xf0] sm:$0xff] %vm1526_vm1, %v8263_v14  ;;  %v11111_v44 = vld [vmem:[#allocation3 + $0xd4] sm:$0x1]  ;;  %v8261_v52 = vadd.f32 %v8229_v43, %v8186_v56  ;;  %v11489_v32 = vor.u32 %v11488_v7, %v17854_v5  ;;  %v11977_v60 = vsel %vm15123_vm10, %v11975_v26, %v11976_v11  ;;  %v8800_v34 = vadd.f32 %v8768_v33, %v8643_v36  ;;  %v11872_v22 = vld [vmem:[#allocation3 + $0x60] sm:$0xe]  ;;  %v8777_v33 = vld [vmem:[#allocation5 + $0x50] sm:$0xff] }
 0x3cd   : > { %v11492_v6 = vshll.u32 %v11111_v44, 16  ;;  %v14051_v20 = vpop.f32.mrf.mxu0  ;;  %v11485_v18 = vsel %vm14632_vm15, %v11480_v13, %v17854_v5  ;;  %8834 = vst.msk [vmem:[#allocation5 + $0x18] sm:$0xff] %vm1526_vm1, %v8802_v46  ;;  %v11983_v53 = vrot.slane %v11868_v24, 5  ;;  %v14060_v63 = vpop.f32.mrf.mxu1  ;;  %v13275_v55 = vcombine.low %v11974_v10, %v11977_v60  ;;  %v17889_v35 = vld [vmem:[#allocation3 + $0x70] sm:$0xf] }
 0x3ce   : > { %8293 = vst.msk [vmem:[#allocation5 + $0xe0] sm:$0xff] %vm1526_vm1, %v8261_v52  ;;  %v8264_v49 = vadd.f32 %v14051_v20, %v8232_v47  ;;  %v11490_v61 = vrot.slane %v11489_v32, 4  ;;  %v11982_v62 = vrot.slane %v11980_v40, 4  ;;  %8832 = vst.msk [vmem:[#allocation5 + $0x8] sm:$0xff] %vm1526_vm1, %v8800_v34  ;;  %v8805_v58 = vadd.f32 %v14060_v63, %v8773_v54  ;;  %v8774_v14 = vld [vmem:[#allocation5 + $0x38] sm:$0xff]  ;;  %v8775_v54 = vld [vmem:[#allocation5 + $0x40] sm:$0xff] }
 0x3cf   : > { %v11494_v45 = vrot.slane %v11492_v6, 5  ;;  %v8189_v9 = vpop.f32.mrf.mxu0  ;;  %v11987_v30 = vrot.slane %v17867_v41, 5  ;;  %v11981_v29 = vsel %vm15123_vm10, %v13259_v51, %v11980_v40  ;;  %v8656_v8 = vpop.f32.mrf.mxu1  ;;  %v11994_v25 = vrot.slane %v17874_v21, 5  ;;  %v17895_v0 = vld [vmem:[#allocation3 + $0x7c] sm:$0xf]  ;;  %v8772_v40 = vld [vmem:[#allocation5 + $0x28] sm:$0xff] }
 0x3d0   : > { %8296 = vst.msk [vmem:[#allocation5 + $0xf8] sm:$0xff] %vm1526_vm1, %v8264_v49  ;;  %v8262_v1 = vadd.f32 %v8230_v50, %v8189_v9  ;;  %14263 = vmatmul.mubr.msk.bf16.gmra.mxu1 %vm1526_vm1, %v13275_v55  ;;  %v9191_v38 = vld [vmem:[#allocation5 + $0x10] sm:$0xff]  ;;  %v11984_v16 = vsel %vm15123_vm10, %v11982_v62, %v11983_v53  ;;  %8837 = vst.msk [vmem:[#allocation5 + $0x30] sm:$0xff] %vm1526_vm1, %v8805_v58  ;;  %v8803_v57 = vadd.f32 %v8771_v27, %v8656_v8  ;;  %v11877_v41 = vld [vmem:[#allocation3 + $0x74] sm:$0x1] }
 0x3d1   : > { %v11495_v48 = vsel %vm14632_vm15, %v11490_v61, %v11494_v45  ;;  %v14090_v23 = vpop.f32.mrf.mxu0  ;;  %v13276_v3 = vcombine.low %v11981_v29, %v11984_v16  ;;  %v14061_v4 = vpop.f32.mrf.mxu1  ;;  %v11989_v42 = vrot.slane %v11987_v30, 4  ;;  %v11990_v31 = vrot.slane %v11871_v28, 5  ;;  %v11875_v21 = vld [vmem:[#allocation3 + $0x6c] sm:$0xe]  ;;  %v11880_v45 = vld [vmem:[#allocation3 + $0x80] sm:$0x1] }
 0x3d2   : > { %v13238_v19 = vcombine.low %v11485_v18, %v11495_v48  ;;  %8294 = vst.msk [vmem:[#allocation5 + $0xe8] sm:$0xff] %vm1526_vm1, %v8262_v1  ;;  %v9223_v59 = vadd.f32 %v14090_v23, %v9191_v38  ;;  %v9189_v17 = vld [vmem:[#allocation5] sm:$0xff]  ;;  %v11996_v37 = vrot.slane %v11994_v25, 4  ;;  %8835 = vst.msk [vmem:[#allocation5 + $0x20] sm:$0xff] %vm1526_vm1, %v8803_v57  ;;  %v8806_v7 = vadd.f32 %v14061_v4, %v8774_v14  ;;  %v17912_v62 = vld [vmem:[#allocation3 + $0x88] sm:$0xf] }
 0x3d3   : > { %v9062_v5 = vpop.f32.mrf.mxu0  ;;  %14266 = vmatprep.mubr.msk.bf16.mxu1 %vm1526_vm1, %v13276_v3  ;;  %v13260_v56 = vrot.slane %v11869_v12, 9  ;;  %v11997_v43 = vrot.slane %v11874_v2, 5  ;;  %v8659_v11 = vpop.f32.mrf.mxu1  ;;  %v11991_v44 = vsel %vm15123_vm10, %v11989_v42, %v11990_v31  ;;  %v13261_v13 = vrot.slane %v11872_v22, 9  ;;  %v11878_v28 = vld [vmem:[#allocation3 + $0x78] sm:$0xe]  ;;  %v8778_v29 = vld [vmem:[#allocation5 + $0x58] sm:$0xff] }
 0x3d4   : > { %14253 = vmatmul.mubr.msk.bf16.gmra.mxu0 %vm1526_vm1, %v13238_v19  ;;  %9255 = vst.msk [vmem:[#allocation5 + $0x10] sm:$0xff] %vm1526_vm1, %v9223_v59  ;;  %v9221_v24 = vadd.f32 %v9189_v17, %v9062_v5  ;;  %v9192_v26 = vld [vmem:[#allocation5 + $0x18] sm:$0xff]  ;;  %v12001_v52 = vrot.slane %v17889_v35, 5  ;;  %8838 = vst.msk [vmem:[#allocation5 + $0x38] sm:$0xff] %vm1526_vm1, %v8806_v7  ;;  %v8804_v51 = vadd.f32 %v8772_v40, %v8659_v11  ;;  %v12008_v18 = vrot.slane %v17895_v0, 5  ;;  %v8776_v22 = vld [vmem:[#allocation5 + $0x48] sm:$0xff] }
 0x3d5   : > { %v14091_v39 = vpop.f32.mrf.mxu0  ;;  %v11988_v32 = vsel %vm15123_vm10, %v13260_v56, %v11987_v30  ;;  %v11998_v6 = vsel %vm15123_vm10, %v11996_v37, %v11997_v43  ;;  %v9190_v47 = vld [vmem:[#allocation5 + $0x8] sm:$0xff]  ;;  %v14064_v36 = vpop.f32.mrf.mxu1  ;;  %v11995_v60 = vsel %vm15123_vm10, %v13261_v13, %v11994_v25  ;;  %v12004_v12 = vrot.slane %v11877_v41, 5  ;;  %v17917_v30 = vld [vmem:[#allocation3 + $0x94] sm:$0xf]  ;;  %v8781_v7 = vld [vmem:[#allocation5 + $0x70] sm:$0xff] }
 0x3d6   : > { %9253 = vst.msk [vmem:[#allocation5] sm:$0xff] %vm1526_vm1, %v9221_v24  ;;  %v9224_v46 = vadd.f32 %v14091_v39, %v9192_v26  ;;  %v13277_v10 = vcombine.low %v11988_v32, %v11991_v44  ;;  %8836 = vst.msk [vmem:[#allocation5 + $0x28] sm:$0xff] %vm1526_vm1, %v8804_v51  ;;  %v8809_v34 = vadd.f32 %v14064_v36, %v8777_v33  ;;  %v12003_v61 = vrot.slane %v12001_v52, 4  ;;  %v11883_v0 = vld [vmem:[#allocation3 + $0x8c] sm:$0x1]  ;;  %v8779_v32 = vld [vmem:[#allocation5 + $0x60] sm:$0xff] }
 0x3d7   : > { %v9065_v20 = vpop.f32.mrf.mxu0  ;;  %v13278_v53 = vcombine.low %v11995_v60, %v11998_v6  ;;  %v9195_v50 = vld [vmem:[#allocation5 + $0x30] sm:$0xff]  ;;  %v8672_v63 = vpop.f32.mrf.mxu1  ;;  %v12010_v55 = vrot.slane %v12008_v18, 4  ;;  %v13262_v16 = vrot.slane %v11875_v21, 9  ;;  %v12011_v8 = vrot.slane %v11880_v45, 5  ;;  %v11881_v40 = vld [vmem:[#allocation3 + $0x84] sm:$0xe] }
 0x3d8   : > { %9256 = vst.msk [vmem:[#allocation5 + $0x18] sm:$0xff] %vm1526_vm1, %v9224_v46  ;;  %v9222_v49 = vadd.f32 %v9190_v47, %v9065_v20  ;;  %14267 = vmatmul.mubr.msk.bf16.gmra.mxu1 %vm1526_vm1, %v13277_v10  ;;  %8841 = vst.msk [vmem:[#allocation5 + $0x50] sm:$0xff] %vm1526_vm1, %v8809_v34  ;;  %v8807_v58 = vadd.f32 %v8775_v54, %v8672_v63  ;;  %v12005_v25 = vsel %vm15123_vm10, %v12003_v61, %v12004_v12  ;;  %v11886_v13 = vld [vmem:[#allocation3 + $0x98] sm:$0x1]  ;;  %v17940_v20 = vld [vmem:[#allocation3 + $0xa0] sm:$0xf] }
 0x3d9   : > { %v14094_v9 = vpop.f32.mrf.mxu0  ;;  %14270 = vmatprep.mubr.msk.bf16.mxu1 %vm1526_vm1, %v13278_v53  ;;  %v9193_v23 = vld [vmem:[#allocation5 + $0x20] sm:$0xff]  ;;  %v14065_v38 = vpop.f32.mrf.mxu1  ;;  %v12015_v19 = vrot.slane %v17912_v62, 5  ;;  %v13263_v35 = vrot.slane %v11878_v28, 9  ;;  %v12012_v5 = vsel %vm15123_vm10, %v12010_v55, %v12011_v8  ;;  %v12022_v17 = vrot.slane %v17917_v30, 5  ;;  %v11884_v10 = vld [vmem:[#allocation3 + $0x90] sm:$0xe] }
 0x3da   : > { %9254 = vst.msk [vmem:[#allocation5 + $0x8] sm:$0xff] %vm1526_vm1, %v9222_v49  ;;  %v9227_v1 = vadd.f32 %v14094_v9, %v9195_v50  ;;  %8839 = vst.msk [vmem:[#allocation5 + $0x40] sm:$0xff] %vm1526_vm1, %v8807_v58  ;;  %v8810_v2 = vadd.f32 %v14065_v38, %v8778_v29  ;;  %v12002_v42 = vsel %vm15123_vm10, %v13262_v16, %v12001_v52  ;;  %v12018_v33 = vrot.slane %v11883_v0, 5  ;;  %v17945_v60 = vld [vmem:[#allocation3 + $0xac] sm:$0xf]  ;;  %v8782_v34 = vld [vmem:[#allocation5 + $0x78] sm:$0xff] }
 0x3db   : > { %v9078_v48 = vpop.f32.mrf.mxu0  ;;  %v9196_v3 = vld [vmem:[#allocation5 + $0x38] sm:$0xff]  ;;  %v8675_v57 = vpop.f32.mrf.mxu1  ;;  %v13279_v56 = vcombine.low %v12002_v42, %v12005_v25  ;;  %v12009_v43 = vsel %vm15123_vm10, %v13263_v35, %v12008_v18  ;;  %v12017_v44 = vrot.slane %v12015_v19, 4  ;;  %v12024_v6 = vrot.slane %v12022_v17, 4  ;;  %v17972_v42 = vld [vmem:[#allocation3 + $0xb8] sm:$0xf] }
 0x3dc   : > { %9259 = vst.msk [vmem:[#allocation5 + $0x30] sm:$0xff] %vm1526_vm1, %v9227_v1  ;;  %v9225_v27 = vadd.f32 %v9193_v23, %v9078_v48  ;;  %8842 = vst.msk [vmem:[#allocation5 + $0x58] sm:$0xff] %vm1526_vm1, %v8810_v2  ;;  %v8808_v14 = vadd.f32 %v8776_v22, %v8675_v57  ;;  %v13280_v11 = vcombine.low %v12009_v43, %v12012_v5  ;;  %v13264_v53 = vrot.slane %v11881_v40, 9  ;;  %v8780_v1 = vld [vmem:[#allocation5 + $0x68] sm:$0xff]  ;;  %v11887_v22 = vld [vmem:[#allocation3 + $0x9c] sm:$0xe] }
 0x3dd   : > { %v14095_v59 = vpop.f32.mrf.mxu0  ;;  %v9194_v37 = vld [vmem:[#allocation5 + $0x28] sm:$0xff]  ;;  %v14068_v24 = vpop.f32.mrf.mxu1  ;;  %v12025_v21 = vrot.slane %v11886_v13, 5  ;;  %v12019_v9 = vsel %vm15123_vm10, %v12017_v44, %v12018_v33  ;;  %v12029_v50 = vrot.slane %v17940_v20, 5  ;;  %v13265_v58 = vrot.slane %v11884_v10, 9  ;;  %v11892_v35 = vld [vmem:[#allocation3 + $0xb0] sm:$0x1] }
 0x3de   : > { %9257 = vst.msk [vmem:[#allocation5 + $0x20] sm:$0xff] %vm1526_vm1, %v9225_v27  ;;  %v9228_v4 = vadd.f32 %v14095_v59, %v9196_v3  ;;  %8840 = vst.msk [vmem:[#allocation5 + $0x48] sm:$0xff] %vm1526_vm1, %v8808_v14  ;;  %v8813_v26 = vadd.f32 %v14068_v24, %v8781_v7  ;;  %v12036_v28 = vrot.slane %v17945_v60, 5  ;;  %v12016_v38 = vsel %vm15123_vm10, %v13264_v53, %v12015_v19  ;;  %v8785_v27 = vld [vmem:[#allocation5 + $0x90] sm:$0xff]  ;;  %v11889_v59 = vld [vmem:[#allocation3 + $0xa4] sm:$0x1] }
 0x3df   : > { %v9081_v31 = vpop.f32.mrf.mxu0  ;;  %v9199_v46 = vld [vmem:[#allocation5 + $0x50] sm:$0xff]  ;;  %v8688_v51 = vpop.f32.mrf.mxu1  ;;  %v12026_v12 = vsel %vm15123_vm10, %v12024_v6, %v12025_v21  ;;  %v13281_v2 = vcombine.low %v12016_v38, %v12019_v9  ;;  %v12023_v25 = vsel %vm15123_vm10, %v13265_v58, %v12022_v17  ;;  %v12031_v19 = vrot.slane %v12029_v50, 4  ;;  %v8783_v14 = vld [vmem:[#allocation5 + $0x80] sm:$0xff] }
 0x3e0   : > { %9260 = vst.msk [vmem:[#allocation5 + $0x38] sm:$0xff] %vm1526_vm1, %v9228_v4  ;;  %v9226_v39 = vadd.f32 %v9194_v37, %v9081_v31  ;;  %14271 = vmatmul.mubr.msk.bf16.gmra.mxu1 %vm1526_vm1, %v13279_v56  ;;  %8845 = vst.msk [vmem:[#allocation5 + $0x70] sm:$0xff] %vm1526_vm1, %v8813_v26  ;;  %v8811_v36 = vadd.f32 %v8779_v32, %v8688_v51  ;;  %v13282_v57 = vcombine.low %v12023_v25, %v12026_v12  ;;  %v11890_v7 = vld [vmem:[#allocation3 + $0xa8] sm:$0xe]  ;;  %v17977_v56 = vld [vmem:[#allocation3 + $0xc4] sm:$0xf] }
 0x3e1   : > { %v14098_v52 = vpop.f32.mrf.mxu0  ;;  %14274 = vmatprep.mubr.msk.bf16.mxu1 %vm1526_vm1, %v13280_v11  ;;  %v9197_v18 = vld [vmem:[#allocation5 + $0x40] sm:$0xff]  ;;  %v14069_v49 = vpop.f32.mrf.mxu1  ;;  %v12038_v17 = vrot.slane %v12036_v28, 4  ;;  %v12032_v24 = vrot.slane %v11889_v59, 5  ;;  %v8786_v26 = vld [vmem:[#allocation5 + $0x98] sm:$0xff]  ;;  %v13266_v11 = vrot.slane %v11887_v22, 9  ;;  %v12039_v40 = vrot.slane %v11892_v35, 5 }
 0x3e2   : > { %9258 = vst.msk [vmem:[#allocation5 + $0x28] sm:$0xff] %vm1526_vm1, %v9226_v39  ;;  %v9231_v47 = vadd.f32 %v14098_v52, %v9199_v46  ;;  %8843 = vst.msk [vmem:[#allocation5 + $0x60] sm:$0xff] %vm1526_vm1, %v8811_v36  ;;  %v8814_v45 = vadd.f32 %v14069_v49, %v8782_v34  ;;  %v12043_v46 = vrot.slane %v17972_v42, 5  ;;  %v13267_v36 = vrot.slane %v11890_v7, 9  ;;  %v11895_v34 = vld [vmem:[#allocation3 + $0xbc] sm:$0x1] }
 0x3e3   : > { %v9094_v41 = vpop.f32.mrf.mxu0  ;;  %v9200_v54 = vld [vmem:[#allocation5 + $0x58] sm:$0xff]  ;;  %v8691_v55 = vpop.f32.mrf.mxu1  ;;  %v12033_v52 = vsel %vm15123_vm10, %v12031_v19, %v12032_v24  ;;  %v12040_v33 = vsel %vm15123_vm10, %v12038_v17, %v12039_v40  ;;  %v12050_v10 = vrot.slane %v17977_v56, 5  ;;  %v12030_v49 = vsel %vm15123_vm10, %v13266_v11, %v12029_v50  ;;  %v11898_v12 = vld [vmem:[#allocation3 + $0xc8] sm:$0x1]  ;;  %v8787_v38 = vld [vmem:[#allocation5 + $0xa0] sm:$0xff] }
 0x3e4   : > { %9263 = vst.msk [vmem:[#allocation5 + $0x50] sm:$0xff] %vm1526_vm1, %v9231_v47  ;;  %v9229_v61 = vadd.f32 %v9197_v18, %v9094_v41  ;;  %8846 = vst.msk [vmem:[#allocation5 + $0x78] sm:$0xff] %vm1526_vm1, %v8814_v45  ;;  %v8812_v23 = vadd.f32 %v8780_v1, %v8691_v55  ;;  %v8784_v47 = vld [vmem:[#allocation5 + $0x88] sm:$0xff]  ;;  %v8789_v45 = vld [vmem:[#allocation5 + $0xb0] sm:$0xff]  ;;  %v13283_v9 = vcombine.low %v12030_v49, %v12033_v52  ;;  %v12045_v58 = vrot.slane %v12043_v46, 4 }
 0x3e5   : > { %v14099_v63 = vpop.f32.mrf.mxu0  ;;  %v9198_v16 = vld [vmem:[#allocation5 + $0x48] sm:$0xff]  ;;  %v14072_v8 = vpop.f32.mrf.mxu1  ;;  %v11893_v1 = vld [vmem:[#allocation3 + $0xb4] sm:$0xe]  ;;  %v12053_v19 = vrot.slane %v11898_v12, 5  ;;  %v11901_v35 = vld [vmem:[#allocation3 + $0xd4] sm:$0x1] }
 0x3e6   : > { %9261 = vst.msk [vmem:[#allocation5 + $0x40] sm:$0xff] %vm1526_vm1, %v9229_v61  ;;  %v9232_v48 = vadd.f32 %v14099_v63, %v9200_v54  ;;  %8844 = vst.msk [vmem:[#allocation5 + $0x68] sm:$0xff] %vm1526_vm1, %v8812_v23  ;;  %v8817_v62 = vadd.f32 %v14072_v8, %v8785_v27  ;;  %v12037_v63 = vsel %vm15123_vm10, %v13267_v36, %v12036_v28  ;;  %v17997_v54 = vld [vmem:[#allocation3 + $0xd0] sm:$0xf]  ;;  %v12052_v28 = vrot.slane %v12050_v10, 4  ;;  %v8793_v52 = vld [vmem:[#allocation5 + $0xd0] sm:$0xff] }
 0x3e7   : > { %v9097_v29 = vpop.f32.mrf.mxu0  ;;  %v9203_v30 = vld [vmem:[#allocation5 + $0x70] sm:$0xff]  ;;  %v8704_v4 = vpop.f32.mrf.mxu1  ;;  %v13284_v50 = vcombine.low %v12037_v63, %v12040_v33  ;;  %v12046_v8 = vrot.slane %v11895_v34, 5  ;;  %v11896_v27 = vld [vmem:[#allocation3 + $0xc0] sm:$0xe]  ;;  %v12057_v25 = vrot.slane %v17997_v54, 5  ;;  %v13268_v22 = vrot.slane %v11893_v1, 9 }
 0x3e8   : > { %9264 = vst.msk [vmem:[#allocation5 + $0x58] sm:$0xff] %vm1526_vm1, %v9232_v48  ;;  %v9230_v3 = vadd.f32 %v9198_v16, %v9097_v29  ;;  %14275 = vmatmul.mubr.msk.bf16.gmra.mxu1 %vm1526_vm1, %v13281_v2  ;;  %8849 = vst.msk [vmem:[#allocation5 + $0x90] sm:$0xff] %vm1526_vm1, %v8817_v62  ;;  %v8815_v37 = vadd.f32 %v8783_v14, %v8704_v4  ;;  %v11899_v2 = vld [vmem:[#allocation3 + $0xcc] sm:$0xe]  ;;  %v13269_v24 = vrot.slane %v11896_v27, 9  ;;  %v12060_v11 = vrot.slane %v11901_v35, 5 }
 0x3e9   : > { %v14102_v5 = vpop.f32.mrf.mxu0  ;;  %14278 = vmatprep.mubr.msk.bf16.mxu1 %vm1526_vm1, %v13282_v57  ;;  %v9201_v0 = vld [vmem:[#allocation5 + $0x60] sm:$0xff]  ;;  %v14073_v39 = vpop.f32.mrf.mxu1  ;;  %v8790_v57 = vld [vmem:[#allocation5 + $0xb8] sm:$0xff]  ;;  %v12047_v4 = vsel %vm15123_vm10, %v12045_v58, %v12046_v8  ;;  %v12054_v7 = vsel %vm15123_vm10, %v12052_v28, %v12053_v19 }
 0x3ea   : > { %9262 = vst.msk [vmem:[#allocation5 + $0x48] sm:$0xff] %vm1526_vm1, %v9230_v3  ;;  %v9235_v31 = vadd.f32 %v14102_v5, %v9203_v30  ;;  %8847 = vst.msk [vmem:[#allocation5 + $0x80] sm:$0xff] %vm1526_vm1, %v8815_v37  ;;  %v8818_v13 = vadd.f32 %v14073_v39, %v8786_v26  ;;  %v12044_v37 = vsel %vm15123_vm10, %v13268_v22, %v12043_v46  ;;  %v12059_v26 = vrot.slane %v12057_v25, 4  ;;  %v8795_v27 = vld [vmem:[#allocation5 + $0xe0] sm:$0xff] }
 0x3eb   : > { %v9110_v43 = vpop.f32.mrf.mxu0  ;;  %v9204_v32 = vld [vmem:[#allocation5 + $0x78] sm:$0xff]  ;;  %v8707_v6 = vpop.f32.mrf.mxu1  ;;  %v12051_v46 = vsel %vm15123_vm10, %v13269_v24, %v12050_v10  ;;  %v9981_v24 = vld [vmem:[#allocation5 + $0x10] sm:$0xff] }
 0x3ec   : > { %9267 = vst.msk [vmem:[#allocation5 + $0x70] sm:$0xff] %vm1526_vm1, %v9235_v31  ;;  %v9233_v44 = vadd.f32 %v9201_v0, %v9110_v43  ;;  %8850 = vst.msk [vmem:[#allocation5 + $0x98] sm:$0xff] %vm1526_vm1, %v8818_v13  ;;  %v8816_v18 = vadd.f32 %v8784_v47, %v8707_v6  ;;  %v8788_v31 = vld [vmem:[#allocation5 + $0xa8] sm:$0xff]  ;;  %v13270_v43 = vrot.slane %v11899_v2, 9  ;;  %v13286_v47 = vcombine.low %v12051_v46, %v12054_v7  ;;  %v9982_v46 = vld [vmem:[#allocation5 + $0x18] sm:$0xff] }
 0x3ed   : > { %v14103_v51 = vpop.f32.mrf.mxu0  ;;  %v9202_v21 = vld [vmem:[#allocation5 + $0x68] sm:$0xff]  ;;  %v14076_v61 = vpop.f32.mrf.mxu1  ;;  %v12061_v34 = vsel %vm15123_vm10, %v12059_v26, %v12060_v11  ;;  %v9979_v11 = vld [vmem:[#allocation5] sm:$0xff] }
 0x3ee   : > { %9265 = vst.msk [vmem:[#allocation5 + $0x60] sm:$0xff] %vm1526_vm1, %v9233_v44  ;;  %v9236_v41 = vadd.f32 %v14103_v51, %v9204_v32  ;;  %8848 = vst.msk [vmem:[#allocation5 + $0x88] sm:$0xff] %vm1526_vm1, %v8816_v18  ;;  %v8821_v55 = vadd.f32 %v14076_v61, %v8789_v45  ;;  %v13285_v51 = vcombine.low %v12044_v37, %v12047_v4  ;;  %v8791_v18 = vld [vmem:[#allocation5 + $0xc0] sm:$0xff]  ;;  %v8794_v45 = vld [vmem:[#allocation5 + $0xd8] sm:$0xff] }
 0x3ef   : > { %v9113_v53 = vpop.f32.mrf.mxu0  ;;  %v9207_v23 = vld [vmem:[#allocation5 + $0x90] sm:$0xff]  ;;  %v8720_v60 = vpop.f32.mrf.mxu1  ;;  %v12058_v49 = vsel %vm15123_vm10, %v13270_v43, %v12057_v25  ;;  %v8796_v4 = vld [vmem:[#allocation5 + $0xe8] sm:$0xff] }
 0x3f0   : > { %9268 = vst.msk [vmem:[#allocation5 + $0x78] sm:$0xff] %vm1526_vm1, %v9236_v41  ;;  %v9234_v20 = vadd.f32 %v9202_v21, %v9113_v53  ;;  %14279 = vmatmul.mubr.msk.bf16.gmra.mxu1 %vm1526_vm1, %v13283_v9  ;;  %8853 = vst.msk [vmem:[#allocation5 + $0xb0] sm:$0xff] %vm1526_vm1, %v8821_v55  ;;  %v8819_v16 = vadd.f32 %v8787_v38, %v8720_v60  ;;  %v13287_v1 = vcombine.low %v12058_v49, %v12061_v34  ;;  %v8797_v60 = vld [vmem:[#allocation5 + $0xf0] sm:$0xff] }
 0x3f1   : > { %v14106_v48 = vpop.f32.mrf.mxu0  ;;  %14282 = vmatprep.mubr.msk.bf16.mxu1 %vm1526_vm1, %v13284_v50  ;;  %v9205_v3 = vld [vmem:[#allocation5 + $0x80] sm:$0xff]  ;;  %v14077_v62 = vpop.f32.mrf.mxu1  ;;  %v8792_v50 = vld [vmem:[#allocation5 + $0xc8] sm:$0xff] }
 0x3f2   : > { %9266 = vst.msk [vmem:[#allocation5 + $0x68] sm:$0xff] %vm1526_vm1, %v9234_v20  ;;  %v9239_v29 = vadd.f32 %v14106_v48, %v9207_v23  ;;  %8851 = vst.msk [vmem:[#allocation5 + $0xa0] sm:$0xff] %vm1526_vm1, %v8819_v16  ;;  %v8822_v30 = vadd.f32 %v14077_v62, %v8790_v57  ;;  %v8798_v57 = vld [vmem:[#allocation5 + $0xf8] sm:$0xff] }
 0x3f3   : > { %v9126_v59 = vpop.f32.mrf.mxu0  ;;  %v9208_v17 = vld [vmem:[#allocation5 + $0x98] sm:$0xff]  ;;  %v8723_v42 = vpop.f32.mrf.mxu1 }
 0x3f4   : > { %9271 = vst.msk [vmem:[#allocation5 + $0x90] sm:$0xff] %vm1526_vm1, %v9239_v29  ;;  %v9237_v5 = vadd.f32 %v9205_v3, %v9126_v59  ;;  %8854 = vst.msk [vmem:[#allocation5 + $0xb8] sm:$0xff] %vm1526_vm1, %v8822_v30  ;;  %v8820_v39 = vadd.f32 %v8788_v31, %v8723_v42 }
 0x3f5   : > { %v14107_v14 = vpop.f32.mrf.mxu0  ;;  %v9206_v44 = vld [vmem:[#allocation5 + $0x88] sm:$0xff]  ;;  %v14080_v13 = vpop.f32.mrf.mxu1 }
 0x3f6   : > { %9269 = vst.msk [vmem:[#allocation5 + $0x80] sm:$0xff] %vm1526_vm1, %v9237_v5  ;;  %v9240_v0 = vadd.f32 %v14107_v14, %v9208_v17  ;;  %8852 = vst.msk [vmem:[#allocation5 + $0xa8] sm:$0xff] %vm1526_vm1, %v8820_v39  ;;  %v8825_v6 = vadd.f32 %v14080_v13, %v8793_v52 }
 0x3f7   : > { %v9129_v40 = vpop.f32.mrf.mxu0  ;;  %v9211_v33 = vld [vmem:[#allocation5 + $0xb0] sm:$0xff]  ;;  %v8736_v41 = vpop.f32.mrf.mxu1 }
 0x3f8   : > { %9272 = vst.msk [vmem:[#allocation5 + $0x98] sm:$0xff] %vm1526_vm1, %v9240_v0  ;;  %v9238_v32 = vadd.f32 %v9206_v44, %v9129_v40  ;;  %14283 = vmatmul.mubr.msk.bf16.gmra.mxu1 %vm1526_vm1, %v13285_v51  ;;  %8857 = vst.msk [vmem:[#allocation5 + $0xd0] sm:$0xff] %vm1526_vm1, %v8825_v6  ;;  %v8823_v10 = vadd.f32 %v8791_v18, %v8736_v41  ;;  %v9980_v41 = vld [vmem:[#allocation5 + $0x8] sm:$0xff] }
 0x3f9   : > { %v14110_v36 = vpop.f32.mrf.mxu0  ;;  %14286 = vmatprep.mubr.msk.bf16.mxu1 %vm1526_vm1, %v13286_v47  ;;  %v9209_v21 = vld [vmem:[#allocation5 + $0xa0] sm:$0xff]  ;;  %v14081_v61 = vpop.f32.mrf.mxu1 }
 0x3fa   : > { %9270 = vst.msk [vmem:[#allocation5 + $0x88] sm:$0xff] %vm1526_vm1, %v9238_v32  ;;  %v9243_v56 = vadd.f32 %v14110_v36, %v9211_v33  ;;  %8855 = vst.msk [vmem:[#allocation5 + $0xc0] sm:$0xff] %vm1526_vm1, %v8823_v10  ;;  %v8826_v63 = vadd.f32 %v14081_v61, %v8794_v45 }
 0x3fb   : > { %v9142_v53 = vpop.f32.mrf.mxu0  ;;  %v9212_v20 = vld [vmem:[#allocation5 + $0xb8] sm:$0xff]  ;;  %v8739_v55 = vpop.f32.mrf.mxu1 }
 0x3fc   : > { %9275 = vst.msk [vmem:[#allocation5 + $0xb0] sm:$0xff] %vm1526_vm1, %v9243_v56  ;;  %v9241_v9 = vadd.f32 %v9209_v21, %v9142_v53  ;;  %8858 = vst.msk [vmem:[#allocation5 + $0xd8] sm:$0xff] %vm1526_vm1, %v8826_v63  ;;  %v8824_v58 = vadd.f32 %v8792_v50, %v8739_v55  ;;  %v9985_v53 = vld [vmem:[#allocation5 + $0x30] sm:$0xff] }
 0x3fd   : > { %v14111_v54 = vpop.f32.mrf.mxu0  ;;  %v9210_v48 = vld [vmem:[#allocation5 + $0xa8] sm:$0xff]  ;;  %v14084_v23 = vpop.f32.mrf.mxu1 }
 0x3fe   : > { %9273 = vst.msk [vmem:[#allocation5 + $0xa0] sm:$0xff] %vm1526_vm1, %v9241_v9  ;;  %v9244_v15 = vadd.f32 %v14111_v54, %v9212_v20  ;;  %8856 = vst.msk [vmem:[#allocation5 + $0xc8] sm:$0xff] %vm1526_vm1, %v8824_v58  ;;  %v8829_v28 = vadd.f32 %v14084_v23, %v8797_v60  ;;  %v9983_v54 = vld [vmem:[#allocation5 + $0x20] sm:$0xff]  ;;  %v9986_v58 = vld [vmem:[#allocation5 + $0x38] sm:$0xff] }
 0x3ff   : > { %v9145_v12 = vpop.f32.mrf.mxu0  ;;  %v9215_v16 = vld [vmem:[#allocation5 + $0xd0] sm:$0xff]  ;;  %v8752_v8 = vpop.f32.mrf.mxu1 }
 0x400   : > { %9276 = vst.msk [vmem:[#allocation5 + $0xb8] sm:$0xff] %vm1526_vm1, %v9244_v15  ;;  %v9242_v38 = vadd.f32 %v9210_v48, %v9145_v12  ;;  %14287 = vmatmul.mubr.msk.bf16.gmra.mxu1 %vm1526_vm1, %v13287_v1  ;;  %8861 = vst.msk [vmem:[#allocation5 + $0xf0] sm:$0xff] %vm1526_vm1, %v8829_v28  ;;  %v8827_v25 = vadd.f32 %v8795_v27, %v8752_v8  ;;  %v9984_v28 = vld [vmem:[#allocation5 + $0x28] sm:$0xff] }
 0x401   : > { %v14114_v29 = vpop.f32.mrf.mxu0  ;;  %v9213_v3 = vld [vmem:[#allocation5 + $0xc0] sm:$0xff]  ;;  %v14085_v62 = vpop.f32.mrf.mxu1 }
 0x402   : > { %9274 = vst.msk [vmem:[#allocation5 + $0xa8] sm:$0xff] %vm1526_vm1, %v9242_v38  ;;  %v9247_v2 = vadd.f32 %v14114_v29, %v9215_v16  ;;  %8859 = vst.msk [vmem:[#allocation5 + $0xe0] sm:$0xff] %vm1526_vm1, %v8827_v25  ;;  %v8830_v19 = vadd.f32 %v14085_v62, %v8798_v57  ;;  %v9989_v25 = vld [vmem:[#allocation5 + $0x50] sm:$0xff] }
 0x403   : > { %v9158_v59 = vpop.f32.mrf.mxu0  ;;  %v9216_v5 = vld [vmem:[#allocation5 + $0xd8] sm:$0xff]  ;;  %v8755_v30 = vpop.f32.mrf.mxu1 }
 0x404   : > { %9279 = vst.msk [vmem:[#allocation5 + $0xd0] sm:$0xff] %vm1526_vm1, %v9247_v2  ;;  %v9245_v22 = vadd.f32 %v9213_v3, %v9158_v59  ;;  %8862 = vst.msk [vmem:[#allocation5 + $0xf8] sm:$0xff] %vm1526_vm1, %v8830_v19  ;;  %v8828_v17 = vadd.f32 %v8796_v4, %v8755_v30  ;;  %v9987_v19 = vld [vmem:[#allocation5 + $0x40] sm:$0xff] }
 0x405   : > { %v14115_v35 = vpop.f32.mrf.mxu0  ;;  %v9214_v31 = vld [vmem:[#allocation5 + $0xc8] sm:$0xff]  ;;  %v14124_v37 = vpop.f32.mrf.mxu1 }
 0x406   : > { %9277 = vst.msk [vmem:[#allocation5 + $0xc0] sm:$0xff] %vm1526_vm1, %v9245_v22  ;;  %v9248_v14 = vadd.f32 %v14115_v35, %v9216_v5  ;;  %8860 = vst.msk [vmem:[#allocation5 + $0xe8] sm:$0xff] %vm1526_vm1, %v8828_v17  ;;  %v10013_v43 = vadd.f32 %v14124_v37, %v9981_v24  ;;  %v9990_v17 = vld [vmem:[#allocation5 + $0x58] sm:$0xff] }
 0x407   : > { %v9161_v42 = vpop.f32.mrf.mxu0  ;;  %v9219_v39 = vld [vmem:[#allocation5 + $0xf0] sm:$0xff]  ;;  %v9852_v26 = vpop.f32.mrf.mxu1 }
 0x408   : > { %9280 = vst.msk [vmem:[#allocation5 + $0xd8] sm:$0xff] %vm1526_vm1, %v9248_v14  ;;  %v9246_v7 = vadd.f32 %v9214_v31, %v9161_v42  ;;  %10045 = vst.msk [vmem:[#allocation5 + $0x10] sm:$0xff] %vm1526_vm1, %v10013_v43  ;;  %v10011_v44 = vadd.f32 %v9979_v11, %v9852_v26  ;;  %v9988_v43 = vld [vmem:[#allocation5 + $0x48] sm:$0xff] }
 0x409   : > { %v14118_v0 = vpop.f32.mrf.mxu0  ;;  %v9217_v52 = vld [vmem:[#allocation5 + $0xe0] sm:$0xff]  ;;  %v14125_v51 = vpop.f32.mrf.mxu1 }
 0x40a   : > { %9278 = vst.msk [vmem:[#allocation5 + $0xc8] sm:$0xff] %vm1526_vm1, %v9246_v7  ;;  %v9251_v40 = vadd.f32 %v14118_v0, %v9219_v39  ;;  %10043 = vst.msk [vmem:[#allocation5] sm:$0xff] %vm1526_vm1, %v10011_v44  ;;  %v10014_v6 = vadd.f32 %v14125_v51, %v9982_v46  ;;  %v9993_v44 = vld [vmem:[#allocation5 + $0x70] sm:$0xff] }
 0x40b   : > { %v9174_v13 = vpop.f32.mrf.mxu0  ;;  %v9220_v36 = vld [vmem:[#allocation5 + $0xf8] sm:$0xff]  ;;  %v9855_v33 = vpop.f32.mrf.mxu1 }
 0x40c   : > { %9283 = vst.msk [vmem:[#allocation5 + $0xf0] sm:$0xff] %vm1526_vm1, %v9251_v40  ;;  %v9249_v32 = vadd.f32 %v9217_v52, %v9174_v13  ;;  %10046 = vst.msk [vmem:[#allocation5 + $0x18] sm:$0xff] %vm1526_vm1, %v10014_v6  ;;  %v10012_v56 = vadd.f32 %v9980_v41, %v9855_v33  ;;  %v9991_v6 = vld [vmem:[#allocation5 + $0x60] sm:$0xff] }
 0x40d   : > { %v14119_v47 = vpop.f32.mrf.mxu0  ;;  %v9218_v49 = vld [vmem:[#allocation5 + $0xe8] sm:$0xff]  ;;  %v14128_v34 = vpop.f32.mrf.mxu1 }
 0x40e   : > { %9281 = vst.msk [vmem:[#allocation5 + $0xe0] sm:$0xff] %vm1526_vm1, %v9249_v32  ;;  %v9252_v18 = vadd.f32 %v14119_v47, %v9220_v36  ;;  %10044 = vst.msk [vmem:[#allocation5 + $0x8] sm:$0xff] %vm1526_vm1, %v10012_v56  ;;  %v10017_v61 = vadd.f32 %v14128_v34, %v9985_v53  ;;  %v9994_v56 = vld [vmem:[#allocation5 + $0x78] sm:$0xff] }
 0x40f   : > { %v9177_v10 = vpop.f32.mrf.mxu0  ;;  %v10547_v9 = vld [vmem:[#allocation5 + $0x10] sm:$0xff]  ;;  %v9868_v63 = vpop.f32.mrf.mxu1 }
 0x410   : > { %9284 = vst.msk [vmem:[#allocation5 + $0xf8] sm:$0xff] %vm1526_vm1, %v9252_v18  ;;  %v9250_v21 = vadd.f32 %v9218_v49, %v9177_v10  ;;  %10049 = vst.msk [vmem:[#allocation5 + $0x30] sm:$0xff] %vm1526_vm1, %v10017_v61  ;;  %v10015_v55 = vadd.f32 %v9983_v54, %v9868_v63  ;;  %v9992_v61 = vld [vmem:[#allocation5 + $0x68] sm:$0xff] }
 0x411   : > { %v14158_v45 = vpop.f32.mrf.mxu0  ;;  %v10545_v1 = vld [vmem:[#allocation5] sm:$0xff]  ;;  %v14129_v15 = vpop.f32.mrf.mxu1 }
 0x412   : > { %9282 = vst.msk [vmem:[#allocation5 + $0xe8] sm:$0xff] %vm1526_vm1, %v9250_v21  ;;  %v10579_v20 = vadd.f32 %v14158_v45, %v10547_v9  ;;  %10047 = vst.msk [vmem:[#allocation5 + $0x20] sm:$0xff] %vm1526_vm1, %v10015_v55  ;;  %v10018_v48 = vadd.f32 %v14129_v15, %v9986_v58  ;;  %v9997_v55 = vld [vmem:[#allocation5 + $0x90] sm:$0xff] }
 0x413   : > { %v10418_v50 = vpop.f32.mrf.mxu0  ;;  %v10548_v60 = vld [vmem:[#allocation5 + $0x18] sm:$0xff]  ;;  %v9871_v38 = vpop.f32.mrf.mxu1 }
 0x414   : > { %10611 = vst.msk [vmem:[#allocation5 + $0x10] sm:$0xff] %vm1526_vm1, %v10579_v20  ;;  %v10577_v12 = vadd.f32 %v10545_v1, %v10418_v50  ;;  %10050 = vst.msk [vmem:[#allocation5 + $0x38] sm:$0xff] %vm1526_vm1, %v10018_v48  ;;  %v10016_v16 = vadd.f32 %v9984_v28, %v9871_v38  ;;  %v9995_v48 = vld [vmem:[#allocation5 + $0x80] sm:$0xff] }
 0x415   : > { %v14159_v23 = vpop.f32.mrf.mxu0  ;;  %v10546_v27 = vld [vmem:[#allocation5 + $0x8] sm:$0xff]  ;;  %v14132_v2 = vpop.f32.mrf.mxu1 }
 0x416   : > { %10609 = vst.msk [vmem:[#allocation5] sm:$0xff] %vm1526_vm1, %v10577_v12  ;;  %v10580_v29 = vadd.f32 %v14159_v23, %v10548_v60  ;;  %10048 = vst.msk [vmem:[#allocation5 + $0x28] sm:$0xff] %vm1526_vm1, %v10016_v16  ;;  %v10021_v3 = vadd.f32 %v14132_v2, %v9989_v25  ;;  %v9998_v16 = vld [vmem:[#allocation5 + $0x98] sm:$0xff] }
 0x417   : > { %v10421_v8 = vpop.f32.mrf.mxu0  ;;  %v10551_v57 = vld [vmem:[#allocation5 + $0x30] sm:$0xff]  ;;  %v9884_v22 = vpop.f32.mrf.mxu1 }
 0x418   : > { %10612 = vst.msk [vmem:[#allocation5 + $0x18] sm:$0xff] %vm1526_vm1, %v10580_v29  ;;  %v10578_v59 = vadd.f32 %v10546_v27, %v10421_v8  ;;  %10053 = vst.msk [vmem:[#allocation5 + $0x50] sm:$0xff] %vm1526_vm1, %v10021_v3  ;;  %v10019_v5 = vadd.f32 %v9987_v19, %v9884_v22  ;;  %v9996_v3 = vld [vmem:[#allocation5 + $0x88] sm:$0xff] }
 0x419   : > { %v14162_v62 = vpop.f32.mrf.mxu0  ;;  %v10549_v4 = vld [vmem:[#allocation5 + $0x20] sm:$0xff]  ;;  %v14133_v14 = vpop.f32.mrf.mxu1 }
 0x41a   : > { %10610 = vst.msk [vmem:[#allocation5 + $0x8] sm:$0xff] %vm1526_vm1, %v10578_v59  ;;  %v10583_v35 = vadd.f32 %v14162_v62, %v10551_v57  ;;  %10051 = vst.msk [vmem:[#allocation5 + $0x40] sm:$0xff] %vm1526_vm1, %v10019_v5  ;;  %v10022_v31 = vadd.f32 %v14133_v14, %v9990_v17  ;;  %v10001_v5 = vld [vmem:[#allocation5 + $0xb0] sm:$0xff] }
 0x41b   : > { %v10434_v30 = vpop.f32.mrf.mxu0  ;;  %v10552_v24 = vld [vmem:[#allocation5 + $0x38] sm:$0xff]  ;;  %v9887_v7 = vpop.f32.mrf.mxu1 }
 0x41c   : > { %10615 = vst.msk [vmem:[#allocation5 + $0x30] sm:$0xff] %vm1526_vm1, %v10583_v35  ;;  %v10581_v42 = vadd.f32 %v10549_v4, %v10434_v30  ;;  %10054 = vst.msk [vmem:[#allocation5 + $0x58] sm:$0xff] %vm1526_vm1, %v10022_v31  ;;  %v10020_v39 = vadd.f32 %v9988_v43, %v9887_v7  ;;  %v9999_v31 = vld [vmem:[#allocation5 + $0xa0] sm:$0xff] }
 0x41d   : > { %v14163_v37 = vpop.f32.mrf.mxu0  ;;  %v10550_v11 = vld [vmem:[#allocation5 + $0x28] sm:$0xff]  ;;  %v14136_v40 = vpop.f32.mrf.mxu1 }
 0x41e   : > { %10613 = vst.msk [vmem:[#allocation5 + $0x20] sm:$0xff] %vm1526_vm1, %v10581_v42  ;;  %v10584_v0 = vadd.f32 %v14163_v37, %v10552_v24  ;;  %10052 = vst.msk [vmem:[#allocation5 + $0x48] sm:$0xff] %vm1526_vm1, %v10020_v39  ;;  %v10025_v52 = vadd.f32 %v14136_v40, %v9993_v44  ;;  %v10002_v39 = vld [vmem:[#allocation5 + $0xb8] sm:$0xff] }
 0x41f   : > { %v10437_v26 = vpop.f32.mrf.mxu0  ;;  %v10555_v46 = vld [vmem:[#allocation5 + $0x50] sm:$0xff]  ;;  %v9900_v32 = vpop.f32.mrf.mxu1 }
 0x420   : > { %10616 = vst.msk [vmem:[#allocation5 + $0x38] sm:$0xff] %vm1526_vm1, %v10584_v0  ;;  %v10582_v13 = vadd.f32 %v10550_v11, %v10437_v26  ;;  %10057 = vst.msk [vmem:[#allocation5 + $0x70] sm:$0xff] %vm1526_vm1, %v10025_v52  ;;  %v10023_v36 = vadd.f32 %v9991_v6, %v9900_v32  ;;  %v10000_v52 = vld [vmem:[#allocation5 + $0xa8] sm:$0xff] }
 0x421   : > { %v14166_v51 = vpop.f32.mrf.mxu0  ;;  %v10553_v41 = vld [vmem:[#allocation5 + $0x40] sm:$0xff]  ;;  %v14137_v18 = vpop.f32.mrf.mxu1 }
 0x422   : > { %10614 = vst.msk [vmem:[#allocation5 + $0x28] sm:$0xff] %vm1526_vm1, %v10582_v13  ;;  %v10587_v47 = vadd.f32 %v14166_v51, %v10555_v46  ;;  %10055 = vst.msk [vmem:[#allocation5 + $0x60] sm:$0xff] %vm1526_vm1, %v10023_v36  ;;  %v10026_v49 = vadd.f32 %v14137_v18, %v9994_v56  ;;  %v10005_v36 = vld [vmem:[#allocation5 + $0xd0] sm:$0xff] }
 0x423   : > { %v10450_v33 = vpop.f32.mrf.mxu0  ;;  %v10556_v53 = vld [vmem:[#allocation5 + $0x58] sm:$0xff]  ;;  %v9903_v21 = vpop.f32.mrf.mxu1 }
 0x424   : > { %10619 = vst.msk [vmem:[#allocation5 + $0x50] sm:$0xff] %vm1526_vm1, %v10587_v47  ;;  %v10585_v10 = vadd.f32 %v10553_v41, %v10450_v33  ;;  %10058 = vst.msk [vmem:[#allocation5 + $0x78] sm:$0xff] %vm1526_vm1, %v10026_v49  ;;  %v10024_v9 = vadd.f32 %v9992_v61, %v9903_v21  ;;  %v10003_v49 = vld [vmem:[#allocation5 + $0xc0] sm:$0xff] }
 0x425   : > { %v14167_v34 = vpop.f32.mrf.mxu0  ;;  %v10554_v54 = vld [vmem:[#allocation5 + $0x48] sm:$0xff]  ;;  %v14140_v20 = vpop.f32.mrf.mxu1 }
 0x426   : > { %10617 = vst.msk [vmem:[#allocation5 + $0x40] sm:$0xff] %vm1526_vm1, %v10585_v10  ;;  %v10588_v45 = vadd.f32 %v14167_v34, %v10556_v53  ;;  %10056 = vst.msk [vmem:[#allocation5 + $0x68] sm:$0xff] %vm1526_vm1, %v10024_v9  ;;  %v10029_v1 = vadd.f32 %v14140_v20, %v9997_v55  ;;  %v10006_v9 = vld [vmem:[#allocation5 + $0xd8] sm:$0xff] }
 0x427   : > { %v10453_v63 = vpop.f32.mrf.mxu0  ;;  %v10559_v58 = vld [vmem:[#allocation5 + $0x70] sm:$0xff]  ;;  %v9916_v12 = vpop.f32.mrf.mxu1 }
 0x428   : > { %10620 = vst.msk [vmem:[#allocation5 + $0x58] sm:$0xff] %vm1526_vm1, %v10588_v45  ;;  %v10586_v50 = vadd.f32 %v10554_v54, %v10453_v63  ;;  %10061 = vst.msk [vmem:[#allocation5 + $0x90] sm:$0xff] %vm1526_vm1, %v10029_v1  ;;  %v10027_v60 = vadd.f32 %v9995_v48, %v9916_v12  ;;  %v10004_v1 = vld [vmem:[#allocation5 + $0xc8] sm:$0xff] }
 0x429   : > { %v14170_v15 = vpop.f32.mrf.mxu0  ;;  %v10557_v28 = vld [vmem:[#allocation5 + $0x60] sm:$0xff]  ;;  %v14141_v29 = vpop.f32.mrf.mxu1 }
 0x42a   : > { %10618 = vst.msk [vmem:[#allocation5 + $0x48] sm:$0xff] %vm1526_vm1, %v10586_v50  ;;  %v10591_v23 = vadd.f32 %v14170_v15, %v10559_v58  ;;  %10059 = vst.msk [vmem:[#allocation5 + $0x80] sm:$0xff] %vm1526_vm1, %v10027_v60  ;;  %v10030_v27 = vadd.f32 %v14141_v29, %v9998_v16  ;;  %v10009_v60 = vld [vmem:[#allocation5 + $0xf0] sm:$0xff] }
 0x42b   : > { %v10466_v38 = vpop.f32.mrf.mxu0  ;;  %v10560_v25 = vld [vmem:[#allocation5 + $0x78] sm:$0xff]  ;;  %v9919_v59 = vpop.f32.mrf.mxu1 }
 0x42c   : > { %10623 = vst.msk [vmem:[#allocation5 + $0x70] sm:$0xff] %vm1526_vm1, %v10591_v23  ;;  %v10589_v8 = vadd.f32 %v10557_v28, %v10466_v38  ;;  %10062 = vst.msk [vmem:[#allocation5 + $0x98] sm:$0xff] %vm1526_vm1, %v10030_v27  ;;  %v10028_v57 = vadd.f32 %v9996_v3, %v9919_v59  ;;  %v10007_v27 = vld [vmem:[#allocation5 + $0xe0] sm:$0xff] }
 0x42d   : > { %v14171_v2 = vpop.f32.mrf.mxu0  ;;  %v10558_v19 = vld [vmem:[#allocation5 + $0x68] sm:$0xff]  ;;  %v14144_v35 = vpop.f32.mrf.mxu1 }
 0x42e   : > { %10621 = vst.msk [vmem:[#allocation5 + $0x60] sm:$0xff] %vm1526_vm1, %v10589_v8  ;;  %v10592_v62 = vadd.f32 %v14171_v2, %v10560_v25  ;;  %10060 = vst.msk [vmem:[#allocation5 + $0x88] sm:$0xff] %vm1526_vm1, %v10028_v57  ;;  %v10033_v4 = vadd.f32 %v14144_v35, %v10001_v5  ;;  %v10010_v57 = vld [vmem:[#allocation5 + $0xf8] sm:$0xff] }
 0x42f   : > { %v10469_v22 = vpop.f32.mrf.mxu0  ;;  %v10563_v17 = vld [vmem:[#allocation5 + $0x90] sm:$0xff]  ;;  %v9932_v42 = vpop.f32.mrf.mxu1 }
 0x430   : > { %10624 = vst.msk [vmem:[#allocation5 + $0x78] sm:$0xff] %vm1526_vm1, %v10592_v62  ;;  %v10590_v30 = vadd.f32 %v10558_v19, %v10469_v22  ;;  %10065 = vst.msk [vmem:[#allocation5 + $0xb0] sm:$0xff] %vm1526_vm1, %v10033_v4  ;;  %v10031_v24 = vadd.f32 %v9999_v31, %v9932_v42  ;;  %v10008_v4 = vld [vmem:[#allocation5 + $0xe8] sm:$0xff] }
 0x431   : > { %v14174_v14 = vpop.f32.mrf.mxu0  ;;  %v10561_v43 = vld [vmem:[#allocation5 + $0x80] sm:$0xff]  ;;  %v14145_v0 = vpop.f32.mrf.mxu1 }
 0x432   : > { %10622 = vst.msk [vmem:[#allocation5 + $0x68] sm:$0xff] %vm1526_vm1, %v10590_v30  ;;  %v10595_v37 = vadd.f32 %v14174_v14, %v10563_v17  ;;  %10063 = vst.msk [vmem:[#allocation5 + $0xa0] sm:$0xff] %vm1526_vm1, %v10031_v24  ;;  %v10034_v11 = vadd.f32 %v14145_v0, %v10002_v39  ;;  %v10970_v24 = vld [vmem:[#allocation5 + $0x10] sm:$0xff] }
 0x433   : > { %v10482_v7 = vpop.f32.mrf.mxu0  ;;  %v10564_v44 = vld [vmem:[#allocation5 + $0x98] sm:$0xff]  ;;  %v9935_v13 = vpop.f32.mrf.mxu1 }
 0x434   : > { %10627 = vst.msk [vmem:[#allocation5 + $0x90] sm:$0xff] %vm1526_vm1, %v10595_v37  ;;  %v10593_v26 = vadd.f32 %v10561_v43, %v10482_v7  ;;  %10066 = vst.msk [vmem:[#allocation5 + $0xb8] sm:$0xff] %vm1526_vm1, %v10034_v11  ;;  %v10032_v46 = vadd.f32 %v10000_v52, %v9935_v13  ;;  %v10968_v11 = vld [vmem:[#allocation5] sm:$0xff] }
 0x435   : > { %v14175_v40 = vpop.f32.mrf.mxu0  ;;  %v10562_v6 = vld [vmem:[#allocation5 + $0x88] sm:$0xff]  ;;  %v14148_v47 = vpop.f32.mrf.mxu1 }
 0x436   : > { %10625 = vst.msk [vmem:[#allocation5 + $0x80] sm:$0xff] %vm1526_vm1, %v10593_v26  ;;  %v10596_v51 = vadd.f32 %v14175_v40, %v10564_v44  ;;  %10064 = vst.msk [vmem:[#allocation5 + $0xa8] sm:$0xff] %vm1526_vm1, %v10032_v46  ;;  %v10037_v41 = vadd.f32 %v14148_v47, %v10005_v36  ;;  %v10971_v46 = vld [vmem:[#allocation5 + $0x18] sm:$0xff] }
 0x437   : > { %v10485_v32 = vpop.f32.mrf.mxu0  ;;  %v10567_v56 = vld [vmem:[#allocation5 + $0xb0] sm:$0xff]  ;;  %v9948_v10 = vpop.f32.mrf.mxu1 }
 0x438   : > { %10628 = vst.msk [vmem:[#allocation5 + $0x98] sm:$0xff] %vm1526_vm1, %v10596_v51  ;;  %v10594_v33 = vadd.f32 %v10562_v6, %v10485_v32  ;;  %10069 = vst.msk [vmem:[#allocation5 + $0xd0] sm:$0xff] %vm1526_vm1, %v10037_v41  ;;  %v10035_v53 = vadd.f32 %v10003_v49, %v9948_v10  ;;  %v10969_v41 = vld [vmem:[#allocation5 + $0x8] sm:$0xff] }
 0x439   : > { %v14178_v18 = vpop.f32.mrf.mxu0  ;;  %v10565_v61 = vld [vmem:[#allocation5 + $0xa0] sm:$0xff]  ;;  %v14149_v45 = vpop.f32.mrf.mxu1 }
 0x43a   : > { %10626 = vst.msk [vmem:[#allocation5 + $0x88] sm:$0xff] %vm1526_vm1, %v10594_v33  ;;  %v10599_v34 = vadd.f32 %v14178_v18, %v10567_v56  ;;  %10067 = vst.msk [vmem:[#allocation5 + $0xc0] sm:$0xff] %vm1526_vm1, %v10035_v53  ;;  %v10038_v54 = vadd.f32 %v14149_v45, %v10006_v9  ;;  %v10974_v53 = vld [vmem:[#allocation5 + $0x30] sm:$0xff] }
 0x43b   : > { %v10498_v21 = vpop.f32.mrf.mxu0  ;;  %v10568_v55 = vld [vmem:[#allocation5 + $0xb8] sm:$0xff]  ;;  %v9951_v50 = vpop.f32.mrf.mxu1 }
 0x43c   : > { %10631 = vst.msk [vmem:[#allocation5 + $0xb0] sm:$0xff] %vm1526_vm1, %v10599_v34  ;;  %v10597_v63 = vadd.f32 %v10565_v61, %v10498_v21  ;;  %10070 = vst.msk [vmem:[#allocation5 + $0xd8] sm:$0xff] %vm1526_vm1, %v10038_v54  ;;  %v10036_v58 = vadd.f32 %v10004_v1, %v9951_v50  ;;  %v10972_v54 = vld [vmem:[#allocation5 + $0x20] sm:$0xff] }
 0x43d   : > { %v14179_v20 = vpop.f32.mrf.mxu0  ;;  %v10566_v48 = vld [vmem:[#allocation5 + $0xa8] sm:$0xff]  ;;  %v14152_v23 = vpop.f32.mrf.mxu1 }
 0x43e   : > { %10629 = vst.msk [vmem:[#allocation5 + $0xa0] sm:$0xff] %vm1526_vm1, %v10597_v63  ;;  %v10600_v15 = vadd.f32 %v14179_v20, %v10568_v55  ;;  %10068 = vst.msk [vmem:[#allocation5 + $0xc8] sm:$0xff] %vm1526_vm1, %v10036_v58  ;;  %v10041_v28 = vadd.f32 %v14152_v23, %v10009_v60  ;;  %v10975_v58 = vld [vmem:[#allocation5 + $0x38] sm:$0xff] }
 0x43f   : > { %v10501_v12 = vpop.f32.mrf.mxu0  ;;  %v10571_v16 = vld [vmem:[#allocation5 + $0xd0] sm:$0xff]  ;;  %v9964_v8 = vpop.f32.mrf.mxu1 }
 0x440   : > { %10632 = vst.msk [vmem:[#allocation5 + $0xb8] sm:$0xff] %vm1526_vm1, %v10600_v15  ;;  %v10598_v38 = vadd.f32 %v10566_v48, %v10501_v12  ;;  %10073 = vst.msk [vmem:[#allocation5 + $0xf0] sm:$0xff] %vm1526_vm1, %v10041_v28  ;;  %v10039_v25 = vadd.f32 %v10007_v27, %v9964_v8  ;;  %v10973_v28 = vld [vmem:[#allocation5 + $0x28] sm:$0xff] }
 0x441   : > { %v14182_v29 = vpop.f32.mrf.mxu0  ;;  %v10569_v3 = vld [vmem:[#allocation5 + $0xc0] sm:$0xff]  ;;  %v14153_v62 = vpop.f32.mrf.mxu1 }
 0x442   : > { %10630 = vst.msk [vmem:[#allocation5 + $0xa8] sm:$0xff] %vm1526_vm1, %v10598_v38  ;;  %v10603_v2 = vadd.f32 %v14182_v29, %v10571_v16  ;;  %10071 = vst.msk [vmem:[#allocation5 + $0xe0] sm:$0xff] %vm1526_vm1, %v10039_v25  ;;  %v10042_v19 = vadd.f32 %v14153_v62, %v10010_v57  ;;  %v10978_v25 = vld [vmem:[#allocation5 + $0x50] sm:$0xff] }
 0x443   : > { %v10514_v59 = vpop.f32.mrf.mxu0  ;;  %v10572_v5 = vld [vmem:[#allocation5 + $0xd8] sm:$0xff]  ;;  %v9967_v30 = vpop.f32.mrf.mxu1 }
 0x444   : > { %10635 = vst.msk [vmem:[#allocation5 + $0xd0] sm:$0xff] %vm1526_vm1, %v10603_v2  ;;  %v10601_v22 = vadd.f32 %v10569_v3, %v10514_v59  ;;  %10074 = vst.msk [vmem:[#allocation5 + $0xf8] sm:$0xff] %vm1526_vm1, %v10042_v19  ;;  %v10040_v17 = vadd.f32 %v10008_v4, %v9967_v30  ;;  %v10976_v19 = vld [vmem:[#allocation5 + $0x40] sm:$0xff] }
 0x445   : > { %v14183_v35 = vpop.f32.mrf.mxu0  ;;  %v10570_v31 = vld [vmem:[#allocation5 + $0xc8] sm:$0xff]  ;;  %v14192_v37 = vpop.f32.mrf.mxu1 }
 0x446   : > { %10633 = vst.msk [vmem:[#allocation5 + $0xc0] sm:$0xff] %vm1526_vm1, %v10601_v22  ;;  %v10604_v14 = vadd.f32 %v14183_v35, %v10572_v5  ;;  %10072 = vst.msk [vmem:[#allocation5 + $0xe8] sm:$0xff] %vm1526_vm1, %v10040_v17  ;;  %v11002_v43 = vadd.f32 %v14192_v37, %v10970_v24  ;;  %v10979_v17 = vld [vmem:[#allocation5 + $0x58] sm:$0xff] }
 0x447   : > { %v10517_v42 = vpop.f32.mrf.mxu0  ;;  %v10575_v39 = vld [vmem:[#allocation5 + $0xf0] sm:$0xff]  ;;  %v10841_v26 = vpop.f32.mrf.mxu1 }
 0x448   : > { %10636 = vst.msk [vmem:[#allocation5 + $0xd8] sm:$0xff] %vm1526_vm1, %v10604_v14  ;;  %v10602_v7 = vadd.f32 %v10570_v31, %v10517_v42  ;;  %11034 = vst.msk [vmem:[#allocation5 + $0x10] sm:$0xff] %vm1526_vm1, %v11002_v43  ;;  %v11000_v44 = vadd.f32 %v10968_v11, %v10841_v26  ;;  %v10977_v43 = vld [vmem:[#allocation5 + $0x48] sm:$0xff] }
 0x449   : > { %v14186_v0 = vpop.f32.mrf.mxu0  ;;  %v10573_v52 = vld [vmem:[#allocation5 + $0xe0] sm:$0xff]  ;;  %v14193_v51 = vpop.f32.mrf.mxu1 }
 0x44a   : > { %10634 = vst.msk [vmem:[#allocation5 + $0xc8] sm:$0xff] %vm1526_vm1, %v10602_v7  ;;  %v10607_v40 = vadd.f32 %v14186_v0, %v10575_v39  ;;  %11032 = vst.msk [vmem:[#allocation5] sm:$0xff] %vm1526_vm1, %v11000_v44  ;;  %v11003_v6 = vadd.f32 %v14193_v51, %v10971_v46  ;;  %v10982_v44 = vld [vmem:[#allocation5 + $0x70] sm:$0xff] }
 0x44b   : > { %v10530_v13 = vpop.f32.mrf.mxu0  ;;  %v10576_v36 = vld [vmem:[#allocation5 + $0xf8] sm:$0xff]  ;;  %v10844_v33 = vpop.f32.mrf.mxu1 }
 0x44c   : > { %10639 = vst.msk [vmem:[#allocation5 + $0xf0] sm:$0xff] %vm1526_vm1, %v10607_v40  ;;  %v10605_v32 = vadd.f32 %v10573_v52, %v10530_v13  ;;  %11035 = vst.msk [vmem:[#allocation5 + $0x18] sm:$0xff] %vm1526_vm1, %v11003_v6  ;;  %v11001_v56 = vadd.f32 %v10969_v41, %v10844_v33  ;;  %v10980_v6 = vld [vmem:[#allocation5 + $0x60] sm:$0xff] }
 0x44d   : > { %v14187_v47 = vpop.f32.mrf.mxu0  ;;  %v10574_v49 = vld [vmem:[#allocation5 + $0xe8] sm:$0xff]  ;;  %v14196_v34 = vpop.f32.mrf.mxu1 }
 0x44e   : > { %10637 = vst.msk [vmem:[#allocation5 + $0xe0] sm:$0xff] %vm1526_vm1, %v10605_v32  ;;  %v10608_v18 = vadd.f32 %v14187_v47, %v10576_v36  ;;  %11033 = vst.msk [vmem:[#allocation5 + $0x8] sm:$0xff] %vm1526_vm1, %v11001_v56  ;;  %v11006_v61 = vadd.f32 %v14196_v34, %v10974_v53  ;;  %v10983_v56 = vld [vmem:[#allocation5 + $0x78] sm:$0xff] }
 0x44f   : > { %v10533_v10 = vpop.f32.mrf.mxu0  ;;  %v11760_v9 = vld [vmem:[#allocation5 + $0x10] sm:$0xff]  ;;  %v10857_v63 = vpop.f32.mrf.mxu1 }
 0x450   : > { %10640 = vst.msk [vmem:[#allocation5 + $0xf8] sm:$0xff] %vm1526_vm1, %v10608_v18  ;;  %v10606_v21 = vadd.f32 %v10574_v49, %v10533_v10  ;;  %11038 = vst.msk [vmem:[#allocation5 + $0x30] sm:$0xff] %vm1526_vm1, %v11006_v61  ;;  %v11004_v55 = vadd.f32 %v10972_v54, %v10857_v63  ;;  %v10981_v61 = vld [vmem:[#allocation5 + $0x68] sm:$0xff] }
 0x451   : > { %v14226_v45 = vpop.f32.mrf.mxu0  ;;  %v11758_v1 = vld [vmem:[#allocation5] sm:$0xff]  ;;  %v14197_v15 = vpop.f32.mrf.mxu1 }
 0x452   : > { %10638 = vst.msk [vmem:[#allocation5 + $0xe8] sm:$0xff] %vm1526_vm1, %v10606_v21  ;;  %v11792_v20 = vadd.f32 %v14226_v45, %v11760_v9  ;;  %11036 = vst.msk [vmem:[#allocation5 + $0x20] sm:$0xff] %vm1526_vm1, %v11004_v55  ;;  %v11007_v48 = vadd.f32 %v14197_v15, %v10975_v58  ;;  %v10986_v55 = vld [vmem:[#allocation5 + $0x90] sm:$0xff] }
 0x453   : > { %v11631_v50 = vpop.f32.mrf.mxu0  ;;  %v11761_v60 = vld [vmem:[#allocation5 + $0x18] sm:$0xff]  ;;  %v10860_v38 = vpop.f32.mrf.mxu1 }
 0x454   : > { %11824 = vst.msk [vmem:[#allocation5 + $0x10] sm:$0xff] %vm1526_vm1, %v11792_v20  ;;  %v11790_v12 = vadd.f32 %v11758_v1, %v11631_v50  ;;  %11039 = vst.msk [vmem:[#allocation5 + $0x38] sm:$0xff] %vm1526_vm1, %v11007_v48  ;;  %v11005_v16 = vadd.f32 %v10973_v28, %v10860_v38  ;;  %v10984_v48 = vld [vmem:[#allocation5 + $0x80] sm:$0xff] }
 0x455   : > { %v14227_v23 = vpop.f32.mrf.mxu0  ;;  %v11759_v27 = vld [vmem:[#allocation5 + $0x8] sm:$0xff]  ;;  %v14200_v2 = vpop.f32.mrf.mxu1 }
 0x456   : > { %11822 = vst.msk [vmem:[#allocation5] sm:$0xff] %vm1526_vm1, %v11790_v12  ;;  %v11793_v29 = vadd.f32 %v14227_v23, %v11761_v60  ;;  %11037 = vst.msk [vmem:[#allocation5 + $0x28] sm:$0xff] %vm1526_vm1, %v11005_v16  ;;  %v11010_v3 = vadd.f32 %v14200_v2, %v10978_v25  ;;  %v10987_v16 = vld [vmem:[#allocation5 + $0x98] sm:$0xff] }
 0x457   : > { %v11634_v8 = vpop.f32.mrf.mxu0  ;;  %v11764_v57 = vld [vmem:[#allocation5 + $0x30] sm:$0xff]  ;;  %v10873_v22 = vpop.f32.mrf.mxu1 }
 0x458   : > { %11825 = vst.msk [vmem:[#allocation5 + $0x18] sm:$0xff] %vm1526_vm1, %v11793_v29  ;;  %v11791_v59 = vadd.f32 %v11759_v27, %v11634_v8  ;;  %11042 = vst.msk [vmem:[#allocation5 + $0x50] sm:$0xff] %vm1526_vm1, %v11010_v3  ;;  %v11008_v5 = vadd.f32 %v10976_v19, %v10873_v22  ;;  %v10985_v3 = vld [vmem:[#allocation5 + $0x88] sm:$0xff] }
 0x459   : > { %v14230_v62 = vpop.f32.mrf.mxu0  ;;  %v11762_v4 = vld [vmem:[#allocation5 + $0x20] sm:$0xff]  ;;  %v14201_v14 = vpop.f32.mrf.mxu1 }
 0x45a   : > { %11823 = vst.msk [vmem:[#allocation5 + $0x8] sm:$0xff] %vm1526_vm1, %v11791_v59  ;;  %v11796_v35 = vadd.f32 %v14230_v62, %v11764_v57  ;;  %11040 = vst.msk [vmem:[#allocation5 + $0x40] sm:$0xff] %vm1526_vm1, %v11008_v5  ;;  %v11011_v31 = vadd.f32 %v14201_v14, %v10979_v17  ;;  %v10990_v5 = vld [vmem:[#allocation5 + $0xb0] sm:$0xff] }
 0x45b   : > { %v11647_v30 = vpop.f32.mrf.mxu0  ;;  %v11765_v24 = vld [vmem:[#allocation5 + $0x38] sm:$0xff]  ;;  %v10876_v7 = vpop.f32.mrf.mxu1 }
 0x45c   : > { %11828 = vst.msk [vmem:[#allocation5 + $0x30] sm:$0xff] %vm1526_vm1, %v11796_v35  ;;  %v11794_v42 = vadd.f32 %v11762_v4, %v11647_v30  ;;  %11043 = vst.msk [vmem:[#allocation5 + $0x58] sm:$0xff] %vm1526_vm1, %v11011_v31  ;;  %v11009_v39 = vadd.f32 %v10977_v43, %v10876_v7  ;;  %v10988_v31 = vld [vmem:[#allocation5 + $0xa0] sm:$0xff] }
 0x45d   : > { %v14231_v37 = vpop.f32.mrf.mxu0  ;;  %v11763_v11 = vld [vmem:[#allocation5 + $0x28] sm:$0xff]  ;;  %v14204_v40 = vpop.f32.mrf.mxu1 }
 0x45e   : > { %11826 = vst.msk [vmem:[#allocation5 + $0x20] sm:$0xff] %vm1526_vm1, %v11794_v42  ;;  %v11797_v0 = vadd.f32 %v14231_v37, %v11765_v24  ;;  %11041 = vst.msk [vmem:[#allocation5 + $0x48] sm:$0xff] %vm1526_vm1, %v11009_v39  ;;  %v11014_v52 = vadd.f32 %v14204_v40, %v10982_v44  ;;  %v10991_v39 = vld [vmem:[#allocation5 + $0xb8] sm:$0xff] }
 0x45f   : > { %v11650_v26 = vpop.f32.mrf.mxu0  ;;  %v11768_v46 = vld [vmem:[#allocation5 + $0x50] sm:$0xff]  ;;  %v10889_v32 = vpop.f32.mrf.mxu1 }
 0x460   : > { %11829 = vst.msk [vmem:[#allocation5 + $0x38] sm:$0xff] %vm1526_vm1, %v11797_v0  ;;  %v11795_v13 = vadd.f32 %v11763_v11, %v11650_v26  ;;  %11046 = vst.msk [vmem:[#allocation5 + $0x70] sm:$0xff] %vm1526_vm1, %v11014_v52  ;;  %v11012_v36 = vadd.f32 %v10980_v6, %v10889_v32  ;;  %v10989_v52 = vld [vmem:[#allocation5 + $0xa8] sm:$0xff] }
 0x461   : > { %v14234_v51 = vpop.f32.mrf.mxu0  ;;  %v11766_v41 = vld [vmem:[#allocation5 + $0x40] sm:$0xff]  ;;  %v14205_v18 = vpop.f32.mrf.mxu1 }
 0x462   : > { %11827 = vst.msk [vmem:[#allocation5 + $0x28] sm:$0xff] %vm1526_vm1, %v11795_v13  ;;  %v11800_v47 = vadd.f32 %v14234_v51, %v11768_v46  ;;  %11044 = vst.msk [vmem:[#allocation5 + $0x60] sm:$0xff] %vm1526_vm1, %v11012_v36  ;;  %v11015_v49 = vadd.f32 %v14205_v18, %v10983_v56  ;;  %v10994_v36 = vld [vmem:[#allocation5 + $0xd0] sm:$0xff] }
 0x463   : > { %v11663_v33 = vpop.f32.mrf.mxu0  ;;  %v11769_v53 = vld [vmem:[#allocation5 + $0x58] sm:$0xff]  ;;  %v10892_v21 = vpop.f32.mrf.mxu1 }
 0x464   : > { %11832 = vst.msk [vmem:[#allocation5 + $0x50] sm:$0xff] %vm1526_vm1, %v11800_v47  ;;  %v11798_v10 = vadd.f32 %v11766_v41, %v11663_v33  ;;  %11047 = vst.msk [vmem:[#allocation5 + $0x78] sm:$0xff] %vm1526_vm1, %v11015_v49  ;;  %v11013_v9 = vadd.f32 %v10981_v61, %v10892_v21  ;;  %v10992_v49 = vld [vmem:[#allocation5 + $0xc0] sm:$0xff] }
 0x465   : > { %v14235_v34 = vpop.f32.mrf.mxu0  ;;  %v11767_v54 = vld [vmem:[#allocation5 + $0x48] sm:$0xff]  ;;  %v14208_v20 = vpop.f32.mrf.mxu1 }
 0x466   : > { %11830 = vst.msk [vmem:[#allocation5 + $0x40] sm:$0xff] %vm1526_vm1, %v11798_v10  ;;  %v11801_v45 = vadd.f32 %v14235_v34, %v11769_v53  ;;  %11045 = vst.msk [vmem:[#allocation5 + $0x68] sm:$0xff] %vm1526_vm1, %v11013_v9  ;;  %v11018_v1 = vadd.f32 %v14208_v20, %v10986_v55  ;;  %v10995_v9 = vld [vmem:[#allocation5 + $0xd8] sm:$0xff] }
 0x467   : > { %v11666_v63 = vpop.f32.mrf.mxu0  ;;  %v11772_v58 = vld [vmem:[#allocation5 + $0x70] sm:$0xff]  ;;  %v10905_v12 = vpop.f32.mrf.mxu1 }
 0x468   : > { %11833 = vst.msk [vmem:[#allocation5 + $0x58] sm:$0xff] %vm1526_vm1, %v11801_v45  ;;  %v11799_v50 = vadd.f32 %v11767_v54, %v11666_v63  ;;  %11050 = vst.msk [vmem:[#allocation5 + $0x90] sm:$0xff] %vm1526_vm1, %v11018_v1  ;;  %v11016_v60 = vadd.f32 %v10984_v48, %v10905_v12  ;;  %v10993_v1 = vld [vmem:[#allocation5 + $0xc8] sm:$0xff] }
 0x469   : > { %v14238_v15 = vpop.f32.mrf.mxu0  ;;  %v11770_v28 = vld [vmem:[#allocation5 + $0x60] sm:$0xff]  ;;  %v14209_v29 = vpop.f32.mrf.mxu1 }
 0x46a   : > { %11831 = vst.msk [vmem:[#allocation5 + $0x48] sm:$0xff] %vm1526_vm1, %v11799_v50  ;;  %v11804_v23 = vadd.f32 %v14238_v15, %v11772_v58  ;;  %11048 = vst.msk [vmem:[#allocation5 + $0x80] sm:$0xff] %vm1526_vm1, %v11016_v60  ;;  %v11019_v27 = vadd.f32 %v14209_v29, %v10987_v16  ;;  %v10998_v60 = vld [vmem:[#allocation5 + $0xf0] sm:$0xff] }
 0x46b   : > { %v11679_v38 = vpop.f32.mrf.mxu0  ;;  %v11773_v25 = vld [vmem:[#allocation5 + $0x78] sm:$0xff]  ;;  %v10908_v59 = vpop.f32.mrf.mxu1 }
 0x46c   : > { %11836 = vst.msk [vmem:[#allocation5 + $0x70] sm:$0xff] %vm1526_vm1, %v11804_v23  ;;  %v11802_v8 = vadd.f32 %v11770_v28, %v11679_v38  ;;  %11051 = vst.msk [vmem:[#allocation5 + $0x98] sm:$0xff] %vm1526_vm1, %v11019_v27  ;;  %v11017_v57 = vadd.f32 %v10985_v3, %v10908_v59  ;;  %v10999_v3 = vld [vmem:[#allocation5 + $0xf8] sm:$0xff] }
 0x46d   : > { %v14239_v2 = vpop.f32.mrf.mxu0  ;;  %v11771_v19 = vld [vmem:[#allocation5 + $0x68] sm:$0xff]  ;;  %v14212_v35 = vpop.f32.mrf.mxu1 }
 0x46e   : > { %11834 = vst.msk [vmem:[#allocation5 + $0x60] sm:$0xff] %vm1526_vm1, %v11802_v8  ;;  %v11805_v62 = vadd.f32 %v14239_v2, %v11773_v25  ;;  %11049 = vst.msk [vmem:[#allocation5 + $0x88] sm:$0xff] %vm1526_vm1, %v11017_v57  ;;  %v11022_v4 = vadd.f32 %v14212_v35, %v10990_v5  ;;  %v10996_v8 = vld [vmem:[#allocation5 + $0xe0] sm:$0xff]  ;;  %v10997_v5 = vld [vmem:[#allocation5 + $0xe8] sm:$0xff] }
 0x46f   : > { %v11682_v22 = vpop.f32.mrf.mxu0  ;;  %v11776_v17 = vld [vmem:[#allocation5 + $0x90] sm:$0xff]  ;;  %v10921_v42 = vpop.f32.mrf.mxu1 }
 0x470   : > { %11837 = vst.msk [vmem:[#allocation5 + $0x78] sm:$0xff] %vm1526_vm1, %v11805_v62  ;;  %v11803_v30 = vadd.f32 %v11771_v19, %v11682_v22  ;;  %11054 = vst.msk [vmem:[#allocation5 + $0xb0] sm:$0xff] %vm1526_vm1, %v11022_v4  ;;  %v11020_v24 = vadd.f32 %v10988_v31, %v10921_v42 }
 0x471   : > { %v14242_v14 = vpop.f32.mrf.mxu0  ;;  %v11774_v43 = vld [vmem:[#allocation5 + $0x80] sm:$0xff]  ;;  %v14213_v0 = vpop.f32.mrf.mxu1 }
 0x472   : > { %11835 = vst.msk [vmem:[#allocation5 + $0x68] sm:$0xff] %vm1526_vm1, %v11803_v30  ;;  %v11808_v37 = vadd.f32 %v14242_v14, %v11776_v17  ;;  %11052 = vst.msk [vmem:[#allocation5 + $0xa0] sm:$0xff] %vm1526_vm1, %v11020_v24  ;;  %v11023_v11 = vadd.f32 %v14213_v0, %v10991_v39  ;;  %v12326_v24 = vld [vmem:[#allocation5 + $0x10] sm:$0xff]  ;;  %v12324_v39 = vld [vmem:[#allocation5] sm:$0xff] }
 0x473   : > { %v11695_v7 = vpop.f32.mrf.mxu0  ;;  %v11777_v44 = vld [vmem:[#allocation5 + $0x98] sm:$0xff]  ;;  %v10924_v13 = vpop.f32.mrf.mxu1 }
 0x474   : > { %11840 = vst.msk [vmem:[#allocation5 + $0x90] sm:$0xff] %vm1526_vm1, %v11808_v37  ;;  %v11806_v26 = vadd.f32 %v11774_v43, %v11695_v7  ;;  %11055 = vst.msk [vmem:[#allocation5 + $0xb8] sm:$0xff] %vm1526_vm1, %v11023_v11  ;;  %v11021_v46 = vadd.f32 %v10989_v52, %v10924_v13  ;;  %v12325_v52 = vld [vmem:[#allocation5 + $0x8] sm:$0xff] }
 0x475   : > { %v14243_v40 = vpop.f32.mrf.mxu0  ;;  %v11775_v6 = vld [vmem:[#allocation5 + $0x88] sm:$0xff]  ;;  %v14216_v47 = vpop.f32.mrf.mxu1 }
 0x476   : > { %11838 = vst.msk [vmem:[#allocation5 + $0x80] sm:$0xff] %vm1526_vm1, %v11806_v26  ;;  %v11809_v51 = vadd.f32 %v14243_v40, %v11777_v44  ;;  %11053 = vst.msk [vmem:[#allocation5 + $0xa8] sm:$0xff] %vm1526_vm1, %v11021_v46  ;;  %v11026_v41 = vadd.f32 %v14216_v47, %v10994_v36  ;;  %v12327_v40 = vld [vmem:[#allocation5 + $0x18] sm:$0xff] }
 0x477   : > { %v11698_v32 = vpop.f32.mrf.mxu0  ;;  %v11780_v56 = vld [vmem:[#allocation5 + $0xb0] sm:$0xff]  ;;  %v10937_v10 = vpop.f32.mrf.mxu1 }
 0x478   : > { %11841 = vst.msk [vmem:[#allocation5 + $0x98] sm:$0xff] %vm1526_vm1, %v11809_v51  ;;  %v11807_v33 = vadd.f32 %v11775_v6, %v11698_v32  ;;  %11058 = vst.msk [vmem:[#allocation5 + $0xd0] sm:$0xff] %vm1526_vm1, %v11026_v41  ;;  %v11024_v53 = vadd.f32 %v10992_v49, %v10937_v10  ;;  %v12330_v32 = vld [vmem:[#allocation5 + $0x30] sm:$0xff]  ;;  %v12328_v41 = vld [vmem:[#allocation5 + $0x20] sm:$0xff] }
 0x479   : > { %v14246_v18 = vpop.f32.mrf.mxu0  ;;  %v11778_v61 = vld [vmem:[#allocation5 + $0xa0] sm:$0xff]  ;;  %v14217_v45 = vpop.f32.mrf.mxu1 }
 0x47a   : > { %11839 = vst.msk [vmem:[#allocation5 + $0x88] sm:$0xff] %vm1526_vm1, %v11807_v33  ;;  %v11812_v34 = vadd.f32 %v14246_v18, %v11780_v56  ;;  %11056 = vst.msk [vmem:[#allocation5 + $0xc0] sm:$0xff] %vm1526_vm1, %v11024_v53  ;;  %v11027_v54 = vadd.f32 %v14217_v45, %v10995_v9 }
 0x47b   : > { %v11711_v21 = vpop.f32.mrf.mxu0  ;;  %v11781_v55 = vld [vmem:[#allocation5 + $0xb8] sm:$0xff]  ;;  %v10940_v50 = vpop.f32.mrf.mxu1 }
 0x47c   : > { %11844 = vst.msk [vmem:[#allocation5 + $0xb0] sm:$0xff] %vm1526_vm1, %v11812_v34  ;;  %v11810_v63 = vadd.f32 %v11778_v61, %v11711_v21  ;;  %11059 = vst.msk [vmem:[#allocation5 + $0xd8] sm:$0xff] %vm1526_vm1, %v11027_v54  ;;  %v11025_v58 = vadd.f32 %v10993_v1, %v10940_v50  ;;  %v12331_v21 = vld [vmem:[#allocation5 + $0x38] sm:$0xff] }
 0x47d   : > { %v14247_v20 = vpop.f32.mrf.mxu0  ;;  %v11779_v48 = vld [vmem:[#allocation5 + $0xa8] sm:$0xff]  ;;  %v14220_v23 = vpop.f32.mrf.mxu1 }
 0x47e   : > { %11842 = vst.msk [vmem:[#allocation5 + $0xa0] sm:$0xff] %vm1526_vm1, %v11810_v63  ;;  %v11813_v15 = vadd.f32 %v14247_v20, %v11781_v55  ;;  %11057 = vst.msk [vmem:[#allocation5 + $0xc8] sm:$0xff] %vm1526_vm1, %v11025_v58  ;;  %v11030_v28 = vadd.f32 %v14220_v23, %v10998_v60  ;;  %v12329_v55 = vld [vmem:[#allocation5 + $0x28] sm:$0xff]  ;;  %v12334_v23 = vld [vmem:[#allocation5 + $0x50] sm:$0xff] }
 0x47f   : > { %v11714_v12 = vpop.f32.mrf.mxu0  ;;  %v11784_v29 = vld [vmem:[#allocation5 + $0xd0] sm:$0xff]  ;;  %v10953_v16 = vpop.f32.mrf.mxu1 }
 0x480   : > { %11845 = vst.msk [vmem:[#allocation5 + $0xb8] sm:$0xff] %vm1526_vm1, %v11813_v15  ;;  %v11811_v38 = vadd.f32 %v11779_v48, %v11714_v12  ;;  %11062 = vst.msk [vmem:[#allocation5 + $0xf0] sm:$0xff] %vm1526_vm1, %v11030_v28  ;;  %v11028_v27 = vadd.f32 %v10996_v8, %v10953_v16  ;;  %v12332_v8 = vld [vmem:[#allocation5 + $0x40] sm:$0xff] }
 0x481   : > { %v11782_v25 = vld [vmem:[#allocation5 + $0xc0] sm:$0xff]  ;;  %v14221_v59 = vpop.f32.mrf.mxu1 }
 0x482   : > { %11843 = vst.msk [vmem:[#allocation5 + $0xa8] sm:$0xff] %vm1526_vm1, %v11811_v38  ;;  %v14250_v2 = vpop.f32.mrf.mxu0  ;;  %11060 = vst.msk [vmem:[#allocation5 + $0xe0] sm:$0xff] %vm1526_vm1, %v11028_v27  ;;  %v11031_v57 = vadd.f32 %v14221_v59, %v10999_v3  ;;  %v12335_v59 = vld [vmem:[#allocation5 + $0x58] sm:$0xff] }
 0x483   : > { %v11816_v62 = vadd.f32 %v14250_v2, %v11784_v29  ;;  %v11785_v19 = vld [vmem:[#allocation5 + $0xd8] sm:$0xff]  ;;  %v10956_v35 = vpop.f32.mrf.mxu1 }
 0x484   : > { %v11727_v22 = vpop.f32.mrf.mxu0  ;;  %11063 = vst.msk [vmem:[#allocation5 + $0xf8] sm:$0xff] %vm1526_vm1, %v11031_v57  ;;  %v11029_v4 = vadd.f32 %v10997_v5, %v10956_v35 }
 0x485   : > { %11848 = vst.msk [vmem:[#allocation5 + $0xd0] sm:$0xff] %vm1526_vm1, %v11816_v62  ;;  %v11814_v30 = vadd.f32 %v11782_v25, %v11727_v22  ;;  %v11783_v17 = vld [vmem:[#allocation5 + $0xc8] sm:$0xff] }
 0x486   : > { %v14251_v14 = vpop.f32.mrf.mxu0  ;;  %11061 = vst.msk [vmem:[#allocation5 + $0xe8] sm:$0xff] %vm1526_vm1, %v11029_v4  ;;  %v12333_v22 = vld [vmem:[#allocation5 + $0x48] sm:$0xff] }
 0x487   : > { %11846 = vst.msk [vmem:[#allocation5 + $0xc0] sm:$0xff] %vm1526_vm1, %v11814_v30  ;;  %v11817_v42 = vadd.f32 %v14251_v14, %v11785_v19  ;;  %v11788_v6 = vld [vmem:[#allocation5 + $0xf0] sm:$0xff] }
 0x488   : > { %v11730_v31 = vpop.f32.mrf.mxu0  ;;  %v14260_v37 = vpop.f32.mrf.mxu1  ;;  %v12338_v30 = vld [vmem:[#allocation5 + $0x70] sm:$0xff] }
 0x489   : > { %11849 = vst.msk [vmem:[#allocation5 + $0xd8] sm:$0xff] %vm1526_vm1, %v11817_v42  ;;  %v11815_v7 = vadd.f32 %v11783_v17, %v11730_v31  ;;  %v12358_v43 = vadd.f32 %v14260_v37, %v12326_v24  ;;  %v11786_v56 = vld [vmem:[#allocation5 + $0xe0] sm:$0xff] }
 0x48a   : > { %v12197_v0 = vpop.f32.mrf.mxu1  ;;  %v12336_v42 = vld [vmem:[#allocation5 + $0x60] sm:$0xff] }
 0x48b   : > { %11847 = vst.msk [vmem:[#allocation5 + $0xc8] sm:$0xff] %vm1526_vm1, %v11815_v7  ;;  %12390 = vst.msk [vmem:[#allocation5 + $0x10] sm:$0xff] %vm1526_vm1, %v12358_v43  ;;  %v12356_v26 = vadd.f32 %v12324_v39, %v12197_v0  ;;  %v11789_v45 = vld [vmem:[#allocation5 + $0xf8] sm:$0xff] }
 0x48c   : > { %v14261_v11 = vpop.f32.mrf.mxu1  ;;  %v12339_v7 = vld [vmem:[#allocation5 + $0x78] sm:$0xff] }
 0x48d   : > { %12388 = vst.msk [vmem:[#allocation5] sm:$0xff] %vm1526_vm1, %v12356_v26  ;;  %v12359_v44 = vadd.f32 %v14261_v11, %v12327_v40  ;;  %v11787_v1 = vld [vmem:[#allocation5 + $0xe8] sm:$0xff] }
 0x48e   : > { %v12200_v13 = vpop.f32.mrf.mxu1  ;;  %v12337_v26 = vld [vmem:[#allocation5 + $0x68] sm:$0xff] }
 0x48f   : > { %12391 = vst.msk [vmem:[#allocation5 + $0x18] sm:$0xff] %vm1526_vm1, %v12359_v44  ;;  %v12357_v51 = vadd.f32 %v12325_v52, %v12200_v13  ;;  %v12342_v13 = vld [vmem:[#allocation5 + $0x90] sm:$0xff] }
 0x490   : > { %v14264_v46 = vpop.f32.mrf.mxu1 }
 0x491   : > { %12389 = vst.msk [vmem:[#allocation5 + $0x8] sm:$0xff] %vm1526_vm1, %v12357_v51  ;;  %v12362_v47 = vadd.f32 %v14264_v46, %v12330_v32  ;;  %v12340_v32 = vld [vmem:[#allocation5 + $0x80] sm:$0xff] }
 0x492   : > { %v12422_v36 = vld [vmem:[#allocation5 + $0x10] sm:$0xff]  ;;  %v12213_v33 = vpop.f32.mrf.mxu1 }
 0x493   : > { %12454 = vst.msk [vmem:[%s18184_s8 + $0x10] sm:$0xff] %vm1526_vm1, %v12422_v36  ;;  %12394 = vst.msk [vmem:[#allocation5 + $0x30] sm:$0xff] %vm1526_vm1, %v12362_v47  ;;  %v12360_v10 = vadd.f32 %v12328_v41, %v12213_v33  ;;  %v12343_v33 = vld [vmem:[#allocation5 + $0x98] sm:$0xff] }
 0x494   : > { %v14254_v18 = vpop.f32.mrf.mxu0  ;;  %v12420_v34 = vld [vmem:[#allocation5] sm:$0xff]  ;;  %v14265_v53 = vpop.f32.mrf.mxu1 }
 0x495   : > { %v11820_v49 = vadd.f32 %v14254_v18, %v11788_v6  ;;  %12452 = vst.msk [vmem:[%s18184_s8] sm:$0xff] %vm1526_vm1, %v12420_v34  ;;  %12392 = vst.msk [vmem:[#allocation5 + $0x20] sm:$0xff] %vm1526_vm1, %v12360_v10  ;;  %v12363_v9 = vadd.f32 %v14265_v53, %v12331_v21  ;;  %v12341_v10 = vld [vmem:[#allocation5 + $0x88] sm:$0xff]  ;;  %v12346_v21 = vld [vmem:[#allocation5 + $0xb0] sm:$0xff] }
 0x496   : > { %v11743_v61 = vpop.f32.mrf.mxu0  ;;  %v12423_v54 = vld [vmem:[#allocation5 + $0x18] sm:$0xff]  ;;  %v12216_v20 = vpop.f32.mrf.mxu1 }
 0x497   : > { %11852 = vst.msk [vmem:[#allocation5 + $0xf0] sm:$0xff] %vm1526_vm1, %v11820_v49  ;;  %v11818_v63 = vadd.f32 %v11786_v56, %v11743_v61  ;;  %12455 = vst.msk [vmem:[%s18184_s8 + $0x18] sm:$0xff] %vm1526_vm1, %v12423_v54  ;;  %v12361_v15 = vadd.f32 %v12329_v55, %v12216_v20 }
 0x498   : > { %v14255_v50 = vpop.f32.mrf.mxu0  ;;  %12395 = vst.msk [vmem:[#allocation5 + $0x38] sm:$0xff] %vm1526_vm1, %v12363_v9  ;;  %v12421_v12 = vld [vmem:[#allocation5 + $0x8] sm:$0xff]  ;;  %v14268_v48 = vpop.f32.mrf.mxu1 }
 0x499   : > { %11850 = vst.msk [vmem:[#allocation5 + $0xe0] sm:$0xff] %vm1526_vm1, %v11818_v63  ;;  %v11821_v58 = vadd.f32 %v14255_v50, %v11789_v45  ;;  %12453 = vst.msk [vmem:[%s18184_s8 + $0x8] sm:$0xff] %vm1526_vm1, %v12421_v12  ;;  %v12366_v38 = vadd.f32 %v14268_v48, %v12334_v23  ;;  %v12344_v63 = vld [vmem:[#allocation5 + $0xa0] sm:$0xff]  ;;  %v12347_v50 = vld [vmem:[#allocation5 + $0xb8] sm:$0xff] }
 0x49a   : > { %v11746_v60 = vpop.f32.mrf.mxu0  ;;  %12393 = vst.msk [vmem:[#allocation5 + $0x28] sm:$0xff] %vm1526_vm1, %v12361_v15  ;;  %v12426_v29 = vld [vmem:[#allocation5 + $0x30] sm:$0xff]  ;;  %v12229_v16 = vpop.f32.mrf.mxu1  ;;  %v12345_v12 = vld [vmem:[#allocation5 + $0xa8] sm:$0xff] }
 0x49b   : > { %11853 = vst.msk [vmem:[#allocation5 + $0xf8] sm:$0xff] %vm1526_vm1, %v11821_v58  ;;  %v11819_v28 = vadd.f32 %v11787_v1, %v11746_v60  ;;  %12458 = vst.msk [vmem:[%s18184_s8 + $0x30] sm:$0xff] %vm1526_vm1, %v12426_v29  ;;  %v12364_v27 = vadd.f32 %v12332_v8, %v12229_v16  ;;  %v12348_v8 = vld [vmem:[#allocation5 + $0xc0] sm:$0xff] }
 0x49c   : > { %12398 = vst.msk [vmem:[#allocation5 + $0x50] sm:$0xff] %vm1526_vm1, %v12366_v38  ;;  %v12424_v2 = vld [vmem:[#allocation5 + $0x20] sm:$0xff]  ;;  %v14269_v25 = vpop.f32.mrf.mxu1  ;;  %v12350_v38 = vld [vmem:[#allocation5 + $0xd0] sm:$0xff] }
 0x49d   : > { %11851 = vst.msk [vmem:[#allocation5 + $0xe8] sm:$0xff] %vm1526_vm1, %v11819_v28  ;;  %12456 = vst.msk [vmem:[%s18184_s8 + $0x20] sm:$0xff] %vm1526_vm1, %v12424_v2  ;;  %v12367_v3 = vadd.f32 %v14269_v25, %v12335_v59  ;;  %v12351_v59 = vld [vmem:[#allocation5 + $0xd8] sm:$0xff] }
 0x49e   : > { %12396 = vst.msk [vmem:[#allocation5 + $0x40] sm:$0xff] %vm1526_vm1, %v12364_v27  ;;  %v12232_v57 = vpop.f32.mrf.mxu1 }
 0x49f   : > { %v12427_v62 = vld [vmem:[#allocation5 + $0x38] sm:$0xff]  ;;  %12399 = vst.msk [vmem:[#allocation5 + $0x58] sm:$0xff] %vm1526_vm1, %v12367_v3  ;;  %v12365_v19 = vadd.f32 %v12333_v22, %v12232_v57  ;;  %v12349_v22 = vld [vmem:[#allocation5 + $0xc8] sm:$0xff] }
 0x4a0   : > { %12459 = vst.msk [vmem:[%s18184_s8 + $0x38] sm:$0xff] %vm1526_vm1, %v12427_v62  ;;  %v14272_v5 = vpop.f32.mrf.mxu1 }
 0x4a1   : > { %v12425_v35 = vld [vmem:[#allocation5 + $0x28] sm:$0xff]  ;;  %12397 = vst.msk [vmem:[#allocation5 + $0x48] sm:$0xff] %vm1526_vm1, %v12365_v19  ;;  %v12370_v4 = vadd.f32 %v14272_v5, %v12338_v30  ;;  %v12354_v30 = vld [vmem:[#allocation5 + $0xf0] sm:$0xff] }
 0x4a2   : > { %12457 = vst.msk [vmem:[%s18184_s8 + $0x28] sm:$0xff] %vm1526_vm1, %v12425_v35  ;;  %v12245_v17 = vpop.f32.mrf.mxu1 }
 0x4a3   : > { %v12430_v14 = vld [vmem:[#allocation5 + $0x50] sm:$0xff]  ;;  %12402 = vst.msk [vmem:[#allocation5 + $0x70] sm:$0xff] %vm1526_vm1, %v12370_v4  ;;  %v12368_v31 = vadd.f32 %v12336_v42, %v12245_v17  ;;  %v12352_v42 = vld [vmem:[#allocation5 + $0xe0] sm:$0xff] }
 0x4a4   : > { %12462 = vst.msk [vmem:[%s18184_s8 + $0x50] sm:$0xff] %vm1526_vm1, %v12430_v14  ;;  %v14273_v24 = vpop.f32.mrf.mxu1 }
 0x4a5   : > { %v12428_v37 = vld [vmem:[#allocation5 + $0x40] sm:$0xff]  ;;  %12400 = vst.msk [vmem:[#allocation5 + $0x60] sm:$0xff] %vm1526_vm1, %v12368_v31  ;;  %v12371_v43 = vadd.f32 %v14273_v24, %v12339_v7  ;;  %v12355_v7 = vld [vmem:[#allocation5 + $0xf8] sm:$0xff] }
 0x4a6   : > { %12460 = vst.msk [vmem:[%s18184_s8 + $0x40] sm:$0xff] %vm1526_vm1, %v12428_v37  ;;  %v12431_v0 = vld [vmem:[#allocation5 + $0x58] sm:$0xff]  ;;  %v12248_v39 = vpop.f32.mrf.mxu1 }
 0x4a7   : > { %12463 = vst.msk [vmem:[%s18184_s8 + $0x58] sm:$0xff] %vm1526_vm1, %v12431_v0  ;;  %12403 = vst.msk [vmem:[#allocation5 + $0x78] sm:$0xff] %vm1526_vm1, %v12371_v43  ;;  %v12369_v11 = vadd.f32 %v12337_v26, %v12248_v39  ;;  %v12353_v26 = vld [vmem:[#allocation5 + $0xe8] sm:$0xff] }
 0x4a8   : > { %v12429_v40 = vld [vmem:[#allocation5 + $0x48] sm:$0xff]  ;;  %v14276_v44 = vpop.f32.mrf.mxu1 }
 0x4a9   : > { %12461 = vst.msk [vmem:[%s18184_s8 + $0x48] sm:$0xff] %vm1526_vm1, %v12429_v40  ;;  %12401 = vst.msk [vmem:[#allocation5 + $0x68] sm:$0xff] %vm1526_vm1, %v12369_v11  ;;  %v12374_v52 = vadd.f32 %v14276_v44, %v12342_v13 }
 0x4aa   : > { %v12434_v51 = vld [vmem:[#allocation5 + $0x70] sm:$0xff]  ;;  %v12261_v46 = vpop.f32.mrf.mxu1 }
 0x4ab   : > { %12466 = vst.msk [vmem:[%s18184_s8 + $0x70] sm:$0xff] %vm1526_vm1, %v12434_v51  ;;  %12406 = vst.msk [vmem:[#allocation5 + $0x90] sm:$0xff] %vm1526_vm1, %v12374_v52  ;;  %v12372_v6 = vadd.f32 %v12340_v32, %v12261_v46 }
 0x4ac   : > { %v12432_v47 = vld [vmem:[#allocation5 + $0x60] sm:$0xff]  ;;  %v14277_v36 = vpop.f32.mrf.mxu1 }
 0x4ad   : > { %12464 = vst.msk [vmem:[%s18184_s8 + $0x60] sm:$0xff] %vm1526_vm1, %v12432_v47  ;;  %12404 = vst.msk [vmem:[#allocation5 + $0x80] sm:$0xff] %vm1526_vm1, %v12372_v6  ;;  %v12375_v41 = vadd.f32 %v14277_v36, %v12343_v33 }
 0x4ae   : > { %v12435_v18 = vld [vmem:[#allocation5 + $0x78] sm:$0xff]  ;;  %v12264_v56 = vpop.f32.mrf.mxu1 }
 0x4af   : > { %12467 = vst.msk [vmem:[%s18184_s8 + $0x78] sm:$0xff] %vm1526_vm1, %v12435_v18  ;;  %12407 = vst.msk [vmem:[#allocation5 + $0x98] sm:$0xff] %vm1526_vm1, %v12375_v41  ;;  %v12373_v49 = vadd.f32 %v12341_v10, %v12264_v56 }
 0x4b0   : > { %v12433_v34 = vld [vmem:[#allocation5 + $0x68] sm:$0xff]  ;;  %v14280_v53 = vpop.f32.mrf.mxu1 }
 0x4b1   : > { %12465 = vst.msk [vmem:[%s18184_s8 + $0x68] sm:$0xff] %vm1526_vm1, %v12433_v34  ;;  %12405 = vst.msk [vmem:[#allocation5 + $0x88] sm:$0xff] %vm1526_vm1, %v12373_v49  ;;  %v12378_v61 = vadd.f32 %v14280_v53, %v12346_v21 }
 0x4b2   : > { %v12438_v45 = vld [vmem:[#allocation5 + $0x90] sm:$0xff]  ;;  %v12277_v9 = vpop.f32.mrf.mxu1 }
 0x4b3   : > { %12470 = vst.msk [vmem:[%s18184_s8 + $0x90] sm:$0xff] %vm1526_vm1, %v12438_v45  ;;  %12410 = vst.msk [vmem:[#allocation5 + $0xb0] sm:$0xff] %vm1526_vm1, %v12378_v61  ;;  %v12376_v54 = vadd.f32 %v12344_v63, %v12277_v9 }
 0x4b4   : > { %v12436_v20 = vld [vmem:[#allocation5 + $0x80] sm:$0xff]  ;;  %v14281_v55 = vpop.f32.mrf.mxu1 }
 0x4b5   : > { %12468 = vst.msk [vmem:[%s18184_s8 + $0x80] sm:$0xff] %vm1526_vm1, %v12436_v20  ;;  %12408 = vst.msk [vmem:[#allocation5 + $0xa0] sm:$0xff] %vm1526_vm1, %v12376_v54  ;;  %v12379_v1 = vadd.f32 %v14281_v55, %v12347_v50 }
 0x4b6   : > { %v12439_v15 = vld [vmem:[#allocation5 + $0x98] sm:$0xff]  ;;  %v12280_v58 = vpop.f32.mrf.mxu1 }
 0x4b7   : > { %12471 = vst.msk [vmem:[%s18184_s8 + $0x98] sm:$0xff] %vm1526_vm1, %v12439_v15  ;;  %12411 = vst.msk [vmem:[#allocation5 + $0xb8] sm:$0xff] %vm1526_vm1, %v12379_v1  ;;  %v12377_v48 = vadd.f32 %v12345_v12, %v12280_v58 }
 0x4b8   : > { %v12437_v23 = vld [vmem:[#allocation5 + $0x88] sm:$0xff]  ;;  %v14284_v60 = vpop.f32.mrf.mxu1 }
 0x4b9   : > { %12469 = vst.msk [vmem:[%s18184_s8 + $0x88] sm:$0xff] %vm1526_vm1, %v12437_v23  ;;  %12409 = vst.msk [vmem:[#allocation5 + $0xa8] sm:$0xff] %vm1526_vm1, %v12377_v48  ;;  %v12382_v28 = vadd.f32 %v14284_v60, %v12350_v38 }
 0x4ba   : > { %v12442_v29 = vld [vmem:[#allocation5 + $0xb0] sm:$0xff]  ;;  %v12293_v16 = vpop.f32.mrf.mxu1 }
 0x4bb   : > { %12474 = vst.msk [vmem:[%s18184_s8 + $0xb0] sm:$0xff] %vm1526_vm1, %v12442_v29  ;;  %12414 = vst.msk [vmem:[#allocation5 + $0xd0] sm:$0xff] %vm1526_vm1, %v12382_v28  ;;  %v12380_v27 = vadd.f32 %v12348_v8, %v12293_v16 }
 0x4bc   : > { %v12440_v2 = vld [vmem:[#allocation5 + $0xa0] sm:$0xff]  ;;  %v14285_v25 = vpop.f32.mrf.mxu1 }
 0x4bd   : > { %12472 = vst.msk [vmem:[%s18184_s8 + $0xa0] sm:$0xff] %vm1526_vm1, %v12440_v2  ;;  %12412 = vst.msk [vmem:[#allocation5 + $0xc0] sm:$0xff] %vm1526_vm1, %v12380_v27  ;;  %v12383_v3 = vadd.f32 %v14285_v25, %v12351_v59 }
 0x4be   : > { %v12443_v62 = vld [vmem:[#allocation5 + $0xb8] sm:$0xff]  ;;  %v12296_v57 = vpop.f32.mrf.mxu1 }
 0x4bf   : > { %12475 = vst.msk [vmem:[%s18184_s8 + $0xb8] sm:$0xff] %vm1526_vm1, %v12443_v62  ;;  %12415 = vst.msk [vmem:[#allocation5 + $0xd8] sm:$0xff] %vm1526_vm1, %v12383_v3  ;;  %v12381_v19 = vadd.f32 %v12349_v22, %v12296_v57 }
 0x4c0   : > { %v12441_v35 = vld [vmem:[#allocation5 + $0xa8] sm:$0xff]  ;;  %v14288_v5 = vpop.f32.mrf.mxu1 }
 0x4c1   : > { %12473 = vst.msk [vmem:[%s18184_s8 + $0xa8] sm:$0xff] %vm1526_vm1, %v12441_v35  ;;  %12413 = vst.msk [vmem:[#allocation5 + $0xc8] sm:$0xff] %vm1526_vm1, %v12381_v19  ;;  %v12386_v4 = vadd.f32 %v14288_v5, %v12354_v30 }
 0x4c2   : > { %v12446_v14 = vld [vmem:[#allocation5 + $0xd0] sm:$0xff]  ;;  %v12309_v17 = vpop.f32.mrf.mxu1 }
 0x4c3   : > { %12478 = vst.msk [vmem:[%s18184_s8 + $0xd0] sm:$0xff] %vm1526_vm1, %v12446_v14  ;;  %12418 = vst.msk [vmem:[#allocation5 + $0xf0] sm:$0xff] %vm1526_vm1, %v12386_v4  ;;  %v12384_v31 = vadd.f32 %v12352_v42, %v12309_v17 }
 0x4c4   : > { %v12444_v37 = vld [vmem:[#allocation5 + $0xc0] sm:$0xff]  ;;  %v14289_v24 = vpop.f32.mrf.mxu1 }
 0x4c5   : > { %12476 = vst.msk [vmem:[%s18184_s8 + $0xc0] sm:$0xff] %vm1526_vm1, %v12444_v37  ;;  %12416 = vst.msk [vmem:[#allocation5 + $0xe0] sm:$0xff] %vm1526_vm1, %v12384_v31  ;;  %v12387_v43 = vadd.f32 %v14289_v24, %v12355_v7 }
 0x4c6   : > { %v12447_v0 = vld [vmem:[#allocation5 + $0xd8] sm:$0xff]  ;;  %v12312_v39 = vpop.f32.mrf.mxu1 }
 0x4c7   : > { %12479 = vst.msk [vmem:[%s18184_s8 + $0xd8] sm:$0xff] %vm1526_vm1, %v12447_v0  ;;  %12419 = vst.msk [vmem:[#allocation5 + $0xf8] sm:$0xff] %vm1526_vm1, %v12387_v43  ;;  %v12385_v11 = vadd.f32 %v12353_v26, %v12312_v39 }
 0x4c8   : > { %v12445_v40 = vld [vmem:[#allocation5 + $0xc8] sm:$0xff] }
 0x4c9   : > { %12477 = vst.msk [vmem:[%s18184_s8 + $0xc8] sm:$0xff] %vm1526_vm1, %v12445_v40  ;;  %12417 = vst.msk [vmem:[#allocation5 + $0xe8] sm:$0xff] %vm1526_vm1, %v12385_v11 }
 0x4ca   : > { %v12450_v44 = vld [vmem:[#allocation5 + $0xf0] sm:$0xff] }
 0x4cb   : > { %12482 = vst.msk [vmem:[%s18184_s8 + $0xf0] sm:$0xff] %vm1526_vm1, %v12450_v44 }
 0x4cc   : > { %v12448_v13 = vld [vmem:[#allocation5 + $0xe0] sm:$0xff] }
 0x4cd   : > { %12480 = vst.msk [vmem:[%s18184_s8 + $0xe0] sm:$0xff] %vm1526_vm1, %v12448_v13 }
 0x4ce   : > { %v12451_v52 = vld [vmem:[#allocation5 + $0xf8] sm:$0xff] }
 0x4cf   : > { %12483 = vst.msk [vmem:[%s18184_s8 + $0xf8] sm:$0xff] %vm1526_vm1, %v12451_v52 }
 0x4d0   : > { %v12449_v51 = vld [vmem:[#allocation5 + $0xe8] sm:$0xff] }
 0x4d1   : > { %12481 = vst.msk [vmem:[%s18184_s8 + $0xe8] sm:$0xff] %vm1526_vm1, %v12449_v51 }
 0x4d2 PF: > { %s17_s24 = sadd.s32 1, %s14427_s24  }
 0x4d3   : > { %p14_p4 = scmp.ge.s32.totalorder %s17_s24, 4  }
 0x4d5   :  { %16 = sbr.rel (!%p14_p4) target bundleno = 1 (0x1), region = 100 }

</bundles_post_ra>
